<compile_context>
chip_gen: v7x
topology: tpu7x:2x2x1
jax: 0.10.0
libtpu: 0.0.40
codegen_flags: <defaults>
</compile_context>

<pallas_src>
import functools

import jax
import jax.numpy as jnp
import numpy as np
from jax import lax
from jax.experimental import pallas as pl
from jax.experimental.pallas import tpu as pltpu

CP = 128  # all channel dims are zero-padded to this (TPU lane width)


# ----------------------------- Pallas kernels --------------------------------

def _conv_relu_pool_kernel(x_ref, w_ref, b_ref, sel_ref, o_ref, *, H, W):
    """Fused 3x3 'same' conv + bias + ReLU + 2x2/stride-2 max pool, one image.

    x_ref:   (1, H+2, W+2, CP)  halo-padded activations (bf16)
    w_ref:   (9, CP, CP)        per-tap weights, tap k = dy*3+dx (bf16)
    b_ref:   (1, CP)            bias (f32)
    sel_ref: (2, Ho*Wo, Ho*W)   one-hot even/odd column selectors (bf16)
    o_ref:   (Ho*Wo, CP)        pooled output rows for this image (bf16)
    """
    Ho, Wo = H // 2, W // 2
    # Up-cast once so the slice/reshape interior is identical to the proven
    # f32 code path (bf16 -> f32 -> bf16 per tap is an exact round trip).
    x = x_ref[0].astype(jnp.float32)                    # (H+2, W+2, CP)

    # --- conv: accumulate the 9 taps on the MXU (im2col stays in VMEM) ---
    def tap_dot(k):
        dy, dx = k // 3, k % 3
        tap = x[dy:dy + H, dx:dx + W, :]                # (H, W, CP)
        tap = tap.reshape(H * W, CP).astype(jnp.bfloat16)
        return jnp.dot(tap, w_ref[k], preferred_element_type=jnp.float32)

    acc = tap_dot(0)
    for k in range(1, 9):
        acc = acc + tap_dot(k)                          # (H*W, CP) f32

    # --- bias + ReLU (f32 epilogue) ---
    y = jnp.maximum(acc + b_ref[...], 0.0)              # (H*W, CP)

    # --- 2x2 max pool: row pairs via aligned reshape, column pairs via two
    #     one-hot selection matmuls (avoids strided slicing in-kernel) ---
    y = y.reshape(Ho, 2, W, CP)
    y = jnp.maximum(y[:, 0], y[:, 1])                   # (Ho, W, CP)
    yb = y.reshape(Ho * W, CP).astype(jnp.bfloat16)
    even = jnp.dot(sel_ref[0], yb, preferred_element_type=jnp.float32)
    odd = jnp.dot(sel_ref[1], yb, preferred_element_type=jnp.float32)
    o_ref[...] = jnp.maximum(even, odd).astype(o_ref.dtype)   # (Ho*Wo, CP)


def _fc_kernel(x_ref, w_ref, b_ref, o_ref):
    xb = x_ref[...].astype(jnp.bfloat16)
    acc = jnp.dot(xb, w_ref[...], preferred_element_type=jnp.float32)
    o_ref[...] = acc + b_ref[...]


# ------------------------------- wrappers -------------------------------------

@functools.lru_cache(maxsize=None)
def _pool_selectors(H, W):
    """One-hot matrices selecting even/odd columns of the row-pooled image."""
    Ho, Wo = H // 2, W // 2
    q = np.arange(Ho * Wo)
    ho, xo = q // Wo, q % Wo
    sel = np.zeros((2, Ho * Wo, Ho * W), np.float32)
    sel[0, q, ho * W + 2 * xo] = 1.0
    sel[1, q, ho * W + 2 * xo + 1] = 1.0
    return jnp.asarray(sel, jnp.bfloat16)


def conv_relu_pool(xp, w9, b, *, H, W):
    """xp: (B, H+2, W+2, CP) bf16  ->  (B*Ho*Wo, CP) bf16 pooled activations."""
    B = xp.shape[0]
    Ho, Wo = H // 2, W // 2
    sel = _pool_selectors(H, W)
    kern = functools.partial(_conv_relu_pool_kernel, H=H, W=W)
    return pl.pallas_call(
        kern,
        out_shape=jax.ShapeDtypeStruct((B * Ho * Wo, CP), jnp.bfloat16),
        grid_spec=pltpu.PrefetchScalarGridSpec(
            num_scalar_prefetch=0,
            grid=(B,),
            in_specs=[
                pl.BlockSpec((1, H + 2, W + 2, CP), lambda i: (i, 0, 0, 0)),
                pl.BlockSpec((9, CP, CP), lambda i: (0, 0, 0)),
                pl.BlockSpec((1, CP), lambda i: (0, 0)),
                pl.BlockSpec((2, Ho * Wo, Ho * W), lambda i: (0, 0, 0)),
            ],
            out_specs=pl.BlockSpec((Ho * Wo, CP), lambda i: (i, 0)),
        ),
        compiler_params=pltpu.CompilerParams(
            dimension_semantics=("parallel",)),
    )(xp, w9, b, sel)


def fc(x, w, b):
    """x: (B, K) bf16, w: (K, CP) bf16, b: (1, CP) f32  ->  (B, CP) f32."""
    B, K = x.shape
    return pl.pallas_call(
        _fc_kernel,
        out_shape=jax.ShapeDtypeStruct((B, CP), jnp.float32),
        grid_spec=pltpu.PrefetchScalarGridSpec(
            num_scalar_prefetch=0,
            grid=(1,),
            in_specs=[
                pl.BlockSpec((B, K), lambda i: (0, 0)),
                pl.BlockSpec((K, CP), lambda i: (0, 0)),
                pl.BlockSpec((1, CP), lambda i: (0, 0)),
            ],
            out_specs=pl.BlockSpec((B, CP), lambda i: (0, 0)),
        ),
    )(x, w, b)


# ------------------------------ forward pass -----------------------------------

def convnet_forward(params, x_nchw):
    B = x_nchw.shape[0]
    x = jnp.transpose(x_nchw, (0, 2, 3, 1))                        # NCHW -> NHWC
    # one up-front pad: 1-pixel spatial halo + zero-pad channels 3 -> CP;
    # bf16 storage (exactly the rounding the MXU dots apply anyway).
    x = jnp.pad(x, ((0, 0), (1, 1), (1, 1), (0, CP - x.shape[-1])))
    x = x.astype(jnp.bfloat16)
    x = conv_relu_pool(x, params["w1"], params["b1"], H=32, W=32)  # (B*256, CP)
    x = jnp.pad(x.reshape(B, 16, 16, CP), ((0, 0), (1, 1), (1, 1), (0, 0)))
    x = conv_relu_pool(x, params["w2"], params["b2"], H=16, W=16)  # (B*64, CP)
    x = jnp.pad(x.reshape(B, 8, 8, CP), ((0, 0), (1, 1), (1, 1), (0, 0)))
    x = conv_relu_pool(x, params["w3"], params["b3"], H=8, W=8)    # (B*16, CP)
    # flatten: rows are (h, w) ordered, lanes are channels; the FC weight was
    # pre-permuted to (h, w, c) order so this matches PyTorch's NCHW view().
    x = x.reshape(B, 16 * CP)
    # TODO(synk): nn.Dropout(0.5) is identity in eval mode; training-mode
    # random masking is not implemented here.
    logits = fc(x, params["wfc"], params["bfc"])                   # (B, CP)
    return logits[:, :10]


# ---------------------------- params / reference -------------------------------

def init_torch_params(key):
    """PyTorch-layout parameters (OIHW convs, (out, in) fc)."""
    keys = jax.random.split(key, 8)
    nrm = lambda k, shape, s: s * jax.random.normal(k, shape, jnp.float32)
    return {
        "w1": nrm(keys[0], (32, 3, 3, 3), 0.05),   "b1": nrm(keys[1], (32,), 0.05),
        "w2": nrm(keys[2], (64, 32, 3, 3), 0.05),  "b2": nrm(keys[3], (64,), 0.05),
        "w3": nrm(keys[4], (128, 64, 3, 3), 0.05), "b3": nrm(keys[5], (128,), 0.05),
        "wfc": nrm(keys[6], (10, 128 * 4 * 4), 0.05),
        "bfc": nrm(keys[7], (10,), 0.05),
    }


def prepare_params(raw):
    """One-time weight transform: transpose, zero-pad to CP lanes, cast bf16."""
    def conv(w, b):
        cout, cin = w.shape[0], w.shape[1]
        wt = jnp.transpose(w, (2, 3, 1, 0)).reshape(9, cin, cout)  # (tap,cin,cout)
        wp = jnp.zeros((9, CP, CP), jnp.float32).at[:, :cin, :cout].set(wt)
        bp = jnp.zeros((1, CP), jnp.float32).at[0, :cout].set(b)
        return wp.astype(jnp.bfloat16), bp

    w1, b1 = conv(raw["w1"], raw["b1"])
    w2, b2 = conv(raw["w2"], raw["b2"])
    w3, b3 = conv(raw["w3"], raw["b3"])
    # fc: column index c*16 + h*4 + w  ->  row index (h*4 + w)*CP + c
    wfc = raw["wfc"].reshape(10, 128, 4, 4).transpose(2, 3, 1, 0).reshape(2048, 10)
    wfc = jnp.zeros((2048, CP), jnp.float32).at[:, :10].set(wfc).astype(jnp.bfloat16)
    bfc = jnp.zeros((1, CP), jnp.float32).at[0, :10].set(raw["bfc"])
    return {"w1": w1, "b1": b1, "w2": w2, "b2": b2, "w3": w3, "b3": b3,
            "wfc": wfc, "bfc": bfc}


def reference_forward(params, x_nchw):
    """Pure-JAX reference mirroring the PyTorch forward (eval mode)."""
    def conv(x, w, b):
        y = lax.conv_general_dilated(
            x, w, window_strides=(1, 1), padding="SAME",
            dimension_numbers=("NCHW", "OIHW", "NCHW"),
            precision=lax.Precision.HIGHEST)
        return jax.nn.relu(y + b[None, :, None, None])

    def pool(x):
        return lax.reduce_window(x, -jnp.inf, lax.max,
                                 (1, 1, 2, 2), (1, 1, 2, 2), "VALID")

    x = pool(conv(x_nchw, params["w1"], params["b1"]))
    x = pool(conv(x, params["w2"], params["b2"]))
    x = pool(conv(x, params["w3"], params["b3"]))
    x = x.reshape(x.shape[0], -1)
    return jnp.dot(x, params["wfc"].T,
                   precision=lax.Precision.HIGHEST) + params["bfc"]


# ----------------------------------- main --------------------------------------

if __name__ == "__main__":
    key = jax.random.PRNGKey(0)
    pkey, xkey = jax.random.split(key)
    raw = init_torch_params(pkey)
    params = prepare_params(raw)

    # CIFAR-10 shaped input (the 128*4*4 FC requires 32x32 spatial); batch=2.
    x = jax.random.normal(xkey, (2, 3, 32, 32), jnp.float32)

    fwd = jax.jit(convnet_forward)
    out = jax.block_until_ready(fwd(params, x))
    assert out.shape == (2, 10), out.shape

    ref = reference_forward(raw, x)
    # bf16 matmul inputs / activations (f32 accumulate) vs HIGHEST-precision ref.
    if not jnp.allclose(out, ref, atol=5e-2, rtol=5e-2):
        max_err = float(jnp.max(jnp.abs(out - ref)))
        raise AssertionError(f"mismatch vs reference, max abs err = {max_err}")

    print("KERNEL_OK")
</pallas_src>

<mosaic_0001>
module attributes {stable_mosaic.version = 11 : i64} {
  func.func @_conv_relu_pool_kernel(%arg0: i32, %arg1: memref<1x34x34x128xbf16, #tpu.memory_space<vmem>>, %arg2: memref<9x128x128xbf16, #tpu.memory_space<vmem>>, %arg3: memref<1x128xf32, #tpu.memory_space<vmem>>, %arg4: memref<2x256x512xbf16, #tpu.memory_space<vmem>>, %arg5: memref<256x128xbf16, #tpu.memory_space<vmem>>) attributes {dimension_semantics = [#tpu.dimension_semantics<parallel>], iteration_bounds = array<i64: 2>, scalar_prefetch = 0 : i64, scratch_operands = 0 : i64, tpu.core_type = #tpu.core_type<tc>, window_params = [{transform_indices = @transform_0, window_bounds = array<i64: 1, 34, 34, 128>}, {pipeline_mode = #tpu.pipeline_mode<synchronous>, transform_indices = @transform_1, window_bounds = array<i64: 9, 128, 128>}, {pipeline_mode = #tpu.pipeline_mode<synchronous>, transform_indices = @transform_2, window_bounds = array<i64: 1, 128>}, {pipeline_mode = #tpu.pipeline_mode<synchronous>, transform_indices = @transform_3, window_bounds = array<i64: 2, 256, 512>}, {transform_indices = @transform_4, window_bounds = array<i64: 256, 128>}]} {
    %c0 = arith.constant 0 : index
    %c0_0 = arith.constant 0 : index
    %c0_1 = arith.constant 0 : index
    %c0_2 = arith.constant 0 : index
    %0 = vector.load %arg1[%c0, %c0_0, %c0_1, %c0_2] : memref<1x34x34x128xbf16, #tpu.memory_space<vmem>>, vector<1x34x34x128xbf16>
    %1 = vector.shape_cast %0 : vector<1x34x34x128xbf16> to vector<34x34x128xbf16>
    %2 = arith.extf %1 : vector<34x34x128xbf16> to vector<34x34x128xf32>
    %3 = vector.extract_strided_slice %2 {offsets = [0, 0, 0], sizes = [32, 32, 128], strides = [1, 1, 1]} : vector<34x34x128xf32> to vector<32x32x128xf32>
    %4 = vector.shape_cast %3 : vector<32x32x128xf32> to vector<1024x128xf32>
    %5 = arith.truncf %4 : vector<1024x128xf32> to vector<1024x128xbf16>
    %c0_3 = arith.constant 0 : index
    %c0_4 = arith.constant 0 : index
    %c0_5 = arith.constant 0 : index
    %6 = vector.load %arg2[%c0_3, %c0_4, %c0_5] : memref<9x128x128xbf16, #tpu.memory_space<vmem>>, vector<1x128x128xbf16>
    %7 = vector.shape_cast %6 : vector<1x128x128xbf16> to vector<128x128xbf16>
    %cst = arith.constant dense<0.000000e+00> : vector<1024x128xf32>
    %8 = tpu.matmul %5, %7, %cst {dimension_numbers = #tpu.dot_dimension_numbers<[1], [0], [0], [1], [0, 0, 1, 1], [], []>} : vector<1024x128xbf16>, vector<128x128xbf16>, vector<1024x128xf32> -> vector<1024x128xf32>
    %9 = vector.extract_strided_slice %2 {offsets = [0, 1, 0], sizes = [32, 32, 128], strides = [1, 1, 1]} : vector<34x34x128xf32> to vector<32x32x128xf32>
    %10 = vector.shape_cast %9 : vector<32x32x128xf32> to vector<1024x128xf32>
    %11 = arith.truncf %10 : vector<1024x128xf32> to vector<1024x128xbf16>
    %c1 = arith.constant 1 : index
    %c0_6 = arith.constant 0 : index
    %c0_7 = arith.constant 0 : index
    %12 = vector.load %arg2[%c1, %c0_6, %c0_7] : memref<9x128x128xbf16, #tpu.memory_space<vmem>>, vector<1x128x128xbf16>
    %13 = vector.shape_cast %12 : vector<1x128x128xbf16> to vector<128x128xbf16>
    %cst_8 = arith.constant dense<0.000000e+00> : vector<1024x128xf32>
    %14 = tpu.matmul %11, %13, %cst_8 {dimension_numbers = #tpu.dot_dimension_numbers<[1], [0], [0], [1], [0, 0, 1, 1], [], []>} : vector<1024x128xbf16>, vector<128x128xbf16>, vector<1024x128xf32> -> vector<1024x128xf32>
    %15 = arith.addf %8, %14 : vector<1024x128xf32>
    %16 = vector.extract_strided_slice %2 {offsets = [0, 2, 0], sizes = [32, 32, 128], strides = [1, 1, 1]} : vector<34x34x128xf32> to vector<32x32x128xf32>
    %17 = vector.shape_cast %16 : vector<32x32x128xf32> to vector<1024x128xf32>
    %18 = arith.truncf %17 : vector<1024x128xf32> to vector<1024x128xbf16>
    %c2 = arith.constant 2 : index
    %c0_9 = arith.constant 0 : index
    %c0_10 = arith.constant 0 : index
    %19 = vector.load %arg2[%c2, %c0_9, %c0_10] : memref<9x128x128xbf16, #tpu.memory_space<vmem>>, vector<1x128x128xbf16>
    %20 = vector.shape_cast %19 : vector<1x128x128xbf16> to vector<128x128xbf16>
    %cst_11 = arith.constant dense<0.000000e+00> : vector<1024x128xf32>
    %21 = tpu.matmul %18, %20, %cst_11 {dimension_numbers = #tpu.dot_dimension_numbers<[1], [0], [0], [1], [0, 0, 1, 1], [], []>} : vector<1024x128xbf16>, vector<128x128xbf16>, vector<1024x128xf32> -> vector<1024x128xf32>
    %22 = arith.addf %15, %21 : vector<1024x128xf32>
    %23 = vector.extract_strided_slice %2 {offsets = [1, 0, 0], sizes = [32, 32, 128], strides = [1, 1, 1]} : vector<34x34x128xf32> to vector<32x32x128xf32>
    %24 = vector.shape_cast %23 : vector<32x32x128xf32> to vector<1024x128xf32>
    %25 = arith.truncf %24 : vector<1024x128xf32> to vector<1024x128xbf16>
    %c3 = arith.constant 3 : index
    %c0_12 = arith.constant 0 : index
    %c0_13 = arith.constant 0 : index
    %26 = vector.load %arg2[%c3, %c0_12, %c0_13] : memref<9x128x128xbf16, #tpu.memory_space<vmem>>, vector<1x128x128xbf16>
    %27 = vector.shape_cast %26 : vector<1x128x128xbf16> to vector<128x128xbf16>
    %cst_14 = arith.constant dense<0.000000e+00> : vector<1024x128xf32>
    %28 = tpu.matmul %25, %27, %cst_14 {dimension_numbers = #tpu.dot_dimension_numbers<[1], [0], [0], [1], [0, 0, 1, 1], [], []>} : vector<1024x128xbf16>, vector<128x128xbf16>, vector<1024x128xf32> -> vector<1024x128xf32>
    %29 = arith.addf %22, %28 : vector<1024x128xf32>
    %30 = vector.extract_strided_slice %2 {offsets = [1, 1, 0], sizes = [32, 32, 128], strides = [1, 1, 1]} : vector<34x34x128xf32> to vector<32x32x128xf32>
    %31 = vector.shape_cast %30 : vector<32x32x128xf32> to vector<1024x128xf32>
    %32 = arith.truncf %31 : vector<1024x128xf32> to vector<1024x128xbf16>
    %c4 = arith.constant 4 : index
    %c0_15 = arith.constant 0 : index
    %c0_16 = arith.constant 0 : index
    %33 = vector.load %arg2[%c4, %c0_15, %c0_16] : memref<9x128x128xbf16, #tpu.memory_space<vmem>>, vector<1x128x128xbf16>
    %34 = vector.shape_cast %33 : vector<1x128x128xbf16> to vector<128x128xbf16>
    %cst_17 = arith.constant dense<0.000000e+00> : vector<1024x128xf32>
    %35 = tpu.matmul %32, %34, %cst_17 {dimension_numbers = #tpu.dot_dimension_numbers<[1], [0], [0], [1], [0, 0, 1, 1], [], []>} : vector<1024x128xbf16>, vector<128x128xbf16>, vector<1024x128xf32> -> vector<1024x128xf32>
    %36 = arith.addf %29, %35 : vector<1024x128xf32>
    %37 = vector.extract_strided_slice %2 {offsets = [1, 2, 0], sizes = [32, 32, 128], strides = [1, 1, 1]} : vector<34x34x128xf32> to vector<32x32x128xf32>
    %38 = vector.shape_cast %37 : vector<32x32x128xf32> to vector<1024x128xf32>
    %39 = arith.truncf %38 : vector<1024x128xf32> to vector<1024x128xbf16>
    %c5 = arith.constant 5 : index
    %c0_18 = arith.constant 0 : index
    %c0_19 = arith.constant 0 : index
    %40 = vector.load %arg2[%c5, %c0_18, %c0_19] : memref<9x128x128xbf16, #tpu.memory_space<vmem>>, vector<1x128x128xbf16>
    %41 = vector.shape_cast %40 : vector<1x128x128xbf16> to vector<128x128xbf16>
    %cst_20 = arith.constant dense<0.000000e+00> : vector<1024x128xf32>
    %42 = tpu.matmul %39, %41, %cst_20 {dimension_numbers = #tpu.dot_dimension_numbers<[1], [0], [0], [1], [0, 0, 1, 1], [], []>} : vector<1024x128xbf16>, vector<128x128xbf16>, vector<1024x128xf32> -> vector<1024x128xf32>
    %43 = arith.addf %36, %42 : vector<1024x128xf32>
    %44 = vector.extract_strided_slice %2 {offsets = [2, 0, 0], sizes = [32, 32, 128], strides = [1, 1, 1]} : vector<34x34x128xf32> to vector<32x32x128xf32>
    %45 = vector.shape_cast %44 : vector<32x32x128xf32> to vector<1024x128xf32>
    %46 = arith.truncf %45 : vector<1024x128xf32> to vector<1024x128xbf16>
    %c6 = arith.constant 6 : index
    %c0_21 = arith.constant 0 : index
    %c0_22 = arith.constant 0 : index
    %47 = vector.load %arg2[%c6, %c0_21, %c0_22] : memref<9x128x128xbf16, #tpu.memory_space<vmem>>, vector<1x128x128xbf16>
    %48 = vector.shape_cast %47 : vector<1x128x128xbf16> to vector<128x128xbf16>
    %cst_23 = arith.constant dense<0.000000e+00> : vector<1024x128xf32>
    %49 = tpu.matmul %46, %48, %cst_23 {dimension_numbers = #tpu.dot_dimension_numbers<[1], [0], [0], [1], [0, 0, 1, 1], [], []>} : vector<1024x128xbf16>, vector<128x128xbf16>, vector<1024x128xf32> -> vector<1024x128xf32>
    %50 = arith.addf %43, %49 : vector<1024x128xf32>
    %51 = vector.extract_strided_slice %2 {offsets = [2, 1, 0], sizes = [32, 32, 128], strides = [1, 1, 1]} : vector<34x34x128xf32> to vector<32x32x128xf32>
    %52 = vector.shape_cast %51 : vector<32x32x128xf32> to vector<1024x128xf32>
    %53 = arith.truncf %52 : vector<1024x128xf32> to vector<1024x128xbf16>
    %c7 = arith.constant 7 : index
    %c0_24 = arith.constant 0 : index
    %c0_25 = arith.constant 0 : index
    %54 = vector.load %arg2[%c7, %c0_24, %c0_25] : memref<9x128x128xbf16, #tpu.memory_space<vmem>>, vector<1x128x128xbf16>
    %55 = vector.shape_cast %54 : vector<1x128x128xbf16> to vector<128x128xbf16>
    %cst_26 = arith.constant dense<0.000000e+00> : vector<1024x128xf32>
    %56 = tpu.matmul %53, %55, %cst_26 {dimension_numbers = #tpu.dot_dimension_numbers<[1], [0], [0], [1], [0, 0, 1, 1], [], []>} : vector<1024x128xbf16>, vector<128x128xbf16>, vector<1024x128xf32> -> vector<1024x128xf32>
    %57 = arith.addf %50, %56 : vector<1024x128xf32>
    %58 = vector.extract_strided_slice %2 {offsets = [2, 2, 0], sizes = [32, 32, 128], strides = [1, 1, 1]} : vector<34x34x128xf32> to vector<32x32x128xf32>
    %59 = vector.shape_cast %58 : vector<32x32x128xf32> to vector<1024x128xf32>
    %60 = arith.truncf %59 : vector<1024x128xf32> to vector<1024x128xbf16>
    %c8 = arith.constant 8 : index
    %c0_27 = arith.constant 0 : index
    %c0_28 = arith.constant 0 : index
    %61 = vector.load %arg2[%c8, %c0_27, %c0_28] : memref<9x128x128xbf16, #tpu.memory_space<vmem>>, vector<1x128x128xbf16>
    %62 = vector.shape_cast %61 : vector<1x128x128xbf16> to vector<128x128xbf16>
    %cst_29 = arith.constant dense<0.000000e+00> : vector<1024x128xf32>
    %63 = tpu.matmul %60, %62, %cst_29 {dimension_numbers = #tpu.dot_dimension_numbers<[1], [0], [0], [1], [0, 0, 1, 1], [], []>} : vector<1024x128xbf16>, vector<128x128xbf16>, vector<1024x128xf32> -> vector<1024x128xf32>
    %64 = arith.addf %57, %63 : vector<1024x128xf32>
    %c0_30 = arith.constant 0 : index
    %c0_31 = arith.constant 0 : index
    %65 = vector.load %arg3[%c0_30, %c0_31] : memref<1x128xf32, #tpu.memory_space<vmem>>, vector<1x128xf32>
    %66 = vector.broadcast %65 : vector<1x128xf32> to vector<1024x128xf32>
    %67 = arith.addf %64, %66 : vector<1024x128xf32>
    %cst_32 = arith.constant 0.000000e+00 : f32
    %68 = vector.broadcast %cst_32 : f32 to vector<1024x128xf32>
    %69 = arith.maximumf %67, %68 : vector<1024x128xf32>
    %70 = vector.shape_cast %69 : vector<1024x128xf32> to vector<16x2x32x128xf32>
    %71 = vector.extract_strided_slice %70 {offsets = [0, 0, 0, 0], sizes = [16, 1, 32, 128], strides = [1, 1, 1, 1]} : vector<16x2x32x128xf32> to vector<16x1x32x128xf32>
    %72 = vector.shape_cast %71 : vector<16x1x32x128xf32> to vector<16x32x128xf32>
    %73 = vector.extract_strided_slice %70 {offsets = [0, 1, 0, 0], sizes = [16, 1, 32, 128], strides = [1, 1, 1, 1]} : vector<16x2x32x128xf32> to vector<16x1x32x128xf32>
    %74 = vector.shape_cast %73 : vector<16x1x32x128xf32> to vector<16x32x128xf32>
    %75 = arith.maximumf %72, %74 : vector<16x32x128xf32>
    %76 = vector.shape_cast %75 : vector<16x32x128xf32> to vector<512x128xf32>
    %77 = arith.truncf %76 : vector<512x128xf32> to vector<512x128xbf16>
    %c0_33 = arith.constant 0 : index
    %c0_34 = arith.constant 0 : index
    %c0_35 = arith.constant 0 : index
    %78 = vector.load %arg4[%c0_33, %c0_34, %c0_35] : memref<2x256x512xbf16, #tpu.memory_space<vmem>>, vector<1x256x512xbf16>
    %79 = vector.shape_cast %78 : vector<1x256x512xbf16> to vector<256x512xbf16>
    %cst_36 = arith.constant dense<0.000000e+00> : vector<256x128xf32>
    %80 = tpu.matmul %79, %77, %cst_36 {dimension_numbers = #tpu.dot_dimension_numbers<[1], [0], [0], [1], [0, 0, 1, 1], [], []>} : vector<256x512xbf16>, vector<512x128xbf16>, vector<256x128xf32> -> vector<256x128xf32>
    %c1_37 = arith.constant 1 : index
    %c0_38 = arith.constant 0 : index
    %c0_39 = arith.constant 0 : index
    %81 = vector.load %arg4[%c1_37, %c0_38, %c0_39] : memref<2x256x512xbf16, #tpu.memory_space<vmem>>, vector<1x256x512xbf16>
    %82 = vector.shape_cast %81 : vector<1x256x512xbf16> to vector<256x512xbf16>
    %cst_40 = arith.constant dense<0.000000e+00> : vector<256x128xf32>
    %83 = tpu.matmul %82, %77, %cst_40 {dimension_numbers = #tpu.dot_dimension_numbers<[1], [0], [0], [1], [0, 0, 1, 1], [], []>} : vector<256x512xbf16>, vector<512x128xbf16>, vector<256x128xf32> -> vector<256x128xf32>
    %84 = arith.maximumf %80, %83 : vector<256x128xf32>
    %85 = arith.truncf %84 : vector<256x128xf32> to vector<256x128xbf16>
    %c0_41 = arith.constant 0 : index
    %c0_42 = arith.constant 0 : index
    %86 = vector.load %arg5[%c0_41, %c0_42] : memref<256x128xbf16, #tpu.memory_space<vmem>>, vector<256x128xbf16>
    tpu.vector_store %arg5[%c0_41, %c0_42], %85 {strides = array<i32>} : memref<256x128xbf16, #tpu.memory_space<vmem>>, vector<256x128xbf16>,
    return
  }
  func.func @transform_0(%arg0: i32) -> (i32, i32, i32, i32) {
    %c0_i32 = arith.constant 0 : i32
    %c0_i32_0 = arith.constant 0 : i32
    %c0_i32_1 = arith.constant 0 : i32
    %c0_i32_2 = arith.constant 0 : i32
    return %arg0, %c0_i32, %c0_i32_0, %c0_i32_1 : i32, i32, i32, i32
  }
  func.func @transform_1(%arg0: i32) -> (i32, i32, i32) {
    %c0_i32 = arith.constant 0 : i32
    %c0_i32_0 = arith.constant 0 : i32
    %c0_i32_1 = arith.constant 0 : i32
    %c0_i32_2 = arith.constant 0 : i32
    return %c0_i32, %c0_i32_0, %c0_i32_1 : i32, i32, i32
  }
  func.func @transform_2(%arg0: i32) -> (i32, i32) {
    %c0_i32 = arith.constant 0 : i32
    %c0_i32_0 = arith.constant 0 : i32
    %c0_i32_1 = arith.constant 0 : i32
    return %c0_i32, %c0_i32_0 : i32, i32
  }
  func.func @transform_3(%arg0: i32) -> (i32, i32, i32) {
    %c0_i32 = arith.constant 0 : i32
    %c0_i32_0 = arith.constant 0 : i32
    %c0_i32_1 = arith.constant 0 : i32
    %c0_i32_2 = arith.constant 0 : i32
    return %c0_i32, %c0_i32_0, %c0_i32_1 : i32, i32, i32
  }
  func.func @transform_4(%arg0: i32) -> (i32, i32) {
    %c0_i32 = arith.constant 0 : i32
    %c0_i32_0 = arith.constant 0 : i32
    return %arg0, %c0_i32 : i32, i32
  }
}

module attributes {stable_mosaic.version = 11 : i64} {
  func.func @_conv_relu_pool_kernel(%arg0: i32, %arg1: memref<1x18x18x128xbf16, #tpu.memory_space<vmem>>, %arg2: memref<9x128x128xbf16, #tpu.memory_space<vmem>>, %arg3: memref<1x128xf32, #tpu.memory_space<vmem>>, %arg4: memref<2x64x128xbf16, #tpu.memory_space<vmem>>, %arg5: memref<64x128xbf16, #tpu.memory_space<vmem>>) attributes {dimension_semantics = [#tpu.dimension_semantics<parallel>], iteration_bounds = array<i64: 2>, scalar_prefetch = 0 : i64, scratch_operands = 0 : i64, tpu.core_type = #tpu.core_type<tc>, window_params = [{transform_indices = @transform_0, window_bounds = array<i64: 1, 18, 18, 128>}, {pipeline_mode = #tpu.pipeline_mode<synchronous>, transform_indices = @transform_1, window_bounds = array<i64: 9, 128, 128>}, {pipeline_mode = #tpu.pipeline_mode<synchronous>, transform_indices = @transform_2, window_bounds = array<i64: 1, 128>}, {pipeline_mode = #tpu.pipeline_mode<synchronous>, transform_indices = @transform_3, window_bounds = array<i64: 2, 64, 128>}, {transform_indices = @transform_4, window_bounds = array<i64: 64, 128>}]} {
    %c0 = arith.constant 0 : index
    %c0_0 = arith.constant 0 : index
    %c0_1 = arith.constant 0 : index
    %c0_2 = arith.constant 0 : index
    %0 = vector.load %arg1[%c0, %c0_0, %c0_1, %c0_2] : memref<1x18x18x128xbf16, #tpu.memory_space<vmem>>, vector<1x18x18x128xbf16>
    %1 = vector.shape_cast %0 : vector<1x18x18x128xbf16> to vector<18x18x128xbf16>
    %2 = arith.extf %1 : vector<18x18x128xbf16> to vector<18x18x128xf32>
    %3 = vector.extract_strided_slice %2 {offsets = [0, 0, 0], sizes = [16, 16, 128], strides = [1, 1, 1]} : vector<18x18x128xf32> to vector<16x16x128xf32>
    %4 = vector.shape_cast %3 : vector<16x16x128xf32> to vector<256x128xf32>
    %5 = arith.truncf %4 : vector<256x128xf32> to vector<256x128xbf16>
    %c0_3 = arith.constant 0 : index
    %c0_4 = arith.constant 0 : index
    %c0_5 = arith.constant 0 : index
    %6 = vector.load %arg2[%c0_3, %c0_4, %c0_5] : memref<9x128x128xbf16, #tpu.memory_space<vmem>>, vector<1x128x128xbf16>
    %7 = vector.shape_cast %6 : vector<1x128x128xbf16> to vector<128x128xbf16>
    %cst = arith.constant dense<0.000000e+00> : vector<256x128xf32>
    %8 = tpu.matmul %5, %7, %cst {dimension_numbers = #tpu.dot_dimension_numbers<[1], [0], [0], [1], [0, 0, 1, 1], [], []>} : vector<256x128xbf16>, vector<128x128xbf16>, vector<256x128xf32> -> vector<256x128xf32>
    %9 = vector.extract_strided_slice %2 {offsets = [0, 1, 0], sizes = [16, 16, 128], strides = [1, 1, 1]} : vector<18x18x128xf32> to vector<16x16x128xf32>
    %10 = vector.shape_cast %9 : vector<16x16x128xf32> to vector<256x128xf32>
    %11 = arith.truncf %10 : vector<256x128xf32> to vector<256x128xbf16>
    %c1 = arith.constant 1 : index
    %c0_6 = arith.constant 0 : index
    %c0_7 = arith.constant 0 : index
    %12 = vector.load %arg2[%c1, %c0_6, %c0_7] : memref<9x128x128xbf16, #tpu.memory_space<vmem>>, vector<1x128x128xbf16>
    %13 = vector.shape_cast %12 : vector<1x128x128xbf16> to vector<128x128xbf16>
    %cst_8 = arith.constant dense<0.000000e+00> : vector<256x128xf32>
    %14 = tpu.matmul %11, %13, %cst_8 {dimension_numbers = #tpu.dot_dimension_numbers<[1], [0], [0], [1], [0, 0, 1, 1], [], []>} : vector<256x128xbf16>, vector<128x128xbf16>, vector<256x128xf32> -> vector<256x128xf32>
    %15 = arith.addf %8, %14 : vector<256x128xf32>
    %16 = vector.extract_strided_slice %2 {offsets = [0, 2, 0], sizes = [16, 16, 128], strides = [1, 1, 1]} : vector<18x18x128xf32> to vector<16x16x128xf32>
    %17 = vector.shape_cast %16 : vector<16x16x128xf32> to vector<256x128xf32>
    %18 = arith.truncf %17 : vector<256x128xf32> to vector<256x128xbf16>
    %c2 = arith.constant 2 : index
    %c0_9 = arith.constant 0 : index
    %c0_10 = arith.constant 0 : index
    %19 = vector.load %arg2[%c2, %c0_9, %c0_10] : memref<9x128x128xbf16, #tpu.memory_space<vmem>>, vector<1x128x128xbf16>
    %20 = vector.shape_cast %19 : vector<1x128x128xbf16> to vector<128x128xbf16>
    %cst_11 = arith.constant dense<0.000000e+00> : vector<256x128xf32>
    %21 = tpu.matmul %18, %20, %cst_11 {dimension_numbers = #tpu.dot_dimension_numbers<[1], [0], [0], [1], [0, 0, 1, 1], [], []>} : vector<256x128xbf16>, vector<128x128xbf16>, vector<256x128xf32> -> vector<256x128xf32>
    %22 = arith.addf %15, %21 : vector<256x128xf32>
    %23 = vector.extract_strided_slice %2 {offsets = [1, 0, 0], sizes = [16, 16, 128], strides = [1, 1, 1]} : vector<18x18x128xf32> to vector<16x16x128xf32>
    %24 = vector.shape_cast %23 : vector<16x16x128xf32> to vector<256x128xf32>
    %25 = arith.truncf %24 : vector<256x128xf32> to vector<256x128xbf16>
    %c3 = arith.constant 3 : index
    %c0_12 = arith.constant 0 : index
    %c0_13 = arith.constant 0 : index
    %26 = vector.load %arg2[%c3, %c0_12, %c0_13] : memref<9x128x128xbf16, #tpu.memory_space<vmem>>, vector<1x128x128xbf16>
    %27 = vector.shape_cast %26 : vector<1x128x128xbf16> to vector<128x128xbf16>
    %cst_14 = arith.constant dense<0.000000e+00> : vector<256x128xf32>
    %28 = tpu.matmul %25, %27, %cst_14 {dimension_numbers = #tpu.dot_dimension_numbers<[1], [0], [0], [1], [0, 0, 1, 1], [], []>} : vector<256x128xbf16>, vector<128x128xbf16>, vector<256x128xf32> -> vector<256x128xf32>
    %29 = arith.addf %22, %28 : vector<256x128xf32>
    %30 = vector.extract_strided_slice %2 {offsets = [1, 1, 0], sizes = [16, 16, 128], strides = [1, 1, 1]} : vector<18x18x128xf32> to vector<16x16x128xf32>
    %31 = vector.shape_cast %30 : vector<16x16x128xf32> to vector<256x128xf32>
    %32 = arith.truncf %31 : vector<256x128xf32> to vector<256x128xbf16>
    %c4 = arith.constant 4 : index
    %c0_15 = arith.constant 0 : index
    %c0_16 = arith.constant 0 : index
    %33 = vector.load %arg2[%c4, %c0_15, %c0_16] : memref<9x128x128xbf16, #tpu.memory_space<vmem>>, vector<1x128x128xbf16>
    %34 = vector.shape_cast %33 : vector<1x128x128xbf16> to vector<128x128xbf16>
    %cst_17 = arith.constant dense<0.000000e+00> : vector<256x128xf32>
    %35 = tpu.matmul %32, %34, %cst_17 {dimension_numbers = #tpu.dot_dimension_numbers<[1], [0], [0], [1], [0, 0, 1, 1], [], []>} : vector<256x128xbf16>, vector<128x128xbf16>, vector<256x128xf32> -> vector<256x128xf32>
    %36 = arith.addf %29, %35 : vector<256x128xf32>
    %37 = vector.extract_strided_slice %2 {offsets = [1, 2, 0], sizes = [16, 16, 128], strides = [1, 1, 1]} : vector<18x18x128xf32> to vector<16x16x128xf32>
    %38 = vector.shape_cast %37 : vector<16x16x128xf32> to vector<256x128xf32>
    %39 = arith.truncf %38 : vector<256x128xf32> to vector<256x128xbf16>
    %c5 = arith.constant 5 : index
    %c0_18 = arith.constant 0 : index
    %c0_19 = arith.constant 0 : index
    %40 = vector.load %arg2[%c5, %c0_18, %c0_19] : memref<9x128x128xbf16, #tpu.memory_space<vmem>>, vector<1x128x128xbf16>
    %41 = vector.shape_cast %40 : vector<1x128x128xbf16> to vector<128x128xbf16>
    %cst_20 = arith.constant dense<0.000000e+00> : vector<256x128xf32>
    %42 = tpu.matmul %39, %41, %cst_20 {dimension_numbers = #tpu.dot_dimension_numbers<[1], [0], [0], [1], [0, 0, 1, 1], [], []>} : vector<256x128xbf16>, vector<128x128xbf16>, vector<256x128xf32> -> vector<256x128xf32>
    %43 = arith.addf %36, %42 : vector<256x128xf32>
    %44 = vector.extract_strided_slice %2 {offsets = [2, 0, 0], sizes = [16, 16, 128], strides = [1, 1, 1]} : vector<18x18x128xf32> to vector<16x16x128xf32>
    %45 = vector.shape_cast %44 : vector<16x16x128xf32> to vector<256x128xf32>
    %46 = arith.truncf %45 : vector<256x128xf32> to vector<256x128xbf16>
    %c6 = arith.constant 6 : index
    %c0_21 = arith.constant 0 : index
    %c0_22 = arith.constant 0 : index
    %47 = vector.load %arg2[%c6, %c0_21, %c0_22] : memref<9x128x128xbf16, #tpu.memory_space<vmem>>, vector<1x128x128xbf16>
    %48 = vector.shape_cast %47 : vector<1x128x128xbf16> to vector<128x128xbf16>
    %cst_23 = arith.constant dense<0.000000e+00> : vector<256x128xf32>
    %49 = tpu.matmul %46, %48, %cst_23 {dimension_numbers = #tpu.dot_dimension_numbers<[1], [0], [0], [1], [0, 0, 1, 1], [], []>} : vector<256x128xbf16>, vector<128x128xbf16>, vector<256x128xf32> -> vector<256x128xf32>
    %50 = arith.addf %43, %49 : vector<256x128xf32>
    %51 = vector.extract_strided_slice %2 {offsets = [2, 1, 0], sizes = [16, 16, 128], strides = [1, 1, 1]} : vector<18x18x128xf32> to vector<16x16x128xf32>
    %52 = vector.shape_cast %51 : vector<16x16x128xf32> to vector<256x128xf32>
    %53 = arith.truncf %52 : vector<256x128xf32> to vector<256x128xbf16>
    %c7 = arith.constant 7 : index
    %c0_24 = arith.constant 0 : index
    %c0_25 = arith.constant 0 : index
    %54 = vector.load %arg2[%c7, %c0_24, %c0_25] : memref<9x128x128xbf16, #tpu.memory_space<vmem>>, vector<1x128x128xbf16>
    %55 = vector.shape_cast %54 : vector<1x128x128xbf16> to vector<128x128xbf16>
    %cst_26 = arith.constant dense<0.000000e+00> : vector<256x128xf32>
    %56 = tpu.matmul %53, %55, %cst_26 {dimension_numbers = #tpu.dot_dimension_numbers<[1], [0], [0], [1], [0, 0, 1, 1], [], []>} : vector<256x128xbf16>, vector<128x128xbf16>, vector<256x128xf32> -> vector<256x128xf32>
    %57 = arith.addf %50, %56 : vector<256x128xf32>
    %58 = vector.extract_strided_slice %2 {offsets = [2, 2, 0], sizes = [16, 16, 128], strides = [1, 1, 1]} : vector<18x18x128xf32> to vector<16x16x128xf32>
    %59 = vector.shape_cast %58 : vector<16x16x128xf32> to vector<256x128xf32>
    %60 = arith.truncf %59 : vector<256x128xf32> to vector<256x128xbf16>
    %c8 = arith.constant 8 : index
    %c0_27 = arith.constant 0 : index
    %c0_28 = arith.constant 0 : index
    %61 = vector.load %arg2[%c8, %c0_27, %c0_28] : memref<9x128x128xbf16, #tpu.memory_space<vmem>>, vector<1x128x128xbf16>
    %62 = vector.shape_cast %61 : vector<1x128x128xbf16> to vector<128x128xbf16>
    %cst_29 = arith.constant dense<0.000000e+00> : vector<256x128xf32>
    %63 = tpu.matmul %60, %62, %cst_29 {dimension_numbers = #tpu.dot_dimension_numbers<[1], [0], [0], [1], [0, 0, 1, 1], [], []>} : vector<256x128xbf16>, vector<128x128xbf16>, vector<256x128xf32> -> vector<256x128xf32>
    %64 = arith.addf %57, %63 : vector<256x128xf32>
    %c0_30 = arith.constant 0 : index
    %c0_31 = arith.constant 0 : index
    %65 = vector.load %arg3[%c0_30, %c0_31] : memref<1x128xf32, #tpu.memory_space<vmem>>, vector<1x128xf32>
    %66 = vector.broadcast %65 : vector<1x128xf32> to vector<256x128xf32>
    %67 = arith.addf %64, %66 : vector<256x128xf32>
    %cst_32 = arith.constant 0.000000e+00 : f32
    %68 = vector.broadcast %cst_32 : f32 to vector<256x128xf32>
    %69 = arith.maximumf %67, %68 : vector<256x128xf32>
    %70 = vector.shape_cast %69 : vector<256x128xf32> to vector<8x2x16x128xf32>
    %71 = vector.extract_strided_slice %70 {offsets = [0, 0, 0, 0], sizes = [8, 1, 16, 128], strides = [1, 1, 1, 1]} : vector<8x2x16x128xf32> to vector<8x1x16x128xf32>
    %72 = vector.shape_cast %71 : vector<8x1x16x128xf32> to vector<8x16x128xf32>
    %73 = vector.extract_strided_slice %70 {offsets = [0, 1, 0, 0], sizes = [8, 1, 16, 128], strides = [1, 1, 1, 1]} : vector<8x2x16x128xf32> to vector<8x1x16x128xf32>
    %74 = vector.shape_cast %73 : vector<8x1x16x128xf32> to vector<8x16x128xf32>
    %75 = arith.maximumf %72, %74 : vector<8x16x128xf32>
    %76 = vector.shape_cast %75 : vector<8x16x128xf32> to vector<128x128xf32>
    %77 = arith.truncf %76 : vector<128x128xf32> to vector<128x128xbf16>
    %c0_33 = arith.constant 0 : index
    %c0_34 = arith.constant 0 : index
    %c0_35 = arith.constant 0 : index
    %78 = vector.load %arg4[%c0_33, %c0_34, %c0_35] : memref<2x64x128xbf16, #tpu.memory_space<vmem>>, vector<1x64x128xbf16>
    %79 = vector.shape_cast %78 : vector<1x64x128xbf16> to vector<64x128xbf16>
    %cst_36 = arith.constant dense<0.000000e+00> : vector<64x128xf32>
    %80 = tpu.matmul %79, %77, %cst_36 {dimension_numbers = #tpu.dot_dimension_numbers<[1], [0], [0], [1], [0, 0, 1, 1], [], []>} : vector<64x128xbf16>, vector<128x128xbf16>, vector<64x128xf32> -> vector<64x128xf32>
    %c1_37 = arith.constant 1 : index
    %c0_38 = arith.constant 0 : index
    %c0_39 = arith.constant 0 : index
    %81 = vector.load %arg4[%c1_37, %c0_38, %c0_39] : memref<2x64x128xbf16, #tpu.memory_space<vmem>>, vector<1x64x128xbf16>
    %82 = vector.shape_cast %81 : vector<1x64x128xbf16> to vector<64x128xbf16>
    %cst_40 = arith.constant dense<0.000000e+00> : vector<64x128xf32>
    %83 = tpu.matmul %82, %77, %cst_40 {dimension_numbers = #tpu.dot_dimension_numbers<[1], [0], [0], [1], [0, 0, 1, 1], [], []>} : vector<64x128xbf16>, vector<128x128xbf16>, vector<64x128xf32> -> vector<64x128xf32>
    %84 = arith.maximumf %80, %83 : vector<64x128xf32>
    %85 = arith.truncf %84 : vector<64x128xf32> to vector<64x128xbf16>
    %c0_41 = arith.constant 0 : index
    %c0_42 = arith.constant 0 : index
    %86 = vector.load %arg5[%c0_41, %c0_42] : memref<64x128xbf16, #tpu.memory_space<vmem>>, vector<64x128xbf16>
    tpu.vector_store %arg5[%c0_41, %c0_42], %85 {strides = array<i32>} : memref<64x128xbf16, #tpu.memory_space<vmem>>, vector<64x128xbf16>,
    return
  }
  func.func @transform_0(%arg0: i32) -> (i32, i32, i32, i32) {
    %c0_i32 = arith.constant 0 : i32
    %c0_i32_0 = arith.constant 0 : i32
    %c0_i32_1 = arith.constant 0 : i32
    %c0_i32_2 = arith.constant 0 : i32
    return %arg0, %c0_i32, %c0_i32_0, %c0_i32_1 : i32, i32, i32, i32
  }
  func.func @transform_1(%arg0: i32) -> (i32, i32, i32) {
    %c0_i32 = arith.constant 0 : i32
    %c0_i32_0 = arith.constant 0 : i32
    %c0_i32_1 = arith.constant 0 : i32
    %c0_i32_2 = arith.constant 0 : i32
    return %c0_i32, %c0_i32_0, %c0_i32_1 : i32, i32, i32
  }
  func.func @transform_2(%arg0: i32) -> (i32, i32) {
    %c0_i32 = arith.constant 0 : i32
    %c0_i32_0 = arith.constant 0 : i32
    %c0_i32_1 = arith.constant 0 : i32
    return %c0_i32, %c0_i32_0 : i32, i32
  }
  func.func @transform_3(%arg0: i32) -> (i32, i32, i32) {
    %c0_i32 = arith.constant 0 : i32
    %c0_i32_0 = arith.constant 0 : i32
    %c0_i32_1 = arith.constant 0 : i32
    %c0_i32_2 = arith.constant 0 : i32
    return %c0_i32, %c0_i32_0, %c0_i32_1 : i32, i32, i32
  }
  func.func @transform_4(%arg0: i32) -> (i32, i32) {
    %c0_i32 = arith.constant 0 : i32
    %c0_i32_0 = arith.constant 0 : i32
    return %arg0, %c0_i32 : i32, i32
  }
}

module attributes {stable_mosaic.version = 11 : i64} {
  func.func @_conv_relu_pool_kernel(%arg0: i32, %arg1: memref<1x10x10x128xbf16, #tpu.memory_space<vmem>>, %arg2: memref<9x128x128xbf16, #tpu.memory_space<vmem>>, %arg3: memref<1x128xf32, #tpu.memory_space<vmem>>, %arg4: memref<2x16x32xbf16, #tpu.memory_space<vmem>>, %arg5: memref<16x128xbf16, #tpu.memory_space<vmem>>) attributes {dimension_semantics = [#tpu.dimension_semantics<parallel>], iteration_bounds = array<i64: 2>, scalar_prefetch = 0 : i64, scratch_operands = 0 : i64, tpu.core_type = #tpu.core_type<tc>, window_params = [{transform_indices = @transform_0, window_bounds = array<i64: 1, 10, 10, 128>}, {pipeline_mode = #tpu.pipeline_mode<synchronous>, transform_indices = @transform_1, window_bounds = array<i64: 9, 128, 128>}, {pipeline_mode = #tpu.pipeline_mode<synchronous>, transform_indices = @transform_2, window_bounds = array<i64: 1, 128>}, {pipeline_mode = #tpu.pipeline_mode<synchronous>, transform_indices = @transform_3, window_bounds = array<i64: 2, 16, 32>}, {transform_indices = @transform_4, window_bounds = array<i64: 16, 128>}]} {
    %c0 = arith.constant 0 : index
    %c0_0 = arith.constant 0 : index
    %c0_1 = arith.constant 0 : index
    %c0_2 = arith.constant 0 : index
    %0 = vector.load %arg1[%c0, %c0_0, %c0_1, %c0_2] : memref<1x10x10x128xbf16, #tpu.memory_space<vmem>>, vector<1x10x10x128xbf16>
    %1 = vector.shape_cast %0 : vector<1x10x10x128xbf16> to vector<10x10x128xbf16>
    %2 = arith.extf %1 : vector<10x10x128xbf16> to vector<10x10x128xf32>
    %3 = vector.extract_strided_slice %2 {offsets = [0, 0, 0], sizes = [8, 8, 128], strides = [1, 1, 1]} : vector<10x10x128xf32> to vector<8x8x128xf32>
    %4 = vector.shape_cast %3 : vector<8x8x128xf32> to vector<64x128xf32>
    %5 = arith.truncf %4 : vector<64x128xf32> to vector<64x128xbf16>
    %c0_3 = arith.constant 0 : index
    %c0_4 = arith.constant 0 : index
    %c0_5 = arith.constant 0 : index
    %6 = vector.load %arg2[%c0_3, %c0_4, %c0_5] : memref<9x128x128xbf16, #tpu.memory_space<vmem>>, vector<1x128x128xbf16>
    %7 = vector.shape_cast %6 : vector<1x128x128xbf16> to vector<128x128xbf16>
    %cst = arith.constant dense<0.000000e+00> : vector<64x128xf32>
    %8 = tpu.matmul %5, %7, %cst {dimension_numbers = #tpu.dot_dimension_numbers<[1], [0], [0], [1], [0, 0, 1, 1], [], []>} : vector<64x128xbf16>, vector<128x128xbf16>, vector<64x128xf32> -> vector<64x128xf32>
    %9 = vector.extract_strided_slice %2 {offsets = [0, 1, 0], sizes = [8, 8, 128], strides = [1, 1, 1]} : vector<10x10x128xf32> to vector<8x8x128xf32>
    %10 = vector.shape_cast %9 : vector<8x8x128xf32> to vector<64x128xf32>
    %11 = arith.truncf %10 : vector<64x128xf32> to vector<64x128xbf16>
    %c1 = arith.constant 1 : index
    %c0_6 = arith.constant 0 : index
    %c0_7 = arith.constant 0 : index
    %12 = vector.load %arg2[%c1, %c0_6, %c0_7] : memref<9x128x128xbf16, #tpu.memory_space<vmem>>, vector<1x128x128xbf16>
    %13 = vector.shape_cast %12 : vector<1x128x128xbf16> to vector<128x128xbf16>
    %cst_8 = arith.constant dense<0.000000e+00> : vector<64x128xf32>
    %14 = tpu.matmul %11, %13, %cst_8 {dimension_numbers = #tpu.dot_dimension_numbers<[1], [0], [0], [1], [0, 0, 1, 1], [], []>} : vector<64x128xbf16>, vector<128x128xbf16>, vector<64x128xf32> -> vector<64x128xf32>
    %15 = arith.addf %8, %14 : vector<64x128xf32>
    %16 = vector.extract_strided_slice %2 {offsets = [0, 2, 0], sizes = [8, 8, 128], strides = [1, 1, 1]} : vector<10x10x128xf32> to vector<8x8x128xf32>
    %17 = vector.shape_cast %16 : vector<8x8x128xf32> to vector<64x128xf32>
    %18 = arith.truncf %17 : vector<64x128xf32> to vector<64x128xbf16>
    %c2 = arith.constant 2 : index
    %c0_9 = arith.constant 0 : index
    %c0_10 = arith.constant 0 : index
    %19 = vector.load %arg2[%c2, %c0_9, %c0_10] : memref<9x128x128xbf16, #tpu.memory_space<vmem>>, vector<1x128x128xbf16>
    %20 = vector.shape_cast %19 : vector<1x128x128xbf16> to vector<128x128xbf16>
    %cst_11 = arith.constant dense<0.000000e+00> : vector<64x128xf32>
    %21 = tpu.matmul %18, %20, %cst_11 {dimension_numbers = #tpu.dot_dimension_numbers<[1], [0], [0], [1], [0, 0, 1, 1], [], []>} : vector<64x128xbf16>, vector<128x128xbf16>, vector<64x128xf32> -> vector<64x128xf32>
    %22 = arith.addf %15, %21 : vector<64x128xf32>
    %23 = vector.extract_strided_slice %2 {offsets = [1, 0, 0], sizes = [8, 8, 128], strides = [1, 1, 1]} : vector<10x10x128xf32> to vector<8x8x128xf32>
    %24 = vector.shape_cast %23 : vector<8x8x128xf32> to vector<64x128xf32>
    %25 = arith.truncf %24 : vector<64x128xf32> to vector<64x128xbf16>
    %c3 = arith.constant 3 : index
    %c0_12 = arith.constant 0 : index
    %c0_13 = arith.constant 0 : index
    %26 = vector.load %arg2[%c3, %c0_12, %c0_13] : memref<9x128x128xbf16, #tpu.memory_space<vmem>>, vector<1x128x128xbf16>
    %27 = vector.shape_cast %26 : vector<1x128x128xbf16> to vector<128x128xbf16>
    %cst_14 = arith.constant dense<0.000000e+00> : vector<64x128xf32>
    %28 = tpu.matmul %25, %27, %cst_14 {dimension_numbers = #tpu.dot_dimension_numbers<[1], [0], [0], [1], [0, 0, 1, 1], [], []>} : vector<64x128xbf16>, vector<128x128xbf16>, vector<64x128xf32> -> vector<64x128xf32>
    %29 = arith.addf %22, %28 : vector<64x128xf32>
    %30 = vector.extract_strided_slice %2 {offsets = [1, 1, 0], sizes = [8, 8, 128], strides = [1, 1, 1]} : vector<10x10x128xf32> to vector<8x8x128xf32>
    %31 = vector.shape_cast %30 : vector<8x8x128xf32> to vector<64x128xf32>
    %32 = arith.truncf %31 : vector<64x128xf32> to vector<64x128xbf16>
    %c4 = arith.constant 4 : index
    %c0_15 = arith.constant 0 : index
    %c0_16 = arith.constant 0 : index
    %33 = vector.load %arg2[%c4, %c0_15, %c0_16] : memref<9x128x128xbf16, #tpu.memory_space<vmem>>, vector<1x128x128xbf16>
    %34 = vector.shape_cast %33 : vector<1x128x128xbf16> to vector<128x128xbf16>
    %cst_17 = arith.constant dense<0.000000e+00> : vector<64x128xf32>
    %35 = tpu.matmul %32, %34, %cst_17 {dimension_numbers = #tpu.dot_dimension_numbers<[1], [0], [0], [1], [0, 0, 1, 1], [], []>} : vector<64x128xbf16>, vector<128x128xbf16>, vector<64x128xf32> -> vector<64x128xf32>
    %36 = arith.addf %29, %35 : vector<64x128xf32>
    %37 = vector.extract_strided_slice %2 {offsets = [1, 2, 0], sizes = [8, 8, 128], strides = [1, 1, 1]} : vector<10x10x128xf32> to vector<8x8x128xf32>
    %38 = vector.shape_cast %37 : vector<8x8x128xf32> to vector<64x128xf32>
    %39 = arith.truncf %38 : vector<64x128xf32> to vector<64x128xbf16>
    %c5 = arith.constant 5 : index
    %c0_18 = arith.constant 0 : index
    %c0_19 = arith.constant 0 : index
    %40 = vector.load %arg2[%c5, %c0_18, %c0_19] : memref<9x128x128xbf16, #tpu.memory_space<vmem>>, vector<1x128x128xbf16>
    %41 = vector.shape_cast %40 : vector<1x128x128xbf16> to vector<128x128xbf16>
    %cst_20 = arith.constant dense<0.000000e+00> : vector<64x128xf32>
    %42 = tpu.matmul %39, %41, %cst_20 {dimension_numbers = #tpu.dot_dimension_numbers<[1], [0], [0], [1], [0, 0, 1, 1], [], []>} : vector<64x128xbf16>, vector<128x128xbf16>, vector<64x128xf32> -> vector<64x128xf32>
    %43 = arith.addf %36, %42 : vector<64x128xf32>
    %44 = vector.extract_strided_slice %2 {offsets = [2, 0, 0], sizes = [8, 8, 128], strides = [1, 1, 1]} : vector<10x10x128xf32> to vector<8x8x128xf32>
    %45 = vector.shape_cast %44 : vector<8x8x128xf32> to vector<64x128xf32>
    %46 = arith.truncf %45 : vector<64x128xf32> to vector<64x128xbf16>
    %c6 = arith.constant 6 : index
    %c0_21 = arith.constant 0 : index
    %c0_22 = arith.constant 0 : index
    %47 = vector.load %arg2[%c6, %c0_21, %c0_22] : memref<9x128x128xbf16, #tpu.memory_space<vmem>>, vector<1x128x128xbf16>
    %48 = vector.shape_cast %47 : vector<1x128x128xbf16> to vector<128x128xbf16>
    %cst_23 = arith.constant dense<0.000000e+00> : vector<64x128xf32>
    %49 = tpu.matmul %46, %48, %cst_23 {dimension_numbers = #tpu.dot_dimension_numbers<[1], [0], [0], [1], [0, 0, 1, 1], [], []>} : vector<64x128xbf16>, vector<128x128xbf16>, vector<64x128xf32> -> vector<64x128xf32>
    %50 = arith.addf %43, %49 : vector<64x128xf32>
    %51 = vector.extract_strided_slice %2 {offsets = [2, 1, 0], sizes = [8, 8, 128], strides = [1, 1, 1]} : vector<10x10x128xf32> to vector<8x8x128xf32>
    %52 = vector.shape_cast %51 : vector<8x8x128xf32> to vector<64x128xf32>
    %53 = arith.truncf %52 : vector<64x128xf32> to vector<64x128xbf16>
    %c7 = arith.constant 7 : index
    %c0_24 = arith.constant 0 : index
    %c0_25 = arith.constant 0 : index
    %54 = vector.load %arg2[%c7, %c0_24, %c0_25] : memref<9x128x128xbf16, #tpu.memory_space<vmem>>, vector<1x128x128xbf16>
    %55 = vector.shape_cast %54 : vector<1x128x128xbf16> to vector<128x128xbf16>
    %cst_26 = arith.constant dense<0.000000e+00> : vector<64x128xf32>
    %56 = tpu.matmul %53, %55, %cst_26 {dimension_numbers = #tpu.dot_dimension_numbers<[1], [0], [0], [1], [0, 0, 1, 1], [], []>} : vector<64x128xbf16>, vector<128x128xbf16>, vector<64x128xf32> -> vector<64x128xf32>
    %57 = arith.addf %50, %56 : vector<64x128xf32>
    %58 = vector.extract_strided_slice %2 {offsets = [2, 2, 0], sizes = [8, 8, 128], strides = [1, 1, 1]} : vector<10x10x128xf32> to vector<8x8x128xf32>
    %59 = vector.shape_cast %58 : vector<8x8x128xf32> to vector<64x128xf32>
    %60 = arith.truncf %59 : vector<64x128xf32> to vector<64x128xbf16>
    %c8 = arith.constant 8 : index
    %c0_27 = arith.constant 0 : index
    %c0_28 = arith.constant 0 : index
    %61 = vector.load %arg2[%c8, %c0_27, %c0_28] : memref<9x128x128xbf16, #tpu.memory_space<vmem>>, vector<1x128x128xbf16>
    %62 = vector.shape_cast %61 : vector<1x128x128xbf16> to vector<128x128xbf16>
    %cst_29 = arith.constant dense<0.000000e+00> : vector<64x128xf32>
    %63 = tpu.matmul %60, %62, %cst_29 {dimension_numbers = #tpu.dot_dimension_numbers<[1], [0], [0], [1], [0, 0, 1, 1], [], []>} : vector<64x128xbf16>, vector<128x128xbf16>, vector<64x128xf32> -> vector<64x128xf32>
    %64 = arith.addf %57, %63 : vector<64x128xf32>
    %c0_30 = arith.constant 0 : index
    %c0_31 = arith.constant 0 : index
    %65 = vector.load %arg3[%c0_30, %c0_31] : memref<1x128xf32, #tpu.memory_space<vmem>>, vector<1x128xf32>
    %66 = vector.broadcast %65 : vector<1x128xf32> to vector<64x128xf32>
    %67 = arith.addf %64, %66 : vector<64x128xf32>
    %cst_32 = arith.constant 0.000000e+00 : f32
    %68 = vector.broadcast %cst_32 : f32 to vector<64x128xf32>
    %69 = arith.maximumf %67, %68 : vector<64x128xf32>
    %70 = vector.shape_cast %69 : vector<64x128xf32> to vector<4x2x8x128xf32>
    %71 = vector.extract_strided_slice %70 {offsets = [0, 0, 0, 0], sizes = [4, 1, 8, 128], strides = [1, 1, 1, 1]} : vector<4x2x8x128xf32> to vector<4x1x8x128xf32>
    %72 = vector.shape_cast %71 : vector<4x1x8x128xf32> to vector<4x8x128xf32>
    %73 = vector.extract_strided_slice %70 {offsets = [0, 1, 0, 0], sizes = [4, 1, 8, 128], strides = [1, 1, 1, 1]} : vector<4x2x8x128xf32> to vector<4x1x8x128xf32>
    %74 = vector.shape_cast %73 : vector<4x1x8x128xf32> to vector<4x8x128xf32>
    %75 = arith.maximumf %72, %74 : vector<4x8x128xf32>
    %76 = vector.shape_cast %75 : vector<4x8x128xf32> to vector<32x128xf32>
    %77 = arith.truncf %76 : vector<32x128xf32> to vector<32x128xbf16>
    %c0_33 = arith.constant 0 : index
    %c0_34 = arith.constant 0 : index
    %c0_35 = arith.constant 0 : index
    %78 = vector.load %arg4[%c0_33, %c0_34, %c0_35] : memref<2x16x32xbf16, #tpu.memory_space<vmem>>, vector<1x16x32xbf16>
    %79 = vector.shape_cast %78 : vector<1x16x32xbf16> to vector<16x32xbf16>
    %cst_36 = arith.constant dense<0.000000e+00> : vector<16x128xf32>
    %80 = tpu.matmul %79, %77, %cst_36 {dimension_numbers = #tpu.dot_dimension_numbers<[1], [0], [0], [1], [0, 0, 1, 1], [], []>} : vector<16x32xbf16>, vector<32x128xbf16>, vector<16x128xf32> -> vector<16x128xf32>
    %c1_37 = arith.constant 1 : index
    %c0_38 = arith.constant 0 : index
    %c0_39 = arith.constant 0 : index
    %81 = vector.load %arg4[%c1_37, %c0_38, %c0_39] : memref<2x16x32xbf16, #tpu.memory_space<vmem>>, vector<1x16x32xbf16>
    %82 = vector.shape_cast %81 : vector<1x16x32xbf16> to vector<16x32xbf16>
    %cst_40 = arith.constant dense<0.000000e+00> : vector<16x128xf32>
    %83 = tpu.matmul %82, %77, %cst_40 {dimension_numbers = #tpu.dot_dimension_numbers<[1], [0], [0], [1], [0, 0, 1, 1], [], []>} : vector<16x32xbf16>, vector<32x128xbf16>, vector<16x128xf32> -> vector<16x128xf32>
    %84 = arith.maximumf %80, %83 : vector<16x128xf32>
    %85 = arith.truncf %84 : vector<16x128xf32> to vector<16x128xbf16>
    %c0_41 = arith.constant 0 : index
    %c0_42 = arith.constant 0 : index
    %86 = vector.load %arg5[%c0_41, %c0_42] : memref<16x128xbf16, #tpu.memory_space<vmem>>, vector<16x128xbf16>
    tpu.vector_store %arg5[%c0_41, %c0_42], %85 {strides = array<i32>} : memref<16x128xbf16, #tpu.memory_space<vmem>>, vector<16x128xbf16>,
    return
  }
  func.func @transform_0(%arg0: i32) -> (i32, i32, i32, i32) {
    %c0_i32 = arith.constant 0 : i32
    %c0_i32_0 = arith.constant 0 : i32
    %c0_i32_1 = arith.constant 0 : i32
    %c0_i32_2 = arith.constant 0 : i32
    return %arg0, %c0_i32, %c0_i32_0, %c0_i32_1 : i32, i32, i32, i32
  }
  func.func @transform_1(%arg0: i32) -> (i32, i32, i32) {
    %c0_i32 = arith.constant 0 : i32
    %c0_i32_0 = arith.constant 0 : i32
    %c0_i32_1 = arith.constant 0 : i32
    %c0_i32_2 = arith.constant 0 : i32
    return %c0_i32, %c0_i32_0, %c0_i32_1 : i32, i32, i32
  }
  func.func @transform_2(%arg0: i32) -> (i32, i32) {
    %c0_i32 = arith.constant 0 : i32
    %c0_i32_0 = arith.constant 0 : i32
    %c0_i32_1 = arith.constant 0 : i32
    return %c0_i32, %c0_i32_0 : i32, i32
  }
  func.func @transform_3(%arg0: i32) -> (i32, i32, i32) {
    %c0_i32 = arith.constant 0 : i32
    %c0_i32_0 = arith.constant 0 : i32
    %c0_i32_1 = arith.constant 0 : i32
    %c0_i32_2 = arith.constant 0 : i32
    return %c0_i32, %c0_i32_0, %c0_i32_1 : i32, i32, i32
  }
  func.func @transform_4(%arg0: i32) -> (i32, i32) {
    %c0_i32 = arith.constant 0 : i32
    %c0_i32_0 = arith.constant 0 : i32
    return %arg0, %c0_i32 : i32, i32
  }
}

module attributes {stable_mosaic.version = 11 : i64} {
  func.func @_fc_kernel(%arg0: i32, %arg1: memref<2x2048xbf16, #tpu.memory_space<vmem>>, %arg2: memref<2048x128xbf16, #tpu.memory_space<vmem>>, %arg3: memref<1x128xf32, #tpu.memory_space<vmem>>, %arg4: memref<2x128xf32, #tpu.memory_space<vmem>>) attributes {dimension_semantics = [#tpu.dimension_semantics<arbitrary>], iteration_bounds = array<i64: 1>, scalar_prefetch = 0 : i64, scratch_operands = 0 : i64, tpu.core_type = #tpu.core_type<tc>, window_params = [{pipeline_mode = #tpu.pipeline_mode<synchronous>, transform_indices = @transform_0, window_bounds = array<i64: 2, 2048>}, {pipeline_mode = #tpu.pipeline_mode<synchronous>, transform_indices = @transform_1, window_bounds = array<i64: 2048, 128>}, {pipeline_mode = #tpu.pipeline_mode<synchronous>, transform_indices = @transform_2, window_bounds = array<i64: 1, 128>}, {pipeline_mode = #tpu.pipeline_mode<synchronous>, transform_indices = @transform_3, window_bounds = array<i64: 2, 128>}]} {
    %c0 = arith.constant 0 : index
    %c0_0 = arith.constant 0 : index
    %0 = vector.load %arg1[%c0, %c0_0] : memref<2x2048xbf16, #tpu.memory_space<vmem>>, vector<2x2048xbf16>
    %c0_1 = arith.constant 0 : index
    %c0_2 = arith.constant 0 : index
    %1 = vector.load %arg2[%c0_1, %c0_2] : memref<2048x128xbf16, #tpu.memory_space<vmem>>, vector<2048x128xbf16>
    %cst = arith.constant dense<0.000000e+00> : vector<2x128xf32>
    %2 = tpu.matmul %0, %1, %cst {dimension_numbers = #tpu.dot_dimension_numbers<[1], [0], [0], [1], [0, 0, 1, 1], [], []>} : vector<2x2048xbf16>, vector<2048x128xbf16>, vector<2x128xf32> -> vector<2x128xf32>
    %c0_3 = arith.constant 0 : index
    %c0_4 = arith.constant 0 : index
    %3 = vector.load %arg3[%c0_3, %c0_4] : memref<1x128xf32, #tpu.memory_space<vmem>>, vector<1x128xf32>
    %4 = vector.broadcast %3 : vector<1x128xf32> to vector<2x128xf32>
    %5 = arith.addf %2, %4 : vector<2x128xf32>
    %c0_5 = arith.constant 0 : index
    %c0_6 = arith.constant 0 : index
    %6 = vector.load %arg4[%c0_5, %c0_6] : memref<2x128xf32, #tpu.memory_space<vmem>>, vector<2x128xf32>
    tpu.vector_store %arg4[%c0_5, %c0_6], %5 {strides = array<i32>} : memref<2x128xf32, #tpu.memory_space<vmem>>, vector<2x128xf32>,
    return
  }
  func.func @transform_0(%arg0: i32) -> (i32, i32) {
    %c0_i32 = arith.constant 0 : i32
    %c0_i32_0 = arith.constant 0 : i32
    %c0_i32_1 = arith.constant 0 : i32
    return %c0_i32, %c0_i32_0 : i32, i32
  }
  func.func @transform_1(%arg0: i32) -> (i32, i32) {
    %c0_i32 = arith.constant 0 : i32
    %c0_i32_0 = arith.constant 0 : i32
    %c0_i32_1 = arith.constant 0 : i32
    return %c0_i32, %c0_i32_0 : i32, i32
  }
  func.func @transform_2(%arg0: i32) -> (i32, i32) {
    %c0_i32 = arith.constant 0 : i32
    %c0_i32_0 = arith.constant 0 : i32
    %c0_i32_1 = arith.constant 0 : i32
    return %c0_i32, %c0_i32_0 : i32, i32
  }
  func.func @transform_3(%arg0: i32) -> (i32, i32) {
    %c0_i32 = arith.constant 0 : i32
    %c0_i32_0 = arith.constant 0 : i32
    %c0_i32_1 = arith.constant 0 : i32
    return %c0_i32, %c0_i32_0 : i32, i32
  }
}

</mosaic_0001>

<bundles_post_ra>
// kernel: convnet_forward.5
= control target key start
LH: loop header
LB: loop body
LE: loop exit
PB: predicated region body
PF: predicated region fallthrough
CT: control target
= control target key end

     0   :  { %s4740_s15 = smov 0   ;;  %s5845_s0 = inlined_call_operand.vmem [shape: bf16[2,18,18,128], index: 0, kind: input, shape index: {}]   ;;  %s5846_s1 = inlined_call_operand.vmem [shape: bf16[9,128,128], index: 1, kind: input, shape index: {}]   ;;  %s5847_s2 = inlined_call_operand.vmem [shape: f32[1,128], index: 2, kind: input, shape index: {}]   ;;  %s5848_s3 = inlined_call_operand.vmem [shape: bf16[2,64,128], index: 3, kind: input, shape index: {}]   ;;  %s5849_s4 = inlined_call_operand.vmem [shape: bf16[128,128], index: 4, kind: output, shape index: {}]  }
   0x1 LB: > { %s4746_s16 = sadd.s32 4294967295, %s4713_s15   ;;  %p3325_p0 = scmp.ge.s32.totalorder %s4713_s15, 1  ;;  %s4713_s15 = sphi %s4740_s15, %s14_s15  }
   0x2   : > { %p162_p1 = scmp.lt.s32.totalorder %s4713_s15, 3 }
   0x4   : > { %p163_p2 = pnand %p3325_p0, %p162_p1 }
   0x6   : > { %166 = sbr.rel (%p163_p2) target bundleno = 852 (0x354), region = 36 }
   0xd   : > { %v4590_v0 = vld [vmem:[%s5846_s1 + $0x40] sm:$0xff]   ;;  %p188_p3 = scmp.lt.s32.totalorder %s4746_s16, 1  ;;  %v4592_v2 = vld [vmem:[%s5846_s1 + $0x48] sm:$0xff]   ;;  %v4594_v4 = vld [vmem:[%s5846_s1 + $0x50] sm:$0xff]   ;;  %vm388_vm0 = vcmask 1046528   ;;  %vm952_vm1 = vcmask 1045504  }
   0xe   : > { %v4591_v1 = vld [vmem:[%s5846_s1 + $0x100] sm:$0xff]   ;;  %3845 = vmatprep.subr.bf16.mxu1 %v4590_v0  ;;  %v4593_v3 = vld [vmem:[%s5846_s1 + $0x108] sm:$0xff]   ;;  %v4595_v5 = vld [vmem:[%s5846_s1 + $0x110] sm:$0xff]   ;;  %s3327_s20 = sshll.u32 %s4746_s16, 3 }
   0xf   : > { %4037 = vmatprep.subr.bf16.mxu0 %v4591_v1  ;;  %3846 = vmatpush3.bf16.msra.mxu1 %v4590_v0  ;;  %s189_s29 = scalar_select %p188_p3, %s4746_s16, 1  ;;  %v4596_v6 = vld [vmem:[%s5846_s1 + $0x58] sm:$0xff]   ;;  %v4598_v8 = vld [vmem:[%s5846_s1 + $0x60] sm:$0xff]   ;;  %v4600_v10 = vld [vmem:[%s5846_s1 + $0x68] sm:$0xff]  }
  0x10   : > { %4038 = vmatpush3.bf16.msra.mxu0 %v4591_v1  ;;  %3847 = vmatprep.subr.bf16.mxu1 %v4592_v2  ;;  %v4597_v7 = vld [vmem:[%s5846_s1 + $0x118] sm:$0xff]   ;;  %v4599_v9 = vld [vmem:[%s5846_s1 + $0x120] sm:$0xff]   ;;  %v4601_v11 = vld [vmem:[%s5846_s1 + $0x128] sm:$0xff]   ;;  %p194_p4 = scmp.lt.s32.totalorder %s3327_s20, 15 }
  0x11   : > { %4039 = vmatprep.subr.bf16.mxu0 %v4593_v3  ;;  %s4581_s8 = smul.u32 216, %s189_s29  ;;  %v4602_v29 = vld [vmem:[%s5846_s1 + $0x70] sm:$0xff]   ;;  %v4604_v43 = vld [vmem:[%s5846_s1 + $0x78] sm:$0xff]   ;;  %v4607_v62 = vld [vmem:[%s5846_s1 + $0x140] sm:$0xff]  }
  0x12   : > { %v4603_v30 = vld [vmem:[%s5846_s1 + $0x130] sm:$0xff]   ;;  %v4605_v53 = vld [vmem:[%s5846_s1 + $0x138] sm:$0xff]   ;;  %s5967_s20 = smov (!%p194_p4, %s3327_s20), 15 }
  0x13   : > { %3848 = vmatpush3.bf16.msra.mxu1 %v4592_v2  ;;  %s4785_s17 = scalar_lea.vmem %s5845_s0, %s4581_s8  ;;  %s3328_s21 = sshll.u32 %s5967_s20, 2 }
  0x14   : > { %4040 = vmatpush3.bf16.msra.mxu0 %v4593_v3  ;;  %3849 = vmatprep.subr.bf16.mxu1 %v4594_v4  ;;  %v4794_v12 = vld [vmem:[%s4785_s17] sm:$0xff]   ;;  %v4797_v13 = vld [vmem:[%s4785_s17 + $0x8] sm:$0x1]  ;;  %v4800_v14 = vld [vmem:[%s4785_s17 + $0xc] sm:$0xff]   ;;  %s197_s24 = scalar_lea.vmem %s5849_s4, %s3328_s21 }
  0x15   : > { %4041 = vmatprep.subr.bf16.mxu0 %v4595_v5  ;;  %v5852_v15 = vunpack.c.l.bf16 %v4794_v12  ;;  %v5851_v16 = vunpack.c.h.bf16 %v4794_v12  ;;  %v5850_v17 = vunpack.c.l.bf16 %v4797_v13  ;;  %v4806_v18 = vld [vmem:[%s4785_s17 + $0x14] sm:$0x1]  ;;  %v5877_v19 = vunpack.c.l.bf16 %v4800_v14  ;;  %v4810_v20 = vld [vmem:[%s4785_s17 + $0x18] sm:$0xff]   ;;  %v4813_v21 = vld [vmem:[%s4785_s17 + $0x20] sm:$0x1] }
  0x16   : > { %v5876_v22 = vunpack.c.h.bf16 %v4800_v14  ;;  %v5873_v23 = vunpack.c.l.bf16 %v4806_v18  ;;  %v260_v24 = vunpack.c.l.bf16 %v4810_v20  ;;  %v5879_v33 = vunpack.c.h.bf16 %v4810_v20  ;;  %v4839_v35 = vld [vmem:[%s4785_s17 + $0x24] sm:$0xff]   ;;  %v4844_v38 = vld [vmem:[%s4785_s17 + $0x2c] sm:$0x1]  ;;  %v4849_v42 = vld [vmem:[%s4785_s17 + $0x30] sm:$0xff]  }
  0x17   : > { %3850 = vmatpush3.bf16.msra.mxu1 %v4594_v4  ;;  %v389_v25 = vrot.slane %v5852_v15, 1  ;;  %v390_v26 = vrot.slane %v5851_v16, 1  ;;  %v392_v27 = vrot.slane %v5850_v17, 1  ;;  %v394_v28 = vrot.slane %v5877_v19, 1  ;;  %v4861_v48 = vld [vmem:[%s4785_s17 + $0x38] sm:$0x1] }
  0x18   : > { %4042 = vmatpush3.bf16.msra.mxu0 %v4595_v5  ;;  %3851 = vmatprep.subr.bf16.mxu1 %v4596_v6  ;;  %v395_v31 = vrot.slane %v5876_v22, 1  ;;  %v397_v32 = vrot.slane %v5873_v23, 1  ;;  %v5878_v34 = vunpack.c.l.bf16 %v4813_v21  ;;  %v399_v45 = vrot.slane %v260_v24, 1  ;;  %v4867_v52 = vld [vmem:[%s4785_s17 + $0x3c] sm:$0xff]   ;;  %v4874_v55 = vld [vmem:[%s4785_s17 + $0x44] sm:$0x1] }
  0x19   : > { %4043 = vmatprep.subr.bf16.mxu0 %v4597_v7  ;;  %v391_v36 = vsel %vm388_vm0, %v389_v25, %v390_v26  ;;  %v393_v37 = vsel %vm388_vm0, %v390_v26, %v392_v27  ;;  %v400_v46 = vrot.slane %v5879_v33, 1  ;;  %v5872_v49 = vunpack.c.l.bf16 %v4839_v35  ;;  %v4891_v1 = vld [vmem:[%s4785_s17 + $0x48] sm:$0xff]   ;;  %v4913_v25 = vld [vmem:[%s4785_s17 + $0x5c] sm:$0x1]  ;;  %v4984_v16 = vld [vmem:[%s4785_s17 + $0x80] sm:$0x1] }
  0x1a   : > { %v501_v39 = vpack.c.bf16 %v393_v37, %v391_v36  ;;  %v396_v40 = vsel %vm388_vm0, %v394_v28, %v395_v31  ;;  %v398_v41 = vsel %vm388_vm0, %v395_v31, %v397_v32  ;;  %v402_v47 = vrot.slane %v5878_v34, 1  ;;  %v4608_v37 = vld [vmem:[%s5846_s1 + $0x148] sm:$0xff]   ;;  %v4614_v15 = vld [vmem:[%s5846_s1 + $0x10] sm:$0xff]   ;;  %v4617_v23 = vld [vmem:[%s5846_s1 + $0x20] sm:$0xff]  }
  0x1b   : > { %3852 = vmatpush3.bf16.msra.mxu1 %v4596_v6  ;;  %v502_v44 = vpack.c.bf16 %v398_v41, %v396_v40  ;;  %v5869_v50 = vunpack.c.h.bf16 %v4839_v35  ;;  %v5868_v51 = vunpack.c.l.bf16 %v4844_v38  ;;  %v5866_v54 = vunpack.c.l.bf16 %v4849_v42  ;;  %v4898_v6 = vld [vmem:[%s4785_s17 + $0x50] sm:$0x1]  ;;  %v4934_v41 = vld [vmem:[%s4785_s17 + $0x60] sm:$0xff]   ;;  %v5065_v19 = vld [vmem:[%s4785_s17 + $0xa8] sm:$0xff]  }
  0x1c   : > { %4044 = vmatpush3.bf16.msra.mxu0 %v4597_v7  ;;  %3853 = vmatprep.subr.bf16.mxu1 %v4598_v8  ;;  %v404_v56 = vrot.slane %v5872_v49, 1  ;;  %v5865_v59 = vunpack.c.h.bf16 %v4849_v42  ;;  %v401_v60 = vsel %vm388_vm0, %v399_v45, %v400_v46  ;;  %v403_v61 = vsel %vm388_vm0, %v400_v46, %v402_v47  ;;  %v4901_v7 = vld [vmem:[%s4785_s17 + $0x54] sm:$0xff]   ;;  %v4613_v47 = vld [vmem:[%s5846_s1 + $0x8] sm:$0xff]  }
  0x1d   : > { %4045 = vmatprep.subr.bf16.mxu0 %v4599_v9  ;;  %3861 = vmatprep.mubr.bf16.mxu1 %v501_v39  ;;  %v405_v57 = vrot.slane %v5869_v50, 1  ;;  %v407_v58 = vrot.slane %v5868_v51, 1  ;;  %v5863_v63 = vunpack.c.l.bf16 %v4861_v48  ;;  %v5862_v0 = vunpack.c.l.bf16 %v4867_v52 }
  0x1e   : > { %4053 = vmatprep.mubr.bf16.mxu0 %v502_v44  ;;  %v5860_v4 = vunpack.c.h.bf16 %v4867_v52  ;;  %v5859_v5 = vunpack.c.l.bf16 %v4874_v55  ;;  %v5858_v28 = vunpack.c.l.bf16 %v4891_v1  ;;  %v5856_v36 = vunpack.c.l.bf16 %v4898_v6 }
  0x1f   : > { %3854 = vmatpush3.bf16.msra.mxu1 %v4598_v8  ;;  %v406_v2 = vsel %vm388_vm0, %v404_v56, %v405_v57  ;;  %v408_v3 = vsel %vm388_vm0, %v405_v57, %v407_v58  ;;  %v4611_v8 = vld [vmem:[%s5846_s1] sm:$0xff]   ;;  %v412_v27 = vrot.slane %v5863_v63, 1  ;;  %v5855_v39 = vunpack.c.l.bf16 %v4901_v7  ;;  %v4956_v57 = vld [vmem:[%s4785_s17 + $0x74] sm:$0x1] }
  0x20   : > { %4046 = vmatpush3.bf16.msra.mxu0 %v4599_v9  ;;  %3855 = vmatprep.subr.bf16.mxu1 %v4600_v10  ;;  %v4906_v9 = vpack.c.bf16 %v403_v61, %v401_v60  ;;  %v4915_v26 = vpack.c.bf16 %v408_v3, %v406_v2  ;;  %v415_v31 = vrot.slane %v5860_v4, 1  ;;  %v417_v32 = vrot.slane %v5859_v5, 1  ;;  %v4965_v3 = vld [vmem:[%s4785_s17 + $0x6c] sm:$0xff]   ;;  %v5014_v5 = vld [vmem:[%s4785_s17 + $0x98] sm:$0x1] }
  0x21   : > { %4047 = vmatprep.subr.bf16.mxu0 %v4601_v11  ;;  %v5853_v40 = vunpack.c.h.bf16 %v4901_v7  ;;  %v4941_v45 = vrot.slane %v260_v24, 2  ;;  %v5854_v46 = vunpack.c.l.bf16 %v4913_v25  ;;  %v419_v24 = vrot.slane %v5858_v28, 1  ;;  %v5011_v28 = vld [vmem:[%s4785_s17 + $0x90] sm:$0xff]  }
  0x22   : > { %v418_v60 = vsel %vm388_vm0, %v415_v31, %v417_v32  ;;  %v422_v61 = vrot.slane %v5856_v36, 1  ;;  %v5861_v2 = vunpack.c.l.bf16 %v4934_v41  ;;  %v5003_v36 = vld [vmem:[%s4785_s17 + $0x8c] sm:$0x1] }
  0x23   : > { %3856 = vmatpush3.bf16.msra.mxu1 %v4600_v10  ;;  %v409_v10 = vrot.slane %v5866_v54, 1  ;;  %v427_v32 = vrot.slane %v5854_v46, 1  ;;  %v5871_v46 = vunpack.c.h.bf16 %v4965_v3  ;;  %v5034_v54 = vld [vmem:[%s4785_s17 + $0xa4] sm:$0x1] }
  0x24   : > { %4048 = vmatpush3.bf16.msra.mxu0 %v4601_v11  ;;  %3857 = vmatprep.subr.bf16.mxu1 %v4602_v29  ;;  %v410_v11 = vrot.slane %v5865_v59, 1  ;;  %v5031_v59 = vld [vmem:[%s4785_s17 + $0x9c] sm:$0xff]  }
  0x25   : > { %4049 = vmatprep.subr.bf16.mxu0 %v4603_v30 }
  0x26   : > { %v413_v56 = vsel %vm388_vm0, %v410_v11, %v412_v27  ;;  %v5864_v27 = vunpack.c.h.bf16 %v4934_v41 }
  0x27   : > { %3858 = vmatpush3.bf16.msra.mxu1 %v4602_v29  ;;  %v5857_v29 = vunpack.c.h.bf16 %v4891_v1 }
  0x28   : > { %4050 = vmatpush3.bf16.msra.mxu0 %v4603_v30  ;;  %3859 = vmatprep.subr.bf16.mxu1 %v4604_v43  ;;  %v414_v30 = vrot.slane %v5862_v0, 1 }
  0x29   : > { %4051 = vmatprep.subr.bf16.mxu0 %v4605_v53 }
  0x2a   : > { %v416_v58 = vsel %vm388_vm0, %v414_v30, %v415_v31  ;;  %v4976_v30 = vld [vmem:[%s4785_s17 + $0x78] sm:$0xff]  }
  0x2b   : > { %3860 = vmatpush3.bf16.msra.mxu1 %v4604_v43  ;;  %v4937_v43 = vld [vmem:[%s4785_s17 + $0x68] sm:$0x1] }
  0x2c   : > { %4052 = vmatpush3.bf16.msra.mxu0 %v4605_v53  ;;  %3893 = vmatprep.subr.bf16.mxu1 %v4611_v8  ;;  %v411_v53 = vsel %vm388_vm0, %v409_v10, %v410_v11  ;;  %v4609_v10 = vld [vmem:[%s5846_s1 + $0x150] sm:$0xff]   ;;  %v425_v11 = vrot.slane %v5853_v40, 1  ;;  %v5867_v17 = vunpack.c.l.bf16 %v4937_v43  ;;  %v4989_v40 = vpack.c.bf16 %v418_v60, %v416_v58 }
  0x2d   : > { %4085 = vmatprep.subr.bf16.mxu0 %v4607_v62  ;;  %v4978_v31 = vpack.c.bf16 %v413_v56, %v411_v53  ;;  %v4995_v53 = vld [vmem:[%s5846_s1 + $0x158] sm:$0xff]   ;;  %v5870_v56 = vunpack.c.l.bf16 %v4965_v3  ;;  %v429_v58 = vrot.slane %v5861_v2, 1  ;;  %v5874_v60 = vunpack.c.l.bf16 %v4976_v30 }
  0x2e   : > { %3862 = vmatmul.mubr.bf16.vlgmr.msra.gmra.mrb[0].mxu1 %v502_v44  ;;  %v420_v44 = vrot.slane %v5857_v29, 1  ;;  %v4616_v2 = vld [vmem:[%s5846_s1 + $0x18] sm:$0xff]   ;;  %v428_v0 = vsel %vm388_vm0, %v425_v11, %v427_v32  ;;  %v432_v63 = vrot.slane %v5867_v17, 1  ;;  %v5885_v32 = vunpack.c.l.bf16 %v5003_v36 }
  0x2f   : > { %4054 = vmatmul.mubr.bf16.vlgmr.msra.gmra.mrb[0].mxu0 %v4906_v9  ;;  %3865 = vmatprep.mubr.bf16.mxu1 %v4906_v9  ;;  %5896 = vst [vmem:[#allocation2_spill] sm:$0xff] %v4978_v31  ;;  %v5884_v17 = vunpack.c.l.bf16 %v5011_v28  ;;  %v439_v50 = vrot.slane %v5874_v60, 1 }
  0x30   : > { %4086 = vmatpush3.bf16.msra.mxu0 %v4607_v62  ;;  %4057 = vmatprep.mubr.bf16.mxu0 %v4915_v26  ;;  %v424_v62 = vrot.slane %v5855_v39, 1  ;;  %v5000_v39 = vld [vmem:[%s4785_s17 + $0x84] sm:$0xff]   ;;  %v423_v29 = vsel %vm388_vm0, %v420_v44, %v422_v61  ;;  %v5881_v61 = vunpack.c.l.bf16 %v4984_v16 }
  0x31   : > { %4087 = vmatprep.subr.bf16.mxu0 %v4608_v37  ;;  %3894 = vmatpush3.bf16.msra.mxu1 %v4611_v8  ;;  %v421_v8 = vsel %vm388_vm0, %v419_v24, %v420_v44  ;;  %v5875_v24 = vunpack.c.l.bf16 %v4956_v57  ;;  %v5880_v44 = vunpack.c.h.bf16 %v4976_v30 }
  0x32   : > { %3895 = vmatprep.subr.bf16.mxu1 %v4613_v47  ;;  %v426_v4 = vsel %vm388_vm0, %v424_v62, %v425_v11  ;;  %v5882_v62 = vunpack.c.l.bf16 %v5000_v39  ;;  %v435_v11 = vrot.slane %v5871_v46, 1  ;;  %v5886_v46 = vunpack.c.h.bf16 %v5011_v28 }
  0x33   : > { %v437_v51 = vrot.slane %v5875_v24, 1  ;;  %v442_v60 = vrot.slane %v5881_v61, 1  ;;  %v5067_v34 = vpack.c.bf16 %v423_v29, %v421_v8  ;;  %v449_v61 = vrot.slane %v5884_v17, 1  ;;  %v5083_v24 = vld [vmem:[%s4785_s17 + $0xb0] sm:$0x1]  ;;  %v4615_v17 = vld [vmem:[%s5846_s1 + $0x168] sm:$0xff]  }
  0x34   : > { %4088 = vmatpush3.bf16.msra.mxu0 %v4608_v37  ;;  %v430_v37 = vrot.slane %v5864_v27, 1  ;;  %v5883_v27 = vunpack.c.h.bf16 %v5000_v39  ;;  %v444_v33 = vrot.slane %v5882_v62, 1  ;;  %v450_v22 = vrot.slane %v5886_v46, 1 }
  0x35   : > { %4089 = vmatprep.subr.bf16.mxu0 %v4609_v10  ;;  %3896 = vmatpush3.bf16.msra.mxu1 %v4613_v47  ;;  %v434_v47 = vrot.slane %v5870_v56, 1  ;;  %v4612_v56 = vld [vmem:[%s5846_s1 + $0x160] sm:$0xff]   ;;  %5897 = vst [vmem:[#allocation3_spill] sm:$0xff] %v5067_v34  ;;  %v5898_v29 = vunpack.c.l.bf16 %v5014_v5  ;;  %v5085_v62 = vpack.c.bf16 %v428_v0, %v426_v4  ;;  %v5901_v0 = vunpack.c.h.bf16 %v5031_v59 }
  0x36   : > { %3866 = vmatmul.mubr.bf16.gmra.mrb[4].mxu1 %v4915_v26  ;;  %3897 = vmatprep.subr.bf16.mxu1 %v4614_v15  ;;  %v433_v49 = vsel %vm388_vm0, %v430_v37, %v432_v63  ;;  %v5902_v63 = vunpack.c.l.bf16 %v5034_v54 }
  0x37   : > { %4058 = vmatmul.mubr.bf16.gmra.mrb[4].mxu0 %v4978_v31  ;;  %3869 = vmatprep.mubr.bf16.mxu1 %v4978_v31  ;;  %v452_v8 = vrot.slane %v5898_v29, 1  ;;  %5899 = vst [vmem:[#allocation4_spill] sm:$0xff] %v5085_v62  ;;  %v436_v31 = vsel %vm388_vm0, %v434_v47, %v435_v11  ;;  %v438_v29 = vsel %vm388_vm0, %v435_v11, %v437_v51  ;;  %v455_v4 = vrot.slane %v5901_v0, 1 }
  0x38   : > { %4061 = vmatprep.mubr.bf16.mxu0 %v4989_v40  ;;  %4090 = vmatpush3.bf16.msra.mxu0 %v4609_v10  ;;  %v440_v10 = vrot.slane %v5880_v44, 1  ;;  %v445_v44 = vrot.slane %v5883_v27, 1  ;;  %v431_v27 = vsel %vm388_vm0, %v429_v58, %v430_v37  ;;  %v451_v11 = vsel %vm388_vm0, %v449_v61, %v450_v22 }
  0x39   : > { %4091 = vmatprep.subr.bf16.mxu0 %v4995_v53  ;;  %3898 = vmatpush3.bf16.msra.mxu1 %v4614_v15  ;;  %v447_v15 = vrot.slane %v5885_v32, 1  ;;  %v5900_v32 = vunpack.c.l.bf16 %v5031_v59  ;;  %v5123_v51 = vpack.c.bf16 %v438_v29, %v436_v31  ;;  %v5906_v61 = vunpack.c.l.bf16 %v4813_v21  ;;  %v4620_v31 = vld [vmem:[%s5846_s1 + $0x30] sm:$0xff]  }
  0x3a   : > { %3899 = vmatprep.subr.bf16.mxu1 %v4616_v2  ;;  %v441_v58 = vsel %vm388_vm0, %v439_v50, %v440_v10  ;;  %v443_v37 = vsel %vm388_vm0, %v440_v10, %v442_v60  ;;  %v453_v50 = vsel %vm388_vm0, %v450_v22, %v452_v8  ;;  %v5116_v60 = vld [vmem:[%s4785_s17 + $0xb4] sm:$0xff]   ;;  %v5903_v10 = vunpack.c.h.bf16 %v4810_v20 }
  0x3b   : > { %v454_v46 = vrot.slane %v5900_v32, 1  ;;  %v446_v32 = vsel %vm388_vm0, %v444_v33, %v445_v44  ;;  %v448_v47 = vsel %vm388_vm0, %v445_v44, %v447_v15  ;;  %v5888_v33 = vunpack.c.h.bf16 %v5065_v19  ;;  %5905 = vst [vmem:[#allocation6_spill] sm:$0xff] %v5123_v51  ;;  %v4618_v22 = vld [vmem:[%s5846_s1 + $0x170] sm:$0xff]  }
  0x3c   : > { %4092 = vmatpush3.bf16.msra.mxu0 %v4995_v53  ;;  %v457_v53 = vrot.slane %v5902_v63, 1  ;;  %v964_v0 = vrot.slane %v5903_v10, 2  ;;  %v5121_v63 = vpack.c.bf16 %v433_v49, %v431_v27  ;;  %v5889_v44 = vunpack.c.l.bf16 %v5083_v24  ;;  %v5136_v27 = vld [vmem:[%s4785_s17 + $0xbc] sm:$0x1] }
  0x3d   : > { %4093 = vmatprep.subr.bf16.mxu0 %v4612_v56  ;;  %3900 = vmatpush3.bf16.msra.mxu1 %v4616_v2  ;;  %v4619_v2 = vld [vmem:[%s5846_s1 + $0x28] sm:$0xff]   ;;  %v966_v15 = vrot.slane %v5906_v61, 2  ;;  %v5131_v8 = vpack.c.bf16 %v443_v37, %v441_v58  ;;  %v456_v10 = vsel %vm388_vm0, %v454_v46, %v455_v4  ;;  %v5143_v29 = vpack.c.bf16 %v453_v50, %v451_v11  ;;  %v5149_v46 = vld [vmem:[%s4785_s17 + $0xc0] sm:$0xff]  }
  0x3e   : > { %3870 = vmatmul.mubr.bf16.gmra.mrb[8].mxu1 %v4989_v40  ;;  %3901 = vmatprep.subr.bf16.mxu1 %v4617_v23  ;;  %5904 = vst [vmem:[#allocation5_spill] sm:$0xff] %v5121_v63  ;;  %v458_v49 = vsel %vm388_vm0, %v455_v4, %v457_v53  ;;  %v5908_v21 = vunpack.c.l.bf16 %v5065_v19  ;;  %v4621_v53 = vld [vmem:[%s5846_s1 + $0x178] sm:$0xff]   ;;  %v5910_v11 = vunpack.c.h.bf16 %v4800_v14  ;;  %v5911_v4 = vunpack.c.l.bf16 %v4806_v18 }
  0x3f   : > { %4062 = vmatmul.mubr.bf16.gmra.mrb[8].mxu0 %v5067_v34  ;;  %3873 = vmatprep.mubr.bf16.mxu1 %v5067_v34  ;;  %5907 = vst [vmem:[#allocation7_spill] sm:$0xff] %v5131_v8  ;;  %v5163_v61 = vpack.c.bf16 %v458_v49, %v456_v10  ;;  %v967_v49 = vsel %vm952_vm1, %v964_v0, %v966_v15 }
  0x40   : > { %4065 = vmatprep.mubr.bf16.mxu0 %v5085_v62  ;;  %4094 = vmatpush3.bf16.msra.mxu0 %v4612_v56  ;;  %v5141_v56 = vpack.c.bf16 %v448_v47, %v446_v32  ;;  %v459_v58 = vrot.slane %v5908_v21, 1  ;;  %v5909_v32 = vunpack.c.l.bf16 %v4800_v14  ;;  %v959_v50 = vrot.slane %v5910_v11, 2 }
  0x41   : > { %4095 = vmatprep.subr.bf16.mxu0 %v4615_v17  ;;  %3902 = vmatpush3.bf16.msra.mxu1 %v4617_v23  ;;  %v5153_v23 = vrot.slane %v5888_v33, 1  ;;  %v5167_v21 = vrot.slane %v5889_v44, 1  ;;  %v4622_v33 = vld [vmem:[%s5846_s1 + $0x38] sm:$0xff]   ;;  %v961_v37 = vrot.slane %v5911_v4, 2  ;;  %v5912_v11 = vunpack.c.l.bf16 %v5116_v60 }
  0x42   : > { %3903 = vmatprep.subr.bf16.mxu1 %v4619_v2  ;;  %v958_v47 = vrot.slane %v5909_v32, 2  ;;  %v965_v32 = vsel %vm952_vm1, %v4941_v45, %v964_v0 }
  0x43   : > { %v5183_v44 = vrot.slane %v5912_v11, 1  ;;  %v962_v18 = vsel %vm952_vm1, %v959_v50, %v961_v37  ;;  %v5186_v45 = vpack.c.bf16 %v967_v49, %v965_v32  ;;  %v5194_v0 = vsel %vm388_vm0, %v459_v58, %v5153_v23 }
  0x44   : > { %4096 = vmatpush3.bf16.msra.mxu0 %v4615_v17  ;;  %v960_v10 = vsel %vm952_vm1, %v958_v47, %v959_v50  ;;  %v5914_v47 = vunpack.c.h.bf16 %v4839_v35  ;;  %v5915_v37 = vunpack.c.l.bf16 %v4844_v38  ;;  %v5916_v32 = vunpack.c.h.bf16 %v5116_v60  ;;  %v5216_v38 = vld [vmem:[%s5846_s1 + $0x180] sm:$0xff]  }
  0x45   : > { %4097 = vmatprep.subr.bf16.mxu0 %v4618_v22  ;;  %3904 = vmatpush3.bf16.msra.mxu1 %v4619_v2  ;;  %v5913_v2 = vunpack.c.l.bf16 %v4839_v35  ;;  %v5196_v15 = vpack.c.bf16 %v962_v18, %v960_v10  ;;  %v5918_v58 = vunpack.c.h.bf16 %v4849_v42  ;;  %v5919_v18 = vunpack.c.l.bf16 %v4861_v48 }
  0x46   : > { %3874 = vmatmul.mubr.bf16.gmra.mrb[12].mxu1 %v5085_v62  ;;  %3905 = vmatprep.subr.bf16.mxu1 %v4620_v31  ;;  %v969_v11 = vrot.slane %v5914_v47, 2  ;;  %v971_v50 = vrot.slane %v5915_v37, 2  ;;  %v5205_v49 = vrot.slane %v5916_v32, 1  ;;  %v5920_v37 = vunpack.c.l.bf16 %v4867_v52 }
  0x47   : > { %v968_v4 = vrot.slane %v5913_v2, 2  ;;  %4066 = vmatmul.mubr.bf16.gmra.mrb[12].mxu0 %v5121_v63  ;;  %3877 = vmatprep.mubr.bf16.mxu1 %v5121_v63  ;;  %v5917_v2 = vunpack.c.l.bf16 %v4849_v42  ;;  %v974_v10 = vrot.slane %v5918_v58, 2  ;;  %v976_v14 = vrot.slane %v5919_v18, 2 }
  0x48   : > { %4069 = vmatprep.mubr.bf16.mxu0 %v5123_v51  ;;  %4098 = vmatpush3.bf16.msra.mxu0 %v4618_v22  ;;  %v972_v47 = vsel %vm952_vm1, %v969_v11, %v971_v50  ;;  %v978_v32 = vrot.slane %v5920_v37, 2  ;;  %v5922_v63 = vunpack.c.l.bf16 %v4874_v55 }
  0x49   : > { %v973_v17 = vrot.slane %v5917_v2, 2  ;;  %3906 = vmatpush3.bf16.msra.mxu1 %v4620_v31  ;;  %4099 = vmatprep.subr.bf16.mxu0 %v4621_v53  ;;  %v970_v22 = vsel %vm952_vm1, %v968_v4, %v969_v11  ;;  %v5921_v2 = vunpack.c.h.bf16 %v4867_v52  ;;  %v977_v18 = vsel %vm952_vm1, %v974_v10, %v976_v14  ;;  %v5233_v4 = vld [vmem:[%s5846_s1 + $0x80] sm:$0xff]  }
  0x4a   : > { %3907 = vmatprep.subr.bf16.mxu1 %v4622_v33  ;;  %v5224_v48 = vpack.c.bf16 %v972_v47, %v970_v22  ;;  %v981_v62 = vrot.slane %v5922_v63, 2  ;;  %v5923_v11 = vunpack.c.l.bf16 %v5136_v27  ;;  %v5894_v14 = vunpack.c.h.bf16 %v5149_v46 }
  0x4b   : > { %v979_v58 = vrot.slane %v5921_v2, 2  ;;  %v975_v31 = vsel %vm952_vm1, %v973_v17, %v974_v10  ;;  %v5924_v17 = vunpack.c.l.bf16 %v4891_v1  ;;  %v5925_v63 = vunpack.c.h.bf16 %v4891_v1 }
  0x4c   : > { %v467_v50 = vrot.slane %v5923_v11, 1  ;;  %v5237_v37 = vpack.c.bf16 %v977_v18, %v975_v31  ;;  %4100 = vmatpush3.bf16.msra.mxu0 %v4621_v53  ;;  %v5926_v2 = vunpack.c.l.bf16 %v4898_v6  ;;  %v5928_v11 = vunpack.c.h.bf16 %v4901_v7 }
  0x4d   : > { %v980_v22 = vsel %vm952_vm1, %v978_v32, %v979_v58  ;;  %v983_v47 = vrot.slane %v5924_v17, 2  ;;  %v982_v55 = vsel %vm952_vm1, %v979_v58, %v981_v62  ;;  %v984_v10 = vrot.slane %v5925_v63, 2  ;;  %3908 = vmatpush3.bf16.msra.mxu1 %v4622_v33  ;;  %4133 = vmatprep.subr.bf16.mxu0 %v5216_v38  ;;  %v5259_v58 = vld [vmem:[%s4785_s17 + $0xc8] sm:$0x1] }
  0x4e   : > { %v986_v34 = vrot.slane %v5926_v2, 2  ;;  %v5249_v31 = vpack.c.bf16 %v982_v55, %v980_v22  ;;  %v5927_v32 = vunpack.c.l.bf16 %v4901_v7  ;;  %v989_v17 = vrot.slane %v5928_v11, 2  ;;  %3878 = vmatmul.mubr.bf16.gmra.mrb[16].mxu1 %v5123_v51  ;;  %3941 = vmatprep.subr.bf16.mxu1 %v5233_v4 }
  0x4f   : > { %v5929_v53 = vunpack.c.l.bf16 %v4913_v25  ;;  %v5930_v6 = vunpack.c.l.bf16 %v5149_v46  ;;  %v985_v22 = vsel %vm952_vm1, %v983_v47, %v984_v10  ;;  %v5931_v63 = vunpack.c.l.bf16 %v4934_v41  ;;  %4070 = vmatmul.mubr.bf16.gmra.mrb[16].mxu0 %v5131_v8  ;;  %3881 = vmatprep.mubr.bf16.mxu1 %v5131_v8 }
  0x50   : > { %v988_v18 = vrot.slane %v5927_v32, 2  ;;  %v987_v55 = vsel %vm952_vm1, %v984_v10, %v986_v34  ;;  %4073 = vmatprep.mubr.bf16.mxu0 %v5141_v56  ;;  %v463_v34 = vsel %vm388_vm0, %v5153_v23, %v5167_v21  ;;  %v5936_v8 = vunpack.c.l.bf16 %v4956_v57 }
  0x51   : > { %v991_v62 = vrot.slane %v5929_v53, 2  ;;  %v5263_v33 = vrot.slane %v5930_v6, 1  ;;  %v993_v2 = vrot.slane %v5931_v63, 2  ;;  %v5272_v25 = vpack.c.bf16 %v987_v55, %v985_v22 }
  0x52   : > { %v990_v32 = vsel %vm952_vm1, %v988_v18, %v989_v17  ;;  %v5932_v53 = vunpack.c.h.bf16 %v4934_v41  ;;  %v5933_v6 = vunpack.c.l.bf16 %v4937_v43  ;;  %v5934_v22 = vunpack.c.l.bf16 %v4965_v3 }
  0x53   : > { %v992_v11 = vsel %vm952_vm1, %v989_v17, %v991_v62  ;;  %v5290_v18 = vrot.slane %v5894_v14, 1  ;;  %v5935_v62 = vunpack.c.h.bf16 %v4965_v3  ;;  %v1001_v23 = vrot.slane %v5936_v8, 2 }
  0x54   : > { %v994_v47 = vrot.slane %v5932_v53, 2  ;;  %v5282_v10 = vpack.c.bf16 %v992_v11, %v990_v32  ;;  %v996_v63 = vrot.slane %v5933_v6, 2  ;;  %v998_v55 = vrot.slane %v5934_v22, 2 }
  0x55   : > { %v999_v53 = vrot.slane %v5935_v62, 2  ;;  %v5937_v43 = vunpack.c.l.bf16 %v4976_v30  ;;  %v5938_v11 = vunpack.c.h.bf16 %v4976_v30  ;;  %v5939_v22 = vunpack.c.l.bf16 %v4984_v16 }
  0x56   : > { %v995_v17 = vsel %vm952_vm1, %v993_v2, %v994_v47  ;;  %v997_v21 = vsel %vm952_vm1, %v994_v47, %v996_v63  ;;  %v304_v51 = vunpack.c.l.bf16 %v5259_v58  ;;  %v466_v16 = vsel %vm388_vm0, %v5183_v44, %v5205_v49  ;;  %3882 = vmatmul.mubr.bf16.gmra.mrb[20].mxu1 %v5141_v56 }
  0x57   : > { %v1003_v32 = vrot.slane %v5937_v43, 2  ;;  %v1004_v6 = vrot.slane %v5938_v11, 2  ;;  %v1006_v14 = vrot.slane %v5939_v22, 2  ;;  %v5305_v2 = vpack.c.bf16 %v997_v21, %v995_v17  ;;  %4074 = vmatmul.mubr.bf16.gmra.mrb[20].mxu0 %v5143_v29  ;;  %3885 = vmatprep.mubr.bf16.mxu1 %v5143_v29 }
  0x58   : > { %v1000_v62 = vsel %vm952_vm1, %v998_v55, %v999_v53  ;;  %v1002_v57 = vsel %vm952_vm1, %v999_v53, %v1001_v23  ;;  %v5940_v43 = vunpack.c.l.bf16 %v5000_v39  ;;  %v5941_v17 = vunpack.c.h.bf16 %v5000_v39  ;;  %4077 = vmatprep.mubr.bf16.mxu0 %v5163_v61 }
  0x59   : > { %v5309_v8 = vpack.c.bf16 %v1002_v57, %v1000_v62  ;;  %v1005_v47 = vsel %vm952_vm1, %v1003_v32, %v1004_v6  ;;  %v1007_v63 = vsel %vm952_vm1, %v1004_v6, %v1006_v14  ;;  %v5942_v53 = vunpack.c.l.bf16 %v5003_v36 }
  0x5a   : > { %v1008_v11 = vrot.slane %v5940_v43, 2  ;;  %v5318_v58 = vpack.c.bf16 %v1007_v63, %v1005_v47  ;;  %v1009_v55 = vrot.slane %v5941_v17, 2  ;;  %v468_v14 = vsel %vm388_vm0, %v5205_v49, %v467_v50 }
  0x5b   : > { %v1011_v23 = vrot.slane %v5942_v53, 2  ;;  %v5943_v21 = vunpack.c.l.bf16 %v5011_v28  ;;  %v5944_v6 = vunpack.c.h.bf16 %v5011_v28  ;;  %v5945_v44 = vunpack.c.l.bf16 %v5014_v5 }
  0x5c   : > { %v1010_v36 = vsel %vm952_vm1, %v1008_v11, %v1009_v55  ;;  %v5946_v47 = vunpack.c.l.bf16 %v5031_v59  ;;  %v5947_v50 = vunpack.c.h.bf16 %v5031_v59  ;;  %v5948_v53 = vunpack.c.l.bf16 %v5034_v54 }
  0x5d   : > { %v1013_v32 = vrot.slane %v5943_v21, 2  ;;  %v1014_v22 = vrot.slane %v5944_v6, 2  ;;  %v1016_v62 = vrot.slane %v5945_v44, 2  ;;  %v1012_v57 = vsel %vm952_vm1, %v1009_v55, %v1011_v23 }
  0x5e   : > { %v1018_v49 = vrot.slane %v5946_v47, 2  ;;  %v1019_v63 = vrot.slane %v5947_v50, 2  ;;  %v5342_v43 = vpack.c.bf16 %v1012_v57, %v1010_v36  ;;  %v1021_v21 = vrot.slane %v5948_v53, 2  ;;  %3886 = vmatmul.mubr.bf16.gmra.mrb[24].mxu1 %v5163_v61 }
  0x5f   : > { %v1015_v5 = vsel %vm952_vm1, %v1013_v32, %v1014_v22  ;;  %v1017_v17 = vsel %vm952_vm1, %v1014_v22, %v1016_v62  ;;  %v1604_v11 = vrot.slane %v304_v51, 1  ;;  %v5949_v23 = vunpack.c.l.bf16 %v5065_v19 }
  0x60   : > { %v5348_v6 = vpack.c.bf16 %v1017_v17, %v1015_v5  ;;  %v1020_v55 = vsel %vm952_vm1, %v1018_v49, %v1019_v63  ;;  %v5354_v47 = vpack.c.bf16 %v463_v34, %v5194_v0  ;;  %v1022_v36 = vsel %vm952_vm1, %v1019_v63, %v1021_v21 }
  0x61   : > { %v1023_v44 = vrot.slane %v5949_v23, 2  ;;  %v5950_v32 = vunpack.c.h.bf16 %v5065_v19  ;;  %v5951_v22 = vunpack.c.l.bf16 %v5083_v24  ;;  %v5361_v62 = vpack.c.bf16 %v1022_v36, %v1020_v55 }
  0x62   : > { %v5952_v50 = vunpack.c.l.bf16 %v5116_v60  ;;  %v5953_v49 = vunpack.c.h.bf16 %v5116_v60  ;;  %v5954_v53 = vunpack.c.l.bf16 %v5136_v27  ;;  %v5369_v34 = vpack.c.bf16 %v468_v14, %v466_v16  ;;  %4078 = vmatmul.mubr.bf16.gmra.mrb[24].mxu0 %v5354_v47  ;;  %3889 = vmatprep.mubr.bf16.mxu1 %v5354_v47 }
  0x63   : > { %v1024_v57 = vrot.slane %v5950_v32, 2  ;;  %v1026_v54 = vrot.slane %v5951_v22, 2  ;;  %v5955_v24 = vunpack.c.l.bf16 %v5149_v46  ;;  %v5956_v22 = vunpack.c.h.bf16 %v5149_v46 }
  0x64   : > { %v1028_v5 = vrot.slane %v5952_v50, 2  ;;  %v1029_v17 = vrot.slane %v5953_v49, 2  ;;  %v1031_v0 = vrot.slane %v5954_v53, 2  ;;  %v1870_v16 = vrot.slane %v304_v51, 2  ;;  %4081 = vmatprep.mubr.bf16.mxu0 %v5369_v34 }
  0x65   : > { %v1025_v63 = vsel %vm952_vm1, %v1023_v44, %v1024_v57  ;;  %v1027_v21 = vsel %vm952_vm1, %v1024_v57, %v1026_v54  ;;  %v1867_v23 = vrot.slane %v5955_v24, 2  ;;  %v1868_v50 = vrot.slane %v5956_v22, 2  ;;  %v4646_v22 = vld [vmem:[%s5846_s1 + $0xa0] sm:$0xff]  }
  0x66   : > { %v5375_v55 = vpack.c.bf16 %v1027_v21, %v1025_v63  ;;  %v1030_v36 = vsel %vm952_vm1, %v1028_v5, %v1029_v17  ;;  %v1032_v32 = vsel %vm952_vm1, %v1029_v17, %v1031_v0  ;;  %v5957_v14 = vunpack.c.l.bf16 %v4794_v12  ;;  %3890 = vmatmul.mubr.bf16.gmra.mrb[28].mxu1 %v5369_v34 }
  0x67   : > { %v5382_v27 = vpack.c.bf16 %v1032_v32, %v1030_v36  ;;  %v5958_v57 = vunpack.c.h.bf16 %v4794_v12  ;;  %v1869_v5 = vsel %vm952_vm1, %v1867_v23, %v1868_v50  ;;  %v5959_v49 = vunpack.c.l.bf16 %v4797_v13  ;;  %3909 = vmatprep.mubr.bf16.mxu1 %v4794_v12  ;;  %v4630_v12 = vld [vmem:[%s5846_s1 + $0x190] sm:$0xff]   ;;  %v4643_v32 = vld [vmem:[%s5846_s1 + $0x98] sm:$0xff]  }
  0x68   : > { %v953_v44 = vrot.slane %v5957_v14, 2  ;;  %v1603_v51 = vsel %vm388_vm0, %v5263_v33, %v5290_v18  ;;  %v1605_v53 = vsel %vm388_vm0, %v5290_v18, %v1604_v11  ;;  %v1871_v0 = vsel %vm952_vm1, %v1868_v50, %v1870_v16  ;;  %v5417_v33 = vld [vmem:[%s4785_s17 + $0xc] sm:$0xff]  }
  0x69   : > { %v954_v54 = vrot.slane %v5958_v57, 2  ;;  %v956_v17 = vrot.slane %v5959_v49, 2  ;;  %v5403_v21 = vpack.c.bf16 %v1871_v0, %v1869_v5  ;;  %v5410_v23 = vpack.c.bf16 %v1605_v53, %v1603_v51  ;;  %v4627_v18 = vld [vmem:[%s5846_s1 + $0x188] sm:$0xff]   ;;  %v4641_v36 = vld [vmem:[%s5846_s1 + $0x90] sm:$0xff]   ;;  %v4652_v57 = vld [vmem:[%s5846_s1 + $0x1b8] sm:$0xff]  }
  0x6a   : > { %v4638_v11 = vld [vmem:[%s5846_s1 + $0x88] sm:$0xff]   ;;  %v4647_v14 = vld [vmem:[%s5846_s1 + $0x1b0] sm:$0xff]   ;;  %v4654_v5 = vld [vmem:[%s5846_s1 + $0x1c0] sm:$0xff]  }
  0x6b   : > { %v5401_v63 = vsel %vm952_vm1, %v953_v44, %v954_v54  ;;  %v5406_v24 = vsel %vm952_vm1, %v954_v54, %v956_v17  ;;  %4082 = vmatmul.mubr.bf16.gmra.mrb[28].mxu0 %v5410_v23  ;;  %v4642_v50 = vld [vmem:[%s5846_s1 + $0x1a8] sm:$0xff]   ;;  %v4651_v44 = vld [vmem:[%s5846_s1 + $0xb0] sm:$0xff]   ;;  %v4653_v54 = vld [vmem:[%s5846_s1 + $0xb8] sm:$0xff]  }
  0x6c   : > { %v1065_v13 = vpack.c.bf16 %v5406_v24, %v5401_v63  ;;  %4101 = vmatprep.mubr.bf16.mxu0 %v5196_v15  ;;  %v4648_v16 = vld [vmem:[%s5846_s1 + $0xa8] sm:$0xff]   ;;  %v4658_v49 = vld [vmem:[%s5846_s1 + $0xc0] sm:$0xff]   ;;  %v4656_v53 = vld [vmem:[%s5846_s1 + $0x1d0] sm:$0xff]  }
  0x6d   : > { %v4655_v17 = vld [vmem:[%s5846_s1 + $0x1c8] sm:$0xff]   ;;  %v4657_v0 = vld [vmem:[%s5846_s1 + $0x1d8] sm:$0xff]   ;;  %v4659_v24 = vld [vmem:[%s5846_s1 + $0x1e0] sm:$0xff]  }
  0x6e   : > { %3910 = vmatmul.mubr.bf16.vlgmr.msra.gmra.mrb[0].mxu1 %v5417_v33  ;;  %v4660_v51 = vld [vmem:[%s5846_s1 + $0xc8] sm:$0xff]   ;;  %v4663_v63 = vld [vmem:[%s5846_s1 + $0xd8] sm:$0xff]  }
  0x6f   : > { %3913 = vmatprep.mubr.bf16.mxu1 %v4810_v20  ;;  %3942 = vmatpush3.bf16.msra.mxu1 %v5233_v4  ;;  %v4637_v4 = vld [vmem:[%s5846_s1 + $0x1a0] sm:$0xff]  }
  0x70   : > { %3943 = vmatprep.subr.bf16.mxu1 %v4638_v11 }
  0x73   : > { %4102 = vmatmul.mubr.bf16.vlgmr.msra.gmra.mrb[0].mxu0 %v5186_v45  ;;  %3944 = vmatpush3.bf16.msra.mxu1 %v4638_v11  ;;  %v4666_v11 = vld [vmem:[%s5846_s1 + $0xe8] sm:$0xff]  }
  0x74   : > { %4134 = vmatpush3.bf16.msra.mxu0 %v5216_v38  ;;  %4105 = vmatprep.mubr.bf16.mxu0 %v5224_v48  ;;  %v4633_v38 = vld [vmem:[%s5846_s1 + $0x198] sm:$0xff]  }
  0x75   : > { %4135 = vmatprep.subr.bf16.mxu0 %v4627_v18  ;;  %3945 = vmatprep.subr.bf16.mxu1 %v4641_v36 }
  0x76   : > { %3914 = vmatmul.mubr.bf16.gmra.mrb[4].mxu1 %v4839_v35 }
  0x77   : > { %3917 = vmatprep.mubr.bf16.mxu1 %v4849_v42  ;;  %3946 = vmatpush3.bf16.msra.mxu1 %v4641_v36  ;;  %v4668_v36 = vld [vmem:[%s5846_s1 + $0xf0] sm:$0xff]  }
  0x78   : > { %4136 = vmatpush3.bf16.msra.mxu0 %v4627_v18  ;;  %3947 = vmatprep.subr.bf16.mxu1 %v4643_v32  ;;  %v4662_v18 = vld [vmem:[%s5846_s1 + $0x1e8] sm:$0xff]  }
  0x79   : > { %4137 = vmatprep.subr.bf16.mxu0 %v4630_v12 }
  0x7b   : > { %4106 = vmatmul.mubr.bf16.gmra.mrb[4].mxu0 %v5237_v37  ;;  %3948 = vmatpush3.bf16.msra.mxu1 %v4643_v32  ;;  %v4671_v32 = vld [vmem:[%s5846_s1 + $0xf8] sm:$0xff]  }
  0x7c   : > { %4109 = vmatprep.mubr.bf16.mxu0 %v5249_v31  ;;  %4138 = vmatpush3.bf16.msra.mxu0 %v4630_v12  ;;  %v4665_v12 = vld [vmem:[%s5846_s1 + $0x1f0] sm:$0xff]  }
  0x7d   : > { %4139 = vmatprep.subr.bf16.mxu0 %v4633_v38  ;;  %3949 = vmatprep.subr.bf16.mxu1 %v4646_v22 }
  0x7e   : > { %3918 = vmatmul.mubr.bf16.gmra.mrb[8].mxu1 %v4867_v52 }
  0x7f   : > { %3921 = vmatprep.mubr.bf16.mxu1 %v4891_v1  ;;  %3950 = vmatpush3.bf16.msra.mxu1 %v4646_v22  ;;  %v5573_v22 = vld [vmem:[%s4785_s17 + $0xcc] sm:$0xff]  }
  0x80   : > { %4140 = vmatpush3.bf16.msra.mxu0 %v4633_v38  ;;  %3951 = vmatprep.subr.bf16.mxu1 %v4648_v16  ;;  %v4670_v38 = vld [vmem:[%s5846_s1 + $0x1f8] sm:$0xff]  }
  0x81   : > { %4141 = vmatprep.subr.bf16.mxu0 %v4637_v4 }
  0x83   : > { %4110 = vmatmul.mubr.bf16.gmra.mrb[8].mxu0 %v5272_v25  ;;  %3952 = vmatpush3.bf16.msra.mxu1 %v4648_v16  ;;  %v306_v16 = vunpack.c.h.bf16 %v5573_v22 }
  0x84   : > { %4113 = vmatprep.mubr.bf16.mxu0 %v5282_v10  ;;  %4142 = vmatpush3.bf16.msra.mxu0 %v4637_v4  ;;  %v4672_v4 = vld [vmem:[%s5846_s1 + $0x200] sm:$0xff]  }
  0x85   : > { %4143 = vmatprep.subr.bf16.mxu0 %v4642_v50  ;;  %3953 = vmatprep.subr.bf16.mxu1 %v4651_v44 }
  0x86   : > { %3922 = vmatmul.mubr.bf16.gmra.mrb[12].mxu1 %v4901_v7 }
  0x87   : > { %3925 = vmatprep.mubr.bf16.mxu1 %v4934_v41  ;;  %3954 = vmatpush3.bf16.msra.mxu1 %v4651_v44 }
  0x88   : > { %4144 = vmatpush3.bf16.msra.mxu0 %v4642_v50  ;;  %3955 = vmatprep.subr.bf16.mxu1 %v4653_v54  ;;  %v305_v50 = vunpack.c.l.bf16 %v5573_v22 }
  0x89   : > { %4145 = vmatprep.subr.bf16.mxu0 %v4647_v14 }
  0x8a   : > { %v2661_v44 = vrot.slane %v305_v50, 2 }
  0x8b   : > { %4114 = vmatmul.mubr.bf16.gmra.mrb[12].mxu0 %v5305_v2  ;;  %3956 = vmatpush3.bf16.msra.mxu1 %v4653_v54 }
  0x8c   : > { %4117 = vmatprep.mubr.bf16.mxu0 %v5309_v8  ;;  %4146 = vmatpush3.bf16.msra.mxu0 %v4647_v14  ;;  %v5578_v14 = vld [vmem:[%s4785_s17 + $0xd4] sm:$0x1] }
  0x8d   : > { %4147 = vmatprep.subr.bf16.mxu0 %v4652_v57  ;;  %3989 = vmatprep.subr.bf16.mxu1 %v4658_v49  ;;  %v307_v54 = vunpack.c.l.bf16 %v5578_v14 }
  0x8e   : > { %3926 = vmatmul.mubr.bf16.gmra.mrb[16].mxu1 %v4965_v3 }
  0x8f   : > { %3929 = vmatprep.mubr.bf16.mxu1 %v4976_v30 }
  0x90   : > { %4148 = vmatpush3.bf16.msra.mxu0 %v4652_v57  ;;  %v2662_v57 = vrot.slane %v306_v16, 2 }
  0x91   : > { %4181 = vmatprep.subr.bf16.mxu0 %v4654_v5 }
  0x93   : > { %4118 = vmatmul.mubr.bf16.gmra.mrb[16].mxu0 %v5318_v58 }
  0x94   : > { %4121 = vmatprep.mubr.bf16.mxu0 %v5342_v43 }
  0x96   : > { %3930 = vmatmul.mubr.bf16.gmra.mrb[20].mxu1 %v5000_v39 }
  0x97   : > { %3933 = vmatprep.mubr.bf16.mxu1 %v5011_v28 }
  0x9b   : > { %4122 = vmatmul.mubr.bf16.gmra.mrb[20].mxu0 %v5348_v6 }
  0x9c   : > { %4125 = vmatprep.mubr.bf16.mxu0 %v5361_v62 }
  0x9e   : > { %3934 = vmatmul.mubr.bf16.gmra.mrb[24].mxu1 %v5031_v59 }
  0x9f   : > { %3937 = vmatprep.mubr.bf16.mxu1 %v5065_v19 }
  0xa3   : > { %4126 = vmatmul.mubr.bf16.gmra.mrb[24].mxu0 %v5375_v55 }
  0xa4   : > { %4129 = vmatprep.mubr.bf16.mxu0 %v5382_v27 }
  0xa6   : > { %3938 = vmatmul.mubr.bf16.gmra.mrb[28].mxu1 %v5116_v60 }
  0xa7   : > { %3957 = vmatprep.mubr.bf16.mxu1 %v1065_v13  ;;  %v4664_v13 = vld [vmem:[%s5846_s1 + $0xe0] sm:$0xff]  }
  0xab   : > { %4130 = vmatmul.mubr.bf16.gmra.mrb[28].mxu0 %v5403_v21 }
  0xac   : > { %4149 = vmatprep.mubr.bf16.mxu0 %v4810_v20 }
  0xae   : > { %3958 = vmatmul.mubr.bf16.vlgmr.msra.gmra.mrb[0].mxu1 %v5196_v15  ;;  %v4661_v15 = vld [vmem:[%s5846_s1 + $0xd0] sm:$0xff]  }
  0xaf   : > { %3961 = vmatprep.mubr.bf16.mxu1 %v5186_v45  ;;  %3990 = vmatpush3.bf16.msra.mxu1 %v4658_v49  ;;  %v2664_v49 = vrot.slane %v307_v54, 2 }
  0xb0   : > { %3991 = vmatprep.subr.bf16.mxu1 %v4660_v51 }
  0xb3   : > { %4150 = vmatmul.mubr.bf16.vlgmr.msra.gmra.mrb[0].mxu0 %v4839_v35  ;;  %3992 = vmatpush3.bf16.msra.mxu1 %v4660_v51 }
  0xb4   : > { %4182 = vmatpush3.bf16.msra.mxu0 %v4654_v5  ;;  %4153 = vmatprep.mubr.bf16.mxu0 %v4849_v42  ;;  %v5590_v5 = vsel %vm952_vm1, %v2661_v44, %v2662_v57 }
  0xb5   : > { %4183 = vmatprep.subr.bf16.mxu0 %v4655_v17  ;;  %3993 = vmatprep.subr.bf16.mxu1 %v4661_v15 }
  0xb6   : > { %3962 = vmatmul.mubr.bf16.gmra.mrb[4].mxu1 %v5224_v48 }
  0xb7   : > { %3965 = vmatprep.mubr.bf16.mxu1 %v5237_v37  ;;  %3994 = vmatpush3.bf16.msra.mxu1 %v4661_v15  ;;  %v5960_v15 = vld [vmem:[#allocation2_spill] sm:$0xff] }
  0xb8   : > { %4184 = vmatpush3.bf16.msra.mxu0 %v4655_v17  ;;  %3995 = vmatprep.subr.bf16.mxu1 %v4663_v63  ;;  %v5593_v17 = vsel %vm952_vm1, %v2662_v57, %v2664_v49 }
  0xb9   : > { %4185 = vmatprep.subr.bf16.mxu0 %v4656_v53  ;;  %v2668_v51 = vpack.c.bf16 %v5593_v17, %v5590_v5 }
  0xbb   : > { %4154 = vmatmul.mubr.bf16.gmra.mrb[4].mxu0 %v4867_v52  ;;  %3996 = vmatpush3.bf16.msra.mxu1 %v4663_v63 }
  0xbc   : > { %4157 = vmatprep.mubr.bf16.mxu0 %v4891_v1  ;;  %4186 = vmatpush3.bf16.msra.mxu0 %v4656_v53  ;;  %v4673_v53 = vld [vmem:[%s5846_s1 + $0x208] sm:$0xff]  }
  0xbd   : > { %4187 = vmatprep.subr.bf16.mxu0 %v4657_v0  ;;  %3997 = vmatprep.subr.bf16.mxu1 %v4664_v13 }
  0xbe   : > { %3966 = vmatmul.mubr.bf16.gmra.mrb[8].mxu1 %v5249_v31 }
  0xbf   : > { %3969 = vmatprep.mubr.bf16.mxu1 %v5272_v25  ;;  %3998 = vmatpush3.bf16.msra.mxu1 %v4664_v13 }
  0xc0   : > { %4188 = vmatpush3.bf16.msra.mxu0 %v4657_v0  ;;  %3999 = vmatprep.subr.bf16.mxu1 %v4666_v11  ;;  %v4679_v0 = vld [vmem:[%s5846_s1 + $0x238] sm:$0xff]  }
  0xc1   : > { %4189 = vmatprep.subr.bf16.mxu0 %v4659_v24 }
  0xc3   : > { %4158 = vmatmul.mubr.bf16.gmra.mrb[8].mxu0 %v4901_v7  ;;  %4000 = vmatpush3.bf16.msra.mxu1 %v4666_v11 }
  0xc4   : > { %4161 = vmatprep.mubr.bf16.mxu0 %v4934_v41  ;;  %4190 = vmatpush3.bf16.msra.mxu0 %v4659_v24 }
  0xc5   : > { %4191 = vmatprep.subr.bf16.mxu0 %v4662_v18  ;;  %4001 = vmatprep.subr.bf16.mxu1 %v4668_v36 }
  0xc6   : > { %3970 = vmatmul.mubr.bf16.gmra.mrb[12].mxu1 %v5282_v10 }
  0xc7   : > { %3973 = vmatprep.mubr.bf16.mxu1 %v5305_v2  ;;  %4002 = vmatpush3.bf16.msra.mxu1 %v4668_v36 }
  0xc8   : > { %4192 = vmatpush3.bf16.msra.mxu0 %v4662_v18  ;;  %4003 = vmatprep.subr.bf16.mxu1 %v4671_v32 }
  0xc9   : > { %4193 = vmatprep.subr.bf16.mxu0 %v4665_v12 }
  0xcb   : > { %4162 = vmatmul.mubr.bf16.gmra.mrb[12].mxu0 %v4965_v3  ;;  %4004 = vmatpush3.bf16.msra.mxu1 %v4671_v32 }
  0xcc   : > { %4165 = vmatprep.mubr.bf16.mxu0 %v4976_v30  ;;  %4194 = vmatpush3.bf16.msra.mxu0 %v4665_v12 }
  0xcd   : > { %4195 = vmatprep.subr.bf16.mxu0 %v4670_v38 }
  0xce   : > { %3974 = vmatmul.mubr.bf16.gmra.mrb[16].mxu1 %v5309_v8 }
  0xcf   : > { %3977 = vmatprep.mubr.bf16.mxu1 %v5318_v58 }
  0xd0   : > { %4196 = vmatpush3.bf16.msra.mxu0 %v4670_v38 }
  0xd1   : > { %4229 = vmatprep.subr.bf16.mxu0 %v4672_v4 }
  0xd3   : > { %4166 = vmatmul.mubr.bf16.gmra.mrb[16].mxu0 %v5000_v39 }
  0xd4   : > { %4169 = vmatprep.mubr.bf16.mxu0 %v5011_v28 }
  0xd6   : > { %3978 = vmatmul.mubr.bf16.gmra.mrb[20].mxu1 %v5342_v43 }
  0xd7   : > { %3981 = vmatprep.mubr.bf16.mxu1 %v5348_v6 }
  0xdb   : > { %4170 = vmatmul.mubr.bf16.gmra.mrb[20].mxu0 %v5031_v59 }
  0xdc   : > { %4173 = vmatprep.mubr.bf16.mxu0 %v5065_v19 }
  0xde   : > { %3982 = vmatmul.mubr.bf16.gmra.mrb[24].mxu1 %v5361_v62 }
  0xdf   : > { %3985 = vmatprep.mubr.bf16.mxu1 %v5375_v55 }
  0xe3   : > { %4174 = vmatmul.mubr.bf16.gmra.mrb[24].mxu0 %v5116_v60 }
  0xe4   : > { %4177 = vmatprep.mubr.bf16.mxu0 %v5149_v46 }
  0xe6   : > { %3986 = vmatmul.mubr.bf16.gmra.mrb[28].mxu1 %v5382_v27 }
  0xe7   : > { %4005 = vmatprep.mubr.bf16.mxu1 %v5417_v33  ;;  %v4674_v33 = vld [vmem:[%s5846_s1 + $0x210] sm:$0xff]  }
  0xeb   : > { %4178 = vmatmul.mubr.bf16.gmra.mrb[28].mxu0 %v5573_v22  ;;  %v5729_v22 = vld [vmem:[%s5847_s2] ss:$0 sm:$0xff] }
  0xec   : > { %4197 = vmatprep.mubr.bf16.mxu0 %v4906_v9  ;;  %v4675_v9 = vld [vmem:[%s5846_s1 + $0x218] sm:$0xff]  }
  0xee   : > { %4006 = vmatmul.mubr.bf16.vlgmr.msra.gmra.mrb[0].mxu1 %v4810_v20  ;;  %v5961_v20 = vld [vmem:[#allocation3_spill] sm:$0xff] }
  0xef   : > { %4009 = vmatprep.mubr.bf16.mxu1 %v4839_v35  ;;  %v4676_v35 = vld [vmem:[%s5846_s1 + $0x220] sm:$0xff]  }
  0xf3   : > { %4198 = vmatmul.mubr.bf16.vlgmr.msra.gmra.mrb[0].mxu0 %v4915_v26  ;;  %v4677_v26 = vld [vmem:[%s5846_s1 + $0x228] sm:$0xff]  }
  0xf4   : > { %4230 = vmatpush3.bf16.msra.mxu0 %v4672_v4  ;;  %4201 = vmatprep.mubr.bf16.mxu0 %v5960_v15 }
  0xf5   : > { %4231 = vmatprep.subr.bf16.mxu0 %v4673_v53 }
  0xf6   : > { %4010 = vmatmul.mubr.bf16.gmra.mrb[4].mxu1 %v4849_v42  ;;  %v5962_v42 = vld [vmem:[#allocation4_spill] sm:$0xff] }
  0xf7   : > { %4013 = vmatprep.mubr.bf16.mxu1 %v4867_v52  ;;  %v5963_v52 = vld [vmem:[#allocation5_spill] sm:$0xff] }
  0xf8   : > { %4232 = vmatpush3.bf16.msra.mxu0 %v4673_v53 }
  0xf9   : > { %4233 = vmatprep.subr.bf16.mxu0 %v4674_v33 }
  0xfb   : > { %4202 = vmatmul.mubr.bf16.gmra.mrb[4].mxu0 %v4989_v40  ;;  %v4678_v40 = vld [vmem:[%s5846_s1 + $0x230] sm:$0xff]  }
  0xfc   : > { %4205 = vmatprep.mubr.bf16.mxu0 %v5961_v20  ;;  %4234 = vmatpush3.bf16.msra.mxu0 %v4674_v33 }
  0xfd   : > { %4235 = vmatprep.subr.bf16.mxu0 %v4675_v9 }
  0xfe   : > { %4014 = vmatmul.mubr.bf16.gmra.mrb[8].mxu1 %v4891_v1  ;;  %v5964_v1 = vld [vmem:[#allocation6_spill] sm:$0xff] }
  0xff   : > { %4017 = vmatprep.mubr.bf16.mxu1 %v4901_v7  ;;  %v5965_v7 = vld [vmem:[#allocation7_spill] sm:$0xff] }
 0x100   : > { %4236 = vmatpush3.bf16.msra.mxu0 %v4675_v9 }
 0x101   : > { %4237 = vmatprep.subr.bf16.mxu0 %v4676_v35 }
 0x103   : > { %4206 = vmatmul.mubr.bf16.gmra.mrb[8].mxu0 %v5962_v42 }
 0x104   : > { %4209 = vmatprep.mubr.bf16.mxu0 %v5963_v52  ;;  %4238 = vmatpush3.bf16.msra.mxu0 %v4676_v35 }
 0x105   : > { %4239 = vmatprep.subr.bf16.mxu0 %v4677_v26 }
 0x106   : > { %4018 = vmatmul.mubr.bf16.gmra.mrb[12].mxu1 %v4934_v41  ;;  %v2395_v41 = vrot.slane %v305_v50, 1 }
 0x107   : > { %4021 = vmatprep.mubr.bf16.mxu1 %v4965_v3  ;;  %v2396_v3 = vrot.slane %v306_v16, 1 }
 0x108   : > { %4240 = vmatpush3.bf16.msra.mxu0 %v4677_v26 }
 0x109   : > { %4241 = vmatprep.subr.bf16.mxu0 %v4678_v40 }
 0x10b   : > { %4210 = vmatmul.mubr.bf16.gmra.mrb[12].mxu0 %v5964_v1 }
 0x10c   : > { %4213 = vmatprep.mubr.bf16.mxu0 %v5965_v7  ;;  %4242 = vmatpush3.bf16.msra.mxu0 %v4678_v40 }
 0x10d   : > { %4243 = vmatprep.subr.bf16.mxu0 %v4679_v0 }
 0x10e   : > { %4022 = vmatmul.mubr.bf16.gmra.mrb[16].mxu1 %v4976_v30  ;;  %v2398_v30 = vrot.slane %v307_v54, 1 }
 0x10f   : > { %4025 = vmatprep.mubr.bf16.mxu1 %v5000_v39 }
 0x110   : > { %4244 = vmatpush3.bf16.msra.mxu0 %v4679_v0 }
 0x113   : > { %4214 = vmatmul.mubr.bf16.gmra.mrb[16].mxu0 %v5141_v56 }
 0x114   : > { %4217 = vmatprep.mubr.bf16.mxu0 %v5143_v29 }
 0x116   : > { %4026 = vmatmul.mubr.bf16.gmra.mrb[20].mxu1 %v5011_v28  ;;  %v2397_v28 = vsel %vm388_vm0, %v2395_v41, %v2396_v3 }
 0x117   : > { %4029 = vmatprep.mubr.bf16.mxu1 %v5031_v59  ;;  %v2399_v59 = vsel %vm388_vm0, %v2396_v3, %v2398_v30 }
 0x118   : > { %v2402_v39 = vpack.c.bf16 %v2399_v59, %v2397_v28 }
 0x11b   : > { %4218 = vmatmul.mubr.bf16.gmra.mrb[20].mxu0 %v5163_v61  ;;  %v4680_v61 = vld [vmem:[%s5848_s3] sm:$0xff]  }
 0x11c   : > { %4221 = vmatprep.mubr.bf16.mxu0 %v5354_v47 }
 0x11e   : > { %4030 = vmatmul.mubr.bf16.gmra.mrb[24].mxu1 %v5065_v19 }
 0x11f   : > { %4033 = vmatprep.mubr.bf16.mxu1 %v5116_v60 }
 0x123   : > { %4222 = vmatmul.mubr.bf16.gmra.mrb[24].mxu0 %v5369_v34 }
 0x124   : > { %4225 = vmatprep.mubr.bf16.mxu0 %v5410_v23 }
 0x126   : > { %4034 = vmatmul.mubr.bf16.gmra.mrb[28].mxu1 %v5149_v46 }
 0x127   : > { %4293 = vmatprep.mubr.bf16.mxu1 %v4680_v61 }
 0x12b   : > { %4226 = vmatmul.mubr.bf16.gmra.mrb[28].mxu0 %v2402_v39 }
 0x12c   : > { %4245 = vmatprep.mubr.bf16.mxu0 %v5186_v45 }
 0x133   : > { %4246 = vmatmul.mubr.bf16.vlgmr.msra.gmra.mrb[0].mxu0 %v5224_v48 }
 0x134   : > { %4249 = vmatprep.mubr.bf16.mxu0 %v5237_v37 }
 0x13b   : > { %4250 = vmatmul.mubr.bf16.gmra.mrb[4].mxu0 %v5249_v31 }
 0x13c   : > { %4253 = vmatprep.mubr.bf16.mxu0 %v5272_v25 }
 0x143   : > { %4254 = vmatmul.mubr.bf16.gmra.mrb[8].mxu0 %v5282_v10 }
 0x144   : > { %4257 = vmatprep.mubr.bf16.mxu0 %v5305_v2 }
 0x14b   : > { %4258 = vmatmul.mubr.bf16.gmra.mrb[12].mxu0 %v5309_v8 }
 0x14c   : > { %4261 = vmatprep.mubr.bf16.mxu0 %v5318_v58 }
 0x153   : > { %4262 = vmatmul.mubr.bf16.gmra.mrb[16].mxu0 %v5342_v43 }
 0x154   : > { %4265 = vmatprep.mubr.bf16.mxu0 %v5348_v6 }
 0x15b   : > { %4266 = vmatmul.mubr.bf16.gmra.mrb[20].mxu0 %v5361_v62 }
 0x15c   : > { %4269 = vmatprep.mubr.bf16.mxu0 %v5375_v55 }
 0x163   : > { %4270 = vmatmul.mubr.bf16.gmra.mrb[24].mxu0 %v5382_v27 }
 0x164   : > { %4273 = vmatprep.mubr.bf16.mxu0 %v5403_v21 }
 0x16b   : > { %4274 = vmatmul.mubr.bf16.gmra.mrb[28].mxu0 %v2668_v51 }
 0x1c1   : > { %v4007_v19 = vpop.f32.mrb[0].mxu1 }
 0x1c2   : > { %v1439_v60 = vpop.f32.mrb[1].mxu1 }
 0x1c3   : > { %v4008_v56 = vpop.f32.mrb[2].mxu1 }
 0x1c4   : > { %v1442_v29 = vpop.f32.mrb[3].mxu1 }
 0x1c9   : > { %v4011_v46 = vpop.f32.mrb[4].mxu1 }
 0x1ca   : > { %v1455_v45 = vpop.f32.mrb[5].mxu1 }
 0x1cb   : > { %v4012_v48 = vpop.f32.mrb[6].mxu1 }
 0x1cc   : > { %v1458_v37 = vpop.f32.mrb[7].mxu1 }
 0x1d1   : > { %v5678_v31 = vpop.f32.mrb[8].mxu1 }
 0x1d2   : > { %v5680_v25 = vpop.f32.mrb[9].mxu1 }
 0x1d3   : > { %v5682_v10 = vpop.f32.mrb[10].mxu1 }
 0x1d4   : > { %v5684_v2 = vpop.f32.mrb[11].mxu1 }
 0x1d9   : > { %v5686_v8 = vpop.f32.mrb[12].mxu1 }
 0x1da   : > { %v5688_v58 = vpop.f32.mrb[13].mxu1 }
 0x1db   : > { %v5690_v43 = vpop.f32.mrb[14].mxu1 }
 0x1dc   : > { %v5692_v6 = vpop.f32.mrb[15].mxu1 }
 0x1e1   : > { %v5694_v47 = vpop.f32.mrb[16].mxu1 }
 0x1e2   : > { %v5696_v62 = vpop.f32.mrb[17].mxu1 }
 0x1e3   : > { %v5698_v34 = vpop.f32.mrb[18].mxu1 }
 0x1e4   : > { %v5700_v55 = vpop.f32.mrb[19].mxu1 }
 0x1e9   : > { %v5702_v27 = vpop.f32.mrb[20].mxu1 }
 0x1ea   : > { %v5704_v21 = vpop.f32.mrb[21].mxu1 }
 0x1eb   : > { %v5706_v23 = vpop.f32.mrb[22].mxu1 }
 0x1ec   : > { %v5708_v63 = vpop.f32.mrb[23].mxu1 }
 0x1f1   : > { %v5710_v24 = vpop.f32.mrb[24].mxu1 }
 0x1f2   : > { %v5712_v13 = vpop.f32.mrb[25].mxu1 }
 0x1f3   : > { %v5714_v18 = vpop.f32.mrb[26].mxu1 }
 0x1f4   : > { %v5716_v11 = vpop.f32.mrb[27].mxu1 }
 0x1f9   : > { %v5718_v12 = vpop.f32.mrb[28].mxu1 }
 0x1fa   : > { %v5720_v36 = vpop.f32.mrb[29].mxu1 }
 0x1fb   : > { %v5722_v38 = vpop.f32.mrb[30].mxu1 }
 0x1fc   : > { %v5724_v32 = vpop.f32.mrb[31].mxu1 }
 0x206   : > { %v4247_v4 = vpop.f32.mrb[0].mxu0 }
 0x207   : > { %v4325_v50 = vadd.f32 %v4247_v4, %v4007_v19  ;;  %v2768_v16 = vpop.f32.mrb[1].mxu0 }
 0x208   : > { %v4326_v14 = vadd.f32 %v2768_v16, %v1439_v60  ;;  %v4248_v44 = vpop.f32.mrb[2].mxu0 }
 0x209   : > { %v2936_v57 = vadd.f32 %v4325_v50, %v5729_v22  ;;  %v4327_v54 = vadd.f32 %v4248_v44, %v4008_v56  ;;  %v2771_v5 = vpop.f32.mrb[3].mxu0 }
 0x20a   : > { %v2934_v49 = vadd.f32 %v4326_v14, %v5729_v22  ;;  %v4328_v17 = vadd.f32 %v2771_v5, %v1442_v29 }
 0x20b   : > { %v2968_v51 = vmax.f32 %v2936_v57, 0.0  ;;  %v2937_v53 = vadd.f32 %v4327_v54, %v5729_v22 }
 0x20c   : > { %v2966_v15 = vmax.f32 %v2934_v49, 0.0  ;;  %v2935_v33 = vadd.f32 %v4328_v17, %v5729_v22 }
 0x20d   : > { %v2969_v9 = vmax.f32 %v2937_v53, 0.0 }
 0x20e   : > { %v2998_v20 = vmax.f32 %v2966_v15, %v2968_v51  ;;  %v2967_v35 = vmax.f32 %v2935_v33, 0.0  ;;  %v4251_v26 = vpop.f32.mrb[4].mxu0 }
 0x20f   : > { %v4329_v42 = vadd.f32 %v4251_v26, %v4011_v46  ;;  %v2784_v52 = vpop.f32.mrb[5].mxu0 }
 0x210   : > { %v2999_v40 = vmax.f32 %v2967_v35, %v2969_v9  ;;  %v4330_v0 = vadd.f32 %v2784_v52, %v1455_v45  ;;  %v4252_v1 = vpop.f32.mrb[6].mxu0 }
 0x211   : > { %v2940_v7 = vadd.f32 %v4329_v42, %v5729_v22  ;;  %v4331_v41 = vadd.f32 %v4252_v1, %v4012_v48  ;;  %v2787_v3 = vpop.f32.mrb[7].mxu0 }
 0x212   : > { %v5736_v30 = vpack.c.bf16 %v2999_v40, %v2998_v20  ;;  %v2938_v28 = vadd.f32 %v4330_v0, %v5729_v22  ;;  %v4332_v59 = vadd.f32 %v2787_v3, %v1458_v37 }
 0x213   : > { %v2972_v39 = vmax.f32 %v2940_v7, 0.0  ;;  %v2941_v19 = vadd.f32 %v4331_v41, %v5729_v22 }
 0x214   : > { %v2970_v60 = vmax.f32 %v2938_v28, 0.0  ;;  %v2939_v56 = vadd.f32 %v4332_v59, %v5729_v22  ;;  %4277 = vmatprep.subr.bf16.mxu1 %v5736_v30 }
 0x215   : > { %v2973_v29 = vmax.f32 %v2941_v19, 0.0  ;;  %4278 = vmatpush3.bf16.msra.mxu1 %v5736_v30 }
 0x216   : > { %v3000_v46 = vmax.f32 %v2970_v60, %v2972_v39  ;;  %v2971_v61 = vmax.f32 %v2939_v56, 0.0  ;;  %v4255_v45 = vpop.f32.mrb[8].mxu0 }
 0x217   : > { %v4333_v48 = vadd.f32 %v4255_v45, %v5678_v31  ;;  %v2800_v4 = vpop.f32.mrb[9].mxu0 }
 0x218   : > { %v3001_v50 = vmax.f32 %v2971_v61, %v2973_v29  ;;  %v4334_v37 = vadd.f32 %v2800_v4, %v5680_v25  ;;  %v4256_v16 = vpop.f32.mrb[10].mxu0 }
 0x219   : > { %v2944_v14 = vadd.f32 %v4333_v48, %v5729_v22  ;;  %v4335_v44 = vadd.f32 %v4256_v16, %v5682_v10  ;;  %v2803_v57 = vpop.f32.mrb[11].mxu0 }
 0x21a   : > { %v5747_v54 = vpack.c.bf16 %v3001_v50, %v3000_v46  ;;  %v2942_v5 = vadd.f32 %v4334_v37, %v5729_v22  ;;  %v4336_v49 = vadd.f32 %v2803_v57, %v5684_v2 }
 0x21b   : > { %v2976_v17 = vmax.f32 %v2944_v14, 0.0  ;;  %v2945_v51 = vadd.f32 %v4335_v44, %v5729_v22 }
 0x21c   : > { %v2974_v31 = vmax.f32 %v2942_v5, 0.0  ;;  %v2943_v53 = vadd.f32 %v4336_v49, %v5729_v22  ;;  %4279 = vmatprep.subr.bf16.mxu1 %v5747_v54 }
 0x21d   : > { %v2977_v25 = vmax.f32 %v2945_v51, 0.0  ;;  %4280 = vmatpush3.bf16.msra.mxu1 %v5747_v54 }
 0x21e   : > { %v3002_v15 = vmax.f32 %v2974_v31, %v2976_v17  ;;  %v2975_v10 = vmax.f32 %v2943_v53, 0.0  ;;  %v4259_v33 = vpop.f32.mrb[12].mxu0 }
 0x21f   : > { %v4337_v9 = vadd.f32 %v4259_v33, %v5686_v8  ;;  %v2816_v20 = vpop.f32.mrb[13].mxu0 }
 0x220   : > { %v3003_v35 = vmax.f32 %v2975_v10, %v2977_v25  ;;  %v4338_v2 = vadd.f32 %v2816_v20, %v5688_v58  ;;  %v4260_v26 = vpop.f32.mrb[14].mxu0 }
 0x221   : > { %v2948_v42 = vadd.f32 %v4337_v9, %v5729_v22  ;;  %v4339_v52 = vadd.f32 %v4260_v26, %v5690_v43  ;;  %v2819_v40 = vpop.f32.mrb[15].mxu0 }
 0x222   : > { %v5759_v0 = vpack.c.bf16 %v3003_v35, %v3002_v15  ;;  %v2946_v1 = vadd.f32 %v4338_v2, %v5729_v22  ;;  %v4340_v7 = vadd.f32 %v2819_v40, %v5692_v6 }
 0x223   : > { %v2980_v41 = vmax.f32 %v2948_v42, 0.0  ;;  %v2949_v3 = vadd.f32 %v4339_v52, %v5729_v22 }
 0x224   : > { %v2978_v8 = vmax.f32 %v2946_v1, 0.0  ;;  %v2947_v28 = vadd.f32 %v4340_v7, %v5729_v22  ;;  %4281 = vmatprep.subr.bf16.mxu1 %v5759_v0 }
 0x225   : > { %v2981_v58 = vmax.f32 %v2949_v3, 0.0  ;;  %4282 = vmatpush3.bf16.msra.mxu1 %v5759_v0 }
 0x226   : > { %v3004_v59 = vmax.f32 %v2978_v8, %v2980_v41  ;;  %v2979_v43 = vmax.f32 %v2947_v28, 0.0  ;;  %v4263_v39 = vpop.f32.mrb[16].mxu0 }
 0x227   : > { %v4341_v19 = vadd.f32 %v4263_v39, %v5694_v47  ;;  %v2832_v60 = vpop.f32.mrb[17].mxu0 }
 0x228   : > { %v3005_v56 = vmax.f32 %v2979_v43, %v2981_v58  ;;  %v4342_v6 = vadd.f32 %v2832_v60, %v5696_v62  ;;  %v4264_v29 = vpop.f32.mrb[18].mxu0 }
 0x229   : > { %v2952_v46 = vadd.f32 %v4341_v19, %v5729_v22  ;;  %v4343_v61 = vadd.f32 %v4264_v29, %v5698_v34  ;;  %v2835_v45 = vpop.f32.mrb[19].mxu0 }
 0x22a   : > { %v5771_v48 = vpack.c.bf16 %v3005_v56, %v3004_v59  ;;  %v2950_v4 = vadd.f32 %v4342_v6, %v5729_v22  ;;  %v4344_v50 = vadd.f32 %v2835_v45, %v5700_v55 }
 0x22b   : > { %v2984_v37 = vmax.f32 %v2952_v46, 0.0  ;;  %v2953_v16 = vadd.f32 %v4343_v61, %v5729_v22 }
 0x22c   : > { %v2982_v47 = vmax.f32 %v2950_v4, 0.0  ;;  %v2951_v14 = vadd.f32 %v4344_v50, %v5729_v22  ;;  %4283 = vmatprep.subr.bf16.mxu1 %v5771_v48 }
 0x22d   : > { %v2985_v62 = vmax.f32 %v2953_v16, 0.0  ;;  %4284 = vmatpush3.bf16.msra.mxu1 %v5771_v48 }
 0x22e   : > { %v3006_v44 = vmax.f32 %v2982_v47, %v2984_v37  ;;  %v2983_v34 = vmax.f32 %v2951_v14, 0.0  ;;  %v4267_v57 = vpop.f32.mrb[20].mxu0 }
 0x22f   : > { %v4345_v5 = vadd.f32 %v4267_v57, %v5702_v27  ;;  %v2848_v49 = vpop.f32.mrb[21].mxu0 }
 0x230   : > { %v3007_v17 = vmax.f32 %v2983_v34, %v2985_v62  ;;  %v4346_v55 = vadd.f32 %v2848_v49, %v5704_v21  ;;  %v4268_v51 = vpop.f32.mrb[22].mxu0  ;;  %v4684_v49 = vld [vmem:[%s5848_s3 + $0x20] sm:$0xff]  }
 0x231   : > { %v2956_v31 = vadd.f32 %v4345_v5, %v5729_v22  ;;  %v4347_v53 = vadd.f32 %v4268_v51, %v5706_v23  ;;  %v2851_v25 = vpop.f32.mrb[23].mxu0 }
 0x232   : > { %v5783_v15 = vpack.c.bf16 %v3007_v17, %v3006_v44  ;;  %v2954_v10 = vadd.f32 %v4346_v55, %v5729_v22  ;;  %v4348_v33 = vadd.f32 %v2851_v25, %v5708_v63 }
 0x233   : > { %v2988_v9 = vmax.f32 %v2956_v31, 0.0  ;;  %v2957_v20 = vadd.f32 %v4347_v53, %v5729_v22 }
 0x234   : > { %v2986_v27 = vmax.f32 %v2954_v10, 0.0  ;;  %v2955_v35 = vadd.f32 %v4348_v33, %v5729_v22  ;;  %4285 = vmatprep.subr.bf16.mxu1 %v5783_v15 }
 0x235   : > { %v2989_v21 = vmax.f32 %v2957_v20, 0.0  ;;  %4286 = vmatpush3.bf16.msra.mxu1 %v5783_v15 }
 0x236   : > { %v3008_v2 = vmax.f32 %v2986_v27, %v2988_v9  ;;  %v2987_v23 = vmax.f32 %v2955_v35, 0.0  ;;  %v4271_v26 = vpop.f32.mrb[24].mxu0 }
 0x237   : > { %v4349_v42 = vadd.f32 %v4271_v26, %v5710_v24  ;;  %v2864_v52 = vpop.f32.mrb[25].mxu0 }
 0x238   : > { %v3009_v40 = vmax.f32 %v2987_v23, %v2989_v21  ;;  %v4350_v63 = vadd.f32 %v2864_v52, %v5712_v13  ;;  %v4272_v1 = vpop.f32.mrb[26].mxu0 }
 0x239   : > { %v2960_v7 = vadd.f32 %v4349_v42, %v5729_v22  ;;  %v4351_v41 = vadd.f32 %v4272_v1, %v5714_v18  ;;  %v2867_v3 = vpop.f32.mrb[27].mxu0 }
 0x23a   : > { %v3019_v8 = vpack.c.bf16 %v3009_v40, %v3008_v2  ;;  %v2958_v28 = vadd.f32 %v4350_v63, %v5729_v22  ;;  %v4352_v58 = vadd.f32 %v2867_v3, %v5716_v11 }
 0x23b   : > { %v2992_v59 = vmax.f32 %v2960_v7, 0.0  ;;  %v2961_v43 = vadd.f32 %v4351_v41, %v5729_v22 }
 0x23c   : > { %v2990_v39 = vmax.f32 %v2958_v28, 0.0  ;;  %v2959_v24 = vadd.f32 %v4352_v58, %v5729_v22  ;;  %4287 = vmatprep.subr.bf16.mxu1 %v3019_v8 }
 0x23d   : > { %v2993_v19 = vmax.f32 %v2961_v43, 0.0  ;;  %4288 = vmatpush3.bf16.msra.mxu1 %v3019_v8 }
 0x23e   : > { %v3010_v13 = vmax.f32 %v2990_v39, %v2992_v59  ;;  %v2991_v60 = vmax.f32 %v2959_v24, 0.0  ;;  %v4275_v56 = vpop.f32.mrb[28].mxu0 }
 0x23f   : > { %v4353_v18 = vadd.f32 %v4275_v56, %v5718_v12  ;;  %v2880_v6 = vpop.f32.mrb[29].mxu0 }
 0x240   : > { %v3011_v29 = vmax.f32 %v2991_v60, %v2993_v19  ;;  %v4354_v46 = vadd.f32 %v2880_v6, %v5720_v36  ;;  %v4276_v61 = vpop.f32.mrb[30].mxu0 }
 0x241   : > { %v2964_v11 = vadd.f32 %v4353_v18, %v5729_v22  ;;  %v4355_v45 = vadd.f32 %v4276_v61, %v5722_v38  ;;  %v2883_v4 = vpop.f32.mrb[31].mxu0  ;;  %v4681_v38 = vld [vmem:[%s5848_s3 + $0x8] sm:$0xff]  }
 0x242   : > { %v3020_v50 = vpack.c.bf16 %v3011_v29, %v3010_v13  ;;  %v2962_v37 = vadd.f32 %v4354_v46, %v5729_v22  ;;  %v4356_v16 = vadd.f32 %v2883_v4, %v5724_v32  ;;  %v4682_v32 = vld [vmem:[%s5848_s3 + $0x10] sm:$0xff]  }
 0x243   : > { %v2996_v47 = vmax.f32 %v2964_v11, 0.0  ;;  %v2965_v14 = vadd.f32 %v4355_v45, %v5729_v22 }
 0x244   : > { %v2994_v62 = vmax.f32 %v2962_v37, 0.0  ;;  %v2963_v12 = vadd.f32 %v4356_v16, %v5729_v22  ;;  %4289 = vmatprep.subr.bf16.mxu1 %v3020_v50  ;;  %v4683_v22 = vld [vmem:[%s5848_s3 + $0x18] sm:$0xff]  }
 0x245   : > { %v2997_v44 = vmax.f32 %v2965_v14, 0.0  ;;  %4290 = vmatpush3.bf16.msra.mxu1 %v3020_v50 }
 0x246   : > { %v3012_v36 = vmax.f32 %v2994_v62, %v2996_v47  ;;  %v2995_v34 = vmax.f32 %v2963_v12, 0.0 }
 0x248   : > { %v3013_v57 = vmax.f32 %v2995_v34, %v2997_v44 }
 0x24a   : > { %v3021_v5 = vpack.c.bf16 %v3013_v57, %v3012_v36 }
 0x24c   : > { %4291 = vmatprep.subr.bf16.mxu1 %v3021_v5 }
 0x24d   : > { %4292 = vmatpush3.bf16.msra.mxu1 %v3021_v5 }
 0x24e   : > { %4301 = vmatprep.subr.bf16.mxu1 %v5736_v30 }
 0x250   : > { %4294 = vmatmul.mubr.bf16.vlgmr.msra.gmra.mrb[32].mxu1 %v4681_v38 }
 0x251   : > { %4302 = vmatpush3.bf16.msra.mxu1 %v5736_v30  ;;  %4297 = vmatprep.mubr.bf16.mxu1 %v4682_v32  ;;  %v4685_v30 = vld [vmem:[%s5848_s3 + $0x28] sm:$0xff]  }
 0x252   : > { %4303 = vmatprep.subr.bf16.mxu1 %v5747_v54 }
 0x255   : > { %4304 = vmatpush3.bf16.msra.mxu1 %v5747_v54  ;;  %v4686_v54 = vld [vmem:[%s5848_s3 + $0x30] sm:$0xff]  }
 0x256   : > { %4305 = vmatprep.subr.bf16.mxu1 %v5759_v0 }
 0x258   : > { %4298 = vmatmul.mubr.bf16.gmra.mrb[36].mxu1 %v4683_v22 }
 0x259   : > { %4306 = vmatpush3.bf16.msra.mxu1 %v5759_v0  ;;  %4317 = vmatprep.mubr.bf16.mxu1 %v4684_v49  ;;  %v4687_v0 = vld [vmem:[%s5848_s3 + $0x38] sm:$0xff]  }
 0x25a   : > { %4307 = vmatprep.subr.bf16.mxu1 %v5771_v48 }
 0x25d   : > { %4308 = vmatpush3.bf16.msra.mxu1 %v5771_v48 }
 0x25e   : > { %4309 = vmatprep.subr.bf16.mxu1 %v5783_v15 }
 0x261   : > { %4310 = vmatpush3.bf16.msra.mxu1 %v5783_v15 }
 0x262   : > { %4311 = vmatprep.subr.bf16.mxu1 %v3019_v8 }
 0x265   : > { %4312 = vmatpush3.bf16.msra.mxu1 %v3019_v8 }
 0x266   : > { %4313 = vmatprep.subr.bf16.mxu1 %v3020_v50 }
 0x269   : > { %4314 = vmatpush3.bf16.msra.mxu1 %v3020_v50 }
 0x26a   : > { %4315 = vmatprep.subr.bf16.mxu1 %v3021_v5 }
 0x26d   : > { %4316 = vmatpush3.bf16.msra.mxu1 %v3021_v5 }
 0x270   : > { %4318 = vmatmul.mubr.bf16.vlgmr.msra.gmra.mrb[40].mxu1 %v4685_v30 }
 0x271   : > { %4321 = vmatprep.mubr.bf16.mxu1 %v4686_v54 }
 0x278   : > { %4322 = vmatmul.mubr.bf16.gmra.mrb[44].mxu1 %v4687_v0 }
 0x323   : > { %v4295_v48 = vpop.f32.mrb[32].mxu1 }
 0x324   : > { %v3088_v17 = vpop.f32.mrb[33].mxu1 }
 0x325   : > { %v4296_v55 = vpop.f32.mrb[34].mxu1 }
 0x326   : > { %v3091_v51 = vpop.f32.mrb[35].mxu1 }
 0x32b   : > { %v4299_v31 = vpop.f32.mrb[36].mxu1 }
 0x32c   : > { %v3104_v53 = vpop.f32.mrb[37].mxu1 }
 0x32d   : > { %v4300_v25 = vpop.f32.mrb[38].mxu1 }
 0x32e   : > { %v3107_v15 = vpop.f32.mrb[39].mxu1 }
 0x343   : > { %v4319_v10 = vpop.f32.mrb[40].mxu1 }
 0x344   : > { %v3219_v33 = vmax.f32 %v4295_v48, %v4319_v10  ;;  %v3186_v9 = vpop.f32.mrb[41].mxu1 }
 0x345   : > { %v3217_v20 = vmax.f32 %v3088_v17, %v3186_v9  ;;  %v4320_v27 = vpop.f32.mrb[42].mxu1 }
 0x346   : > { %v3220_v35 = vmax.f32 %v4296_v55, %v4320_v27  ;;  %v3189_v21 = vpop.f32.mrb[43].mxu1 }
 0x347   : > { %v3218_v2 = vmax.f32 %v3091_v51, %v3189_v21 }
 0x348   : > { %v3590_v23 = vpack.c.bf16 %v3220_v35, %v3219_v33 }
 0x349   : > { %v3585_v26 = vpack.c.bf16 %v3218_v2, %v3217_v20 }
 0x34a   : > { %3602 = vst [vmem:[%s197_s24 + $0x8] sm:$0xff] %v3590_v23  }
 0x34b   : > { %3586 = vst [vmem:[%s197_s24] sm:$0xff] %v3585_v26   ;;  %v4323_v42 = vpop.f32.mrb[44].mxu1 }
 0x34c   : > { %v3223_v52 = vmax.f32 %v4299_v31, %v4323_v42  ;;  %v3202_v40 = vpop.f32.mrb[45].mxu1 }
 0x34d   : > { %v3221_v63 = vmax.f32 %v3104_v53, %v3202_v40  ;;  %v4324_v1 = vpop.f32.mrb[46].mxu1 }
 0x34e   : > { %v3224_v7 = vmax.f32 %v4300_v25, %v4324_v1  ;;  %v3205_v41 = vpop.f32.mrb[47].mxu1 }
 0x34f   : > { %v3222_v3 = vmax.f32 %v3107_v15, %v3205_v41 }
 0x350   : > { %v3600_v8 = vpack.c.bf16 %v3224_v7, %v3223_v52 }
 0x351   : > { %v3595_v28 = vpack.c.bf16 %v3222_v3, %v3221_v63 }
 0x352   : > { %3604 = vst [vmem:[%s197_s24 + $0x18] sm:$0xff] %v3600_v8  }
 0x353   : > { %3603 = vst [vmem:[%s197_s24 + $0x10] sm:$0xff] %v3595_v28  }
 0x354 PF: > { %s14_s15 = sadd.s32 1, %s4713_s15  }
 0x355   : > { %p11_p5 = scmp.ge.s32.totalorder %s14_s15, 4  }
 0x357   :  { %13 = sbr.rel (!%p11_p5) target bundleno = 1 (0x1), region = 75 }

// kernel: convnet_forward.6
= control target key start
LH: loop header
LB: loop body
LE: loop exit
PB: predicated region body
PF: predicated region fallthrough
CT: control target
= control target key end

     0   :  { %s2569_s15 = smov 0   ;;  %s3102_s0 = inlined_call_operand.vmem [shape: bf16[2,10,10,128], index: 0, kind: input, shape index: {}]   ;;  %s3103_s1 = inlined_call_operand.vmem [shape: bf16[9,128,128], index: 1, kind: input, shape index: {}]   ;;  %s3104_s2 = inlined_call_operand.vmem [shape: f32[1,128], index: 2, kind: input, shape index: {}]   ;;  %s3105_s3 = inlined_call_operand.vmem [shape: bf16[2,16,32], index: 3, kind: input, shape index: {}]   ;;  %s3106_s4 = inlined_call_operand.vmem [shape: bf16[32,128], index: 4, kind: output, shape index: {}]  }
   0x1 LB: > { %s2575_s16 = sadd.s32 4294967295, %s2540_s15   ;;  %p1799_p0 = scmp.ge.s32.totalorder %s2540_s15, 1  ;;  %s2540_s15 = sphi %s2569_s15, %s14_s15  }
   0x2   : > { %p162_p1 = scmp.lt.s32.totalorder %s2540_s15, 3 }
   0x4   : > { %p163_p2 = pnand %p1799_p0, %p162_p1 }
   0x5   : > { %v2451_v0 = vld [vmem:[%s3103_s1 + $0x40] sm:$0xff] (!%p163_p2)   ;;  %p188_p3 = scmp.lt.s32.totalorder (!%p163_p2), %s2575_s16, 1  ;;  %v2453_v2 = vld [vmem:[%s3103_s1 + $0x48] sm:$0xff] (!%p163_p2)   ;;  %v2455_v4 = vld [vmem:[%s3103_s1 + $0x50] sm:$0xff] (!%p163_p2)   ;;  %vm276_vm0 = vcmask (!%p163_p2), 1046528   ;;  %vm556_vm1 = vcmask (!%p163_p2), 1045504  }
   0x6   : > { %166 = sbr.rel (%p163_p2) target bundleno = 630 (0x276), region = 36  ;;  %v2452_v1 = vld [vmem:[%s3103_s1 + $0x100] sm:$0xff] (!%p163_p2)   ;;  %2144 = vmatprep.subr.bf16.mxu1 (!%p163_p2), %v2451_v0  ;;  %v2454_v3 = vld [vmem:[%s3103_s1 + $0x108] sm:$0xff] (!%p163_p2)   ;;  %v2456_v5 = vld [vmem:[%s3103_s1 + $0x110] sm:$0xff] (!%p163_p2)   ;;  %vm2543_vm2 = vmmov (!%p163_p2), 0   ;;  %vm1630_vm3 = vcmask (!%p163_p2), 261120  }
   0x7   : > { %2240 = vmatprep.subr.bf16.mxu0 (!%p163_p2), %v2452_v1  ;;  %2145 = vmatpush3.bf16.msra.mxu1 (!%p163_p2), %v2451_v0  ;;  %v2457_v6 = vld [vmem:[%s3103_s1 + $0x58] sm:$0xff] (!%p163_p2)   ;;  %v2459_v8 = vld [vmem:[%s3103_s1 + $0x60] sm:$0xff] (!%p163_p2)   ;;  %v2461_v10 = vld [vmem:[%s3103_s1 + $0x68] sm:$0xff] (!%p163_p2)   ;;  %s1801_s30 = sshll.u32 (!%p163_p2), %s2575_s16, 1 }
   0x8   : > { %2241 = vmatpush3.bf16.msra.mxu0 (!%p163_p2), %v2452_v1  ;;  %2146 = vmatprep.subr.bf16.mxu1 (!%p163_p2), %v2453_v2  ;;  %v2458_v7 = vld [vmem:[%s3103_s1 + $0x118] sm:$0xff] (!%p163_p2)   ;;  %v2460_v9 = vld [vmem:[%s3103_s1 + $0x120] sm:$0xff] (!%p163_p2)   ;;  %v2462_v11 = vld [vmem:[%s3103_s1 + $0x128] sm:$0xff] (!%p163_p2)   ;;  %p194_p4 = scmp.lt.s32.totalorder (!%p163_p2), %s1801_s30, 3 }
   0x9   : > { %2242 = vmatprep.subr.bf16.mxu0 (!%p163_p2), %v2454_v3  ;;  %v2463_v27 = vld [vmem:[%s3103_s1 + $0x70] sm:$0xff] (!%p163_p2)   ;;  %v2465_v47 = vld [vmem:[%s3103_s1 + $0x78] sm:$0xff] (!%p163_p2)   ;;  %v2467_v54 = vld [vmem:[%s3103_s1] sm:$0xff] (!%p163_p2)  }
   0xa   : > { %v2464_v32 = vld [vmem:[%s3103_s1 + $0x130] sm:$0xff] (!%p163_p2)   ;;  %v2466_v50 = vld [vmem:[%s3103_s1 + $0x138] sm:$0xff] (!%p163_p2)   ;;  %v2468_v56 = vld [vmem:[%s3103_s1 + $0x140] sm:$0xff] (!%p163_p2)  }
   0xb   : > { %2147 = vmatpush3.bf16.msra.mxu1 (!%p163_p2), %v2453_v2  ;;  %v2469_v58 = vld [vmem:[%s3103_s1 + $0x8] sm:$0xff] (!%p163_p2)  }
   0xc   : > { %2243 = vmatpush3.bf16.msra.mxu0 (!%p163_p2), %v2454_v3  ;;  %2148 = vmatprep.subr.bf16.mxu1 (!%p163_p2), %v2455_v4  ;;  %v2470_v60 = vld [vmem:[%s3103_s1 + $0x148] sm:$0xff] (!%p163_p2)  }
   0xd   : > { %s189_s29 = scalar_select %p188_p3, %s2575_s16, 1  ;;  %2244 = vmatprep.subr.bf16.mxu0 %v2456_v5 }
   0xe   : > { %s3108_s30 = smov (!%p194_p4, %s1801_s30), 3 }
   0xf   : > { %s2440_s8 = smul.u32 80, %s189_s29  ;;  %2149 = vmatpush3.bf16.msra.mxu1 %v2455_v4  ;;  %s1802_s5 = sshll.u32 %s3108_s30, 2 }
  0x10   : > { %2245 = vmatpush3.bf16.msra.mxu0 %v2456_v5  ;;  %2150 = vmatprep.subr.bf16.mxu1 %v2457_v6 }
  0x11   : > { %2246 = vmatprep.subr.bf16.mxu0 %v2458_v7  ;;  %s2614_s17 = scalar_lea.vmem %s3102_s0, %s2440_s8  ;;  %s197_s8 = scalar_lea.vmem %s3106_s4, %s1802_s5 }
  0x12   : > { %v2623_v12 = vld [vmem:[%s2614_s17] sm:$0xf]  ;;  %v2626_v13 = vld [vmem:[%s2614_s17 + $0x4] sm:$0x1]  ;;  %v2629_v14 = vld [vmem:[%s2614_s17 + $0x8] sm:$0xf] }
  0x13   : > { %2151 = vmatpush3.bf16.msra.mxu1 %v2457_v6  ;;  %v2632_v15 = vld [vmem:[%s2614_s17 + $0xc] sm:$0x1]  ;;  %v220_v16 = vunpack.c.l.bf16 %v2623_v12  ;;  %v221_v17 = vunpack.c.l.bf16 %v2626_v13  ;;  %v222_v18 = vunpack.c.l.bf16 %v2629_v14  ;;  %v2639_v20 = vld [vmem:[%s2614_s17 + $0x10] sm:$0xf]  ;;  %v2642_v21 = vld [vmem:[%s2614_s17 + $0x14] sm:$0x1] }
  0x14   : > { %2247 = vmatpush3.bf16.msra.mxu0 %v2458_v7  ;;  %2152 = vmatprep.subr.bf16.mxu1 %v2459_v8  ;;  %v223_v19 = vunpack.c.l.bf16 %v2632_v15  ;;  %v2651_v25 = vld [vmem:[%s2614_s17 + $0x18] sm:$0xf]  ;;  %v224_v26 = vunpack.c.l.bf16 %v2639_v20  ;;  %v2660_v29 = vld [vmem:[%s2614_s17 + $0x1c] sm:$0x1]  ;;  %v225_v30 = vunpack.c.l.bf16 %v2642_v21  ;;  %v2672_v36 = vld [vmem:[%s2614_s17 + $0x20] sm:$0xf]  ;;  %v1863_v37 = vcombine.low %v2629_v14, %v2639_v20 }
  0x15   : > { %2248 = vmatprep.subr.bf16.mxu0 %v2460_v9  ;;  %v277_v22 = vrot.slane %v220_v16, 1  ;;  %v278_v23 = vrot.slane %v221_v17, 1  ;;  %v280_v24 = vrot.slane %v222_v18, 1  ;;  %v226_v31 = vunpack.c.l.bf16 %v2651_v25  ;;  %v2682_v41 = vld [vmem:[%s2614_s17 + $0x24] sm:$0x1]  ;;  %v2471_v7 = vld [vmem:[%s3103_s1 + $0x10] sm:$0xff]  }
  0x16   : > { %v281_v28 = vrot.slane %v223_v19, 1  ;;  %v227_v34 = vunpack.c.l.bf16 %v2660_v29  ;;  %v283_v35 = vrot.slane %v224_v26, 1  ;;  %v284_v39 = vrot.slane %v225_v30, 1  ;;  %v2718_v61 = vld [vmem:[%s2614_s17 + $0x28] sm:$0xf] }
  0x17   : > { %2153 = vmatpush3.bf16.msra.mxu1 %v2459_v8  ;;  %v279_v33 = vsel %vm276_vm0, %v277_v22, %v278_v23  ;;  %v286_v40 = vrot.slane %v226_v31, 1  ;;  %v228_v42 = vunpack.c.l.bf16 %v2672_v36  ;;  %v229_v45 = vunpack.c.l.bf16 %v2682_v41  ;;  %v2721_v62 = vld [vmem:[%s2614_s17 + $0x2c] sm:$0x1]  ;;  %v2726_v1 = vld [vmem:[%s2614_s17 + $0x30] sm:$0xf] }
  0x18   : > { %2249 = vmatpush3.bf16.msra.mxu0 %v2460_v9  ;;  %2154 = vmatprep.subr.bf16.mxu1 %v2461_v10  ;;  %v282_v38 = vsel %vm276_vm0, %v280_v24, %v281_v28  ;;  %v287_v44 = vrot.slane %v227_v34, 1  ;;  %v1864_v46 = vcombine.low %v2651_v25, %v2672_v36  ;;  %v285_v48 = vsel %vm276_vm0, %v283_v35, %v284_v39  ;;  %v2734_v4 = vld [vmem:[%s2614_s17 + $0x34] sm:$0x1]  ;;  %v2759_v23 = vld [vmem:[%s2614_s17 + $0x40] sm:$0xf] }
  0x19   : > { %2250 = vmatprep.subr.bf16.mxu0 %v2462_v11  ;;  %v309_v43 = vpack.c.bf16 %v282_v38, %v279_v33  ;;  %v289_v49 = vrot.slane %v228_v42, 1  ;;  %v879_v51 = vpack.c.bf16 %v285_v48, %v282_v38  ;;  %v290_v52 = vrot.slane %v229_v45, 1  ;;  %v2771_v33 = vld [vmem:[%s2614_s17 + $0x44] sm:$0x1]  ;;  %v2913_v13 = vld [vmem:[%s2614_s17 + $0x48] sm:$0xf] }
  0x1a   : > { %v288_v53 = vsel %vm276_vm0, %v286_v40, %v287_v44  ;;  %v230_v63 = vunpack.c.l.bf16 %v2718_v61  ;;  %v231_v0 = vunpack.c.l.bf16 %v2721_v62  ;;  %v560_v2 = vrot.slane %v222_v18, 2  ;;  %v2484_v62 = vld [vmem:[%s3103_s1 + $0x80] sm:$0xff]  }
  0x1b   : > { %2155 = vmatpush3.bf16.msra.mxu1 %v2461_v10  ;;  %2160 = vmatprep.mubr.bf16.mxu1 %v309_v43  ;;  %v291_v55 = vsel %vm276_vm0, %v289_v49, %v290_v52  ;;  %v2709_v57 = vpack.c.bf16 %v288_v53, %v285_v48  ;;  %v561_v3 = vrot.slane %v223_v19, 2  ;;  %v232_v5 = vunpack.c.l.bf16 %v2726_v1  ;;  %v2755_v19 = vld [vmem:[%s2614_s17 + $0x3c] sm:$0x1] }
  0x1c   : > { %2251 = vmatpush3.bf16.msra.mxu0 %v2462_v11  ;;  %2156 = vmatprep.subr.bf16.mxu1 %v2463_v27  ;;  %v880_v59 = vpack.c.bf16 %v291_v55, %v288_v53  ;;  %v1865_v6 = vcombine.low %v2718_v61, %v2726_v1  ;;  %v292_v8 = vrot.slane %v230_v63, 1  ;;  %v293_v9 = vrot.slane %v231_v0, 1  ;;  %v2748_v11 = vld [vmem:[%s2614_s17 + $0x38] sm:$0xf] }
  0x1d   : > { %2252 = vmatprep.subr.bf16.mxu0 %v2464_v32  ;;  %2256 = vmatprep.mubr.bf16.mxu0 %v879_v51  ;;  %v233_v10 = vunpack.c.l.bf16 %v2734_v4  ;;  %v563_v15 = vrot.slane %v224_v26, 2  ;;  %v295_v18 = vrot.slane %v232_v5, 1  ;;  %v234_v22 = vunpack.c.l.bf16 %v2748_v11  ;;  %v2474_v52 = vld [vmem:[%s3103_s1 + $0x158] sm:$0xff]   ;;  %v2487_v4 = vld [vmem:[%s3103_s1 + $0x88] sm:$0xff]  }
  0x1e   : > { %v564_v24 = vrot.slane %v225_v30, 2  ;;  %v294_v26 = vsel %vm276_vm0, %v292_v8, %v293_v9  ;;  %v236_v35 = vunpack.c.l.bf16 %v2759_v23  ;;  %v237_v30 = vunpack.c.l.bf16 %v2771_v33  ;;  %v2479_v8 = vld [vmem:[%s3103_s1 + $0x30] sm:$0xff]  }
  0x1f   : > { %2157 = vmatpush3.bf16.msra.mxu1 %v2463_v27  ;;  %v2472_v27 = vld [vmem:[%s3103_s1 + $0x150] sm:$0xff]   ;;  %v296_v28 = vrot.slane %v233_v10, 1  ;;  %v2774_v38 = vpack.c.bf16 %v294_v26, %v291_v55  ;;  %v298_v21 = vrot.slane %v234_v22, 1  ;;  %v1866_v44 = vcombine.low %v2748_v11, %v2759_v23 }
  0x20   : > { %2253 = vmatpush3.bf16.msra.mxu0 %v2464_v32  ;;  %2158 = vmatprep.subr.bf16.mxu1 %v2465_v47  ;;  %v235_v32 = vunpack.c.l.bf16 %v2755_v19  ;;  %v875_v43 = vrot.slane %v236_v35, 1  ;;  %v876_v49 = vrot.slane %v237_v30, 1  ;;  %v2795_v51 = vsel %vm556_vm1, %v563_v15, %v564_v24  ;;  %v2480_v9 = vld [vmem:[%s3103_s1 + $0x170] sm:$0xff]  }
  0x21   : > { %2254 = vmatprep.subr.bf16.mxu0 %v2466_v50  ;;  %v297_v39 = vsel %vm276_vm0, %v295_v18, %v296_v28  ;;  %v566_v15 = vrot.slane %v226_v31, 2  ;;  %v567_v18 = vrot.slane %v227_v34, 2  ;;  %v569_v24 = vrot.slane %v228_v42, 2  ;;  %v2482_v31 = vld [vmem:[%s3103_s1 + $0x178] sm:$0xff]  }
  0x22   : > { %v299_v40 = vrot.slane %v235_v32, 1  ;;  %v881_v48 = vpack.c.bf16 %v297_v39, %v294_v26  ;;  %v2805_v55 = vsel %vm276_vm0, %v875_v43, %v876_v49  ;;  %v2481_v26 = vld [vmem:[%s3103_s1 + $0x38] sm:$0xff]   ;;  %v572_v29 = vrot.slane %v230_v63, 2  ;;  %v2485_v63 = vld [vmem:[%s3103_s1 + $0x180] sm:$0xff]  }
  0x23   : > { %2159 = vmatpush3.bf16.msra.mxu1 %v2465_v47  ;;  %v2473_v47 = vld [vmem:[%s3103_s1 + $0x18] sm:$0xff]   ;;  %v573_v34 = vrot.slane %v231_v0, 2  ;;  %v2850_v41 = vsel %vm556_vm1, %v566_v15, %v567_v18  ;;  %v576_v28 = vrot.slane %v233_v10, 2  ;;  %v1021_v43 = vrot.slane %v236_v35, 2  ;;  %v2489_v35 = vld [vmem:[%s3103_s1 + $0x90] sm:$0xff]   ;;  %v2496_v18 = vld [vmem:[%s3103_s1 + $0x1a8] sm:$0xff]  }
  0x24   : > { %2255 = vmatpush3.bf16.msra.mxu0 %v2466_v50  ;;  %2168 = vmatprep.subr.bf16.mxu1 %v2467_v54  ;;  %v2792_v50 = vsel %vm556_vm1, %v560_v2, %v561_v3  ;;  %v300_v53 = vsel %vm276_vm0, %v298_v21, %v299_v40  ;;  %v2476_v2 = vld [vmem:[%s3103_s1 + $0x160] sm:$0xff]   ;;  %v2477_v3 = vld [vmem:[%s3103_s1 + $0x28] sm:$0xff]   ;;  %v579_v40 = vrot.slane %v235_v32, 2  ;;  %v557_v32 = vrot.slane %v220_v16, 2 }
  0x25   : > { %2264 = vmatprep.subr.bf16.mxu0 %v2468_v56  ;;  %v2873_v10 = vsel %vm556_vm1, %v572_v29, %v573_v34  ;;  %v558_v33 = vrot.slane %v221_v17, 2  ;;  %v2917_v16 = vcombine.low %v2726_v1, %v2748_v11  ;;  %v2498_v29 = vld [vmem:[%s3103_s1 + $0xb0] sm:$0xff]   ;;  %v2531_v1 = vld [vmem:[%s3103_s1 + $0x238] sm:$0xff]  }
  0x26   : > { %2161 = vmatmul.mubr.bf16.vlgmr.msra.gmra.mrb[0].mxu1 %v2709_v57 }
  0x27   : > { %2169 = vmatpush3.bf16.msra.mxu1 %v2467_v54  ;;  %2257 = vmatmul.mubr.bf16.vlgmr.msra.gmra.mrb[0].mxu0 %v880_v59  ;;  %v2802_v54 = vpack.c.bf16 %v300_v53, %v297_v39  ;;  %v1025_v59 = vpack.c.bf16 %v2795_v51, %v2792_v50  ;;  %v578_v39 = vrot.slane %v234_v22, 2  ;;  %v2891_v22 = vcombine.low %v2672_v36, %v2718_v61  ;;  %v2528_v36 = vld [vmem:[%s3103_s1 + $0x220] sm:$0xff]   ;;  %v2530_v61 = vld [vmem:[%s3103_s1 + $0x230] sm:$0xff]  }
  0x28   : > { %2265 = vmatpush3.bf16.msra.mxu0 %v2468_v56  ;;  %2170 = vmatprep.subr.bf16.mxu1 %v2469_v58  ;;  %v1803_v56 = vcombine.low %v2623_v12, %v2629_v14  ;;  %v2490_v12 = vld [vmem:[%s3103_s1 + $0x190] sm:$0xff]   ;;  %v559_v17 = vsel %vm556_vm1, %v557_v32, %v558_v33  ;;  %v2522_v32 = vld [vmem:[%s3103_s1 + $0x200] sm:$0xff]   ;;  %v2523_v33 = vld [vmem:[%s3103_s1 + $0x208] sm:$0xff]  }
  0x29   : > { %2266 = vmatprep.subr.bf16.mxu0 %v2470_v60  ;;  %2164 = vmatprep.mubr.bf16.mxu1 %v2774_v38  ;;  %v2515_v14 = vld [vmem:[%s3103_s1 + $0xf0] sm:$0xff]  }
  0x2a   : > { %2260 = vmatprep.mubr.bf16.mxu0 %v881_v48  ;;  %v2488_v48 = vld [vmem:[%s3103_s1 + $0x188] sm:$0xff]  }
  0x2b   : > { %2171 = vmatpush3.bf16.msra.mxu1 %v2469_v58  ;;  %v882_v58 = vpack.c.bf16 %v2805_v55, %v300_v53 }
  0x2c   : > { %2267 = vmatpush3.bf16.msra.mxu0 %v2470_v60  ;;  %2172 = vmatprep.subr.bf16.mxu1 %v2471_v7  ;;  %v2475_v60 = vld [vmem:[%s3103_s1 + $0x20] sm:$0xff]  }
  0x2d   : > { %2268 = vmatprep.subr.bf16.mxu0 %v2472_v27 }
  0x2e   : > { %2165 = vmatmul.mubr.bf16.gmra.mrb[4].mxu1 %v2802_v54 }
  0x2f   : > { %2173 = vmatpush3.bf16.msra.mxu1 %v2471_v7  ;;  %2261 = vmatmul.mubr.bf16.gmra.mrb[4].mxu0 %v882_v58  ;;  %v2478_v7 = vld [vmem:[%s3103_s1 + $0x168] sm:$0xff]   ;;  %v2492_v58 = vld [vmem:[%s3103_s1 + $0x198] sm:$0xff]  }
  0x30   : > { %2269 = vmatpush3.bf16.msra.mxu0 %v2472_v27  ;;  %2174 = vmatprep.subr.bf16.mxu1 %v2473_v47  ;;  %v570_v27 = vrot.slane %v229_v45, 2  ;;  %v575_v45 = vrot.slane %v232_v5, 2  ;;  %v1804_v5 = vcombine.low %v2639_v20, %v2651_v25  ;;  %v2516_v20 = vld [vmem:[%s3103_s1 + $0x1f0] sm:$0xff]   ;;  %v2527_v25 = vld [vmem:[%s3103_s1 + $0x218] sm:$0xff]  }
  0x31   : > { %2270 = vmatprep.subr.bf16.mxu0 %v2474_v52  ;;  %2184 = vmatprep.mubr.bf16.mxu1 %v1803_v56  ;;  %v2491_v56 = vld [vmem:[%s3103_s1 + $0x98] sm:$0xff]  }
  0x32   : > { %2280 = vmatprep.mubr.bf16.mxu0 %v1025_v59  ;;  %v2853_v42 = vsel %vm556_vm1, %v569_v24, %v570_v27  ;;  %v2876_v21 = vsel %vm556_vm1, %v575_v45, %v576_v28  ;;  %v589_v59 = vpack.c.bf16 %v2792_v50, %v559_v17  ;;  %v2495_v50 = vld [vmem:[%s3103_s1 + $0xa8] sm:$0xff]   ;;  %v2499_v28 = vld [vmem:[%s3103_s1 + $0x1b0] sm:$0xff]  }
  0x33   : > { %2175 = vmatpush3.bf16.msra.mxu1 %v2473_v47  ;;  %v1026_v0 = vpack.c.bf16 %v2853_v42, %v2850_v41  ;;  %v1022_v47 = vrot.slane %v237_v30, 2  ;;  %v1027_v19 = vpack.c.bf16 %v2876_v21, %v2873_v10  ;;  %v2903_v30 = vsel %vm556_vm1, %v578_v39, %v579_v40  ;;  %v2505_v39 = vld [vmem:[%s3103_s1 + $0xc8] sm:$0xff]  }
  0x34   : > { %2271 = vmatpush3.bf16.msra.mxu0 %v2474_v52  ;;  %2176 = vmatprep.subr.bf16.mxu1 %v2475_v60  ;;  %v1939_v52 = vcombine.low %v2759_v23, %v2913_v13  ;;  %v2506_v40 = vld [vmem:[%s3103_s1 + $0x1c8] sm:$0xff]  }
  0x35   : > { %2272 = vmatprep.subr.bf16.mxu0 %v2476_v2  ;;  %v2906_v49 = vsel %vm556_vm1, %v1021_v43, %v1022_v47  ;;  %v2986_v43 = vpack.c.bf16 %v2873_v10, %v2853_v42  ;;  %v2999_v42 = vpack.c.bf16 %v2903_v30, %v2876_v21  ;;  %v2509_v10 = vld [vmem:[%s3103_s1 + $0xd8] sm:$0xff]   ;;  %v2511_v21 = vld [vmem:[%s3103_s1 + $0xe0] sm:$0xff]  }
  0x36   : > { %v1028_v53 = vpack.c.bf16 %v2906_v49, %v2903_v30  ;;  %v2510_v47 = vld [vmem:[%s3103_s1 + $0x1d8] sm:$0xff]  }
  0x37   : > { %2177 = vmatpush3.bf16.msra.mxu1 %v2475_v60  ;;  %v238_v60 = vunpack.c.l.bf16 %v2913_v13 }
  0x38   : > { %2273 = vmatpush3.bf16.msra.mxu0 %v2476_v2  ;;  %2178 = vmatprep.subr.bf16.mxu1 %v2477_v3  ;;  %v2493_v2 = vld [vmem:[%s3103_s1 + $0xa0] sm:$0xff]  }
  0x39   : > { %2274 = vmatprep.subr.bf16.mxu0 %v2478_v7 }
  0x3b   : > { %2179 = vmatpush3.bf16.msra.mxu1 %v2477_v3  ;;  %v2494_v3 = vld [vmem:[%s3103_s1 + $0x1a0] sm:$0xff]  }
  0x3c   : > { %2275 = vmatpush3.bf16.msra.mxu0 %v2478_v7  ;;  %2180 = vmatprep.subr.bf16.mxu1 %v2479_v8  ;;  %v219_v7 = vld [vmem:[%s2614_s17 + $0x4c] sm:$0x1] }
  0x3d   : > { %2276 = vmatprep.subr.bf16.mxu0 %v2480_v9  ;;  %v239_v15 = vunpack.c.l.bf16 %v219_v7 }
  0x3f   : > { %2181 = vmatpush3.bf16.msra.mxu1 %v2479_v8  ;;  %v1308_v8 = vrot.slane %v238_v60, 1  ;;  %v1309_v24 = vrot.slane %v239_v15, 1  ;;  %v1452_v27 = vrot.slane %v239_v15, 2 }
  0x40   : > { %2277 = vmatpush3.bf16.msra.mxu0 %v2480_v9  ;;  %2182 = vmatprep.subr.bf16.mxu1 %v2481_v26  ;;  %v1451_v9 = vrot.slane %v238_v60, 2 }
  0x41   : > { %2278 = vmatprep.subr.bf16.mxu0 %v2482_v31 }
  0x43   : > { %2183 = vmatpush3.bf16.msra.mxu1 %v2481_v26  ;;  %v2947_v26 = vsel %vm276_vm0, %v1308_v8, %v1309_v24 }
  0x44   : > { %2279 = vmatpush3.bf16.msra.mxu0 %v2482_v31  ;;  %2192 = vmatprep.subr.bf16.mxu1 %v2484_v62  ;;  %v2950_v31 = vsel %vm556_vm1, %v1451_v9, %v1452_v27  ;;  %v1312_v34 = vpack.c.bf16 %v2947_v26, %v2805_v55 }
  0x45   : > { %2288 = vmatprep.subr.bf16.mxu0 %v2485_v63  ;;  %v1455_v45 = vpack.c.bf16 %v2950_v31, %v2906_v49 }
  0x46   : > { %2185 = vmatmul.mubr.bf16.vlgmr.msra.gmra.mrb[0].mxu1 %v1804_v5 }
  0x47   : > { %2193 = vmatpush3.bf16.msra.mxu1 %v2484_v62  ;;  %2281 = vmatmul.mubr.bf16.vlgmr.msra.gmra.mrb[0].mxu0 %v1026_v0  ;;  %v2501_v62 = vld [vmem:[%s3103_s1 + $0xb8] sm:$0xff]   ;;  %v2503_v0 = vld [vmem:[%s3103_s1 + $0xc0] sm:$0xff]  }
  0x48   : > { %2289 = vmatpush3.bf16.msra.mxu0 %v2485_v63  ;;  %2194 = vmatprep.subr.bf16.mxu1 %v2487_v4  ;;  %v2502_v63 = vld [vmem:[%s3103_s1 + $0x1b8] sm:$0xff]  }
  0x49   : > { %2290 = vmatprep.subr.bf16.mxu0 %v2488_v48  ;;  %2188 = vmatprep.mubr.bf16.mxu1 %v2891_v22 }
  0x4a   : > { %2284 = vmatprep.mubr.bf16.mxu0 %v1027_v19  ;;  %v2514_v19 = vld [vmem:[%s3103_s1 + $0x1e8] sm:$0xff]  }
  0x4b   : > { %2195 = vmatpush3.bf16.msra.mxu1 %v2487_v4  ;;  %v2976_v4 = vpack.c.bf16 %v2850_v41, %v2795_v51  ;;  %v2507_v51 = vld [vmem:[%s3103_s1 + $0xd0] sm:$0xff]  }
  0x4c   : > { %2291 = vmatpush3.bf16.msra.mxu0 %v2488_v48  ;;  %2196 = vmatprep.subr.bf16.mxu1 %v2489_v35  ;;  %v2508_v41 = vld [vmem:[%s3103_s1 + $0x1d0] sm:$0xff]   ;;  %v2512_v48 = vld [vmem:[%s3103_s1 + $0x1e0] sm:$0xff]  }
  0x4d   : > { %2292 = vmatprep.subr.bf16.mxu0 %v2490_v12 }
  0x4e   : > { %2189 = vmatmul.mubr.bf16.gmra.mrb[4].mxu1 %v2917_v16 }
  0x4f   : > { %2197 = vmatpush3.bf16.msra.mxu1 %v2489_v35  ;;  %2285 = vmatmul.mubr.bf16.gmra.mrb[4].mxu0 %v1028_v53  ;;  %v2526_v35 = vld [vmem:[%s3103_s1 + $0x210] sm:$0xff]  }
  0x50   : > { %2293 = vmatpush3.bf16.msra.mxu0 %v2490_v12  ;;  %2198 = vmatprep.subr.bf16.mxu1 %v2491_v56 }
  0x51   : > { %2294 = vmatprep.subr.bf16.mxu0 %v2492_v58  ;;  %2208 = vmatprep.mubr.bf16.mxu1 %v589_v59 }
  0x52   : > { %2304 = vmatprep.mubr.bf16.mxu0 %v1804_v5  ;;  %v2504_v5 = vld [vmem:[%s3103_s1 + $0x1c0] sm:$0xff]  }
  0x53   : > { %2199 = vmatpush3.bf16.msra.mxu1 %v2491_v56 }
  0x54   : > { %2295 = vmatpush3.bf16.msra.mxu0 %v2492_v58  ;;  %2200 = vmatprep.subr.bf16.mxu1 %v2493_v2 }
  0x55   : > { %2296 = vmatprep.subr.bf16.mxu0 %v2494_v3 }
  0x57   : > { %2201 = vmatpush3.bf16.msra.mxu1 %v2493_v2 }
  0x58   : > { %2297 = vmatpush3.bf16.msra.mxu0 %v2494_v3  ;;  %2202 = vmatprep.subr.bf16.mxu1 %v2495_v50 }
  0x59   : > { %2298 = vmatprep.subr.bf16.mxu0 %v2496_v18 }
  0x5b   : > { %2203 = vmatpush3.bf16.msra.mxu1 %v2495_v50 }
  0x5c   : > { %2299 = vmatpush3.bf16.msra.mxu0 %v2496_v18  ;;  %2204 = vmatprep.subr.bf16.mxu1 %v2498_v29 }
  0x5d   : > { %2300 = vmatprep.subr.bf16.mxu0 %v2499_v28 }
  0x5f   : > { %2205 = vmatpush3.bf16.msra.mxu1 %v2498_v29 }
  0x60   : > { %2301 = vmatpush3.bf16.msra.mxu0 %v2499_v28  ;;  %2206 = vmatprep.subr.bf16.mxu1 %v2501_v62 }
  0x61   : > { %2302 = vmatprep.subr.bf16.mxu0 %v2502_v63 }
  0x63   : > { %2207 = vmatpush3.bf16.msra.mxu1 %v2501_v62 }
  0x64   : > { %2303 = vmatpush3.bf16.msra.mxu0 %v2502_v63  ;;  %2216 = vmatprep.subr.bf16.mxu1 %v2503_v0 }
  0x65   : > { %2312 = vmatprep.subr.bf16.mxu0 %v2504_v5 }
  0x66   : > { %2209 = vmatmul.mubr.bf16.vlgmr.msra.gmra.mrb[0].mxu1 %v2976_v4 }
  0x67   : > { %2217 = vmatpush3.bf16.msra.mxu1 %v2503_v0  ;;  %2305 = vmatmul.mubr.bf16.vlgmr.msra.gmra.mrb[0].mxu0 %v2891_v22  ;;  %v2513_v22 = vld [vmem:[%s3103_s1 + $0xe8] sm:$0xff]  }
  0x68   : > { %2313 = vmatpush3.bf16.msra.mxu0 %v2504_v5  ;;  %2218 = vmatprep.subr.bf16.mxu1 %v2505_v39 }
  0x69   : > { %2314 = vmatprep.subr.bf16.mxu0 %v2506_v40  ;;  %2212 = vmatprep.mubr.bf16.mxu1 %v2986_v43 }
  0x6a   : > { %2308 = vmatprep.mubr.bf16.mxu0 %v2917_v16  ;;  %v2012_v16 = vld [vmem:[%s3104_s2] ss:$0 sm:$0xff] }
  0x6b   : > { %2219 = vmatpush3.bf16.msra.mxu1 %v2505_v39 }
  0x6c   : > { %2315 = vmatpush3.bf16.msra.mxu0 %v2506_v40  ;;  %2220 = vmatprep.subr.bf16.mxu1 %v2507_v51 }
  0x6d   : > { %2316 = vmatprep.subr.bf16.mxu0 %v2508_v41 }
  0x6e   : > { %2213 = vmatmul.mubr.bf16.gmra.mrb[4].mxu1 %v2999_v42 }
  0x6f   : > { %2221 = vmatpush3.bf16.msra.mxu1 %v2507_v51  ;;  %2309 = vmatmul.mubr.bf16.gmra.mrb[4].mxu0 %v1939_v52 }
  0x70   : > { %2317 = vmatpush3.bf16.msra.mxu0 %v2508_v41  ;;  %2222 = vmatprep.subr.bf16.mxu1 %v2509_v10 }
  0x71   : > { %2318 = vmatprep.subr.bf16.mxu0 %v2510_v47  ;;  %2232 = vmatprep.mubr.bf16.mxu1 %v1863_v37  ;;  %v2518_v37 = vld [vmem:[%s3103_s1 + $0xf8] sm:$0xff]  }
  0x72   : > { %2328 = vmatprep.mubr.bf16.mxu0 %v2709_v57  ;;  %v2519_v57 = vld [vmem:[%s3103_s1 + $0x1f8] sm:$0xff]  }
  0x73   : > { %2223 = vmatpush3.bf16.msra.mxu1 %v2509_v10 }
  0x74   : > { %2319 = vmatpush3.bf16.msra.mxu0 %v2510_v47  ;;  %2224 = vmatprep.subr.bf16.mxu1 %v2511_v21 }
  0x75   : > { %2320 = vmatprep.subr.bf16.mxu0 %v2512_v48 }
  0x77   : > { %2225 = vmatpush3.bf16.msra.mxu1 %v2511_v21  ;;  %v2532_v21 = vld [vmem:[%s3105_s3] sm:$0xff]  }
  0x78   : > { %2321 = vmatpush3.bf16.msra.mxu0 %v2512_v48  ;;  %2226 = vmatprep.subr.bf16.mxu1 %v2513_v22  ;;  %v2533_v48 = vld [vmem:[%s3105_s3 + $0x8] sm:$0xff]  }
  0x79   : > { %2322 = vmatprep.subr.bf16.mxu0 %v2514_v19 }
  0x7b   : > { %2227 = vmatpush3.bf16.msra.mxu1 %v2513_v22 }
  0x7c   : > { %2323 = vmatpush3.bf16.msra.mxu0 %v2514_v19  ;;  %2228 = vmatprep.subr.bf16.mxu1 %v2515_v14 }
  0x7d   : > { %2324 = vmatprep.subr.bf16.mxu0 %v2516_v20 }
  0x7f   : > { %2229 = vmatpush3.bf16.msra.mxu1 %v2515_v14 }
  0x80   : > { %2325 = vmatpush3.bf16.msra.mxu0 %v2516_v20  ;;  %2230 = vmatprep.subr.bf16.mxu1 %v2518_v37 }
  0x81   : > { %2326 = vmatprep.subr.bf16.mxu0 %v2519_v57 }
  0x83   : > { %2231 = vmatpush3.bf16.msra.mxu1 %v2518_v37 }
  0x84   : > { %2327 = vmatpush3.bf16.msra.mxu0 %v2519_v57 }
  0x85   : > { %2336 = vmatprep.subr.bf16.mxu0 %v2522_v32 }
  0x86   : > { %2233 = vmatmul.mubr.bf16.vlgmr.msra.gmra.mrb[0].mxu1 %v1864_v46  ;;  %v2529_v46 = vld [vmem:[%s3103_s1 + $0x228] sm:$0xff]  }
  0x87   : > { %2329 = vmatmul.mubr.bf16.vlgmr.msra.gmra.mrb[0].mxu0 %v2774_v38  ;;  %2236 = vmatprep.mubr.bf16.mxu1 %v1865_v6  ;;  %v2542_v6 = vmov 0.0  }
  0x88   : > { %2337 = vmatpush3.bf16.msra.mxu0 %v2522_v32  ;;  %2332 = vmatprep.mubr.bf16.mxu0 %v2802_v54 }
  0x89   : > { %2338 = vmatprep.subr.bf16.mxu0 %v2523_v33  ;;  %2360 = vmatprep.subr.bf16.mxu1 %v2542_v6 }
  0x8c   : > { %2339 = vmatpush3.bf16.msra.mxu0 %v2523_v33 }
  0x8d   : > { %2340 = vmatprep.subr.bf16.mxu0 %v2526_v35 }
  0x8e   : > { %2237 = vmatmul.mubr.bf16.gmra.mrb[4].mxu1 %v1866_v44 }
  0x8f   : > { %2333 = vmatmul.mubr.bf16.gmra.mrb[4].mxu0 %v1312_v34  ;;  %2364 = vmatprep.mubr.msk.bf16.mxu1 %vm2543_vm2, %v2542_v6 }
  0x90   : > { %2341 = vmatpush3.bf16.msra.mxu0 %v2526_v35  ;;  %2352 = vmatprep.mubr.bf16.mxu0 %v2976_v4 }
  0x91   : > { %2342 = vmatprep.subr.bf16.mxu0 %v2527_v25 }
  0x94   : > { %2343 = vmatpush3.bf16.msra.mxu0 %v2527_v25 }
  0x95   : > { %2344 = vmatprep.subr.bf16.mxu0 %v2528_v36 }
  0x98   : > { %2345 = vmatpush3.bf16.msra.mxu0 %v2528_v36 }
  0x99   : > { %2346 = vmatprep.subr.bf16.mxu0 %v2529_v46 }
  0x9c   : > { %2347 = vmatpush3.bf16.msra.mxu0 %v2529_v46 }
  0x9d   : > { %2348 = vmatprep.subr.bf16.mxu0 %v2530_v61 }
  0xa0   : > { %2349 = vmatpush3.bf16.msra.mxu0 %v2530_v61 }
  0xa1   : > { %2350 = vmatprep.subr.bf16.mxu0 %v2531_v1 }
  0xa4   : > { %2351 = vmatpush3.bf16.msra.mxu0 %v2531_v1 }
  0xa7   : > { %2353 = vmatmul.mubr.bf16.vlgmr.msra.gmra.mrb[0].mxu0 %v2986_v43 }
  0xa8   : > { %2356 = vmatprep.mubr.bf16.mxu0 %v2999_v42 }
  0xaf   : > { %2357 = vmatmul.mubr.bf16.gmra.mrb[4].mxu0 %v1455_v45 }
 0x159   : > { %v2234_v11 = vpop.f32.mrb[0].mxu1 }
 0x15a   : > { %v834_v23 = vpop.f32.mrb[1].mxu1 }
 0x15b   : > { %v2235_v38 = vpop.f32.mrb[2].mxu1 }
 0x15c   : > { %v837_v44 = vpop.f32.mrb[3].mxu1 }
 0x161   : > { %v2238_v54 = vpop.f32.mrb[4].mxu1 }
 0x162   : > { %v850_v55 = vpop.f32.mrb[5].mxu1 }
 0x163   : > { %v2239_v30 = vpop.f32.mrb[6].mxu1 }
 0x164   : > { %v853_v12 = vpop.f32.mrb[7].mxu1 }
 0x17a   : > { %v2354_v13 = vpop.f32.mrb[0].mxu0 }
 0x17b   : > { %v2376_v49 = vadd.f32 %v2354_v13, %v2234_v11  ;;  %v1555_v17 = vpop.f32.mrb[1].mxu0 }
 0x17c   : > { %v2377_v52 = vadd.f32 %v1555_v17, %v834_v23  ;;  %v2355_v53 = vpop.f32.mrb[2].mxu0 }
 0x17d   : > { %v1603_v56 = vadd.f32 %v2376_v49, %v2012_v16  ;;  %v2378_v58 = vadd.f32 %v2355_v53, %v2235_v38  ;;  %v1558_v59 = vpop.f32.mrb[3].mxu0 }
 0x17e   : > { %v1601_v60 = vadd.f32 %v2377_v52, %v2012_v16  ;;  %v2379_v2 = vadd.f32 %v1558_v59, %v837_v44 }
 0x17f   : > { %v1604_v3 = vadd.f32 %v2378_v58, %v2012_v16  ;;  %v1611_v7 = vmax.f32 %v1603_v56, 0.0 }
 0x180   : > { %v1602_v50 = vadd.f32 %v2379_v2, %v2012_v16  ;;  %v1609_v9 = vmax.f32 %v1601_v60, 0.0 }
 0x181   : > { %v1612_v8 = vmax.f32 %v1604_v3, 0.0 }
 0x182   : > { %v1610_v15 = vmax.f32 %v1602_v50, 0.0  ;;  %v2358_v18 = vpop.f32.mrb[4].mxu0 }
 0x183   : > { %v1618_v24 = vmax.f32 %v1611_v7, %v1612_v8  ;;  %v2380_v27 = vadd.f32 %v2358_v18, %v2238_v54  ;;  %v1571_v26 = vpop.f32.mrb[5].mxu0 }
 0x184   : > { %v1617_v31 = vmax.f32 %v1609_v9, %v1610_v15  ;;  %v2381_v29 = vadd.f32 %v1571_v26, %v850_v55  ;;  %v2359_v34 = vpop.f32.mrb[6].mxu0 }
 0x185   : > { %v1607_v45 = vadd.f32 %v2380_v27, %v2012_v16  ;;  %v2382_v28 = vadd.f32 %v2359_v34, %v2239_v30  ;;  %v1574_v62 = vpop.f32.mrb[7].mxu0 }
 0x186   : > { %v1621_v63 = vpack.c.bf16 %v1618_v24, %v1617_v31  ;;  %v1605_v0 = vadd.f32 %v2381_v29, %v2012_v16  ;;  %v2383_v5 = vadd.f32 %v1574_v62, %v853_v12 }
 0x187   : > { %v1608_v4 = vadd.f32 %v2382_v28, %v2012_v16  ;;  %v1615_v40 = vmax.f32 %v1607_v45, 0.0 }
 0x188   : > { %v1606_v39 = vadd.f32 %v2383_v5, %v2012_v16  ;;  %2361 = vmatpush3.bf16.msra.mxu1 %v1621_v63  ;;  %v1613_v51 = vmax.f32 %v1605_v0, 0.0 }
 0x189   : > { %v1616_v43 = vmax.f32 %v1608_v4, 0.0  ;;  %2362 = vmatprep.subr.bf16.mxu1 %v2542_v6 }
 0x18a   : > { %v1614_v41 = vmax.f32 %v1606_v39, 0.0 }
 0x18b   : > { %v1620_v42 = vmax.f32 %v1615_v40, %v1616_v43 }
 0x18c   : > { %v1619_v10 = vmax.f32 %v1613_v51, %v1614_v41 }
 0x18e   : > { %v1622_v47 = vpack.c.bf16 %v1620_v42, %v1619_v10 }
 0x190   : > { %2363 = vmatpush3.bf16.msra.mxu1 %v1622_v47 }
 0x191   : > { %2368 = vmatprep.subr.bf16.mxu1 %v2542_v6 }
 0x193   : > { %2365 = vmatmul.mubr.msk.bf16.vlgmr.msra.gmra.mrb[8].mxu1 %vm1630_vm3, %v2532_v21 }
 0x194   : > { %2369 = vmatpush3.bf16.msra.mxu1 %v1621_v63  ;;  %2372 = vmatprep.mubr.msk.bf16.mxu1 %vm2543_vm2, %v2542_v6 }
 0x195   : > { %2370 = vmatprep.subr.bf16.mxu1 %v2542_v6 }
 0x198   : > { %2371 = vmatpush3.bf16.msra.mxu1 %v1622_v47 }
 0x19b   : > { %2373 = vmatmul.mubr.msk.bf16.vlgmr.msra.gmra.mrb[12].mxu1 %vm1630_vm3, %v2533_v48 }
 0x266   : > { %v1668_v22 = vpop.f32.mrb[8].mxu1 }
 0x267   : > { %v2366_v19 = vpop.f32.mrb[9].mxu1 }
 0x268   : > { %v1671_v14 = vpop.f32.mrb[10].mxu1 }
 0x269   : > { %v2367_v20 = vpop.f32.mrb[11].mxu1 }
 0x26e   : > { %v1720_v37 = vpop.f32.mrb[12].mxu1 }
 0x26f   : > { %v1727_v57 = vmax.f32 %v1668_v22, %v1720_v37  ;;  %v2374_v32 = vpop.f32.mrb[13].mxu1 }
 0x270   : > { %v1723_v33 = vpop.f32.mrb[14].mxu1 }
 0x271   : > { %v1728_v35 = vmax.f32 %v1671_v14, %v1723_v33  ;;  %v2375_v25 = vpop.f32.mrb[15].mxu1 }
 0x273   : > { %v2028_v36 = vpack.c.bf16 %v1728_v35, %v1727_v57 }
 0x275   : > { %2029 = vst [vmem:[%s197_s8] sm:$0xff] %v2028_v36  }
 0x276 PF: > { %s14_s15 = sadd.s32 1, %s2540_s15  }
 0x277   : > { %p11_p5 = scmp.ge.s32.totalorder %s14_s15, 4  }
 0x279   :  { %13 = sbr.rel (!%p11_p5) target bundleno = 1 (0x1), region = 75 }

// kernel: convnet_forward.7
= control target key start
LH: loop header
LB: loop body
LE: loop exit
PB: predicated region body
PF: predicated region fallthrough
CT: control target
= control target key end

     0   :  { %v287_v28 = vlaneseq  ;;  %v1961_v36 = vmov 1966171168   ;;  %s2412_s0 = inlined_call_operand.vmem [shape: bf16[2,2048], index: 0, kind: input, shape index: {}]   ;;  %s2413_s1 = inlined_call_operand.vmem [shape: bf16[2048,128], index: 1, kind: input, shape index: {}]   ;;  %s2414_s2 = inlined_call_operand.vmem [shape: f32[1,128], index: 2, kind: input, shape index: {}]   ;;  %s2415_s3 = inlined_call_operand.hbm [shape: f32[2,128], index: 3, kind: output, shape index: {}]  }
   0x1   :  { %v1807_v0 = vld [vmem:[%s2413_s1 + $0x40] sm:$0xff]   ;;  %v1811_v4 = vld [vmem:[%s2413_s1 + $0x48] sm:$0xff]   ;;  %v1815_v8 = vld [vmem:[%s2413_s1 + $0x50] sm:$0xff]   ;;  %v285_v37 = vunpack.c.l.s4 %v1961_v36 }
   0x2   :  { %v1808_v1 = vld [vmem:[%s2413_s1 + $0xc0] sm:$0xff]   ;;  %1629 = vmatprep.subr.bf16.mxu0 %v1807_v0  ;;  %v1812_v5 = vld [vmem:[%s2413_s1 + $0xc8] sm:$0xff]   ;;  %v1816_v9 = vld [vmem:[%s2413_s1 + $0xd0] sm:$0xff]   ;;  %v288_v33 = vshrl.u32 %v287_v28, 7 }
   0x3   :  { %v1809_v2 = vld [vmem:[%s2413_s1] sm:$0xff]   ;;  %1651 = vmatprep.subr.bf16.mxu1 %v1808_v1  ;;  %v1813_v6 = vld [vmem:[%s2413_s1 + $0x8] sm:$0xff]   ;;  %v1817_v10 = vld [vmem:[%s2413_s1 + $0x10] sm:$0xff]   ;;  %v286_v40 = vunpack.c.0.s8 %v285_v37 }
   0x4   :  { %v1810_v3 = vld [vmem:[%s2413_s1 + $0x80] sm:$0xff]   ;;  %1630 = vmatpush3.bf16.msra.mxu0 %v1809_v2  ;;  %v1814_v7 = vld [vmem:[%s2413_s1 + $0x88] sm:$0xff]   ;;  %v1818_v11 = vld [vmem:[%s2413_s1 + $0x90] sm:$0xff]  }
   0x5   :  { %1652 = vmatpush3.bf16.msra.mxu1 %v1810_v3  ;;  %1631 = vmatprep.subr.bf16.mxu0 %v1811_v4  ;;  %v1819_v12 = vld [vmem:[%s2413_s1 + $0x58] sm:$0xff]   ;;  %v1823_v16 = vld [vmem:[%s2413_s1 + $0x60] sm:$0xff]   ;;  %v1827_v20 = vld [vmem:[%s2413_s1 + $0x68] sm:$0xff]   ;;  %v2088_v41 = vsub.s32 %v286_v40, %v288_v33 }
   0x6   :  { %1653 = vmatprep.subr.bf16.mxu1 %v1812_v5  ;;  %v1820_v13 = vld [vmem:[%s2413_s1 + $0xd8] sm:$0xff]   ;;  %v1824_v17 = vld [vmem:[%s2413_s1 + $0xe0] sm:$0xff]   ;;  %v1828_v21 = vld [vmem:[%s2413_s1 + $0xe8] sm:$0xff]  }
   0x7   :  { %v1821_v14 = vld [vmem:[%s2413_s1 + $0x18] sm:$0xff]   ;;  %v1825_v18 = vld [vmem:[%s2413_s1 + $0x20] sm:$0xff]   ;;  %v1829_v22 = vld [vmem:[%s2413_s1 + $0x28] sm:$0xff]  }
   0x8   :  { %1632 = vmatpush3.bf16.msra.mxu0 %v1813_v6  ;;  %v1822_v15 = vld [vmem:[%s2413_s1 + $0x98] sm:$0xff]   ;;  %v1826_v19 = vld [vmem:[%s2413_s1 + $0xa0] sm:$0xff]   ;;  %v1830_v23 = vld [vmem:[%s2413_s1 + $0xa8] sm:$0xff]  }
   0x9   :  { %1654 = vmatpush3.bf16.msra.mxu1 %v1814_v7  ;;  %1633 = vmatprep.subr.bf16.mxu0 %v1815_v8  ;;  %v1831_v24 = vld [vmem:[%s2413_s1 + $0x70] sm:$0xff]   ;;  %v1835_v29 = vld [vmem:[%s2413_s1 + $0x78] sm:$0xff]   ;;  %v16_v34 = vld [vmem:[%s2412_s0] sm:$0xff] }
   0xa   :  { %1655 = vmatprep.subr.bf16.mxu1 %v1816_v9  ;;  %v1832_v25 = vld [vmem:[%s2413_s1 + $0xf0] sm:$0xff]   ;;  %v1836_v30 = vld [vmem:[%s2413_s1 + $0xf8] sm:$0xff]   ;;  %v1840_v35 = vld [vmem:[%s2413_s1 + $0x140] sm:$0xff]   ;;  %v283_v39 = vcombine.high %v16_v34, %v16_v34  ;;  %v290_v42 = vrot.slane %v16_v34, %v2088_v41 }
   0xb   :  { %v1833_v26 = vld [vmem:[%s2413_s1 + $0x30] sm:$0xff]   ;;  %v1837_v31 = vld [vmem:[%s2413_s1 + $0x38] sm:$0xff]   ;;  %v1841_v38 = vld [vmem:[%s2413_s1 + $0x1c0] sm:$0xff]  }
   0xc   :  { %1634 = vmatpush3.bf16.msra.mxu0 %v1817_v10  ;;  %v1834_v27 = vld [vmem:[%s2413_s1 + $0xb0] sm:$0xff]   ;;  %v1838_v32 = vld [vmem:[%s2413_s1 + $0xb8] sm:$0xff]   ;;  %v2092_v43 = vrot.slane %v283_v39, %v2088_v41  ;;  %v298_v44 = vcombine.high %v290_v42, %v290_v42  ;;  %v306_v45 = vrot.slane %v290_v42, %v2088_v41  ;;  %v1842_v48 = vld [vmem:[%s2413_s1 + $0x100] sm:$0xff]  }
   0xd   :  { %1656 = vmatpush3.bf16.msra.mxu1 %v1818_v11  ;;  %1635 = vmatprep.subr.bf16.mxu0 %v1819_v12  ;;  %v1844_v51 = vld [vmem:[%s2413_s1 + $0x148] sm:$0xff]   ;;  %v1843_v53 = vld [vmem:[%s2413_s1 + $0x180] sm:$0xff]   ;;  %v1848_v57 = vld [vmem:[%s2413_s1 + $0x150] sm:$0xff]  }
   0xe   :  { %1657 = vmatprep.subr.bf16.mxu1 %v1820_v13  ;;  %v299_v46 = vcombine.high %v2092_v43, %v2092_v43  ;;  %v320_v47 = vrot.slane %v298_v44, %v2088_v41  ;;  %v328_v50 = vcombine.high %v306_v45, %v306_v45  ;;  %v1845_v54 = vld [vmem:[%s2413_s1 + $0x1c8] sm:$0xff]   ;;  %v1849_v59 = vld [vmem:[%s2413_s1 + $0x1d0] sm:$0xff]   ;;  %v1852_v61 = vld [vmem:[%s2413_s1 + $0x158] sm:$0xff]  }
   0xf   :  { %v1846_v56 = vld [vmem:[%s2413_s1 + $0x108] sm:$0xff]   ;;  %v1850_v60 = vld [vmem:[%s2413_s1 + $0x110] sm:$0xff]   ;;  %v1853_v63 = vld [vmem:[%s2413_s1 + $0x1d8] sm:$0xff]  }
  0x10   :  { %1636 = vmatpush3.bf16.msra.mxu0 %v1821_v14  ;;  %v327_v49 = vrot.slane %v299_v46, %v2088_v41  ;;  %1197 = vmatprep.mubr.bf16.mxu0 %v320_v47  ;;  %v330_v52 = vcombine.high %v320_v47, %v320_v47  ;;  %v1847_v58 = vld [vmem:[%s2413_s1 + $0x188] sm:$0xff]   ;;  %v1851_v62 = vld [vmem:[%s2413_s1 + $0x190] sm:$0xff]   ;;  %v1854_v0 = vld [vmem:[%s2413_s1 + $0x118] sm:$0xff]  }
  0x11   :  { %1658 = vmatpush3.bf16.msra.mxu1 %v1822_v15  ;;  %1637 = vmatprep.subr.bf16.mxu0 %v1823_v16  ;;  %v1856_v1 = vld [vmem:[%s2413_s1 + $0x160] sm:$0xff]   ;;  %v1855_v2 = vld [vmem:[%s2413_s1 + $0x198] sm:$0xff]   ;;  %v1860_v5 = vld [vmem:[%s2413_s1 + $0x168] sm:$0xff]  }
  0x12   :  { %1659 = vmatprep.subr.bf16.mxu1 %v1824_v17  ;;  %v331_v55 = vcombine.high %v327_v49, %v327_v49  ;;  %1237 = vmatprep.mubr.bf16.mxu1 %v330_v52  ;;  %v1857_v3 = vld [vmem:[%s2413_s1 + $0x1e0] sm:$0xff]   ;;  %v1861_v7 = vld [vmem:[%s2413_s1 + $0x1e8] sm:$0xff]   ;;  %v1864_v9 = vld [vmem:[%s2413_s1 + $0x170] sm:$0xff]   ;;  %v313_v17 = vrot.slane %v2092_v43, %v2088_v41 }
  0x13   :  { %v1858_v4 = vld [vmem:[%s2413_s1 + $0x120] sm:$0xff]   ;;  %v1862_v8 = vld [vmem:[%s2413_s1 + $0x128] sm:$0xff]   ;;  %v1865_v11 = vld [vmem:[%s2413_s1 + $0x1f0] sm:$0xff]  }
  0x14   :  { %1638 = vmatpush3.bf16.msra.mxu0 %v1825_v18  ;;  %v1859_v6 = vld [vmem:[%s2413_s1 + $0x1a0] sm:$0xff]   ;;  %v1863_v10 = vld [vmem:[%s2413_s1 + $0x1a8] sm:$0xff]   ;;  %v1866_v12 = vld [vmem:[%s2413_s1 + $0x130] sm:$0xff]  }
  0x15   :  { %1660 = vmatpush3.bf16.msra.mxu1 %v1826_v19  ;;  %1639 = vmatprep.subr.bf16.mxu0 %v1827_v20  ;;  %v1868_v13 = vld [vmem:[%s2413_s1 + $0x178] sm:$0xff]   ;;  %v1867_v14 = vld [vmem:[%s2413_s1 + $0x1b0] sm:$0xff]   ;;  %v1872_v18 = vld [vmem:[%s2413_s1 + $0x240] sm:$0xff]  }
  0x16   :  { %1661 = vmatprep.subr.bf16.mxu1 %v1828_v21  ;;  %v1869_v15 = vld [vmem:[%s2413_s1 + $0x1f8] sm:$0xff]   ;;  %v1873_v20 = vld [vmem:[%s2413_s1 + $0x2c0] sm:$0xff]   ;;  %v1879_v28 = vld [vmem:[%s2413_s1 + $0x288] sm:$0xff]  }
  0x17   :  { %v1870_v16 = vld [vmem:[%s2413_s1 + $0x138] sm:$0xff]   ;;  %v1874_v21 = vld [vmem:[%s2413_s1 + $0x200] sm:$0xff]   ;;  %v1892_v39 = vld [vmem:[%s2413_s1 + $0x268] sm:$0xff]  }
  0x18   :  { %1640 = vmatpush3.bf16.msra.mxu0 %v1829_v22  ;;  %v1871_v19 = vld [vmem:[%s2413_s1 + $0x1b8] sm:$0xff]   ;;  %v329_v22 = vcombine.high %v313_v17, %v313_v17  ;;  %v1889_v37 = vld [vmem:[%s2413_s1 + $0x2e0] sm:$0xff]   ;;  %v1893_v42 = vld [vmem:[%s2413_s1 + $0x2e8] sm:$0xff]  }
  0x19   :  { %1662 = vmatpush3.bf16.msra.mxu1 %v1830_v23  ;;  %1641 = vmatprep.subr.bf16.mxu0 %v1831_v24  ;;  %v1876_v23 = vld [vmem:[%s2413_s1 + $0x248] sm:$0xff]   ;;  %v1875_v24 = vld [vmem:[%s2413_s1 + $0x280] sm:$0xff]   ;;  %v1885_v33 = vld [vmem:[%s2413_s1 + $0x2d8] sm:$0xff]  }
  0x1a   :  { %1663 = vmatprep.subr.bf16.mxu1 %v1832_v25  ;;  %v1877_v25 = vld [vmem:[%s2413_s1 + $0x2c8] sm:$0xff]   ;;  %v1886_v34 = vld [vmem:[%s2413_s1 + $0x218] sm:$0xff]   ;;  %v1891_v40 = vld [vmem:[%s2413_s1 + $0x2a0] sm:$0xff]  }
  0x1b   :  { %v1887_v36 = vld [vmem:[%s2413_s1 + $0x298] sm:$0xff]   ;;  %v1894_v43 = vld [vmem:[%s2413_s1 + $0x228] sm:$0xff]   ;;  %v1896_v44 = vld [vmem:[%s2413_s1 + $0x270] sm:$0xff]  }
  0x1c   :  { %1642 = vmatpush3.bf16.msra.mxu0 %v1833_v26  ;;  %v1878_v26 = vld [vmem:[%s2413_s1 + $0x208] sm:$0xff]  }
  0x1d   :  { %1664 = vmatpush3.bf16.msra.mxu1 %v1834_v27  ;;  %1643 = vmatprep.subr.bf16.mxu0 %v1835_v29  ;;  %v1880_v27 = vld [vmem:[%s2413_s1 + $0x250] sm:$0xff]   ;;  %v1895_v46 = vld [vmem:[%s2413_s1 + $0x2a8] sm:$0xff]  }
  0x1e   :  { %1665 = vmatprep.subr.bf16.mxu1 %v1836_v30  ;;  %v1881_v29 = vld [vmem:[%s2413_s1 + $0x2d0] sm:$0xff]  }
  0x1f   :  { %v1882_v30 = vld [vmem:[%s2413_s1 + $0x210] sm:$0xff]  }
  0x20   :  { %1644 = vmatpush3.bf16.msra.mxu0 %v1837_v31  ;;  %v1884_v31 = vld [vmem:[%s2413_s1 + $0x258] sm:$0xff]  }
  0x21   :  { %1666 = vmatpush3.bf16.msra.mxu1 %v1838_v32  ;;  %1673 = vmatprep.subr.bf16.mxu0 %v1840_v35  ;;  %v1883_v32 = vld [vmem:[%s2413_s1 + $0x290] sm:$0xff]   ;;  %v1888_v35 = vld [vmem:[%s2413_s1 + $0x260] sm:$0xff]  }
  0x22   :  { %1695 = vmatprep.subr.bf16.mxu1 %v1841_v38  ;;  %v1890_v38 = vld [vmem:[%s2413_s1 + $0x220] sm:$0xff]  }
  0x23   :  { %1198 = vmatmul.mubr.bf16.vlgmr.msra.gmra.mrb[0].mxu0 %v306_v45  ;;  %v17_v45 = vld [vmem:[%s2412_s0 + $0x8] sm:$0xff] }
  0x24   :  { %1674 = vmatpush3.bf16.msra.mxu0 %v1842_v48  ;;  %1238 = vmatmul.mubr.bf16.vlgmr.msra.gmra.mrb[0].mxu1 %v328_v50  ;;  %v339_v47 = vrot.slane %v17_v45, %v2088_v41  ;;  %v332_v48 = vcombine.high %v17_v45, %v17_v45  ;;  %v1898_v50 = vld [vmem:[%s2413_s1 + $0x230] sm:$0xff]  }
  0x25   :  { %1675 = vmatprep.subr.bf16.mxu0 %v1844_v51  ;;  %1696 = vmatpush3.bf16.msra.mxu1 %v1843_v53  ;;  %v1900_v53 = vld [vmem:[%s2413_s1 + $0x278] sm:$0xff]  }
  0x26   :  { %1277 = vmatprep.mubr.bf16.mxu0 %v327_v49  ;;  %1697 = vmatprep.subr.bf16.mxu1 %v1845_v54  ;;  %v1897_v49 = vld [vmem:[%s2413_s1 + $0x2f0] sm:$0xff]   ;;  %v347_v51 = vcombine.high %v339_v47, %v339_v47  ;;  %v2277_v52 = vrot.slane %v332_v48, %v2088_v41 }
  0x27   :  { %1317 = vmatprep.mubr.bf16.mxu1 %v331_v55  ;;  %v1899_v54 = vld [vmem:[%s2413_s1 + $0x2b0] sm:$0xff]  }
  0x28   :  { %1676 = vmatpush3.bf16.msra.mxu0 %v1846_v56  ;;  %v369_v55 = vrot.slane %v347_v51, %v2088_v41  ;;  %v348_v56 = vcombine.high %v2277_v52, %v2277_v52 }
  0x29   :  { %1677 = vmatprep.subr.bf16.mxu0 %v1848_v57  ;;  %1698 = vmatpush3.bf16.msra.mxu1 %v1847_v58  ;;  %v1901_v57 = vld [vmem:[%s2413_s1 + $0x2f8] sm:$0xff]  }
  0x2a   :  { %1699 = vmatprep.subr.bf16.mxu1 %v1849_v59  ;;  %v1902_v58 = vld [vmem:[%s2413_s1 + $0x238] sm:$0xff]   ;;  %v379_v59 = vcombine.high %v369_v55, %v369_v55 }
  0x2c   :  { %1678 = vmatpush3.bf16.msra.mxu0 %v1850_v60  ;;  %v355_v60 = vrot.slane %v339_v47, %v2088_v41 }
  0x2d   :  { %1679 = vmatprep.subr.bf16.mxu0 %v1852_v61  ;;  %1700 = vmatpush3.bf16.msra.mxu1 %v1851_v62  ;;  %v1904_v61 = vld [vmem:[%s2413_s1 + $0x340] sm:$0xff]   ;;  %v1903_v62 = vld [vmem:[%s2413_s1 + $0x2b8] sm:$0xff]  }
  0x2e   :  { %1701 = vmatprep.subr.bf16.mxu1 %v1853_v63  ;;  %v376_v63 = vrot.slane %v348_v56, %v2088_v41 }
  0x30   :  { %1680 = vmatpush3.bf16.msra.mxu0 %v1854_v0  ;;  %v1905_v0 = vld [vmem:[%s2413_s1 + $0x3c0] sm:$0xff]  }
  0x31   :  { %1681 = vmatprep.subr.bf16.mxu0 %v1856_v1  ;;  %1702 = vmatpush3.bf16.msra.mxu1 %v1855_v2  ;;  %v1906_v1 = vld [vmem:[%s2413_s1 + $0x300] sm:$0xff]   ;;  %v377_v2 = vcombine.high %v355_v60, %v355_v60 }
  0x32   :  { %1703 = vmatprep.subr.bf16.mxu1 %v1857_v3  ;;  %v1908_v3 = vld [vmem:[%s2413_s1 + $0x348] sm:$0xff]  }
  0x34   :  { %1682 = vmatpush3.bf16.msra.mxu0 %v1858_v4  ;;  %v1907_v4 = vld [vmem:[%s2413_s1 + $0x380] sm:$0xff]  }
  0x35   :  { %1683 = vmatprep.subr.bf16.mxu0 %v1860_v5  ;;  %1704 = vmatpush3.bf16.msra.mxu1 %v1859_v6  ;;  %v380_v5 = vcombine.high %v376_v63, %v376_v63  ;;  %v1909_v6 = vld [vmem:[%s2413_s1 + $0x3c8] sm:$0xff]  }
  0x36   :  { %1705 = vmatprep.subr.bf16.mxu1 %v1861_v7  ;;  %v1910_v7 = vld [vmem:[%s2413_s1 + $0x308] sm:$0xff]  }
  0x38   :  { %1684 = vmatpush3.bf16.msra.mxu0 %v1862_v8  ;;  %v1912_v8 = vld [vmem:[%s2413_s1 + $0x350] sm:$0xff]  }
  0x39   :  { %1685 = vmatprep.subr.bf16.mxu0 %v1864_v9  ;;  %1706 = vmatpush3.bf16.msra.mxu1 %v1863_v10  ;;  %v1911_v9 = vld [vmem:[%s2413_s1 + $0x388] sm:$0xff]   ;;  %v1913_v10 = vld [vmem:[%s2413_s1 + $0x3d0] sm:$0xff]  }
  0x3a   :  { %1707 = vmatprep.subr.bf16.mxu1 %v1865_v11  ;;  %v1914_v11 = vld [vmem:[%s2413_s1 + $0x310] sm:$0xff]  }
  0x3c   :  { %1686 = vmatpush3.bf16.msra.mxu0 %v1866_v12  ;;  %v1916_v12 = vld [vmem:[%s2413_s1 + $0x358] sm:$0xff]  }
  0x3d   :  { %1687 = vmatprep.subr.bf16.mxu0 %v1868_v13  ;;  %1708 = vmatpush3.bf16.msra.mxu1 %v1867_v14  ;;  %v1915_v13 = vld [vmem:[%s2413_s1 + $0x390] sm:$0xff]   ;;  %v1917_v14 = vld [vmem:[%s2413_s1 + $0x3d8] sm:$0xff]  }
  0x3e   :  { %1709 = vmatprep.subr.bf16.mxu1 %v1869_v15  ;;  %v1918_v15 = vld [vmem:[%s2413_s1 + $0x318] sm:$0xff]  }
  0x40   :  { %1688 = vmatpush3.bf16.msra.mxu0 %v1870_v16  ;;  %v1920_v16 = vld [vmem:[%s2413_s1 + $0x360] sm:$0xff]  }
  0x41   :  { %1717 = vmatprep.subr.bf16.mxu0 %v1872_v18  ;;  %1710 = vmatpush3.bf16.msra.mxu1 %v1871_v19  ;;  %v1921_v18 = vld [vmem:[%s2413_s1 + $0x3e0] sm:$0xff]  }
  0x42   :  { %1739 = vmatprep.subr.bf16.mxu1 %v1873_v20  ;;  %v1922_v19 = vld [vmem:[%s2413_s1 + $0x320] sm:$0xff]   ;;  %v1924_v20 = vld [vmem:[%s2413_s1 + $0x368] sm:$0xff]  }
  0x43   :  { %1278 = vmatmul.mubr.bf16.vlgmr.msra.gmra.mrb[4].mxu0 %v313_v17  ;;  %v1919_v17 = vld [vmem:[%s2413_s1 + $0x398] sm:$0xff]  }
  0x44   :  { %1718 = vmatpush3.bf16.msra.mxu0 %v1874_v21  ;;  %1318 = vmatmul.mubr.bf16.vlgmr.msra.gmra.mrb[4].mxu1 %v329_v22  ;;  %v1923_v21 = vld [vmem:[%s2413_s1 + $0x3a0] sm:$0xff]   ;;  %v1925_v22 = vld [vmem:[%s2413_s1 + $0x3e8] sm:$0xff]  }
  0x45   :  { %1719 = vmatprep.subr.bf16.mxu0 %v1876_v23  ;;  %1740 = vmatpush3.bf16.msra.mxu1 %v1875_v24  ;;  %v1926_v23 = vld [vmem:[%s2413_s1 + $0x328] sm:$0xff]   ;;  %v1928_v24 = vld [vmem:[%s2413_s1 + $0x370] sm:$0xff]  }
  0x46   :  { %1741 = vmatprep.subr.bf16.mxu1 %v1877_v25  ;;  %1357 = vmatprep.mubr.bf16.mxu0 %v369_v55 }
  0x47   :  { %1397 = vmatprep.mubr.bf16.mxu1 %v379_v59 }
  0x48   :  { %1720 = vmatpush3.bf16.msra.mxu0 %v1878_v26 }
  0x49   :  { %1721 = vmatprep.subr.bf16.mxu0 %v1880_v27  ;;  %1742 = vmatpush3.bf16.msra.mxu1 %v1879_v28 }
  0x4a   :  { %1743 = vmatprep.subr.bf16.mxu1 %v1881_v29 }
  0x4c   :  { %1722 = vmatpush3.bf16.msra.mxu0 %v1882_v30 }
  0x4d   :  { %1723 = vmatprep.subr.bf16.mxu0 %v1884_v31  ;;  %1744 = vmatpush3.bf16.msra.mxu1 %v1883_v32 }
  0x4e   :  { %1745 = vmatprep.subr.bf16.mxu1 %v1885_v33 }
  0x50   :  { %1724 = vmatpush3.bf16.msra.mxu0 %v1886_v34 }
  0x51   :  { %1725 = vmatprep.subr.bf16.mxu0 %v1888_v35  ;;  %1746 = vmatpush3.bf16.msra.mxu1 %v1887_v36 }
  0x52   :  { %1747 = vmatprep.subr.bf16.mxu1 %v1889_v37 }
  0x54   :  { %1726 = vmatpush3.bf16.msra.mxu0 %v1890_v38 }
  0x55   :  { %1727 = vmatprep.subr.bf16.mxu0 %v1892_v39  ;;  %1748 = vmatpush3.bf16.msra.mxu1 %v1891_v40 }
  0x56   :  { %1749 = vmatprep.subr.bf16.mxu1 %v1893_v42 }
  0x58   :  { %1728 = vmatpush3.bf16.msra.mxu0 %v1894_v43 }
  0x59   :  { %1729 = vmatprep.subr.bf16.mxu0 %v1896_v44  ;;  %1750 = vmatpush3.bf16.msra.mxu1 %v1895_v46 }
  0x5a   :  { %1751 = vmatprep.subr.bf16.mxu1 %v1897_v49 }
  0x5c   :  { %1730 = vmatpush3.bf16.msra.mxu0 %v1898_v50 }
  0x5d   :  { %1731 = vmatprep.subr.bf16.mxu0 %v1900_v53  ;;  %1752 = vmatpush3.bf16.msra.mxu1 %v1899_v54 }
  0x5e   :  { %1753 = vmatprep.subr.bf16.mxu1 %v1901_v57 }
  0x60   :  { %1732 = vmatpush3.bf16.msra.mxu0 %v1902_v58 }
  0x61   :  { %1761 = vmatprep.subr.bf16.mxu0 %v1904_v61  ;;  %1754 = vmatpush3.bf16.msra.mxu1 %v1903_v62 }
  0x62   :  { %1783 = vmatprep.subr.bf16.mxu1 %v1905_v0 }
  0x63   :  { %1358 = vmatmul.mubr.bf16.vlgmr.msra.gmra.mrb[8].mxu0 %v355_v60 }
  0x64   :  { %1762 = vmatpush3.bf16.msra.mxu0 %v1906_v1  ;;  %1437 = vmatprep.mubr.bf16.mxu0 %v376_v63 }
  0x65   :  { %1398 = vmatmul.mubr.bf16.vlgmr.msra.gmra.mrb[8].mxu1 %v377_v2  ;;  %1763 = vmatprep.subr.bf16.mxu0 %v1908_v3 }
  0x66   :  { %1784 = vmatpush3.bf16.msra.mxu1 %v1907_v4  ;;  %1477 = vmatprep.mubr.bf16.mxu1 %v380_v5 }
  0x67   :  { %1785 = vmatprep.subr.bf16.mxu1 %v1909_v6 }
  0x68   :  { %1764 = vmatpush3.bf16.msra.mxu0 %v1910_v7 }
  0x69   :  { %1765 = vmatprep.subr.bf16.mxu0 %v1912_v8 }
  0x6a   :  { %1786 = vmatpush3.bf16.msra.mxu1 %v1911_v9 }
  0x6b   :  { %1787 = vmatprep.subr.bf16.mxu1 %v1913_v10 }
  0x6c   :  { %1766 = vmatpush3.bf16.msra.mxu0 %v1914_v11 }
  0x6d   :  { %1767 = vmatprep.subr.bf16.mxu0 %v1916_v12 }
  0x6e   :  { %1788 = vmatpush3.bf16.msra.mxu1 %v1915_v13 }
  0x6f   :  { %1789 = vmatprep.subr.bf16.mxu1 %v1917_v14 }
  0x70   :  { %1768 = vmatpush3.bf16.msra.mxu0 %v1918_v15 }
  0x71   :  { %1769 = vmatprep.subr.bf16.mxu0 %v1920_v16 }
  0x72   :  { %1790 = vmatpush3.bf16.msra.mxu1 %v1919_v17 }
  0x73   :  { %1791 = vmatprep.subr.bf16.mxu1 %v1921_v18 }
  0x74   :  { %1770 = vmatpush3.bf16.msra.mxu0 %v1922_v19 }
  0x75   :  { %1771 = vmatprep.subr.bf16.mxu0 %v1924_v20 }
  0x76   :  { %8 = vsyncpa [#allocation3], 0  ;;  %1792 = vmatpush3.bf16.msra.mxu1 %v1923_v21  ;;  %v1927_v25 = vld [vmem:[%s2413_s1 + $0x3a8] sm:$0xff]   ;;  %v1929_v26 = vld [vmem:[%s2413_s1 + $0x3f0] sm:$0xff]   ;;  %v362_v32 = vrot.slane %v2277_v52, %v2088_v41 }
  0x77   :  { %1793 = vmatprep.subr.bf16.mxu1 %v1925_v22  ;;  %v1930_v27 = vld [vmem:[%s2413_s1 + $0x330] sm:$0xff]   ;;  %v1932_v28 = vld [vmem:[%s2413_s1 + $0x378] sm:$0xff]   ;;  %v1500_v36 = vld [vmem:[%s2414_s2] ss:$0 sm:$0xff] }
  0x78   :  { %1772 = vmatpush3.bf16.msra.mxu0 %v1926_v23  ;;  %v1931_v29 = vld [vmem:[%s2413_s1 + $0x3b0] sm:$0xff]   ;;  %v1933_v30 = vld [vmem:[%s2413_s1 + $0x3f8] sm:$0xff]   ;;  %v378_v34 = vcombine.high %v362_v32, %v362_v32 }
  0x79   :  { %1773 = vmatprep.subr.bf16.mxu0 %v1928_v24  ;;  %v1934_v31 = vld [vmem:[%s2413_s1 + $0x338] sm:$0xff]  }
  0x7a   :  { %1794 = vmatpush3.bf16.msra.mxu1 %v1927_v25  ;;  %v1935_v33 = vld [vmem:[%s2413_s1 + $0x3b8] sm:$0xff]   ;;  %s1962_s1 = smov [#allocation2]  }
  0x7b   :  { %1795 = vmatprep.subr.bf16.mxu1 %v1929_v26  ;;  %s1492_s2 = sshll.u32 %s1962_s1, 4  ;;  %s1493_s2 = int_to_ptr.vmem [resolvable:$true] %s1492_s2 }
  0x7c   :  { %1774 = vmatpush3.bf16.msra.mxu0 %v1930_v27  ;;  %s1937_s28 = scalar_lea.vmem %s1493_s2, 32  ;;  %p1942_p1 = scmp.lt.s32.totalorder %s1493_s2, %s1493_s2 }
  0x7d   :  { %1775 = vmatprep.subr.bf16.mxu0 %v1932_v28  ;;  %p1938_p0 = scmp.ne.s32.totalorder %s1493_s2, %s1937_s28  ;;  %p1943_p2 = scmp.lt.s32.totalorder %s1937_s28, %s1937_s28 }
  0x7e   :  { %1796 = vmatpush3.bf16.msra.mxu1 %v1931_v29 }
  0x7f   :  { %1797 = vmatprep.subr.bf16.mxu1 %v1933_v30  ;;  %p1944_p3 = por %p1943_p2, %p1942_p1 }
  0x80   :  { %1776 = vmatpush3.bf16.msra.mxu0 %v1934_v31 }
  0x81   :  { %p1945_p4 = pnand %p1944_p3, %p1938_p0 }
  0x82   :  { %1798 = vmatpush3.bf16.msra.mxu1 %v1935_v33 }
  0x83   :  { %1438 = vmatmul.mubr.bf16.vlgmr.msra.gmra.mrb[12].mxu0 %v362_v32 }
  0x85   :  { %1478 = vmatmul.mubr.bf16.vlgmr.msra.gmra.mrb[12].mxu1 %v378_v34 }
  0xf6   :  { %v1645_v35 = vpop.f32.mrb[0].mxu0 }
  0xf7   :  { %v1646_v37 = vpop.f32.mrb[1].mxu0  ;;  %v1667_v38 = vpop.f32.mrb[0].mxu1 }
  0xf8   :  { %v1647_v39 = vadd.f32 %v1646_v37, %v1645_v35  ;;  %v1648_v41 = vpop.f32.mrb[2].mxu0  ;;  %v1668_v40 = vpop.f32.mrb[1].mxu1 }
  0xf9   :  { %v1649_v42 = vpop.f32.mrb[3].mxu0  ;;  %v1669_v44 = vadd.f32 %v1668_v40, %v1667_v38  ;;  %v1670_v45 = vpop.f32.mrb[2].mxu1 }
  0xfa   :  { %v1200_v43 = vadd.f32 %v1647_v39, %v1500_v36  ;;  %v1671_v46 = vpop.f32.mrb[3].mxu1 }
  0xfc   :  { %v1240_v47 = vadd.f32 %v1669_v44, %v1200_v43 }
 0x116   :  { %v1689_v48 = vpop.f32.mrb[4].mxu0 }
 0x117   :  { %v1690_v49 = vpop.f32.mrb[5].mxu0  ;;  %v1711_v50 = vpop.f32.mrb[4].mxu1 }
 0x118   :  { %v1691_v51 = vadd.f32 %v1690_v49, %v1689_v48  ;;  %v1692_v52 = vpop.f32.mrb[6].mxu0  ;;  %v1712_v53 = vpop.f32.mrb[5].mxu1 }
 0x119   :  { %v1693_v54 = vpop.f32.mrb[7].mxu0  ;;  %v1713_v56 = vadd.f32 %v1712_v53, %v1711_v50  ;;  %v1714_v57 = vpop.f32.mrb[6].mxu1 }
 0x11a   :  { %v1280_v55 = vadd.f32 %v1691_v51, %v1240_v47  ;;  %v1715_v58 = vpop.f32.mrb[7].mxu1 }
 0x11c   :  { %v1320_v59 = vadd.f32 %v1713_v56, %v1280_v55 }
 0x136   :  { %v1733_v60 = vpop.f32.mrb[8].mxu0 }
 0x137   :  { %v1734_v61 = vpop.f32.mrb[9].mxu0 }
 0x138   :  { %v1755_v62 = vpop.f32.mrb[8].mxu1  ;;  %v1735_v63 = vadd.f32 %v1734_v61, %v1733_v60  ;;  %v1736_v0 = vpop.f32.mrb[10].mxu0 }
 0x139   :  { %v1756_v1 = vpop.f32.mrb[9].mxu1  ;;  %v1737_v2 = vpop.f32.mrb[11].mxu0 }
 0x13a   :  { %v1360_v3 = vadd.f32 %v1735_v63, %v1320_v59  ;;  %v1757_v4 = vadd.f32 %v1756_v1, %v1755_v62  ;;  %v1758_v5 = vpop.f32.mrb[10].mxu1 }
 0x13b   :  { %v1759_v6 = vpop.f32.mrb[11].mxu1 }
 0x13c   :  { %v1400_v7 = vadd.f32 %v1757_v4, %v1360_v3 }
 0x156   :  { %v1777_v8 = vpop.f32.mrb[12].mxu0 }
 0x157   :  { %v1778_v9 = vpop.f32.mrb[13].mxu0 }
 0x158   :  { %v1799_v10 = vpop.f32.mrb[12].mxu1  ;;  %v1779_v11 = vadd.f32 %v1778_v9, %v1777_v8  ;;  %v1780_v12 = vpop.f32.mrb[14].mxu0 }
 0x159   :  { %v1800_v13 = vpop.f32.mrb[13].mxu1  ;;  %v1781_v14 = vpop.f32.mrb[15].mxu0 }
 0x15a   :  { %v1440_v15 = vadd.f32 %v1779_v11, %v1400_v7  ;;  %v1801_v16 = vadd.f32 %v1800_v13, %v1799_v10  ;;  %v1802_v17 = vpop.f32.mrb[14].mxu1 }
 0x15b   :  { %v1803_v18 = vpop.f32.mrb[15].mxu1 }
 0x15c   :  { %v1480_v19 = vadd.f32 %v1801_v16, %v1440_v15 }
 0x15e   :  { %1485 = vst [vmem:[#allocation2] sm:$0x3] %v1480_v19 }
 0x15f   :  { %1948 = shalt.err (!%p1945_p4)
}
 0x160   :  { %s1949_s4 = scalar_lea.hbm %s2415_s3, 32 }
 0x161   :  { %p1950_p5 = scmp.ne.s32.totalorder %s2415_s3, %s1949_s4  ;;  %p1953_p6 = scmp.lt.u32.totalorder %s1949_s4, %s2415_s3 }
 0x163   :  { %p1955_p7 = pnand %p1953_p6, %p1950_p5 }
 0x165   :  { %1958 = shalt.err (!%p1955_p7)
}
 0x166   :  { %1495 = dma.vmem_to_hbm [thread:$0]  %s1493_s2, 32, %s2415_s3, [#allocation3]  }
 0x167   :  { %1959 = dma.done.wait [#allocation3], 32  }
 0x168   :  { %1960 = vsyncadd [#allocation3], 4294967264 }
 0x169   :  { %1499 = vsyncpa [#allocation3], 1 }

// kernel: convnet_forward.4
= control target key start
LH: loop header
LB: loop body
LE: loop exit
PB: predicated region body
PF: predicated region fallthrough
CT: control target
= control target key end

     0   :  { %s14744_s15 = smov 0   ;;  %s18716_s0 = inlined_call_operand.vmem [shape: bf16[2,34,34,128], index: 0, kind: input, shape index: {}]   ;;  %s18717_s1 = inlined_call_operand.vmem [shape: bf16[9,128,128], index: 1, kind: input, shape index: {}]   ;;  %s18718_s2 = inlined_call_operand.vmem [shape: f32[1,128], index: 2, kind: input, shape index: {}]   ;;  %s18719_s3 = inlined_call_operand.vmem [shape: bf16[2,256,512], index: 3, kind: input, shape index: {}]   ;;  %s18720_s4 = inlined_call_operand.vmem [shape: bf16[512,128], index: 4, kind: output, shape index: {}]  }
   0x1 LB: > { %s14750_s16 = sadd.s32 4294967295, %s14717_s15   ;;  %p10209_p0 = scmp.ge.s32.totalorder %s14717_s15, 1  ;;  %s14717_s15 = sphi %s14744_s15, %s14_s15  }
   0x2   : > { %p162_p1 = scmp.lt.s32.totalorder %s14717_s15, 3 }
   0x4   : > { %p163_p2 = pnand %p10209_p0, %p162_p1 }
   0x6   : > { %166 = sbr.rel (%p163_p2) target bundleno = 2280 (0x8e8), region = 36 }
   0xd   : > { %v14276_v0 = vld [vmem:[%s18717_s1 + $0x40] sm:$0xff]   ;;  %p188_p3 = scmp.lt.s32.totalorder %s14750_s16, 1  ;;  %v14278_v2 = vld [vmem:[%s18717_s1 + $0x48] sm:$0xff]   ;;  %v14280_v4 = vld [vmem:[%s18717_s1 + $0x50] sm:$0xff]   ;;  %vm780_vm0 = vcmask 1046528   ;;  %vm2464_vm1 = vcmask 1045504  }
   0xe   : > { %v14277_v1 = vld [vmem:[%s18717_s1 + $0xc0] sm:$0xff]   ;;  %11931 = vmatprep.subr.bf16.mxu1 %v14276_v0  ;;  %v14279_v3 = vld [vmem:[%s18717_s1 + $0xc8] sm:$0xff]   ;;  %v14281_v5 = vld [vmem:[%s18717_s1 + $0xd0] sm:$0xff]   ;;  %s10211_s13 = sshll.u32 %s14750_s16, 5 }
   0xf   : > { %12363 = vmatprep.subr.bf16.mxu0 %v14277_v1  ;;  %11932 = vmatpush3.bf16.msra.mxu1 %v14276_v0  ;;  %s189_s29 = scalar_select %p188_p3, %s14750_s16, 1  ;;  %v14282_v6 = vld [vmem:[%s18717_s1 + $0x58] sm:$0xff]   ;;  %v14284_v8 = vld [vmem:[%s18717_s1 + $0x60] sm:$0xff]   ;;  %v14286_v10 = vld [vmem:[%s18717_s1 + $0x68] sm:$0xff]  }
  0x10   : > { %12364 = vmatpush3.bf16.msra.mxu0 %v14277_v1  ;;  %11933 = vmatprep.subr.bf16.mxu1 %v14278_v2  ;;  %v14283_v7 = vld [vmem:[%s18717_s1 + $0xd8] sm:$0xff]   ;;  %v14285_v9 = vld [vmem:[%s18717_s1 + $0xe0] sm:$0xff]   ;;  %v14287_v14 = vld [vmem:[%s18717_s1 + $0xe8] sm:$0xff]   ;;  %p194_p4 = scmp.lt.s32.totalorder %s10211_s13, 63 }
  0x11   : > { %12365 = vmatprep.subr.bf16.mxu0 %v14279_v3  ;;  %s14267_s8 = smul.u32 680, %s189_s29  ;;  %v14288_v26 = vld [vmem:[%s18717_s1 + $0x70] sm:$0xff]   ;;  %v14290_v38 = vld [vmem:[%s18717_s1 + $0x78] sm:$0xff]   ;;  %v14313_v55 = vld [vmem:[%s18717_s1 + $0x100] sm:$0xff]  }
  0x12   : > { %v14289_v27 = vld [vmem:[%s18717_s1 + $0xf0] sm:$0xff]   ;;  %v14291_v42 = vld [vmem:[%s18717_s1 + $0xf8] sm:$0xff]   ;;  %v14318_v0 = vld [vmem:[%s18717_s1 + $0x108] sm:$0xff]   ;;  %s20057_s13 = smov (!%p194_p4, %s10211_s13), 63 }
  0x13   : > { %11934 = vmatpush3.bf16.msra.mxu1 %v14278_v2  ;;  %s14789_s17 = scalar_lea.vmem %s18716_s0, %s14267_s8  ;;  %s10212_s14 = sshll.u32 %s20057_s13, 2 }
  0x14   : > { %12366 = vmatpush3.bf16.msra.mxu0 %v14279_v3  ;;  %11935 = vmatprep.subr.bf16.mxu1 %v14280_v4  ;;  %v14795_v11 = vld [vmem:[%s14789_s17] sm:$0xff]   ;;  %v14798_v12 = vld [vmem:[%s14789_s17 + $0x8] sm:$0xff]   ;;  %v14801_v13 = vld [vmem:[%s14789_s17 + $0x14] sm:$0xff]   ;;  %s18635_s19 = scalar_lea.vmem %s18720_s4, %s10212_s14 }
  0x15   : > { %12367 = vmatprep.subr.bf16.mxu0 %v14281_v5  ;;  %19132 = vst [vmem:[#allocation2_spill] sm:$0xff] %v14795_v11  ;;  %19133 = vst [vmem:[#allocation3_spill] sm:$0xff] %v14798_v12  ;;  %v18722_v15 = vunpack.c.l.bf16 %v14795_v11  ;;  %v18721_v16 = vunpack.c.h.bf16 %v14795_v11  ;;  %v18723_v17 = vunpack.c.l.bf16 %v14798_v12  ;;  %v14810_v18 = vld [vmem:[%s14789_s17 + $0x10] sm:$0x1]  ;;  %v18763_v19 = vunpack.c.l.bf16 %v14801_v13  ;;  %12379 = vmatprep.mubr.bf16.mxu0 %v14801_v13  ;;  %v14832_v30 = vld [vmem:[%s14789_s17 + $0x1c] sm:$0xff]  }
  0x16   : > { %19134 = vst [vmem:[#allocation4_spill] sm:$0xff] %v14810_v18  ;;  %v18760_v20 = vunpack.c.h.bf16 %v14801_v13  ;;  %v18725_v21 = vunpack.c.h.bf16 %v14798_v12  ;;  %v18724_v25 = vunpack.c.l.bf16 %v14810_v18  ;;  %v377_v33 = vunpack.c.l.bf16 %v14832_v30  ;;  %v14850_v41 = vld [vmem:[%s14789_s17 + $0x24] sm:$0x1]  ;;  %v14866_v48 = vld [vmem:[%s14789_s17 + $0x28] sm:$0xff]   ;;  %v14870_v50 = vld [vmem:[%s14789_s17 + $0x30] sm:$0xff]  }
  0x17   : > { %11936 = vmatpush3.bf16.msra.mxu1 %v14280_v4  ;;  %v781_v22 = vrot.slane %v18722_v15, 1  ;;  %v782_v23 = vrot.slane %v18721_v16, 1  ;;  %v784_v24 = vrot.slane %v18723_v17, 1  ;;  %v790_v34 = vrot.slane %v18763_v19, 1  ;;  %19135 = vst [vmem:[#allocation5_spill] sm:$0xff] %v14866_v48  ;;  %19136 = vst [vmem:[#allocation6_spill] sm:$0xff] %v14870_v50 }
  0x18   : > { %12368 = vmatpush3.bf16.msra.mxu0 %v14281_v5  ;;  %11937 = vmatprep.subr.bf16.mxu1 %v14282_v6  ;;  %v786_v32 = vrot.slane %v18725_v21, 1  ;;  %v791_v35 = vrot.slane %v18760_v20, 1  ;;  %v788_v36 = vrot.slane %v18724_v25, 1  ;;  %v378_v37 = vunpack.c.h.bf16 %v14832_v30  ;;  %v14890_v63 = vld [vmem:[%s14789_s17 + $0x38] sm:$0x1]  ;;  %v14897_v2 = vld [vmem:[%s14789_s17 + $0x3c] sm:$0xff]  }
  0x19   : > { %12369 = vmatprep.subr.bf16.mxu0 %v14283_v7  ;;  %v783_v28 = vsel %vm780_vm0, %v781_v22, %v782_v23  ;;  %v785_v29 = vsel %vm780_vm0, %v782_v23, %v784_v24  ;;  %v793_v39 = vrot.slane %v377_v33, 1  ;;  %v14847_v40 = vrot.slane %v377_v33, 2  ;;  %19137 = vst [vmem:[#allocation7_spill] sm:$0xff] %v14897_v2  ;;  %v14323_v22 = vld [vmem:[%s18717_s1 + $0x110] sm:$0xff]   ;;  %v14324_v33 = vld [vmem:[%s18717_s1 + $0x118] sm:$0xff]   ;;  %v15032_v21 = vld [vmem:[%s14789_s17 + $0x80] sm:$0xff]  }
  0x1a   : > { %v1197_v31 = vpack.c.bf16 %v785_v29, %v783_v28  ;;  %v14855_v43 = vrot.slane %v378_v37, 2  ;;  %v787_v44 = vsel %vm780_vm0, %v784_v24, %v786_v32  ;;  %v789_v45 = vsel %vm780_vm0, %v786_v32, %v788_v36  ;;  %v14927_v29 = vld [vmem:[%s14789_s17 + $0x4c] sm:$0x1]  ;;  %v15028_v25 = vld [vmem:[%s14789_s17 + $0x78] sm:$0xff]   ;;  %19152 = vst [vmem:[#allocation22_spill] sm:$0xff] %v15032_v21 }
  0x1b   : > { %11938 = vmatpush3.bf16.msra.mxu1 %v14282_v6  ;;  %v792_v47 = vsel %vm780_vm0, %v790_v34, %v791_v35  ;;  %v18759_v49 = vunpack.c.l.bf16 %v14850_v41  ;;  %v794_v51 = vsel %vm780_vm0, %v791_v35, %v793_v39  ;;  %v18758_v52 = vunpack.c.l.bf16 %v14866_v48  ;;  %19140 = vst [vmem:[#allocation10_spill] sm:$0xff] %v14927_v29  ;;  %v14939_v35 = vld [vmem:[%s14789_s17 + $0x50] sm:$0xff]   ;;  %19151 = vst [vmem:[#allocation21_spill] sm:$0xff] %v15028_v25 }
  0x1c   : > { %12370 = vmatpush3.bf16.msra.mxu0 %v14283_v7  ;;  %11939 = vmatprep.subr.bf16.mxu1 %v14284_v8  ;;  %v14862_v46 = vsel %vm2464_vm1, %v14847_v40, %v14855_v43  ;;  %v18757_v53 = vunpack.c.h.bf16 %v14866_v48  ;;  %v18756_v54 = vunpack.c.l.bf16 %v14870_v50  ;;  %v1198_v56 = vpack.c.bf16 %v789_v45, %v787_v44  ;;  %v14906_v7 = vld [vmem:[%s14789_s17 + $0x44] sm:$0xff]   ;;  %19141 = vst [vmem:[#allocation11_spill] sm:$0xff] %v14939_v35 }
  0x1d   : > { %12371 = vmatprep.subr.bf16.mxu0 %v14285_v9  ;;  %11947 = vmatprep.mubr.bf16.mxu1 %v1197_v31  ;;  %v795_v57 = vrot.slane %v378_v37, 1  ;;  %v14879_v58 = vpack.c.bf16 %v794_v51, %v792_v47  ;;  %v797_v59 = vrot.slane %v18759_v49, 1  ;;  %v799_v60 = vrot.slane %v18758_v52, 1  ;;  %19138 = vst [vmem:[#allocation8_spill] sm:$0xff] %v14906_v7  ;;  %v15148_v52 = vld [vmem:[%s14789_s17 + $0xc4] sm:$0x1] }
  0x1e   : > { %v800_v61 = vrot.slane %v18757_v53, 1  ;;  %v802_v62 = vrot.slane %v18756_v54, 1  ;;  %v18750_v1 = vunpack.c.h.bf16 %v14870_v50  ;;  %v18748_v5 = vunpack.c.l.bf16 %v14897_v2  ;;  %19168 = vst [vmem:[#allocation38_spill] sm:$0xff] %v15148_v52 }
  0x1f   : > { %11940 = vmatpush3.bf16.msra.mxu1 %v14284_v8  ;;  %v796_v3 = vsel %vm780_vm0, %v793_v39, %v795_v57  ;;  %v798_v4 = vsel %vm780_vm0, %v795_v57, %v797_v59  ;;  %v18749_v6 = vunpack.c.l.bf16 %v14890_v63  ;;  %v18740_v37 = vunpack.c.h.bf16 %v14906_v7 }
  0x20   : > { %12372 = vmatpush3.bf16.msra.mxu0 %v14285_v9  ;;  %11941 = vmatprep.subr.bf16.mxu1 %v14286_v10  ;;  %v801_v8 = vsel %vm780_vm0, %v799_v60, %v800_v61  ;;  %v803_v9 = vsel %vm780_vm0, %v800_v61, %v802_v62  ;;  %v14916_v23 = vpack.c.bf16 %v798_v4, %v796_v3  ;;  %v804_v24 = vrot.slane %v18750_v1, 1 }
  0x21   : > { %12373 = vmatprep.subr.bf16.mxu0 %v14287_v14  ;;  %v806_v28 = vrot.slane %v18749_v6, 1  ;;  %v18739_v39 = vunpack.c.l.bf16 %v14927_v29  ;;  %v18737_v47 = vunpack.c.h.bf16 %v14939_v35  ;;  %v813_v59 = vrot.slane %v18740_v37, 1 }
  0x22   : > { %v805_v34 = vsel %vm780_vm0, %v802_v62, %v804_v24 }
  0x23   : > { %11942 = vmatpush3.bf16.msra.mxu1 %v14286_v10  ;;  %v18747_v10 = vunpack.c.h.bf16 %v14897_v2  ;;  %v807_v36 = vsel %vm780_vm0, %v804_v24, %v806_v28  ;;  %v815_v62 = vrot.slane %v18739_v39, 1  ;;  %v818_v3 = vrot.slane %v18737_v47, 1  ;;  %v14987_v28 = vld [vmem:[%s14789_s17 + $0x6c] sm:$0xff]  }
  0x24   : > { %12374 = vmatpush3.bf16.msra.mxu0 %v14287_v14  ;;  %11943 = vmatprep.subr.bf16.mxu1 %v14288_v26  ;;  %v18746_v14 = vunpack.c.l.bf16 %v14906_v7  ;;  %v14961_v57 = vpack.c.bf16 %v807_v36, %v805_v34  ;;  %19147 = vst [vmem:[#allocation17_spill] sm:$0xff] %v14987_v28  ;;  %v18726_v34 = vunpack.c.l.bf16 %v14987_v28 }
  0x25   : > { %12375 = vmatprep.subr.bf16.mxu0 %v14289_v27  ;;  %v809_v31 = vrot.slane %v18747_v10, 1 }
  0x26   : > { %v811_v32 = vrot.slane %v18746_v14, 1  ;;  %19144 = vst [vmem:[#allocation14_spill] sm:$0xff] %v14961_v57  ;;  %v829_v15 = vrot.slane %v18726_v34, 1  ;;  %v18735_v34 = vunpack.c.l.bf16 %v15028_v25 }
  0x27   : > { %11944 = vmatpush3.bf16.msra.mxu1 %v14288_v26  ;;  %v14920_v26 = vpack.c.bf16 %v803_v9, %v801_v8 }
  0x28   : > { %12376 = vmatpush3.bf16.msra.mxu0 %v14289_v27  ;;  %11945 = vmatprep.subr.bf16.mxu1 %v14290_v38  ;;  %v808_v27 = vrot.slane %v18748_v5, 1  ;;  %v812_v45 = vsel %vm780_vm0, %v809_v31, %v811_v32 }
  0x29   : > { %12377 = vmatprep.subr.bf16.mxu0 %v14291_v42  ;;  %19139 = vst [vmem:[#allocation9_spill] sm:$0xff] %v14920_v26 }
  0x2a   : > { %v810_v44 = vsel %vm780_vm0, %v808_v27, %v809_v31  ;;  %v814_v31 = vsel %vm780_vm0, %v811_v32, %v813_v59  ;;  %v14331_v32 = vld [vmem:[%s18717_s1 + $0x130] sm:$0xff]  }
  0x2b   : > { %11946 = vmatpush3.bf16.msra.mxu1 %v14290_v38  ;;  %v18738_v38 = vunpack.c.l.bf16 %v14939_v35  ;;  %v14965_v60 = vpack.c.bf16 %v812_v45, %v810_v44 }
  0x2c   : > { %12378 = vmatpush3.bf16.msra.mxu0 %v14291_v42  ;;  %v14948_v42 = vld [vmem:[%s14789_s17 + $0x58] sm:$0xff]  }
  0x2d   : > { %12507 = vmatprep.subr.bf16.mxu0 %v14313_v55  ;;  %19142 = vst [vmem:[#allocation12_spill] sm:$0xff] %v14948_v42  ;;  %v18731_v51 = vunpack.c.l.bf16 %v14948_v42  ;;  %19145 = vst [vmem:[#allocation15_spill] sm:$0xff] %v14965_v60  ;;  %v817_v61 = vrot.slane %v18738_v38, 1  ;;  %v18730_v8 = vunpack.c.h.bf16 %v14948_v42 }
  0x2e   : > { %11948 = vmatmul.mubr.bf16.vlgmr.msra.gmra.mrb[0].mxu1 %v1198_v56  ;;  %v14327_v56 = vld [vmem:[%s18717_s1 + $0x120] sm:$0xff]  }
  0x2f   : > { %12380 = vmatmul.mubr.bf16.vlgmr.msra.gmra.mrb[0].mxu0 %v14832_v30  ;;  %11951 = vmatprep.mubr.bf16.mxu1 %v14879_v58  ;;  %v820_v4 = vrot.slane %v18731_v51, 1  ;;  %v819_v36 = vsel %vm780_vm0, %v817_v61, %v818_v3  ;;  %v822_v45 = vrot.slane %v18730_v8, 1  ;;  %v835_v8 = vrot.slane %v18735_v34, 1  ;;  %v15058_v51 = vld [vmem:[%s14789_s17 + $0x8c] sm:$0xff]  }
  0x30   : > { %12383 = vmatprep.mubr.bf16.mxu0 %v14866_v48  ;;  %12508 = vmatpush3.bf16.msra.mxu0 %v14313_v55  ;;  %v14956_v55 = vld [vmem:[%s14789_s17 + $0x60] sm:$0x1]  ;;  %19156 = vst [vmem:[#allocation26_spill] sm:$0xff] %v15058_v51 }
  0x31   : > { %12509 = vmatprep.subr.bf16.mxu0 %v14318_v0  ;;  %19143 = vst [vmem:[#allocation13_spill] sm:$0xff] %v14956_v55  ;;  %v18729_v27 = vunpack.c.l.bf16 %v14956_v55  ;;  %v821_v44 = vsel %vm780_vm0, %v818_v3, %v820_v4 }
  0x32   : > { %v15013_v3 = vpack.c.bf16 %v821_v44, %v819_v36  ;;  %v18736_v44 = vunpack.c.h.bf16 %v14987_v28 }
  0x34   : > { %12510 = vmatpush3.bf16.msra.mxu0 %v14318_v0  ;;  %v14972_v0 = vld [vmem:[%s14789_s17 + $0x64] sm:$0xff]   ;;  %19150 = vst [vmem:[#allocation20_spill] sm:$0xff] %v15013_v3 }
  0x35   : > { %12511 = vmatprep.subr.bf16.mxu0 %v14323_v22  ;;  %19146 = vst [vmem:[#allocation16_spill] sm:$0xff] %v14972_v0  ;;  %v18728_v9 = vunpack.c.l.bf16 %v14972_v0  ;;  %v18727_v24 = vunpack.c.h.bf16 %v14972_v0 }
  0x36   : > { %11952 = vmatmul.mubr.bf16.gmra.mrb[4].mxu1 %v14916_v23 }
  0x37   : > { %12384 = vmatmul.mubr.bf16.gmra.mrb[4].mxu0 %v14870_v50  ;;  %11955 = vmatprep.mubr.bf16.mxu1 %v14920_v26  ;;  %v826_v16 = vrot.slane %v18728_v9, 1  ;;  %v827_v61 = vrot.slane %v18727_v24, 1  ;;  %v18734_v24 = vunpack.c.h.bf16 %v15028_v25  ;;  %v831_v9 = vrot.slane %v18736_v44, 1 }
  0x38   : > { %12387 = vmatprep.mubr.bf16.mxu0 %v14897_v2  ;;  %12512 = vmatpush3.bf16.msra.mxu0 %v14323_v22  ;;  %v14328_v22 = vld [vmem:[%s18717_s1 + $0x128] sm:$0xff]  }
  0x39   : > { %12513 = vmatprep.subr.bf16.mxu0 %v14324_v33  ;;  %v828_v17 = vsel %vm780_vm0, %v826_v16, %v827_v61 }
  0x3c   : > { %12514 = vmatpush3.bf16.msra.mxu0 %v14324_v33  ;;  %v816_v33 = vsel %vm780_vm0, %v813_v59, %v815_v62  ;;  %v15011_v62 = vld [vmem:[%s14789_s17 + $0x74] sm:$0x1] }
  0x3d   : > { %12515 = vmatprep.subr.bf16.mxu0 %v14327_v56  ;;  %v15004_v59 = vpack.c.bf16 %v816_v33, %v814_v31  ;;  %19149 = vst [vmem:[#allocation19_spill] sm:$0xff] %v15011_v62  ;;  %v14332_v31 = vld [vmem:[%s18717_s1 + $0x138] sm:$0xff]   ;;  %v823_v33 = vsel %vm780_vm0, %v820_v4, %v822_v45  ;;  %v830_v4 = vsel %vm780_vm0, %v827_v61, %v829_v15 }
  0x3e   : > { %11956 = vmatmul.mubr.bf16.gmra.mrb[8].mxu1 %v14961_v57 }
  0x3f   : > { %12388 = vmatmul.mubr.bf16.gmra.mrb[8].mxu0 %v14906_v7  ;;  %11959 = vmatprep.mubr.bf16.mxu1 %v14965_v60  ;;  %19148 = vst [vmem:[#allocation18_spill] sm:$0xff] %v15004_v59 }
  0x40   : > { %12391 = vmatprep.mubr.bf16.mxu0 %v14939_v35  ;;  %12516 = vmatpush3.bf16.msra.mxu0 %v14327_v56  ;;  %v824_v56 = vrot.slane %v18729_v27, 1  ;;  %v15046_v27 = vpack.c.bf16 %v830_v4, %v828_v17  ;;  %v18743_v17 = vunpack.c.l.bf16 %v15058_v51  ;;  %v18741_v4 = vunpack.c.h.bf16 %v15058_v51 }
  0x41   : > { %12517 = vmatprep.subr.bf16.mxu0 %v14328_v22 }
  0x42   : > { %v825_v36 = vsel %vm780_vm0, %v822_v45, %v824_v56  ;;  %v18733_v45 = vunpack.c.l.bf16 %v15032_v21  ;;  %v15042_v56 = vld [vmem:[%s14789_s17 + $0x88] sm:$0x1]  ;;  %19155 = vst [vmem:[#allocation25_spill] sm:$0xff] %v15046_v27 }
  0x43   : > { %v15039_v16 = vpack.c.bf16 %v825_v36, %v823_v33  ;;  %19154 = vst [vmem:[#allocation24_spill] sm:$0xff] %v15042_v56  ;;  %v18745_v36 = vunpack.c.h.bf16 %v15032_v21 }
  0x44   : > { %12518 = vmatpush3.bf16.msra.mxu0 %v14328_v22  ;;  %v18732_v22 = vunpack.c.l.bf16 %v15011_v62  ;;  %v838_v33 = vrot.slane %v18733_v45, 1  ;;  %v832_v45 = vsel %vm780_vm0, %v829_v15, %v831_v9  ;;  %v844_v15 = vrot.slane %v18743_v17, 1  ;;  %v15104_v17 = vld [vmem:[%s14789_s17 + $0xa8] sm:$0xff]  }
  0x45   : > { %12519 = vmatprep.subr.bf16.mxu0 %v14331_v32  ;;  %19153 = vst [vmem:[#allocation23_spill] sm:$0xff] %v15039_v16  ;;  %v840_v38 = vrot.slane %v18745_v36, 1  ;;  %19162 = vst [vmem:[#allocation32_spill] sm:$0xff] %v15104_v17 }
  0x46   : > { %11960 = vmatmul.mubr.bf16.gmra.mrb[12].mxu1 %v15004_v59  ;;  %v833_v61 = vrot.slane %v18732_v22, 1  ;;  %v15064_v22 = vld [vmem:[%s14789_s17 + $0x94] sm:$0xff]  }
  0x47   : > { %12392 = vmatmul.mubr.bf16.gmra.mrb[12].mxu0 %v14948_v42  ;;  %11963 = vmatprep.mubr.bf16.mxu1 %v15013_v3  ;;  %19157 = vst [vmem:[#allocation27_spill] sm:$0xff] %v15064_v22  ;;  %v18742_v34 = vunpack.c.l.bf16 %v15064_v22 }
  0x48   : > { %12395 = vmatprep.mubr.bf16.mxu0 %v14972_v0  ;;  %12520 = vmatpush3.bf16.msra.mxu0 %v14331_v32  ;;  %v836_v32 = vrot.slane %v18734_v24, 1  ;;  %v18744_v24 = vunpack.c.l.bf16 %v15042_v56 }
  0x49   : > { %12521 = vmatprep.subr.bf16.mxu0 %v14332_v31 }
  0x4a   : > { %v837_v44 = vsel %vm780_vm0, %v835_v8, %v836_v32  ;;  %v839_v47 = vsel %vm780_vm0, %v836_v32, %v838_v33  ;;  %v842_v8 = vrot.slane %v18744_v24, 1  ;;  %v847_v32 = vrot.slane %v18742_v34, 1 }
  0x4b   : > { %v15086_v37 = vpack.c.bf16 %v839_v47, %v837_v44 }
  0x4c   : > { %12522 = vmatpush3.bf16.msra.mxu0 %v14332_v31  ;;  %v834_v31 = vsel %vm780_vm0, %v831_v9, %v833_v61  ;;  %v845_v9 = vrot.slane %v18741_v4, 1  ;;  %v15084_v61 = vld [vmem:[%s14789_s17 + $0x9c] sm:$0x1]  ;;  %v843_v47 = vsel %vm780_vm0, %v840_v38, %v842_v8  ;;  %v15100_v4 = vld [vmem:[%s14789_s17 + $0xa0] sm:$0xff]   ;;  %v15116_v8 = vld [vmem:[%s14789_s17 + $0xb0] sm:$0x1] }
  0x4d   : > { %v15077_v39 = vpack.c.bf16 %v834_v31, %v832_v45  ;;  %19159 = vst [vmem:[#allocation29_spill] sm:$0xff] %v15084_v61  ;;  %19160 = vst [vmem:[#allocation30_spill] sm:$0xff] %v15086_v37  ;;  %v18755_v45 = vunpack.c.h.bf16 %v15064_v22  ;;  %v841_v31 = vsel %vm780_vm0, %v838_v33, %v840_v38  ;;  %v18754_v34 = vunpack.c.l.bf16 %v15084_v61  ;;  %v15281_v61 = vld [vmem:[%s14789_s17 + $0x104] sm:$0xff]  }
  0x4e   : > { %11964 = vmatmul.mubr.bf16.gmra.mrb[16].mxu1 %v15039_v16  ;;  %v846_v44 = vsel %vm780_vm0, %v844_v15, %v845_v9  ;;  %19161 = vst [vmem:[#allocation31_spill] sm:$0xff] %v15100_v4  ;;  %v848_v24 = vsel %vm780_vm0, %v845_v9, %v847_v32  ;;  %v18753_v36 = vunpack.c.l.bf16 %v15100_v4  ;;  %v18751_v14 = vunpack.c.h.bf16 %v15100_v4  ;;  %19164 = vst [vmem:[#allocation34_spill] sm:$0xff] %v15116_v8 }
  0x4f   : > { %12396 = vmatmul.mubr.bf16.gmra.mrb[16].mxu0 %v14987_v28  ;;  %11967 = vmatprep.mubr.bf16.mxu1 %v15046_v27  ;;  %19158 = vst [vmem:[#allocation28_spill] sm:$0xff] %v15077_v39  ;;  %v18752_v33 = vunpack.c.l.bf16 %v15104_v17  ;;  %v849_v38 = vrot.slane %v18755_v45, 1  ;;  %v15113_v15 = vpack.c.bf16 %v843_v47, %v841_v31  ;;  %v15118_v10 = vpack.c.bf16 %v848_v24, %v846_v44  ;;  %v15129_v31 = vld [vmem:[%s14789_s17 + $0xb4] sm:$0xff]  }
  0x50   : > { %12399 = vmatprep.mubr.bf16.mxu0 %v15028_v25  ;;  %v851_v5 = vrot.slane %v18754_v34, 1  ;;  %v853_v9 = vrot.slane %v18753_v36, 1  ;;  %v854_v6 = vrot.slane %v18751_v14, 1  ;;  %19166 = vst [vmem:[#allocation36_spill] sm:$0xff] %v15129_v31  ;;  %v18761_v24 = vunpack.c.h.bf16 %v15104_v17  ;;  %v15141_v34 = vld [vmem:[%s14789_s17 + $0xbc] sm:$0xff]   ;;  %19195 = vst [vmem:[#allocation56_spill] sm:$0xff] %v15281_v61 }
  0x51   : > { %19163 = vst [vmem:[#allocation33_spill] sm:$0xff] %v15113_v15  ;;  %19165 = vst [vmem:[#allocation35_spill] sm:$0xff] %v15118_v10  ;;  %v856_v1 = vrot.slane %v18752_v33, 1  ;;  %v18762_v47 = vunpack.c.l.bf16 %v15129_v31  ;;  %v850_v44 = vsel %vm780_vm0, %v847_v32, %v849_v38  ;;  %v18765_v33 = vunpack.c.h.bf16 %v15129_v31  ;;  %v15380_v25 = vld [vmem:[%s14789_s17 + $0x13c] sm:$0x1] }
  0x52   : > { %v852_v14 = vsel %vm780_vm0, %v849_v38, %v851_v5  ;;  %v18766_v36 = vunpack.c.l.bf16 %v15116_v8  ;;  %19167 = vst [vmem:[#allocation37_spill] sm:$0xff] %v15141_v34  ;;  %v855_v45 = vsel %vm780_vm0, %v853_v9, %v854_v6  ;;  %v18764_v53 = vunpack.c.l.bf16 %v15141_v34  ;;  %v15157_v38 = vld [vmem:[%s14789_s17 + $0xc8] sm:$0xff]   ;;  %19216 = vst [vmem:[#allocation69_spill] sm:$0xff] %v15380_v25 }
  0x53   : > { %v857_v54 = vsel %vm780_vm0, %v854_v6, %v856_v1  ;;  %v15150_v49 = vpack.c.bf16 %v852_v14, %v850_v44  ;;  %v858_v5 = vrot.slane %v18761_v24, 1  ;;  %v862_v32 = vrot.slane %v18762_v47, 1  ;;  %19170 = vst [vmem:[#allocation40_spill] sm:$0xff] %v15157_v38 }
  0x54   : > { %v15159_v20 = vpack.c.bf16 %v857_v54, %v855_v45  ;;  %v863_v6 = vrot.slane %v18765_v33, 1  ;;  %v860_v9 = vrot.slane %v18766_v36, 1  ;;  %v18772_v14 = vunpack.c.h.bf16 %v15141_v34  ;;  %v15178_v33 = vld [vmem:[%s14789_s17 + $0xd0] sm:$0xff]  }
  0x55   : > { %19169 = vst [vmem:[#allocation39_spill] sm:$0xff] %v15150_v49  ;;  %v865_v44 = vrot.slane %v18764_v53, 1  ;;  %v18773_v24 = vunpack.c.l.bf16 %v15157_v38  ;;  %v859_v54 = vsel %vm780_vm0, %v856_v1, %v858_v5  ;;  %19172 = vst [vmem:[#allocation42_spill] sm:$0xff] %v15178_v33  ;;  %v18776_v11 = vunpack.c.l.bf16 %v15178_v33 }
  0x56   : > { %11968 = vmatmul.mubr.bf16.gmra.mrb[20].mxu1 %v15077_v39  ;;  %19171 = vst [vmem:[#allocation41_spill] sm:$0xff] %v15159_v20  ;;  %v861_v45 = vsel %vm780_vm0, %v858_v5, %v860_v9  ;;  %v864_v53 = vsel %vm780_vm0, %v862_v32, %v863_v6  ;;  %v867_v36 = vrot.slane %v18772_v14, 1  ;;  %v19173_v1 = vunpack.c.h.bf16 %v15157_v38 }
  0x57   : > { %12400 = vmatmul.mubr.bf16.gmra.mrb[20].mxu0 %v15032_v21  ;;  %11971 = vmatprep.mubr.bf16.mxu1 %v15086_v37  ;;  %v866_v19 = vsel %vm780_vm0, %v863_v6, %v865_v44  ;;  %v871_v47 = vrot.slane %v18773_v24, 1  ;;  %v19174_v32 = vunpack.c.l.bf16 %v15148_v52  ;;  %v15191_v18 = vpack.c.bf16 %v861_v45, %v859_v54  ;;  %v15198_v6 = vld [vmem:[%s14789_s17 + $0xd8] sm:$0x1] }
  0x58   : > { %12403 = vmatprep.mubr.bf16.mxu0 %v15058_v51  ;;  %v872_v5 = vrot.slane %v19173_v1, 1  ;;  %v15193_v12 = vpack.c.bf16 %v866_v19, %v864_v53  ;;  %v874_v14 = vrot.slane %v18776_v11, 1  ;;  %19177 = vst [vmem:[#allocation45_spill] sm:$0xff] %v15198_v6  ;;  %v868_v54 = vsel %vm780_vm0, %v865_v44, %v867_v36  ;;  %v15212_v1 = vld [vmem:[%s14789_s17 + $0xe4] sm:$0xff]  }
  0x59   : > { %v869_v9 = vrot.slane %v19174_v32, 1  ;;  %19175 = vst [vmem:[#allocation43_spill] sm:$0xff] %v15191_v18  ;;  %19179 = vst [vmem:[#allocation47_spill] sm:$0xff] %v15212_v1  ;;  %v18784_v52 = vunpack.c.l.bf16 %v15212_v1 }
  0x5a   : > { %19176 = vst [vmem:[#allocation44_spill] sm:$0xff] %v15193_v12  ;;  %v873_v53 = vsel %vm780_vm0, %v871_v47, %v872_v5  ;;  %v875_v32 = vsel %vm780_vm0, %v872_v5, %v874_v14 }
  0x5b   : > { %v870_v19 = vsel %vm780_vm0, %v867_v36, %v869_v9  ;;  %v19181_v36 = vunpack.c.h.bf16 %v15178_v33  ;;  %v15224_v9 = vld [vmem:[%s14789_s17 + $0xec] sm:$0x1]  ;;  %v15226_v45 = vpack.c.bf16 %v875_v32, %v873_v53  ;;  %v15240_v53 = vld [vmem:[%s14789_s17 + $0xf0] sm:$0xff]  }
  0x5c   : > { %v15219_v44 = vpack.c.bf16 %v870_v19, %v868_v54  ;;  %19182 = vst [vmem:[#allocation49_spill] sm:$0xff] %v15224_v9  ;;  %v883_v54 = vrot.slane %v18784_v52, 1  ;;  %19185 = vst [vmem:[#allocation51_spill] sm:$0xff] %v15240_v53  ;;  %v19188_v52 = vunpack.c.h.bf16 %v15212_v1 }
  0x5d   : > { %v876_v47 = vrot.slane %v19181_v36, 1  ;;  %19183 = vst [vmem:[#allocation50_spill] sm:$0xff] %v15226_v45 }
  0x5e   : > { %11972 = vmatmul.mubr.bf16.gmra.mrb[24].mxu1 %v15113_v15  ;;  %19180 = vst [vmem:[#allocation48_spill] sm:$0xff] %v15219_v44  ;;  %v885_v32 = vrot.slane %v19188_v52, 1  ;;  %v18807_v52 = vunpack.c.l.bf16 %v15281_v61 }
  0x5f   : > { %12404 = vmatmul.mubr.bf16.gmra.mrb[24].mxu0 %v15064_v22  ;;  %11975 = vmatprep.mubr.bf16.mxu1 %v15118_v10  ;;  %v877_v19 = vsel %vm780_vm0, %v874_v14, %v876_v47  ;;  %v15254_v14 = vld [vmem:[%s18717_s1 + $0x140] sm:$0xff]  }
  0x60   : > { %12407 = vmatprep.mubr.bf16.mxu0 %v15100_v4  ;;  %12651 = vmatprep.subr.bf16.mxu0 %v15254_v14 }
  0x66   : > { %11976 = vmatmul.mubr.bf16.gmra.mrb[28].mxu1 %v15150_v49 }
  0x67   : > { %12408 = vmatmul.mubr.bf16.gmra.mrb[28].mxu0 %v15104_v17  ;;  %11979 = vmatprep.mubr.bf16.mxu1 %v15159_v20 }
  0x68   : > { %12411 = vmatprep.mubr.bf16.mxu0 %v15129_v31  ;;  %v15203_v31 = vld [vmem:[%s14789_s17 + $0xdc] sm:$0xff]  }
  0x69   : > { %19178 = vst [vmem:[#allocation46_spill] sm:$0xff] %v15203_v31  ;;  %v18785_v11 = vunpack.c.l.bf16 %v15203_v31  ;;  %v18783_v24 = vunpack.c.h.bf16 %v15203_v31 }
  0x6b   : > { %v880_v5 = vrot.slane %v18785_v11, 1  ;;  %v881_v8 = vrot.slane %v18783_v24, 1  ;;  %v15249_v11 = vld [vmem:[%s14789_s17 + $0xf8] sm:$0xff]  }
  0x6c   : > { %19186 = vst [vmem:[#allocation52_spill] sm:$0xff] %v15249_v11 }
  0x6d   : > { %v882_v36 = vsel %vm780_vm0, %v880_v5, %v881_v8  ;;  %v19192_v5 = vunpack.c.h.bf16 %v15240_v53 }
  0x6e   : > { %11980 = vmatmul.mubr.bf16.gmra.mrb[32].mxu1 %v15191_v18 }
  0x6f   : > { %12412 = vmatmul.mubr.bf16.gmra.mrb[32].mxu0 %v15141_v34  ;;  %11983 = vmatprep.mubr.bf16.mxu1 %v15193_v12 }
  0x70   : > { %12415 = vmatprep.mubr.bf16.mxu0 %v15157_v38  ;;  %v19184_v38 = vunpack.c.l.bf16 %v15198_v6  ;;  %v15266_v6 = vld [vmem:[%s14789_s17 + $0x100] sm:$0x1] }
  0x71   : > { %19189 = vst [vmem:[#allocation54_spill] sm:$0xff] %v15266_v6 }
  0x72   : > { %v878_v34 = vrot.slane %v19184_v38, 1 }
  0x74   : > { %v879_v38 = vsel %vm780_vm0, %v876_v47, %v878_v34  ;;  %v884_v34 = vsel %vm780_vm0, %v881_v8, %v883_v54  ;;  %v890_v8 = vrot.slane %v19192_v5, 1  ;;  %v19193_v47 = vunpack.c.l.bf16 %v15224_v9  ;;  %v15290_v5 = vld [vmem:[%s14789_s17 + $0x10c] sm:$0xff]  }
  0x75   : > { %v15261_v24 = vpack.c.bf16 %v879_v38, %v877_v19  ;;  %v19194_v19 = vunpack.c.l.bf16 %v15249_v11  ;;  %19196 = vst [vmem:[#allocation57_spill] sm:$0xff] %v15290_v5  ;;  %v18805_v9 = vunpack.c.h.bf16 %v15281_v61 }
  0x76   : > { %11984 = vmatmul.mubr.bf16.gmra.mrb[36].mxu1 %v15219_v44  ;;  %v887_v4 = vrot.slane %v19193_v47, 1 }
  0x77   : > { %12416 = vmatmul.mubr.bf16.gmra.mrb[36].mxu0 %v15178_v33  ;;  %11987 = vmatprep.mubr.bf16.mxu1 %v15226_v45  ;;  %19187 = vst [vmem:[#allocation53_spill] sm:$0xff] %v15261_v24  ;;  %v15268_v33 = vpack.c.bf16 %v884_v34, %v882_v36  ;;  %v892_v38 = vrot.slane %v19194_v19, 1  ;;  %v899_v51 = vrot.slane %v18805_v9, 1 }
  0x78   : > { %12419 = vmatprep.mubr.bf16.mxu0 %v15203_v31  ;;  %v19191_v31 = vunpack.c.l.bf16 %v15240_v53  ;;  %v888_v36 = vsel %vm780_vm0, %v885_v32, %v887_v4  ;;  %v19198_v4 = vunpack.c.h.bf16 %v15249_v11 }
  0x79   : > { %19190 = vst [vmem:[#allocation55_spill] sm:$0xff] %v15268_v33  ;;  %v893_v19 = vsel %vm780_vm0, %v890_v8, %v892_v38 }
  0x7a   : > { %v889_v17 = vrot.slane %v19191_v31, 1  ;;  %v886_v31 = vsel %vm780_vm0, %v883_v54, %v885_v32  ;;  %v15302_v32 = vld [vmem:[%s14789_s17 + $0x114] sm:$0x1] }
  0x7b   : > { %v15297_v54 = vpack.c.bf16 %v888_v36, %v886_v31  ;;  %19199 = vst [vmem:[#allocation59_spill] sm:$0xff] %v15302_v32 }
  0x7c   : > { %v891_v34 = vsel %vm780_vm0, %v889_v17, %v890_v8  ;;  %v894_v17 = vrot.slane %v19198_v4, 1  ;;  %v898_v8 = vrot.slane %v18807_v52, 1  ;;  %v15327_v52 = vld [vmem:[%s14789_s17 + $0x120] sm:$0xff]   ;;  %v15338_v4 = vld [vmem:[%s14789_s17 + $0x128] sm:$0x1] }
  0x7d   : > { %19197 = vst [vmem:[#allocation58_spill] sm:$0xff] %v15297_v54  ;;  %v15304_v47 = vpack.c.bf16 %v893_v19, %v891_v34  ;;  %v15318_v19 = vld [vmem:[%s14789_s17 + $0x118] sm:$0xff]   ;;  %19203 = vst [vmem:[#allocation62_spill] sm:$0xff] %v15327_v52 }
  0x7e   : > { %11988 = vmatmul.mubr.bf16.gmra.mrb[40].mxu1 %v15261_v24  ;;  %v895_v36 = vsel %vm780_vm0, %v892_v38, %v894_v17  ;;  %19202 = vst [vmem:[#allocation61_spill] sm:$0xff] %v15318_v19  ;;  %v900_v38 = vsel %vm780_vm0, %v898_v8, %v899_v51  ;;  %19206 = vst [vmem:[#allocation64_spill] sm:$0xff] %v15338_v4  ;;  %v19208_v9 = vunpack.c.l.bf16 %v15318_v19  ;;  %v19209_v8 = vunpack.c.h.bf16 %v15318_v19 }
  0x7f   : > { %12420 = vmatmul.mubr.bf16.gmra.mrb[40].mxu0 %v15212_v1  ;;  %11991 = vmatprep.mubr.bf16.mxu1 %v15268_v33  ;;  %v18806_v1 = vunpack.c.l.bf16 %v15290_v5  ;;  %19200 = vst [vmem:[#allocation60_spill] sm:$0xff] %v15304_v47 }
  0x80   : > { %12423 = vmatprep.mubr.bf16.mxu0 %v15240_v53  ;;  %v19201_v53 = vunpack.c.l.bf16 %v15266_v6  ;;  %v908_v56 = vrot.slane %v19209_v8, 1 }
  0x81   : > { %v901_v31 = vrot.slane %v18806_v1, 1 }
  0x82   : > { %v896_v22 = vrot.slane %v19201_v53, 1 }
  0x83   : > { %v902_v34 = vsel %vm780_vm0, %v899_v51, %v901_v31  ;;  %v19210_v51 = vunpack.c.l.bf16 %v15302_v32  ;;  %v15365_v32 = vld [vmem:[%s14789_s17 + $0x134] sm:$0xff]  }
  0x84   : > { %v897_v53 = vsel %vm780_vm0, %v894_v17, %v896_v22  ;;  %v19205_v22 = vunpack.c.h.bf16 %v15290_v5  ;;  %v15340_v1 = vpack.c.bf16 %v902_v34, %v900_v38  ;;  %19213 = vst [vmem:[#allocation67_spill] sm:$0xff] %v15365_v32  ;;  %v14335_v34 = vld [vmem:[%s18717_s1 + $0x8] sm:$0xff]  }
  0x85   : > { %v905_v6 = vrot.slane %v19210_v51, 1  ;;  %v15361_v51 = vld [vmem:[%s14789_s17 + $0x12c] sm:$0xff]  }
  0x86   : > { %11992 = vmatmul.mubr.bf16.gmra.mrb[44].mxu1 %v15297_v54  ;;  %v903_v17 = vrot.slane %v19205_v22, 1  ;;  %19207 = vst [vmem:[#allocation65_spill] sm:$0xff] %v15340_v1  ;;  %v14334_v22 = vld [vmem:[%s18717_s1] sm:$0xff]   ;;  %19212 = vst [vmem:[#allocation66_spill] sm:$0xff] %v15361_v51  ;;  %v19220_v62 = vunpack.c.h.bf16 %v15361_v51 }
  0x87   : > { %12424 = vmatmul.mubr.bf16.gmra.mrb[44].mxu0 %v15249_v11  ;;  %11995 = vmatprep.mubr.bf16.mxu1 %v15304_v47  ;;  %v15333_v11 = vpack.c.bf16 %v897_v53, %v895_v36  ;;  %v19211_v36 = vunpack.c.l.bf16 %v15327_v52 }
  0x88   : > { %12427 = vmatprep.mubr.bf16.mxu0 %v15281_v61  ;;  %v907_v61 = vrot.slane %v19208_v9, 1  ;;  %v904_v9 = vsel %vm780_vm0, %v901_v31, %v903_v17  ;;  %v906_v38 = vsel %vm780_vm0, %v903_v17, %v905_v6  ;;  %12075 = vmatprep.subr.bf16.mxu1 %v14334_v22  ;;  %v19219_v6 = vunpack.c.l.bf16 %v15361_v51 }
  0x89   : > { %19204 = vst [vmem:[#allocation63_spill] sm:$0xff] %v15333_v11  ;;  %v910_v53 = vrot.slane %v19211_v36, 1  ;;  %12076 = vmatpush3.bf16.msra.mxu1 %v14334_v22  ;;  %v15375_v17 = vpack.c.bf16 %v906_v38, %v904_v9  ;;  %v19215_v36 = vunpack.c.h.bf16 %v15327_v52  ;;  %v917_v22 = vrot.slane %v19220_v62, 1 }
  0x8a   : > { %v909_v8 = vsel %vm780_vm0, %v907_v61, %v908_v56  ;;  %12077 = vmatprep.subr.bf16.mxu1 %v14335_v34  ;;  %v916_v61 = vrot.slane %v19219_v6, 1  ;;  %v19221_v9 = vunpack.c.l.bf16 %v15365_v32 }
  0x8b   : > { %19214 = vst [vmem:[#allocation68_spill] sm:$0xff] %v15375_v17  ;;  %v912_v21 = vrot.slane %v19215_v36, 1  ;;  %v14336_v36 = vld [vmem:[%s18717_s1 + $0x10] sm:$0xff]  }
  0x8c   : > { %v919_v38 = vrot.slane %v19221_v9, 1  ;;  %v19225_v9 = vunpack.c.h.bf16 %v15365_v32 }
  0x8d   : > { %12078 = vmatpush3.bf16.msra.mxu1 %v14335_v34 }
  0x8e   : > { %11996 = vmatmul.mubr.bf16.gmra.mrb[48].mxu1 %v15333_v11  ;;  %12079 = vmatprep.subr.bf16.mxu1 %v14336_v36  ;;  %v921_v34 = vrot.slane %v19225_v9, 1  ;;  %v15438_v9 = vld [vmem:[%s14789_s17 + $0x15c] sm:$0xff]  }
  0x8f   : > { %12428 = vmatmul.mubr.bf16.gmra.mrb[48].mxu0 %v15290_v5  ;;  %11999 = vmatprep.mubr.bf16.mxu1 %v15340_v1  ;;  %v911_v5 = vsel %vm780_vm0, %v908_v56, %v910_v53  ;;  %v19218_v56 = vunpack.c.l.bf16 %v15338_v4  ;;  %v15408_v4 = vld [vmem:[%s14789_s17 + $0x148] sm:$0xff]   ;;  %19233 = vst [vmem:[#allocation77_spill] sm:$0xff] %v15438_v9 }
  0x90   : > { %12431 = vmatprep.mubr.bf16.mxu0 %v15318_v19  ;;  %v15382_v19 = vpack.c.bf16 %v911_v5, %v909_v8  ;;  %v913_v5 = vsel %vm780_vm0, %v910_v53, %v912_v21  ;;  %19223 = vst [vmem:[#allocation72_spill] sm:$0xff] %v15408_v4  ;;  %v14338_v53 = vld [vmem:[%s18717_s1 + $0x18] sm:$0xff]   ;;  %v918_v8 = vsel %vm780_vm0, %v916_v61, %v917_v22 }
  0x91   : > { %v914_v31 = vrot.slane %v19218_v56, 1  ;;  %v15399_v56 = vld [vmem:[%s14789_s17 + $0x140] sm:$0xff]   ;;  %12080 = vmatpush3.bf16.msra.mxu1 %v14336_v36  ;;  %v15433_v36 = vld [vmem:[%s14789_s17 + $0x154] sm:$0xff]  }
  0x92   : > { %19217 = vst [vmem:[#allocation70_spill] sm:$0xff] %v15382_v19  ;;  %19222 = vst [vmem:[#allocation71_spill] sm:$0xff] %v15399_v56  ;;  %12081 = vmatprep.subr.bf16.mxu1 %v14338_v53  ;;  %v19229_v61 = vunpack.c.h.bf16 %v15399_v56 }
  0x93   : > { %v915_v62 = vsel %vm780_vm0, %v912_v21, %v914_v31  ;;  %v920_v21 = vsel %vm780_vm0, %v917_v22, %v919_v38  ;;  %v19230_v31 = vunpack.c.l.bf16 %v15380_v25  ;;  %19231 = vst [vmem:[#allocation76_spill] sm:$0xff] %v15433_v36  ;;  %v18845_v25 = vunpack.c.l.bf16 %v15433_v36 }
  0x94   : > { %v15417_v6 = vpack.c.bf16 %v915_v62, %v913_v5  ;;  %v15424_v28 = vpack.c.bf16 %v920_v21, %v918_v8  ;;  %v926_v22 = vrot.slane %v19229_v61, 1  ;;  %v19232_v5 = vunpack.c.l.bf16 %v15408_v4  ;;  %v14339_v8 = vld [vmem:[%s18717_s1 + $0x20] sm:$0xff]  }
  0x95   : > { %v923_v55 = vrot.slane %v19230_v31, 1  ;;  %12082 = vmatpush3.bf16.msra.mxu1 %v14338_v53  ;;  %v922_v21 = vsel %vm780_vm0, %v919_v38, %v921_v34  ;;  %v18844_v38 = vunpack.c.h.bf16 %v15433_v36  ;;  %v934_v42 = vrot.slane %v18845_v25, 1  ;;  %v14342_v36 = vld [vmem:[%s18717_s1 + $0x38] sm:$0xff]  }
  0x96   : > { %12000 = vmatmul.mubr.bf16.gmra.mrb[52].mxu1 %v15375_v17  ;;  %19224 = vst [vmem:[#allocation73_spill] sm:$0xff] %v15417_v6  ;;  %19227 = vst [vmem:[#allocation75_spill] sm:$0xff] %v15424_v28  ;;  %v928_v62 = vrot.slane %v19232_v5, 1  ;;  %v14340_v5 = vld [vmem:[%s18717_s1 + $0x28] sm:$0xff]   ;;  %12083 = vmatprep.subr.bf16.mxu1 %v14339_v8  ;;  %v19242_v25 = vunpack.c.h.bf16 %v15438_v9 }
  0x97   : > { %12432 = vmatmul.mubr.bf16.gmra.mrb[52].mxu0 %v15327_v52  ;;  %12003 = vmatprep.mubr.bf16.mxu1 %v15382_v19  ;;  %v15422_v52 = vld [vmem:[%s14789_s17 + $0x150] sm:$0x1]  ;;  %v924_v31 = vsel %vm780_vm0, %v921_v34, %v923_v55  ;;  %v18843_v55 = vunpack.c.l.bf16 %v15438_v9  ;;  %v19235_v34 = vunpack.c.h.bf16 %v15408_v4  ;;  %v935_v35 = vrot.slane %v18844_v38, 1  ;;  %v15556_v9 = vld [vmem:[%s14789_s17 + $0x18c] sm:$0x1] }
  0x98   : > { %12435 = vmatprep.mubr.bf16.mxu0 %v15361_v51  ;;  %19226 = vst [vmem:[#allocation74_spill] sm:$0xff] %v15422_v52  ;;  %v19228_v51 = vunpack.c.l.bf16 %v15399_v56  ;;  %19253 = vst [vmem:[#allocation90_spill] sm:$0xff] %v15556_v9 }
  0x99   : > { %12084 = vmatpush3.bf16.msra.mxu1 %v14339_v8  ;;  %v930_v53 = vrot.slane %v19235_v34, 1  ;;  %v937_v8 = vrot.slane %v18843_v55, 1  ;;  %v15480_v34 = vld [vmem:[%s14789_s17 + $0x170] sm:$0xff]  }
  0x9a   : > { %v925_v0 = vrot.slane %v19228_v51, 1  ;;  %v929_v51 = vsel %vm780_vm0, %v926_v22, %v928_v62  ;;  %12085 = vmatprep.subr.bf16.mxu1 %v14340_v5  ;;  %19240 = vst [vmem:[#allocation82_spill] sm:$0xff] %v15480_v34 }
  0x9c   : > { %v927_v61 = vsel %vm780_vm0, %v925_v0, %v926_v22  ;;  %v15459_v0 = vpack.c.bf16 %v924_v31, %v922_v21  ;;  %v15474_v21 = vld [vmem:[%s14789_s17 + $0x164] sm:$0x1]  ;;  %v15477_v31 = vld [vmem:[%s14789_s17 + $0x168] sm:$0xff]  }
  0x9d   : > { %19238 = vst [vmem:[#allocation80_spill] sm:$0xff] %v15474_v21  ;;  %19239 = vst [vmem:[#allocation81_spill] sm:$0xff] %v15477_v31  ;;  %12086 = vmatpush3.bf16.msra.mxu1 %v14340_v5  ;;  %v939_v5 = vrot.slane %v19242_v25, 1  ;;  %v15522_v25 = vld [vmem:[%s14789_s17 + $0x184] sm:$0xff]  }
  0x9e   : > { %12004 = vmatmul.mubr.bf16.gmra.mrb[56].mxu1 %v15417_v6  ;;  %19234 = vst [vmem:[#allocation78_spill] sm:$0xff] %v15459_v0  ;;  %19249 = vst [vmem:[#allocation87_spill] sm:$0xff] %v15522_v25 }
  0x9f   : > { %12436 = vmatmul.mubr.bf16.gmra.mrb[56].mxu0 %v15365_v32  ;;  %12007 = vmatprep.mubr.bf16.mxu1 %v15424_v28  ;;  %v15463_v32 = vpack.c.bf16 %v929_v51, %v927_v61  ;;  %v931_v51 = vsel %vm780_vm0, %v928_v62, %v930_v53  ;;  %v936_v62 = vsel %vm780_vm0, %v934_v42, %v935_v35 }
  0xa0   : > { %12439 = vmatprep.mubr.bf16.mxu0 %v15399_v56  ;;  %v19237_v56 = vunpack.c.l.bf16 %v15422_v52  ;;  %v938_v61 = vsel %vm780_vm0, %v935_v35, %v937_v8  ;;  %v19244_v52 = vunpack.c.l.bf16 %v15474_v21  ;;  %v19246_v35 = vunpack.c.h.bf16 %v15477_v31 }
  0xa1   : > { %19236 = vst [vmem:[#allocation79_spill] sm:$0xff] %v15463_v32  ;;  %v15505_v38 = vpack.c.bf16 %v938_v61, %v936_v62  ;;  %v14337_v61 = vld [vmem:[%s18717_s1 + $0x148] sm:$0xff]  }
  0xa2   : > { %v932_v22 = vrot.slane %v19237_v56, 1  ;;  %v14341_v56 = vld [vmem:[%s18717_s1 + $0x30] sm:$0xff]   ;;  %v944_v29 = vrot.slane %v19246_v35, 1 }
  0xa3   : > { %12087 = vmatprep.subr.bf16.mxu1 %v14341_v56  ;;  %19243 = vst [vmem:[#allocation84_spill] sm:$0xff] %v15505_v38 }
  0xa4   : > { %v933_v55 = vsel %vm780_vm0, %v930_v53, %v932_v22  ;;  %v18852_v53 = vunpack.c.l.bf16 %v15480_v34  ;;  %12088 = vmatpush3.bf16.msra.mxu1 %v14341_v56 }
  0xa5   : > { %v15501_v22 = vpack.c.bf16 %v933_v55, %v931_v51  ;;  %12089 = vmatprep.subr.bf16.mxu1 %v14342_v36  ;;  %v15516_v55 = vld [vmem:[%s14789_s17 + $0x178] sm:$0x1]  ;;  %v15519_v51 = vld [vmem:[%s14789_s17 + $0x17c] sm:$0xff]  }
  0xa6   : > { %12008 = vmatmul.mubr.bf16.gmra.mrb[60].mxu1 %v15459_v0  ;;  %v946_v56 = vrot.slane %v18852_v53, 1  ;;  %19247 = vst [vmem:[#allocation85_spill] sm:$0xff] %v15516_v55  ;;  %19248 = vst [vmem:[#allocation86_spill] sm:$0xff] %v15519_v51  ;;  %v18862_v53 = vunpack.c.l.bf16 %v15516_v55 }
  0xa7   : > { %12440 = vmatmul.mubr.bf16.gmra.mrb[60].mxu0 %v15408_v4  ;;  %12011 = vmatprep.mubr.bf16.mxu1 %v15463_v32  ;;  %19241 = vst [vmem:[#allocation83_spill] sm:$0xff] %v15501_v22  ;;  %v19245_v4 = vunpack.c.l.bf16 %v15477_v31  ;;  %v18859_v31 = vunpack.c.l.bf16 %v15522_v25 }
  0xa8   : > { %12523 = vmatprep.mubr.bf16.mxu0 %v14879_v58  ;;  %v941_v58 = vrot.slane %v19244_v52, 1  ;;  %12090 = vmatpush3.bf16.msra.mxu1 %v14342_v36  ;;  %v947_v36 = vsel %vm780_vm0, %v944_v29, %v946_v56  ;;  %v18861_v52 = vunpack.c.l.bf16 %v15519_v51 }
  0xa9   : > { %v943_v42 = vrot.slane %v19245_v4, 1  ;;  %v940_v4 = vsel %vm780_vm0, %v937_v8, %v939_v5 }
  0xaa   : > { %v942_v62 = vsel %vm780_vm0, %v939_v5, %v941_v58  ;;  %v19251_v5 = vunpack.c.h.bf16 %v15480_v34  ;;  %v15925_v34 = vld [vmem:[%s14789_s17 + $0x254] sm:$0x1] }
  0xab   : > { %v945_v35 = vsel %vm780_vm0, %v943_v42, %v944_v29  ;;  %v15541_v8 = vpack.c.bf16 %v942_v62, %v940_v4  ;;  %v950_v29 = vrot.slane %v18862_v53, 1  ;;  %v15559_v4 = vld [vmem:[%s14789_s17 + $0x190] sm:$0xff]   ;;  %v15562_v62 = vld [vmem:[%s14789_s17 + $0x198] sm:$0xff]   ;;  %19323 = vst [vmem:[#allocation139_spill] sm:$0xff] %v15925_v34 }
  0xac   : > { %v948_v58 = vrot.slane %v19251_v5, 1  ;;  %v15545_v42 = vpack.c.bf16 %v947_v36, %v945_v35  ;;  %19254 = vst [vmem:[#allocation91_spill] sm:$0xff] %v15559_v4  ;;  %19255 = vst [vmem:[#allocation92_spill] sm:$0xff] %v15562_v62  ;;  %v18868_v36 = vunpack.c.h.bf16 %v15522_v25  ;;  %v15631_v25 = vld [vmem:[%s14789_s17 + $0x1b4] sm:$0x1] }
  0xad   : > { %19250 = vst [vmem:[#allocation88_spill] sm:$0xff] %v15541_v8  ;;  %19266 = vst [vmem:[#allocation100_spill] sm:$0xff] %v15631_v25 }
  0xae   : > { %12012 = vmatmul.mubr.bf16.gmra.mrb[64].mxu1 %v15501_v22  ;;  %19252 = vst [vmem:[#allocation89_spill] sm:$0xff] %v15545_v42  ;;  %v949_v35 = vsel %vm780_vm0, %v946_v56, %v948_v58  ;;  %v951_v5 = vsel %vm780_vm0, %v948_v58, %v950_v29  ;;  %v14344_v56 = vld [vmem:[%s18717_s1 + $0x150] sm:$0xff]   ;;  %v18869_v58 = vunpack.c.l.bf16 %v15562_v62 }
  0xaf   : > { %12524 = vmatmul.mubr.bf16.vlgmr.msra.gmra.mrb[0].mxu0 %v14916_v23  ;;  %12015 = vmatprep.mubr.bf16.mxu1 %v15505_v38  ;;  %v18860_v23 = vunpack.c.h.bf16 %v15519_v51  ;;  %v15580_v29 = vpack.c.bf16 %v951_v5, %v949_v35  ;;  %v15595_v35 = vld [vmem:[%s14789_s17 + $0x1a0] sm:$0x1]  ;;  %v15598_v5 = vld [vmem:[%s14789_s17 + $0x1a4] sm:$0xff]  }
  0xb0   : > { %12527 = vmatprep.mubr.bf16.mxu0 %v14920_v26  ;;  %12652 = vmatpush3.bf16.msra.mxu0 %v15254_v14  ;;  %v952_v26 = vrot.slane %v18861_v52, 1  ;;  %v955_v14 = vrot.slane %v18859_v31, 1  ;;  %v18870_v31 = vunpack.c.l.bf16 %v15556_v9  ;;  %v964_v55 = vrot.slane %v18869_v58, 1  ;;  %19260 = vst [vmem:[#allocation95_spill] sm:$0xff] %v15595_v35  ;;  %19261 = vst [vmem:[#allocation96_spill] sm:$0xff] %v15598_v5 }
  0xb1   : > { %12653 = vmatprep.subr.bf16.mxu0 %v14337_v61  ;;  %v953_v21 = vrot.slane %v18860_v23, 1  ;;  %19256 = vst [vmem:[#allocation93_spill] sm:$0xff] %v15580_v29 }
  0xb3   : > { %v954_v52 = vsel %vm780_vm0, %v952_v26, %v953_v21  ;;  %v956_v53 = vsel %vm780_vm0, %v953_v21, %v955_v14  ;;  %v19259_v26 = vunpack.c.h.bf16 %v15559_v4 }
  0xb4   : > { %12654 = vmatpush3.bf16.msra.mxu0 %v14337_v61  ;;  %v957_v61 = vrot.slane %v18868_v36, 1  ;;  %v15584_v23 = vpack.c.bf16 %v956_v53, %v954_v52  ;;  %v15601_v36 = vld [vmem:[%s14789_s17 + $0x1ac] sm:$0xff]   ;;  %v18879_v53 = vunpack.c.h.bf16 %v15598_v5 }
  0xb5   : > { %12655 = vmatprep.subr.bf16.mxu0 %v14344_v56  ;;  %v962_v21 = vrot.slane %v19259_v26, 1  ;;  %19262 = vst [vmem:[#allocation97_spill] sm:$0xff] %v15601_v36  ;;  %v18881_v26 = vunpack.c.l.bf16 %v15595_v35 }
  0xb6   : > { %12016 = vmatmul.mubr.bf16.gmra.mrb[68].mxu1 %v15541_v8  ;;  %19257 = vst [vmem:[#allocation94_spill] sm:$0xff] %v15584_v23 }
  0xb7   : > { %12528 = vmatmul.mubr.bf16.gmra.mrb[4].mxu0 %v14961_v57  ;;  %12019 = vmatprep.mubr.bf16.mxu1 %v15545_v42  ;;  %v959_v57 = vrot.slane %v18870_v31, 1  ;;  %v965_v58 = vsel %vm780_vm0, %v962_v21, %v964_v55  ;;  %v18880_v31 = vunpack.c.l.bf16 %v15598_v5  ;;  %v19271_v5 = vunpack.c.l.bf16 %v15631_v25 }
  0xb8   : > { %12531 = vmatprep.mubr.bf16.mxu0 %v14965_v60  ;;  %12656 = vmatpush3.bf16.msra.mxu0 %v14344_v56  ;;  %v19258_v60 = vunpack.c.l.bf16 %v15559_v4 }
  0xb9   : > { %v960_v52 = vsel %vm780_vm0, %v957_v61, %v959_v57  ;;  %v19264_v57 = vunpack.c.h.bf16 %v15562_v62  ;;  %v15667_v62 = vld [vmem:[%s14789_s17 + $0x1c8] sm:$0x1] }
  0xba   : > { %v961_v51 = vrot.slane %v19258_v60, 1  ;;  %v958_v60 = vsel %vm780_vm0, %v955_v14, %v957_v61  ;;  %19273 = vst [vmem:[#allocation105_spill] sm:$0xff] %v15667_v62 }
  0xbb   : > { %v15616_v14 = vpack.c.bf16 %v960_v52, %v958_v60  ;;  %v966_v61 = vrot.slane %v19264_v57, 1  ;;  %v15634_v60 = vld [vmem:[%s14789_s17 + $0x1b8] sm:$0xff]   ;;  %v15637_v52 = vld [vmem:[%s14789_s17 + $0x1c0] sm:$0xff]   ;;  %v18891_v57 = vunpack.c.h.bf16 %v15601_v36 }
  0xbc   : > { %v963_v56 = vsel %vm780_vm0, %v961_v51, %v962_v21  ;;  %v968_v51 = vrot.slane %v18881_v26, 1  ;;  %v971_v21 = vrot.slane %v18879_v53, 1  ;;  %19267 = vst [vmem:[#allocation101_spill] sm:$0xff] %v15634_v60  ;;  %19268 = vst [vmem:[#allocation102_spill] sm:$0xff] %v15637_v52  ;;  %v18890_v26 = vunpack.c.h.bf16 %v15634_v60 }
  0xbd   : > { %19263 = vst [vmem:[#allocation98_spill] sm:$0xff] %v15616_v14  ;;  %v15620_v4 = vpack.c.bf16 %v965_v58, %v963_v56  ;;  %v967_v58 = vsel %vm780_vm0, %v964_v55, %v966_v61  ;;  %v977_v53 = vrot.slane %v19271_v5, 1 }
  0xbe   : > { %12020 = vmatmul.mubr.bf16.gmra.mrb[72].mxu1 %v15580_v29  ;;  %v969_v56 = vsel %vm780_vm0, %v966_v61, %v968_v51 }
  0xbf   : > { %12532 = vmatmul.mubr.bf16.gmra.mrb[8].mxu0 %v15004_v59  ;;  %12023 = vmatprep.mubr.bf16.mxu1 %v15584_v23  ;;  %v18878_v59 = vunpack.c.l.bf16 %v15601_v36  ;;  %19265 = vst [vmem:[#allocation99_spill] sm:$0xff] %v15620_v4  ;;  %v15652_v61 = vpack.c.bf16 %v969_v56, %v967_v58  ;;  %v15670_v58 = vld [vmem:[%s14789_s17 + $0x1cc] sm:$0xff]   ;;  %v15703_v36 = vld [vmem:[%s14789_s17 + $0x1dc] sm:$0x1] }
  0xc0   : > { %12535 = vmatprep.mubr.bf16.mxu0 %v15013_v3  ;;  %v970_v3 = vrot.slane %v18880_v31, 1  ;;  %19274 = vst [vmem:[#allocation106_spill] sm:$0xff] %v15670_v58  ;;  %v18900_v56 = vunpack.c.h.bf16 %v15670_v58  ;;  %19280 = vst [vmem:[#allocation110_spill] sm:$0xff] %v15703_v36 }
  0xc1   : > { %v973_v9 = vrot.slane %v18878_v59, 1  ;;  %19269 = vst [vmem:[#allocation103_spill] sm:$0xff] %v15652_v61  ;;  %v975_v59 = vrot.slane %v18891_v57, 1 }
  0xc2   : > { %v972_v31 = vsel %vm780_vm0, %v970_v3, %v971_v21  ;;  %v980_v3 = vrot.slane %v18890_v26, 1 }
  0xc3   : > { %v974_v55 = vsel %vm780_vm0, %v971_v21, %v973_v9  ;;  %v978_v5 = vsel %vm780_vm0, %v975_v59, %v977_v53 }
  0xc4   : > { %v15654_v51 = vpack.c.bf16 %v974_v55, %v972_v31  ;;  %v15673_v31 = vld [vmem:[%s14789_s17 + $0x1d4] sm:$0xff]   ;;  %v18901_v55 = vunpack.c.l.bf16 %v15667_v62 }
  0xc5   : > { %19275 = vst [vmem:[#allocation107_spill] sm:$0xff] %v15673_v31 }
  0xc6   : > { %12024 = vmatmul.mubr.bf16.gmra.mrb[76].mxu1 %v15616_v14  ;;  %19270 = vst [vmem:[#allocation104_spill] sm:$0xff] %v15654_v51 }
  0xc7   : > { %12536 = vmatmul.mubr.bf16.gmra.mrb[12].mxu0 %v15039_v16  ;;  %12027 = vmatprep.mubr.bf16.mxu1 %v15620_v4  ;;  %v18889_v16 = vunpack.c.l.bf16 %v15637_v52 }
  0xc8   : > { %12539 = vmatprep.mubr.bf16.mxu0 %v15046_v27  ;;  %v19272_v27 = vunpack.c.l.bf16 %v15634_v60 }
  0xc9   : > { %v982_v21 = vrot.slane %v18889_v16, 1  ;;  %v986_v16 = vrot.slane %v18901_v55, 1 }
  0xca   : > { %v979_v35 = vrot.slane %v19272_v27, 1  ;;  %v976_v27 = vsel %vm780_vm0, %v973_v9, %v975_v59  ;;  %v19277_v59 = vunpack.c.h.bf16 %v15637_v52 }
  0xcb   : > { %v983_v57 = vsel %vm780_vm0, %v980_v3, %v982_v21  ;;  %v15688_v9 = vpack.c.bf16 %v978_v5, %v976_v27  ;;  %v15706_v27 = vld [vmem:[%s14789_s17 + $0x1e0] sm:$0xff]   ;;  %v15709_v5 = vld [vmem:[%s14789_s17 + $0x1e8] sm:$0xff]  }
  0xcc   : > { %v981_v26 = vsel %vm780_vm0, %v979_v35, %v980_v3  ;;  %v984_v53 = vrot.slane %v19277_v59, 1  ;;  %v989_v35 = vrot.slane %v18900_v56, 1  ;;  %19281 = vst [vmem:[#allocation111_spill] sm:$0xff] %v15706_v27  ;;  %19282 = vst [vmem:[#allocation112_spill] sm:$0xff] %v15709_v5 }
  0xcd   : > { %19276 = vst [vmem:[#allocation108_spill] sm:$0xff] %v15688_v9  ;;  %v15692_v60 = vpack.c.bf16 %v983_v57, %v981_v26 }
  0xce   : > { %12028 = vmatmul.mubr.bf16.gmra.mrb[80].mxu1 %v15652_v61  ;;  %v985_v26 = vsel %vm780_vm0, %v982_v21, %v984_v53  ;;  %v14345_v21 = vld [vmem:[%s18717_s1 + $0x158] sm:$0xff]  }
  0xcf   : > { %12540 = vmatmul.mubr.bf16.gmra.mrb[16].mxu0 %v15077_v39  ;;  %12031 = vmatprep.mubr.bf16.mxu1 %v15654_v51  ;;  %v18899_v39 = vunpack.c.l.bf16 %v15673_v31  ;;  %19278 = vst [vmem:[#allocation109_spill] sm:$0xff] %v15692_v60 }
  0xd0   : > { %12543 = vmatprep.mubr.bf16.mxu0 %v15086_v37  ;;  %v19279_v37 = vunpack.c.l.bf16 %v15670_v58  ;;  %12657 = vmatprep.subr.bf16.mxu0 %v14345_v21 }
  0xd1   : > { %v991_v3 = vrot.slane %v18899_v39, 1  ;;  %v19284_v39 = vunpack.c.h.bf16 %v15673_v31  ;;  %12658 = vmatpush3.bf16.msra.mxu0 %v14345_v21  ;;  %v15778_v31 = vld [vmem:[%s14789_s17 + $0x204] sm:$0x1] }
  0xd2   : > { %v988_v25 = vrot.slane %v19279_v37, 1  ;;  %v987_v37 = vsel %vm780_vm0, %v984_v53, %v986_v16  ;;  %v18909_v16 = vunpack.c.l.bf16 %v15709_v5  ;;  %19294 = vst [vmem:[#allocation120_spill] sm:$0xff] %v15778_v31 }
  0xd3   : > { %v992_v57 = vsel %vm780_vm0, %v989_v35, %v991_v3  ;;  %v15727_v53 = vpack.c.bf16 %v987_v37, %v985_v26  ;;  %v993_v56 = vrot.slane %v19284_v39, 1  ;;  %v15742_v26 = vld [vmem:[%s14789_s17 + $0x1f0] sm:$0x1]  ;;  %v15745_v37 = vld [vmem:[%s14789_s17 + $0x1f4] sm:$0xff]   ;;  %v15748_v39 = vld [vmem:[%s14789_s17 + $0x1fc] sm:$0xff]  }
  0xd4   : > { %v990_v55 = vsel %vm780_vm0, %v988_v25, %v989_v35  ;;  %v19288_v25 = vunpack.c.h.bf16 %v15706_v27  ;;  %v1000_v52 = vrot.slane %v18909_v16, 1  ;;  %19289 = vst [vmem:[#allocation115_spill] sm:$0xff] %v15742_v26  ;;  %19290 = vst [vmem:[#allocation116_spill] sm:$0xff] %v15745_v37  ;;  %v18920_v21 = vunpack.c.l.bf16 %v15742_v26 }
  0xd5   : > { %19283 = vst [vmem:[#allocation113_spill] sm:$0xff] %v15727_v53  ;;  %v15731_v59 = vpack.c.bf16 %v992_v57, %v990_v55  ;;  %19291 = vst [vmem:[#allocation117_spill] sm:$0xff] %v15748_v39  ;;  %v994_v55 = vsel %vm780_vm0, %v991_v3, %v993_v56  ;;  %v18921_v57 = vunpack.c.h.bf16 %v15709_v5  ;;  %v18919_v3 = vunpack.c.l.bf16 %v15745_v37  ;;  %v15814_v5 = vld [vmem:[%s14789_s17 + $0x218] sm:$0x1] }
  0xd6   : > { %12032 = vmatmul.mubr.bf16.gmra.mrb[84].mxu1 %v15688_v9  ;;  %v998_v35 = vrot.slane %v19288_v25, 1  ;;  %v18917_v16 = vunpack.c.h.bf16 %v15745_v37  ;;  %19301 = vst [vmem:[#allocation125_spill] sm:$0xff] %v15814_v5 }
  0xd7   : > { %12544 = vmatmul.mubr.bf16.gmra.mrb[20].mxu0 %v15113_v15  ;;  %12035 = vmatprep.mubr.bf16.mxu1 %v15692_v60  ;;  %19285 = vst [vmem:[#allocation114_spill] sm:$0xff] %v15731_v59  ;;  %v19286_v15 = vunpack.c.l.bf16 %v15703_v36 }
  0xd8   : > { %12547 = vmatprep.mubr.bf16.mxu0 %v15118_v10  ;;  %v19287_v10 = vunpack.c.l.bf16 %v15706_v27  ;;  %v1001_v25 = vsel %vm780_vm0, %v998_v35, %v1000_v52  ;;  %v1004_v27 = vrot.slane %v18920_v21, 1 }
  0xd9   : > { %v995_v58 = vrot.slane %v19286_v15, 1 }
  0xda   : > { %v997_v62 = vrot.slane %v19287_v10, 1 }
  0xdb   : > { %v996_v10 = vsel %vm780_vm0, %v993_v56, %v995_v58 }
  0xdc   : > { %v999_v15 = vsel %vm780_vm0, %v997_v62, %v998_v35  ;;  %v15763_v58 = vpack.c.bf16 %v996_v10, %v994_v55  ;;  %v1002_v62 = vrot.slane %v18921_v57, 1  ;;  %v1007_v35 = vrot.slane %v18917_v16, 1  ;;  %v15781_v55 = vld [vmem:[%s14789_s17 + $0x208] sm:$0xff]   ;;  %v15784_v10 = vld [vmem:[%s14789_s17 + $0x210] sm:$0xff]  }
  0xdd   : > { %v15765_v56 = vpack.c.bf16 %v1001_v25, %v999_v15  ;;  %19295 = vst [vmem:[#allocation121_spill] sm:$0xff] %v15781_v55  ;;  %19296 = vst [vmem:[#allocation122_spill] sm:$0xff] %v15784_v10  ;;  %v18930_v15 = vunpack.c.h.bf16 %v15781_v55 }
  0xde   : > { %12036 = vmatmul.mubr.bf16.gmra.mrb[88].mxu1 %v15727_v53  ;;  %19292 = vst [vmem:[#allocation118_spill] sm:$0xff] %v15763_v58  ;;  %v1003_v25 = vsel %vm780_vm0, %v1000_v52, %v1002_v62  ;;  %v1005_v16 = vsel %vm780_vm0, %v1002_v62, %v1004_v27  ;;  %v19298_v27 = vunpack.c.h.bf16 %v15748_v39 }
  0xdf   : > { %12548 = vmatmul.mubr.bf16.gmra.mrb[24].mxu0 %v15150_v49  ;;  %12039 = vmatprep.mubr.bf16.mxu1 %v15731_v59  ;;  %v18918_v49 = vunpack.c.l.bf16 %v15748_v39  ;;  %19293 = vst [vmem:[#allocation119_spill] sm:$0xff] %v15765_v56  ;;  %v15799_v52 = vpack.c.bf16 %v1005_v16, %v1003_v25  ;;  %v15817_v16 = vld [vmem:[%s14789_s17 + $0x21c] sm:$0xff]   ;;  %v15820_v25 = vld [vmem:[%s14789_s17 + $0x224] sm:$0xff]   ;;  %v15850_v39 = vld [vmem:[%s14789_s17 + $0x22c] sm:$0x1] }
  0xe0   : > { %12551 = vmatprep.mubr.bf16.mxu0 %v15159_v20  ;;  %v1006_v20 = vrot.slane %v18919_v3, 1  ;;  %v1011_v62 = vrot.slane %v19298_v27, 1  ;;  %19302 = vst [vmem:[#allocation126_spill] sm:$0xff] %v15817_v16  ;;  %19303 = vst [vmem:[#allocation127_spill] sm:$0xff] %v15820_v25 }
  0xe1   : > { %v1009_v36 = vrot.slane %v18918_v49, 1  ;;  %v18931_v49 = vunpack.c.l.bf16 %v15778_v31  ;;  %19297 = vst [vmem:[#allocation123_spill] sm:$0xff] %v15799_v52  ;;  %19308 = vst [vmem:[#allocation130_spill] sm:$0xff] %v15850_v39 }
  0xe2   : > { %v1008_v21 = vsel %vm780_vm0, %v1006_v20, %v1007_v35  ;;  %v1016_v20 = vrot.slane %v18930_v15, 1 }
  0xe3   : > { %v1010_v57 = vsel %vm780_vm0, %v1007_v35, %v1009_v36  ;;  %v1013_v3 = vrot.slane %v18931_v49, 1  ;;  %v18940_v49 = vunpack.c.h.bf16 %v15817_v16 }
  0xe4   : > { %v15803_v37 = vpack.c.bf16 %v1010_v57, %v1008_v21  ;;  %v1012_v57 = vsel %vm780_vm0, %v1009_v36, %v1011_v62  ;;  %v18941_v21 = vunpack.c.h.bf16 %v15784_v10 }
  0xe6   : > { %12040 = vmatmul.mubr.bf16.gmra.mrb[92].mxu1 %v15763_v58  ;;  %19299 = vst [vmem:[#allocation124_spill] sm:$0xff] %v15803_v37  ;;  %v1020_v27 = vrot.slane %v18941_v21, 1 }
  0xe7   : > { %12552 = vmatmul.mubr.bf16.gmra.mrb[28].mxu0 %v15191_v18  ;;  %12043 = vmatprep.mubr.bf16.mxu1 %v15765_v56  ;;  %v18929_v18 = vunpack.c.l.bf16 %v15784_v10 }
  0xe8   : > { %12555 = vmatprep.mubr.bf16.mxu0 %v15193_v12  ;;  %v19300_v12 = vunpack.c.l.bf16 %v15781_v55  ;;  %v19306_v55 = vunpack.c.l.bf16 %v15814_v5 }
  0xe9   : > { %v1018_v35 = vrot.slane %v18929_v18, 1 }
  0xea   : > { %v1015_v26 = vrot.slane %v19300_v12, 1  ;;  %v1014_v12 = vsel %vm780_vm0, %v1011_v62, %v1013_v3  ;;  %v1022_v18 = vrot.slane %v19306_v55, 1 }
  0xeb   : > { %v1019_v36 = vsel %vm780_vm0, %v1016_v20, %v1018_v35  ;;  %v15835_v3 = vpack.c.bf16 %v1014_v12, %v1012_v57  ;;  %v15853_v57 = vld [vmem:[%s14789_s17 + $0x230] sm:$0xff]  }
  0xec   : > { %v1017_v15 = vsel %vm780_vm0, %v1015_v26, %v1016_v20  ;;  %v1025_v26 = vrot.slane %v18940_v49, 1  ;;  %v1023_v55 = vsel %vm780_vm0, %v1020_v27, %v1022_v18  ;;  %v14346_v49 = vld [vmem:[%s18717_s1 + $0x160] sm:$0xff]  }
  0xed   : > { %19304 = vst [vmem:[#allocation128_spill] sm:$0xff] %v15835_v3  ;;  %v15837_v62 = vpack.c.bf16 %v1019_v36, %v1017_v15  ;;  %v15856_v15 = vld [vmem:[%s14789_s17 + $0x238] sm:$0xff]   ;;  %12659 = vmatprep.subr.bf16.mxu0 %v14346_v49 }
  0xee   : > { %12044 = vmatmul.mubr.bf16.gmra.mrb[96].mxu1 %v15799_v52  ;;  %19309 = vst [vmem:[#allocation131_spill] sm:$0xff] %v15856_v15  ;;  %v18949_v18 = vunpack.c.l.bf16 %v15856_v15  ;;  %12660 = vmatpush3.bf16.msra.mxu0 %v14346_v49 }
  0xef   : > { %12556 = vmatmul.mubr.bf16.gmra.mrb[32].mxu0 %v15219_v44  ;;  %12047 = vmatprep.mubr.bf16.mxu1 %v15803_v37  ;;  %v18939_v44 = vunpack.c.l.bf16 %v15820_v25  ;;  %19305 = vst [vmem:[#allocation129_spill] sm:$0xff] %v15837_v62 }
  0xf0   : > { %12559 = vmatprep.mubr.bf16.mxu0 %v15226_v45  ;;  %v19307_v45 = vunpack.c.l.bf16 %v15817_v16  ;;  %v1036_v10 = vrot.slane %v18949_v18, 1 }
  0xf1   : > { %v1027_v20 = vrot.slane %v18939_v44, 1  ;;  %v19311_v44 = vunpack.c.h.bf16 %v15820_v25 }
  0xf2   : > { %v1024_v31 = vrot.slane %v19307_v45, 1  ;;  %v1021_v45 = vsel %vm780_vm0, %v1018_v35, %v1020_v27  ;;  %v18950_v35 = vunpack.c.h.bf16 %v15853_v57 }
  0xf3   : > { %v1028_v12 = vsel %vm780_vm0, %v1025_v26, %v1027_v20  ;;  %v15874_v27 = vpack.c.bf16 %v1023_v55, %v1021_v45  ;;  %v1029_v36 = vrot.slane %v19311_v44, 1  ;;  %v15889_v45 = vld [vmem:[%s14789_s17 + $0x240] sm:$0x1]  ;;  %v15892_v55 = vld [vmem:[%s14789_s17 + $0x244] sm:$0xff]   ;;  %v15895_v44 = vld [vmem:[%s14789_s17 + $0x24c] sm:$0xff]  }
  0xf4   : > { %v1026_v21 = vsel %vm780_vm0, %v1024_v31, %v1025_v26  ;;  %v19314_v31 = vunpack.c.l.bf16 %v15853_v57  ;;  %v1034_v26 = vrot.slane %v18950_v35, 1  ;;  %19315 = vst [vmem:[#allocation134_spill] sm:$0xff] %v15889_v45  ;;  %19316 = vst [vmem:[#allocation135_spill] sm:$0xff] %v15892_v55  ;;  %v19321_v18 = vunpack.c.l.bf16 %v15892_v55 }
  0xf5   : > { %19310 = vst [vmem:[#allocation132_spill] sm:$0xff] %v15874_v27  ;;  %19317 = vst [vmem:[#allocation136_spill] sm:$0xff] %v15895_v44  ;;  %v1030_v49 = vsel %vm780_vm0, %v1027_v20, %v1029_v36 }
  0xf6   : > { %12048 = vmatmul.mubr.bf16.gmra.mrb[100].mxu1 %v15835_v3  ;;  %v1033_v5 = vrot.slane %v19314_v31, 1  ;;  %v1037_v35 = vsel %vm780_vm0, %v1034_v26, %v1036_v10  ;;  %v1042_v25 = vrot.slane %v19321_v18, 1 }
  0xf7   : > { %12560 = vmatmul.mubr.bf16.gmra.mrb[36].mxu0 %v15261_v24  ;;  %12051 = vmatprep.mubr.bf16.mxu1 %v15837_v62  ;;  %v15878_v24 = vpack.c.bf16 %v1028_v12, %v1026_v21  ;;  %v18959_v12 = vunpack.c.l.bf16 %v15889_v45 }
  0xf8   : > { %12563 = vmatprep.mubr.bf16.mxu0 %v15268_v33  ;;  %v19313_v33 = vunpack.c.l.bf16 %v15850_v39  ;;  %v1035_v20 = vsel %vm780_vm0, %v1033_v5, %v1034_v26 }
  0xf9   : > { %19312 = vst [vmem:[#allocation133_spill] sm:$0xff] %v15878_v24  ;;  %v15914_v39 = vpack.c.bf16 %v1037_v35, %v1035_v20  ;;  %v1040_v31 = vrot.slane %v18959_v12, 1  ;;  %v18971_v20 = vunpack.c.h.bf16 %v15895_v44 }
  0xfa   : > { %v1031_v16 = vrot.slane %v19313_v33, 1  ;;  %v18958_v33 = vunpack.c.l.bf16 %v15895_v44  ;;  %v15997_v44 = vld [vmem:[%s14789_s17 + $0x27c] sm:$0x1] }
  0xfb   : > { %19320 = vst [vmem:[#allocation138_spill] sm:$0xff] %v15914_v39 }
  0xfc   : > { %v1032_v21 = vsel %vm780_vm0, %v1029_v36, %v1031_v16  ;;  %v19319_v16 = vunpack.c.h.bf16 %v15856_v15  ;;  %v1045_v26 = vrot.slane %v18958_v33, 1  ;;  %v15961_v15 = vld [vmem:[%s14789_s17 + $0x268] sm:$0x1] }
  0xfe   : > { %12052 = vmatmul.mubr.bf16.gmra.mrb[104].mxu1 %v15874_v27  ;;  %v1038_v36 = vrot.slane %v19319_v16, 1  ;;  %v18970_v16 = vunpack.c.l.bf16 %v15925_v34 }
  0xff   : > { %12564 = vmatmul.mubr.bf16.gmra.mrb[40].mxu0 %v15297_v54  ;;  %12055 = vmatprep.mubr.bf16.mxu1 %v15878_v24  ;;  %v15910_v54 = vpack.c.bf16 %v1032_v21, %v1030_v49  ;;  %v15928_v49 = vld [vmem:[%s14789_s17 + $0x258] sm:$0xff]   ;;  %v15931_v21 = vld [vmem:[%s14789_s17 + $0x260] sm:$0xff]  }
 0x100   : > { %12567 = vmatprep.mubr.bf16.mxu0 %v15304_v47  ;;  %v19322_v47 = vunpack.c.h.bf16 %v15892_v55  ;;  %19324 = vst [vmem:[#allocation140_spill] sm:$0xff] %v15928_v49  ;;  %v1039_v35 = vsel %vm780_vm0, %v1036_v10, %v1038_v36  ;;  %v1041_v18 = vsel %vm780_vm0, %v1038_v36, %v1040_v31  ;;  %v18969_v10 = vunpack.c.l.bf16 %v15928_v49 }
 0x101   : > { %19318 = vst [vmem:[#allocation137_spill] sm:$0xff] %v15910_v54  ;;  %v18967_v12 = vunpack.c.h.bf16 %v15928_v49  ;;  %v15946_v31 = vpack.c.bf16 %v1041_v18, %v1039_v35  ;;  %v1049_v45 = vrot.slane %v18970_v16, 1  ;;  %v15964_v35 = vld [vmem:[%s14789_s17 + $0x26c] sm:$0xff]  }
 0x102   : > { %v1043_v5 = vrot.slane %v19322_v47, 1  ;;  %v18980_v18 = vunpack.c.h.bf16 %v15964_v35 }
 0x103   : > { %19325 = vst [vmem:[#allocation141_spill] sm:$0xff] %v15946_v31 }
 0x104   : > { %v1044_v47 = vsel %vm780_vm0, %v1042_v25, %v1043_v5  ;;  %v1046_v33 = vsel %vm780_vm0, %v1043_v5, %v1045_v26  ;;  %v1047_v25 = vrot.slane %v18971_v20, 1  ;;  %v1052_v5 = vrot.slane %v18967_v12, 1 }
 0x105   : > { %v15948_v36 = vpack.c.bf16 %v1046_v33, %v1044_v47  ;;  %v15967_v33 = vld [vmem:[%s14789_s17 + $0x274] sm:$0xff]  }
 0x106   : > { %12056 = vmatmul.mubr.bf16.gmra.mrb[108].mxu1 %v15910_v54  ;;  %v1048_v47 = vsel %vm780_vm0, %v1045_v26, %v1047_v25  ;;  %v1050_v12 = vsel %vm780_vm0, %v1047_v25, %v1049_v45  ;;  %v19329_v45 = vunpack.c.h.bf16 %v15931_v21 }
 0x107   : > { %12568 = vmatmul.mubr.bf16.gmra.mrb[44].mxu0 %v15333_v11  ;;  %12059 = vmatprep.mubr.bf16.mxu1 %v15914_v39  ;;  %v18968_v11 = vunpack.c.l.bf16 %v15931_v21  ;;  %19326 = vst [vmem:[#allocation142_spill] sm:$0xff] %v15948_v36  ;;  %v15982_v34 = vpack.c.bf16 %v1050_v12, %v1048_v47  ;;  %v14347_v47 = vld [vmem:[%s18717_s1 + $0x168] sm:$0xff]  }
 0x108   : > { %12571 = vmatprep.mubr.bf16.mxu0 %v15340_v1  ;;  %v1051_v1 = vrot.slane %v18969_v10, 1  ;;  %v1056_v25 = vrot.slane %v19329_v45, 1  ;;  %12661 = vmatprep.subr.bf16.mxu0 %v14347_v47 }
 0x109   : > { %v1054_v55 = vrot.slane %v18968_v11, 1  ;;  %v18983_v11 = vunpack.c.l.bf16 %v15961_v15  ;;  %19327 = vst [vmem:[#allocation143_spill] sm:$0xff] %v15982_v34  ;;  %12662 = vmatpush3.bf16.msra.mxu0 %v14347_v47  ;;  %v19335_v47 = vunpack.c.h.bf16 %v14801_v13 }
 0x10a   : > { %v1053_v16 = vsel %vm780_vm0, %v1051_v1, %v1052_v5  ;;  %v1061_v1 = vrot.slane %v18980_v18, 1 }
 0x10b   : > { %v1055_v20 = vsel %vm780_vm0, %v1052_v5, %v1054_v55  ;;  %v1058_v10 = vrot.slane %v18983_v11, 1  ;;  %v1057_v12 = vsel %vm780_vm0, %v1054_v55, %v1056_v25 }
 0x10c   : > { %v15984_v26 = vpack.c.bf16 %v1055_v20, %v1053_v16  ;;  %v18981_v16 = vunpack.c.l.bf16 %v15997_v44 }
 0x10d   : > { %v1059_v20 = vsel %vm780_vm0, %v1056_v25, %v1058_v10 }
 0x10e   : > { %12060 = vmatmul.mubr.bf16.gmra.mrb[112].mxu1 %v15946_v31  ;;  %19328 = vst [vmem:[#allocation144_spill] sm:$0xff] %v15984_v26  ;;  %v16012_v18 = vpack.c.bf16 %v1059_v20, %v1057_v12  ;;  %v1067_v25 = vrot.slane %v18981_v16, 1  ;;  %v19334_v12 = vunpack.c.l.bf16 %v14801_v13  ;;  %v14676_v16 = vld [vmem:[%s14789_s17] sm:$0xff]  }
 0x10f   : > { %12572 = vmatmul.mubr.bf16.gmra.mrb[48].mxu0 %v15375_v17  ;;  %12063 = vmatprep.mubr.bf16.mxu1 %v15948_v36  ;;  %v18979_v17 = vunpack.c.l.bf16 %v15967_v33 }
 0x110   : > { %12575 = vmatprep.mubr.bf16.mxu0 %v15382_v19  ;;  %v19330_v19 = vunpack.c.l.bf16 %v15964_v35  ;;  %19331 = vst [vmem:[#allocation145_spill] sm:$0xff] %v16012_v18  ;;  %v2474_v20 = vrot.slane %v19334_v12, 2 }
 0x111   : > { %v1063_v5 = vrot.slane %v18979_v17, 1 }
 0x112   : > { %v1060_v49 = vrot.slane %v19330_v19, 1  ;;  %v18982_v19 = vunpack.c.h.bf16 %v15967_v33 }
 0x113   : > { %v1064_v17 = vsel %vm780_vm0, %v1061_v1, %v1063_v5 }
 0x114   : > { %v1062_v45 = vsel %vm780_vm0, %v1060_v49, %v1061_v1  ;;  %v1065_v10 = vrot.slane %v18982_v19, 1  ;;  %v14348_v19 = vld [vmem:[%s18717_s1 + $0x170] sm:$0xff]  }
 0x115   : > { %v16014_v55 = vpack.c.bf16 %v1064_v17, %v1062_v45  ;;  %v2475_v45 = vrot.slane %v19335_v47, 2  ;;  %12663 = vmatprep.subr.bf16.mxu0 %v14348_v19  ;;  %v14677_v47 = vld [vmem:[%s14789_s17 + $0x8] sm:$0xff]  }
 0x116   : > { %12064 = vmatmul.mubr.bf16.gmra.mrb[116].mxu1 %v15982_v34  ;;  %v1066_v49 = vsel %vm780_vm0, %v1063_v5, %v1065_v10  ;;  %v1068_v1 = vsel %vm780_vm0, %v1065_v10, %v1067_v25  ;;  %v14349_v5 = vld [vmem:[%s18717_s1 + $0x178] sm:$0xff]   ;;  %12664 = vmatpush3.bf16.msra.mxu0 %v14348_v19 }
 0x117   : > { %12576 = vmatmul.mubr.bf16.gmra.mrb[52].mxu0 %v15417_v6  ;;  %12067 = vmatprep.mubr.bf16.mxu1 %v15984_v26  ;;  %19332 = vst [vmem:[#allocation146_spill] sm:$0xff] %v16014_v55  ;;  %v16026_v17 = vpack.c.bf16 %v1068_v1, %v1066_v49  ;;  %v2476_v10 = vsel %vm2464_vm1, %v2474_v20, %v2475_v45  ;;  %v19336_v49 = vunpack.c.l.bf16 %v14850_v41 }
 0x118   : > { %12579 = vmatprep.mubr.bf16.mxu0 %v15424_v28  ;;  %v2478_v25 = vsel %vm2464_vm1, %v2475_v45, %v14847_v40  ;;  %12665 = vmatprep.subr.bf16.mxu0 %v14349_v5 }
 0x119   : > { %19333 = vst [vmem:[#allocation147_spill] sm:$0xff] %v16026_v17  ;;  %v2481_v1 = vrot.slane %v19336_v49, 2  ;;  %v16047_v12 = vpack.c.bf16 %v2478_v25, %v2476_v10 }
 0x11a   : > { %12666 = vmatpush3.bf16.msra.mxu0 %v14349_v5  ;;  %v19342_v5 = vunpack.c.l.bf16 %v14897_v2 }
 0x11b   : > { %v2482_v41 = vsel %vm2464_vm1, %v14855_v43, %v2481_v1  ;;  %v19341_v43 = vunpack.c.l.bf16 %v14890_v63  ;;  %v19343_v1 = vunpack.c.h.bf16 %v14897_v2 }
 0x11c   : > { %v16059_v45 = vpack.c.bf16 %v2482_v41, %v14862_v46  ;;  %v2492_v49 = vrot.slane %v19342_v5, 2  ;;  %v19349_v5 = vld [vmem:[#allocation11_spill] sm:$0xff] }
 0x11d   : > { %v2490_v46 = vrot.slane %v19341_v43, 2 }
 0x11e   : > { %12068 = vmatmul.mubr.bf16.gmra.mrb[120].mxu1 %v16012_v18 }
 0x11f   : > { %12580 = vmatmul.mubr.bf16.gmra.mrb[56].mxu0 %v15459_v0  ;;  %12071 = vmatprep.mubr.bf16.mxu1 %v16014_v55 }
 0x120   : > { %12583 = vmatprep.mubr.bf16.mxu0 %v15463_v32  ;;  %v19339_v32 = vunpack.c.l.bf16 %v14870_v50 }
 0x122   : > { %v2486_v40 = vrot.slane %v19339_v32, 2 }
 0x126   : > { %12072 = vmatmul.mubr.bf16.gmra.mrb[124].mxu1 %v16026_v17 }
 0x127   : > { %12584 = vmatmul.mubr.bf16.gmra.mrb[60].mxu0 %v15501_v22  ;;  %12091 = vmatprep.mubr.bf16.mxu1 %v14676_v16  ;;  %v19337_v16 = vunpack.c.l.bf16 %v14866_v48  ;;  %v19338_v22 = vunpack.c.h.bf16 %v14866_v48 }
 0x128   : > { %12587 = vmatprep.mubr.bf16.mxu0 %v15505_v38 }
 0x129   : > { %v2483_v11 = vrot.slane %v19337_v16, 2  ;;  %v2484_v20 = vrot.slane %v19338_v22, 2  ;;  %v19340_v22 = vunpack.c.h.bf16 %v14870_v50 }
 0x12b   : > { %v2485_v19 = vsel %vm2464_vm1, %v2483_v11, %v2484_v20  ;;  %v2487_v10 = vsel %vm2464_vm1, %v2484_v20, %v2486_v40  ;;  %v2488_v25 = vrot.slane %v19340_v22, 2  ;;  %v19344_v11 = vunpack.c.l.bf16 %v14906_v7 }
 0x12c   : > { %v16068_v32 = vpack.c.bf16 %v2487_v10, %v2485_v19  ;;  %v19345_v10 = vunpack.c.h.bf16 %v14906_v7 }
 0x12d   : > { %v2489_v16 = vsel %vm2464_vm1, %v2486_v40, %v2488_v25  ;;  %v2491_v20 = vsel %vm2464_vm1, %v2488_v25, %v2490_v46  ;;  %v19347_v25 = vld [vmem:[#allocation10_spill] sm:$0xff] }
 0x12e   : > { %12092 = vmatmul.mubr.bf16.vlgmr.msra.gmra.mrb[0].mxu1 %v14677_v47  ;;  %v2495_v47 = vrot.slane %v19344_v11, 2  ;;  %v16080_v41 = vpack.c.bf16 %v2491_v20, %v2489_v16  ;;  %v2497_v22 = vrot.slane %v19345_v10, 2  ;;  %v19348_v43 = vunpack.c.l.bf16 %v19347_v25  ;;  %v19352_v20 = vld [vmem:[#allocation12_spill] sm:$0xff] }
 0x12f   : > { %12588 = vmatmul.mubr.bf16.gmra.mrb[64].mxu0 %v15541_v8  ;;  %12095 = vmatprep.mubr.bf16.mxu1 %v14801_v13  ;;  %v2493_v13 = vrot.slane %v19343_v1, 2  ;;  %v19351_v11 = vunpack.c.h.bf16 %v19349_v5  ;;  %v19355_v25 = vunpack.c.h.bf16 %v19352_v20 }
 0x130   : > { %12591 = vmatprep.mubr.bf16.mxu0 %v15545_v42  ;;  %v2499_v46 = vrot.slane %v19348_v43, 2 }
 0x131   : > { %v2494_v63 = vsel %vm2464_vm1, %v2492_v49, %v2493_v13  ;;  %v2496_v19 = vsel %vm2464_vm1, %v2493_v13, %v2495_v47  ;;  %v2502_v16 = vrot.slane %v19351_v11, 2  ;;  %v19353_v49 = vunpack.c.l.bf16 %v19352_v20  ;;  %v19359_v11 = vld [vmem:[#allocation16_spill] sm:$0xff] }
 0x132   : > { %v16090_v40 = vpack.c.bf16 %v2496_v19, %v2494_v63  ;;  %v2498_v13 = vsel %vm2464_vm1, %v2495_v47, %v2497_v22  ;;  %v2500_v10 = vsel %vm2464_vm1, %v2497_v22, %v2499_v46  ;;  %v2506_v43 = vrot.slane %v19355_v25, 2  ;;  %v19357_v22 = vld [vmem:[#allocation13_spill] sm:$0xff] }
 0x133   : > { %v16102_v42 = vpack.c.bf16 %v2500_v10, %v2498_v13  ;;  %v19358_v46 = vunpack.c.l.bf16 %v19357_v22  ;;  %v19361_v10 = vunpack.c.h.bf16 %v19359_v11 }
 0x134   : > { %19346 = vst [vmem:[#allocation148_spill] sm:$0xff] %v16090_v40 }
 0x135   : > { %19354 = vst [vmem:[#allocation10_spill] sm:$0xff] %v16102_v42 }
 0x136   : > { %12096 = vmatmul.mubr.bf16.gmra.mrb[4].mxu1 %v14832_v30  ;;  %v19350_v30 = vunpack.c.l.bf16 %v19349_v5 }
 0x137   : > { %12592 = vmatmul.mubr.bf16.gmra.mrb[68].mxu0 %v15580_v29  ;;  %12099 = vmatprep.mubr.bf16.mxu1 %v14866_v48  ;;  %v2504_v29 = vrot.slane %v19353_v49, 2  ;;  %v19360_v49 = vunpack.c.l.bf16 %v19359_v11  ;;  %v19472_v48 = vld [vmem:[#allocation72_spill] sm:$0xff] }
 0x138   : > { %12595 = vmatprep.mubr.bf16.mxu0 %v15584_v23  ;;  %v2501_v1 = vrot.slane %v19350_v30, 2  ;;  %v2508_v30 = vrot.slane %v19358_v46, 2  ;;  %v19362_v23 = vld [vmem:[#allocation17_spill] sm:$0xff] }
 0x139   : > { %v2505_v19 = vsel %vm2464_vm1, %v2502_v16, %v2504_v29  ;;  %v2510_v13 = vrot.slane %v19360_v49, 2  ;;  %v19365_v22 = vunpack.c.h.bf16 %v19362_v23 }
 0x13a   : > { %v2503_v63 = vsel %vm2464_vm1, %v2501_v1, %v2502_v16  ;;  %v19363_v1 = vunpack.c.l.bf16 %v19362_v23  ;;  %v2507_v16 = vsel %vm2464_vm1, %v2504_v29, %v2506_v43  ;;  %v2509_v25 = vsel %vm2464_vm1, %v2506_v43, %v2508_v30  ;;  %v19367_v43 = vld [vmem:[#allocation19_spill] sm:$0xff] }
 0x13b   : > { %v16112_v47 = vpack.c.bf16 %v2505_v19, %v2503_v63  ;;  %v16124_v38 = vpack.c.bf16 %v2509_v25, %v2507_v16  ;;  %v2515_v46 = vrot.slane %v19365_v22, 2  ;;  %v19368_v30 = vunpack.c.l.bf16 %v19367_v43 }
 0x13c   : > { %v2513_v8 = vrot.slane %v19363_v1, 2 }
 0x13d   : > { %19356 = vst [vmem:[#allocation149_spill] sm:$0xff] %v16112_v47  ;;  %19364 = vst [vmem:[#allocation13_spill] sm:$0xff] %v16124_v38  ;;  %v2517_v49 = vrot.slane %v19368_v30, 2 }
 0x13e   : > { %12100 = vmatmul.mubr.bf16.gmra.mrb[8].mxu1 %v14870_v50 }
 0x13f   : > { %12596 = vmatmul.mubr.bf16.gmra.mrb[72].mxu0 %v15616_v14  ;;  %12103 = vmatprep.mubr.bf16.mxu1 %v14897_v2  ;;  %v2511_v14 = vrot.slane %v19361_v10, 2  ;;  %v19369_v10 = vld [vmem:[#allocation21_spill] sm:$0xff]  ;;  %v2518_v22 = vsel %vm2464_vm1, %v2515_v46, %v2517_v49 }
 0x140   : > { %12599 = vmatprep.mubr.bf16.mxu0 %v15620_v4  ;;  %v19370_v1 = vunpack.c.l.bf16 %v19369_v10  ;;  %v19371_v25 = vunpack.c.h.bf16 %v19369_v10  ;;  %v19372_v4 = vld [vmem:[#allocation22_spill] sm:$0xff] }
 0x141   : > { %v2512_v63 = vsel %vm2464_vm1, %v2510_v13, %v2511_v14  ;;  %v2514_v19 = vsel %vm2464_vm1, %v2511_v14, %v2513_v8  ;;  %v19373_v13 = vunpack.c.l.bf16 %v19372_v4  ;;  %v2516_v14 = vsel %vm2464_vm1, %v2513_v8, %v2515_v46  ;;  %v19377_v46 = vld [vmem:[#allocation24_spill] sm:$0xff] }
 0x142   : > { %v16134_v29 = vpack.c.bf16 %v2514_v19, %v2512_v63  ;;  %v2519_v16 = vrot.slane %v19370_v1, 2  ;;  %v16146_v28 = vpack.c.bf16 %v2518_v22, %v2516_v14  ;;  %v19375_v43 = vunpack.c.h.bf16 %v19372_v4 }
 0x143   : > { %v2522_v0 = vrot.slane %v19373_v13, 2  ;;  %v19378_v49 = vunpack.c.l.bf16 %v19377_v46 }
 0x144   : > { %19366 = vst [vmem:[#allocation150_spill] sm:$0xff] %v16134_v29  ;;  %19374 = vst [vmem:[#allocation19_spill] sm:$0xff] %v16146_v28  ;;  %v2524_v30 = vrot.slane %v19375_v43, 2 }
 0x145   : > { %v2526_v1 = vrot.slane %v19378_v49, 2 }
 0x146   : > { %12104 = vmatmul.mubr.bf16.gmra.mrb[12].mxu1 %v14906_v7 }
 0x147   : > { %12600 = vmatmul.mubr.bf16.gmra.mrb[76].mxu0 %v15652_v61  ;;  %12107 = vmatprep.mubr.bf16.mxu1 %v19349_v5  ;;  %v2520_v61 = vrot.slane %v19371_v25, 2  ;;  %v19379_v25 = vld [vmem:[#allocation26_spill] sm:$0xff]  ;;  %v2527_v43 = vsel %vm2464_vm1, %v2524_v30, %v2526_v1  ;;  %v19458_v5 = vld [vmem:[#allocation67_spill] sm:$0xff] }
 0x148   : > { %12603 = vmatprep.mubr.bf16.mxu0 %v15654_v51  ;;  %v19380_v13 = vunpack.c.l.bf16 %v19379_v25  ;;  %v19381_v22 = vunpack.c.h.bf16 %v19379_v25  ;;  %v19382_v51 = vld [vmem:[#allocation27_spill] sm:$0xff] }
 0x149   : > { %v2521_v63 = vsel %vm2464_vm1, %v2519_v16, %v2520_v61  ;;  %v2523_v19 = vsel %vm2464_vm1, %v2520_v61, %v2522_v0  ;;  %v19383_v16 = vunpack.c.l.bf16 %v19382_v51  ;;  %v2525_v61 = vsel %vm2464_vm1, %v2522_v0, %v2524_v30  ;;  %v19387_v30 = vld [vmem:[#allocation29_spill] sm:$0xff] }
 0x14a   : > { %v16156_v8 = vpack.c.bf16 %v2523_v19, %v2521_v63  ;;  %v2528_v14 = vrot.slane %v19380_v13, 2  ;;  %v19385_v46 = vunpack.c.h.bf16 %v19382_v51  ;;  %v19388_v1 = vunpack.c.l.bf16 %v19387_v30 }
 0x14b   : > { %v2531_v6 = vrot.slane %v19383_v16, 2 }
 0x14c   : > { %19376 = vst [vmem:[#allocation151_spill] sm:$0xff] %v16156_v8  ;;  %v2533_v49 = vrot.slane %v19385_v46, 2  ;;  %v2535_v13 = vrot.slane %v19388_v1, 2 }
 0x14e   : > { %12108 = vmatmul.mubr.bf16.gmra.mrb[16].mxu1 %v19352_v20  ;;  %v2536_v46 = vsel %vm2464_vm1, %v2533_v49, %v2535_v13 }
 0x14f   : > { %12604 = vmatmul.mubr.bf16.gmra.mrb[80].mxu0 %v15688_v9  ;;  %12111 = vmatprep.mubr.bf16.mxu1 %v19359_v11  ;;  %v2529_v9 = vrot.slane %v19381_v22, 2  ;;  %v16168_v11 = vpack.c.bf16 %v2527_v43, %v2525_v61  ;;  %v19389_v22 = vld [vmem:[#allocation31_spill] sm:$0xff] }
 0x150   : > { %12607 = vmatprep.mubr.bf16.mxu0 %v15692_v60  ;;  %v19390_v16 = vunpack.c.l.bf16 %v19389_v22  ;;  %v19391_v43 = vunpack.c.h.bf16 %v19389_v22  ;;  %v19392_v60 = vld [vmem:[#allocation32_spill] sm:$0xff] }
 0x151   : > { %19384 = vst [vmem:[#allocation24_spill] sm:$0xff] %v16168_v11  ;;  %v2530_v63 = vsel %vm2464_vm1, %v2528_v14, %v2529_v9  ;;  %v2532_v19 = vsel %vm2464_vm1, %v2529_v9, %v2531_v6  ;;  %v19393_v14 = vunpack.c.l.bf16 %v19392_v60  ;;  %v2534_v9 = vsel %vm2464_vm1, %v2531_v6, %v2533_v49  ;;  %v19397_v49 = vld [vmem:[#allocation34_spill] sm:$0xff] }
 0x152   : > { %v16178_v0 = vpack.c.bf16 %v2532_v19, %v2530_v63  ;;  %v2537_v61 = vrot.slane %v19390_v16, 2  ;;  %v19395_v30 = vunpack.c.h.bf16 %v19392_v60  ;;  %v19398_v13 = vunpack.c.l.bf16 %v19397_v49 }
 0x154   : > { %19386 = vst [vmem:[#allocation152_spill] sm:$0xff] %v16178_v0  ;;  %v2542_v1 = vrot.slane %v19395_v30, 2  ;;  %v2544_v16 = vrot.slane %v19398_v13, 2 }
 0x156   : > { %12112 = vmatmul.mubr.bf16.gmra.mrb[20].mxu1 %v19362_v23  ;;  %v16190_v23 = vpack.c.bf16 %v2536_v46, %v2534_v9  ;;  %v2545_v30 = vsel %vm2464_vm1, %v2542_v1, %v2544_v16 }
 0x157   : > { %12608 = vmatmul.mubr.bf16.gmra.mrb[84].mxu0 %v15727_v53  ;;  %12115 = vmatprep.mubr.bf16.mxu1 %v19369_v10  ;;  %v2538_v53 = vrot.slane %v19391_v43, 2  ;;  %v2540_v10 = vrot.slane %v19393_v14, 2  ;;  %v19399_v43 = vld [vmem:[#allocation36_spill] sm:$0xff] }
 0x158   : > { %12611 = vmatprep.mubr.bf16.mxu0 %v15731_v59  ;;  %19394 = vst [vmem:[#allocation29_spill] sm:$0xff] %v16190_v23  ;;  %v19400_v14 = vunpack.c.l.bf16 %v19399_v43  ;;  %v19401_v46 = vunpack.c.h.bf16 %v19399_v43  ;;  %v19402_v59 = vld [vmem:[#allocation37_spill] sm:$0xff] }
 0x159   : > { %v2539_v63 = vsel %vm2464_vm1, %v2537_v61, %v2538_v53  ;;  %v2541_v19 = vsel %vm2464_vm1, %v2538_v53, %v2540_v10  ;;  %v19403_v61 = vunpack.c.l.bf16 %v19402_v59  ;;  %v2543_v53 = vsel %vm2464_vm1, %v2540_v10, %v2542_v1  ;;  %v19405_v1 = vld [vmem:[#allocation38_spill] sm:$0xff] }
 0x15a   : > { %v16200_v6 = vpack.c.bf16 %v2541_v19, %v2539_v63  ;;  %v2546_v9 = vrot.slane %v19400_v14, 2  ;;  %v19404_v49 = vunpack.c.h.bf16 %v19402_v59  ;;  %v19406_v16 = vunpack.c.l.bf16 %v19405_v1 }
 0x15c   : > { %19396 = vst [vmem:[#allocation153_spill] sm:$0xff] %v16200_v6  ;;  %v2551_v13 = vrot.slane %v19404_v49, 2  ;;  %v2553_v14 = vrot.slane %v19406_v16, 2 }
 0x15e   : > { %12116 = vmatmul.mubr.bf16.gmra.mrb[24].mxu1 %v19372_v4  ;;  %v16212_v4 = vpack.c.bf16 %v2545_v30, %v2543_v53  ;;  %v2554_v49 = vsel %vm2464_vm1, %v2551_v13, %v2553_v14 }
 0x15f   : > { %12612 = vmatmul.mubr.bf16.gmra.mrb[88].mxu0 %v15763_v58  ;;  %12119 = vmatprep.mubr.bf16.mxu1 %v19379_v25  ;;  %v2547_v58 = vrot.slane %v19401_v46, 2  ;;  %v2549_v25 = vrot.slane %v19403_v61, 2  ;;  %v19407_v46 = vld [vmem:[#allocation40_spill] sm:$0xff] }
 0x160   : > { %12615 = vmatprep.mubr.bf16.mxu0 %v15765_v56  ;;  %v19408_v61 = vunpack.c.l.bf16 %v19407_v46  ;;  %v19409_v30 = vunpack.c.h.bf16 %v19407_v46  ;;  %v19410_v56 = vld [vmem:[#allocation42_spill] sm:$0xff] }
 0x161   : > { %v2548_v63 = vsel %vm2464_vm1, %v2546_v9, %v2547_v58  ;;  %v2550_v19 = vsel %vm2464_vm1, %v2547_v58, %v2549_v25  ;;  %v19411_v9 = vunpack.c.l.bf16 %v19410_v56  ;;  %v2552_v58 = vsel %vm2464_vm1, %v2549_v25, %v2551_v13  ;;  %v19415_v13 = vld [vmem:[#allocation45_spill] sm:$0xff] }
 0x162   : > { %v16222_v10 = vpack.c.bf16 %v2550_v19, %v2548_v63  ;;  %v2555_v53 = vrot.slane %v19408_v61, 2  ;;  %v19413_v1 = vunpack.c.h.bf16 %v19410_v56  ;;  %v19416_v14 = vunpack.c.l.bf16 %v19415_v13 }
 0x164   : > { %v2560_v16 = vrot.slane %v19413_v1, 2  ;;  %v2562_v61 = vrot.slane %v19416_v14, 2 }
 0x166   : > { %12120 = vmatmul.mubr.bf16.gmra.mrb[28].mxu1 %v19382_v51  ;;  %v16234_v51 = vpack.c.bf16 %v2554_v49, %v2552_v58  ;;  %v2563_v1 = vsel %vm2464_vm1, %v2560_v16, %v2562_v61  ;;  %v19425_v61 = vld [vmem:[#allocation49_spill] sm:$0xff] }
 0x167   : > { %12616 = vmatmul.mubr.bf16.gmra.mrb[92].mxu0 %v15799_v52  ;;  %12123 = vmatprep.mubr.bf16.mxu1 %v19389_v22  ;;  %v2556_v52 = vrot.slane %v19409_v30, 2  ;;  %v2558_v22 = vrot.slane %v19411_v9, 2  ;;  %v19417_v30 = vld [vmem:[#allocation46_spill] sm:$0xff] }
 0x168   : > { %12619 = vmatprep.mubr.bf16.mxu0 %v15803_v37  ;;  %19412 = vst [vmem:[#allocation34_spill] sm:$0xff] %v16234_v51  ;;  %v19418_v9 = vunpack.c.l.bf16 %v19417_v30  ;;  %v19419_v49 = vunpack.c.h.bf16 %v19417_v30  ;;  %v19420_v37 = vld [vmem:[#allocation47_spill] sm:$0xff] }
 0x169   : > { %v2557_v63 = vsel %vm2464_vm1, %v2555_v53, %v2556_v52  ;;  %v2559_v19 = vsel %vm2464_vm1, %v2556_v52, %v2558_v22  ;;  %v19421_v53 = vunpack.c.l.bf16 %v19420_v37  ;;  %v2561_v52 = vsel %vm2464_vm1, %v2558_v22, %v2560_v16 }
 0x16a   : > { %v16244_v25 = vpack.c.bf16 %v2559_v19, %v2557_v63  ;;  %v2564_v58 = vrot.slane %v19418_v9, 2  ;;  %v16264_v63 = vld [vmem:[%s18717_s1 + $0x180] sm:$0xff]   ;;  %v19423_v22 = vunpack.c.h.bf16 %v19420_v37  ;;  %v19426_v9 = vunpack.c.l.bf16 %v19425_v61 }
 0x16b   : > { %12795 = vmatprep.subr.bf16.mxu0 %v16264_v63 }
 0x16c   : > { %19414 = vst [vmem:[#allocation38_spill] sm:$0xff] %v16244_v25  ;;  %v2569_v16 = vrot.slane %v19423_v22, 2 }
 0x16e   : > { %12124 = vmatmul.mubr.bf16.gmra.mrb[32].mxu1 %v19392_v60  ;;  %v16256_v60 = vpack.c.bf16 %v2563_v1, %v2561_v52 }
 0x16f   : > { %12620 = vmatmul.mubr.bf16.gmra.mrb[96].mxu0 %v15835_v3  ;;  %12127 = vmatprep.mubr.bf16.mxu1 %v19399_v43  ;;  %v2565_v3 = vrot.slane %v19419_v49, 2  ;;  %v2567_v43 = vrot.slane %v19421_v53, 2  ;;  %v2571_v49 = vrot.slane %v19426_v9, 2  ;;  %v19427_v53 = vld [vmem:[#allocation51_spill] sm:$0xff] }
 0x170   : > { %12623 = vmatprep.mubr.bf16.mxu0 %v15837_v62  ;;  %19422 = vst [vmem:[#allocation45_spill] sm:$0xff] %v16256_v60  ;;  %v19428_v52 = vunpack.c.l.bf16 %v19427_v53  ;;  %v19430_v62 = vld [vmem:[#allocation52_spill] sm:$0xff] }
 0x171   : > { %v2566_v19 = vsel %vm2464_vm1, %v2564_v58, %v2565_v3  ;;  %v2568_v13 = vsel %vm2464_vm1, %v2565_v3, %v2567_v43  ;;  %v19431_v3 = vunpack.c.l.bf16 %v19430_v62  ;;  %v2570_v22 = vsel %vm2464_vm1, %v2567_v43, %v2569_v16 }
 0x172   : > { %v16271_v14 = vpack.c.bf16 %v2568_v13, %v2566_v19  ;;  %v2573_v1 = vrot.slane %v19428_v52, 2  ;;  %v19436_v52 = vld [vmem:[#allocation56_spill] sm:$0xff] }
 0x174   : > { %19424 = vst [vmem:[#allocation154_spill] sm:$0xff] %v16271_v14 }
 0x176   : > { %12128 = vmatmul.mubr.bf16.gmra.mrb[36].mxu1 %v19402_v59 }
 0x177   : > { %12624 = vmatmul.mubr.bf16.gmra.mrb[100].mxu0 %v15874_v27  ;;  %12131 = vmatprep.mubr.bf16.mxu1 %v19407_v46  ;;  %v19429_v27 = vunpack.c.h.bf16 %v19427_v53  ;;  %v2576_v46 = vrot.slane %v19431_v3, 2  ;;  %v19437_v3 = vunpack.c.l.bf16 %v19436_v52 }
 0x178   : > { %12627 = vmatprep.mubr.bf16.mxu0 %v15878_v24  ;;  %v2572_v24 = vsel %vm2464_vm1, %v2569_v16, %v2571_v49  ;;  %v19434_v16 = vld [vmem:[#allocation54_spill] sm:$0xff] }
 0x179   : > { %v2574_v58 = vrot.slane %v19429_v27, 2  ;;  %v16284_v19 = vpack.c.bf16 %v2572_v24, %v2570_v22  ;;  %v19432_v27 = vunpack.c.h.bf16 %v19430_v62  ;;  %v19435_v24 = vunpack.c.l.bf16 %v19434_v16 }
 0x17a   : > { %v2582_v22 = vrot.slane %v19437_v3, 2  ;;  %v19446_v3 = vld [vmem:[#allocation61_spill] sm:$0xff] }
 0x17b   : > { %v2575_v13 = vsel %vm2464_vm1, %v2573_v1, %v2574_v58  ;;  %v2577_v61 = vsel %vm2464_vm1, %v2574_v58, %v2576_v46  ;;  %v2578_v9 = vrot.slane %v19432_v27, 2  ;;  %v2580_v49 = vrot.slane %v19435_v24, 2 }
 0x17c   : > { %v16294_v43 = vpack.c.bf16 %v2577_v61, %v2575_v13 }
 0x17d   : > { %v2579_v58 = vsel %vm2464_vm1, %v2576_v46, %v2578_v9  ;;  %v2581_v27 = vsel %vm2464_vm1, %v2578_v9, %v2580_v49  ;;  %v19444_v9 = vld [vmem:[#allocation59_spill] sm:$0xff] }
 0x17e   : > { %12132 = vmatmul.mubr.bf16.gmra.mrb[40].mxu1 %v19410_v56  ;;  %19433 = vst [vmem:[#allocation49_spill] sm:$0xff] %v16294_v43  ;;  %v19439_v56 = vld [vmem:[#allocation57_spill] sm:$0xff]  ;;  %v16306_v20 = vpack.c.bf16 %v2581_v27, %v2579_v58  ;;  %v19445_v24 = vunpack.c.l.bf16 %v19444_v9  ;;  %v19448_v27 = vunpack.c.h.bf16 %v19446_v3  ;;  %v16335_v9 = vld [vmem:[%s14789_s17 + $0x280] sm:$0xff]  }
 0x17f   : > { %12628 = vmatmul.mubr.bf16.gmra.mrb[104].mxu0 %v15910_v54  ;;  %12135 = vmatprep.mubr.bf16.mxu1 %v19417_v30  ;;  %v19438_v54 = vunpack.c.h.bf16 %v19436_v52  ;;  %v19440_v1 = vunpack.c.l.bf16 %v19439_v56  ;;  %v19442_v61 = vunpack.c.h.bf16 %v19439_v56  ;;  %19451 = vst [vmem:[#allocation59_spill] sm:$0xff] %v16335_v9  ;;  %v19461_v7 = vunpack.c.h.bf16 %v16335_v9 }
 0x180   : > { %12631 = vmatprep.mubr.bf16.mxu0 %v15914_v39  ;;  %19441 = vst [vmem:[#allocation54_spill] sm:$0xff] %v16306_v20  ;;  %v2589_v49 = vrot.slane %v19445_v24, 2  ;;  %v19449_v39 = vld [vmem:[#allocation62_spill] sm:$0xff]  ;;  %v16338_v24 = vld [vmem:[%s14789_s17 + $0x288] sm:$0xff]  }
 0x181   : > { %v2583_v30 = vrot.slane %v19438_v54, 2  ;;  %v2585_v59 = vrot.slane %v19440_v1, 2  ;;  %v2587_v16 = vrot.slane %v19442_v61, 2  ;;  %v19447_v1 = vunpack.c.l.bf16 %v19446_v3 }
 0x183   : > { %v2584_v13 = vsel %vm2464_vm1, %v2582_v22, %v2583_v30  ;;  %v2586_v54 = vsel %vm2464_vm1, %v2583_v30, %v2585_v59  ;;  %v2591_v58 = vrot.slane %v19447_v1, 2  ;;  %v19450_v22 = vunpack.c.l.bf16 %v19449_v39 }
 0x184   : > { %v16316_v46 = vpack.c.bf16 %v2586_v54, %v2584_v13  ;;  %v2588_v30 = vsel %vm2464_vm1, %v2585_v59, %v2587_v16  ;;  %v2590_v61 = vsel %vm2464_vm1, %v2587_v16, %v2589_v49  ;;  %v14375_v13 = vld [vmem:[%s18717_s1 + $0x80] sm:$0xff]   ;;  %v14376_v59 = vld [vmem:[%s18717_s1 + $0x88] sm:$0xff]   ;;  %v19452_v1 = vunpack.c.h.bf16 %v19449_v39 }
 0x185   : > { %v16331_v54 = vpack.c.bf16 %v2590_v61, %v2588_v30  ;;  %12219 = vmatprep.subr.bf16.mxu1 %v14375_v13 }
 0x186   : > { %12136 = vmatmul.mubr.bf16.gmra.mrb[44].mxu1 %v19420_v37  ;;  %19443 = vst [vmem:[#allocation155_spill] sm:$0xff] %v16316_v46 }
 0x187   : > { %12632 = vmatmul.mubr.bf16.gmra.mrb[108].mxu0 %v15946_v31  ;;  %12139 = vmatprep.mubr.bf16.mxu1 %v19427_v53  ;;  %v2592_v31 = vrot.slane %v19448_v27, 2  ;;  %v2594_v53 = vrot.slane %v19450_v22, 2  ;;  %v2596_v27 = vrot.slane %v19452_v1, 2 }
 0x188   : > { %12635 = vmatprep.mubr.bf16.mxu0 %v15948_v36  ;;  %12220 = vmatpush3.bf16.msra.mxu1 %v14375_v13 }
 0x189   : > { %v2593_v16 = vsel %vm2464_vm1, %v2591_v58, %v2592_v31  ;;  %v2595_v49 = vsel %vm2464_vm1, %v2592_v31, %v2594_v53  ;;  %12221 = vmatprep.subr.bf16.mxu1 %v14376_v59  ;;  %v19453_v58 = vld [vmem:[#allocation64_spill] sm:$0xff]  ;;  %v2597_v30 = vsel %vm2464_vm1, %v2594_v53, %v2596_v27 }
 0x18a   : > { %v16350_v22 = vpack.c.bf16 %v2595_v49, %v2593_v16  ;;  %v19454_v36 = vunpack.c.l.bf16 %v19453_v58  ;;  %v19459_v16 = vunpack.c.l.bf16 %v19458_v5  ;;  %v4429_v58 = vrot.slane %v19461_v7, 1 }
 0x18c   : > { %v2598_v31 = vrot.slane %v19454_v36, 2  ;;  %v2603_v49 = vrot.slane %v19459_v16, 2  ;;  %v19462_v36 = vunpack.c.l.bf16 %v16338_v24  ;;  %12222 = vmatpush3.bf16.msra.mxu1 %v14376_v59 }
 0x18e   : > { %12140 = vmatmul.mubr.bf16.gmra.mrb[48].mxu1 %v19430_v62  ;;  %v2599_v61 = vsel %vm2464_vm1, %v2596_v27, %v2598_v31  ;;  %v4431_v2 = vrot.slane %v19462_v36, 1  ;;  %v19465_v27 = vunpack.c.h.bf16 %v19458_v5 }
 0x18f   : > { %12636 = vmatmul.mubr.bf16.gmra.mrb[112].mxu0 %v15982_v34  ;;  %12143 = vmatprep.mubr.bf16.mxu1 %v19436_v52  ;;  %v19455_v52 = vld [vmem:[#allocation66_spill] sm:$0xff]  ;;  %v19460_v34 = vunpack.c.l.bf16 %v16335_v9  ;;  %v16377_v16 = vpack.c.bf16 %v2599_v61, %v2597_v30  ;;  %v19473_v61 = vunpack.c.l.bf16 %v19472_v48 }
 0x190   : > { %12639 = vmatprep.mubr.bf16.mxu0 %v15984_v26  ;;  %v19456_v62 = vunpack.c.l.bf16 %v19455_v52  ;;  %v19457_v26 = vunpack.c.h.bf16 %v19455_v52  ;;  %v2605_v30 = vrot.slane %v19465_v27, 2  ;;  %v4432_v7 = vsel %vm780_vm0, %v4429_v58, %v4431_v2 }
 0x191   : > { %v4428_v13 = vrot.slane %v19460_v34, 1  ;;  %19464 = vst [vmem:[#allocation156_spill] sm:$0xff] %v16377_v16  ;;  %v14381_v34 = vld [vmem:[%s18717_s1 + $0x98] sm:$0xff]   ;;  %v2612_v9 = vrot.slane %v19473_v61, 2 }
 0x192   : > { %v2600_v1 = vrot.slane %v19456_v62, 2  ;;  %v2601_v37 = vrot.slane %v19457_v26, 2  ;;  %v16372_v62 = vld [vmem:[%s14789_s17 + $0x290] sm:$0x1] }
 0x193   : > { %19463 = vst [vmem:[#allocation64_spill] sm:$0xff] %v16372_v62  ;;  %v14379_v26 = vld [vmem:[%s18717_s1 + $0x90] sm:$0xff]   ;;  %v4430_v36 = vsel %vm780_vm0, %v4428_v13, %v4429_v58  ;;  %v19476_v58 = vunpack.c.l.bf16 %v16372_v62 }
 0x194   : > { %v2602_v53 = vsel %vm2464_vm1, %v2600_v1, %v2601_v37  ;;  %v2604_v59 = vsel %vm2464_vm1, %v2601_v37, %v2603_v49  ;;  %12223 = vmatprep.subr.bf16.mxu1 %v14379_v26  ;;  %v19469_v37 = vld [vmem:[#allocation71_spill] sm:$0xff]  ;;  %v16406_v13 = vpack.c.bf16 %v4432_v7, %v4430_v36 }
 0x195   : > { %v16392_v31 = vpack.c.bf16 %v2604_v59, %v2602_v53  ;;  %12224 = vmatpush3.bf16.msra.mxu1 %v14379_v26  ;;  %v19471_v27 = vunpack.c.h.bf16 %v19469_v37  ;;  %v19474_v53 = vunpack.c.h.bf16 %v16338_v24  ;;  %v4435_v26 = vrot.slane %v19476_v58, 1  ;;  %v14385_v7 = vld [vmem:[%s18717_s1 + $0xa8] sm:$0xff]   ;;  %v19480_v58 = vld [vmem:[#allocation74_spill] sm:$0xff] }
 0x196   : > { %12144 = vmatmul.mubr.bf16.gmra.mrb[52].mxu1 %v19439_v56  ;;  %12225 = vmatprep.subr.bf16.mxu1 %v14381_v34  ;;  %v19470_v56 = vunpack.c.l.bf16 %v19469_v37 }
 0x197   : > { %12640 = vmatmul.mubr.bf16.gmra.mrb[116].mxu0 %v16012_v18  ;;  %12147 = vmatprep.mubr.bf16.mxu1 %v19446_v3  ;;  %19466 = vst [vmem:[#allocation157_spill] sm:$0xff] %v16392_v31  ;;  %v19467_v18 = vld [vmem:[#allocation69_spill] sm:$0xff]  ;;  %v4433_v59 = vrot.slane %v19474_v53, 1 }
 0x198   : > { %12643 = vmatprep.mubr.bf16.mxu0 %v16014_v55  ;;  %v19468_v1 = vunpack.c.l.bf16 %v19467_v18  ;;  %v2609_v50 = vrot.slane %v19470_v56, 2  ;;  %v2610_v55 = vrot.slane %v19471_v27, 2  ;;  %19475 = vst [vmem:[#allocation69_spill] sm:$0xff] %v16406_v13  ;;  %v2606_v18 = vsel %vm2464_vm1, %v2603_v49, %v2605_v30  ;;  %v14384_v56 = vld [vmem:[%s18717_s1 + $0xa0] sm:$0xff]  }
 0x199   : > { %12226 = vmatpush3.bf16.msra.mxu1 %v14381_v34  ;;  %v19478_v34 = vunpack.c.h.bf16 %v19472_v48  ;;  %v4434_v61 = vsel %vm780_vm0, %v4431_v2, %v4433_v59  ;;  %v4436_v36 = vsel %vm780_vm0, %v4433_v59, %v4435_v26  ;;  %v14388_v26 = vld [vmem:[%s18717_s1 + $0xb0] sm:$0xff]  }
 0x19a   : > { %v2607_v3 = vrot.slane %v19468_v1, 2  ;;  %v2611_v49 = vsel %vm2464_vm1, %v2609_v50, %v2610_v55  ;;  %12227 = vmatprep.subr.bf16.mxu1 %v14384_v56  ;;  %v16434_v50 = vpack.c.bf16 %v4436_v36, %v4434_v61  ;;  %v14380_v61 = vld [vmem:[%s18717_s1 + $0x188] sm:$0xff]  }
 0x19b   : > { %v16488_v36 = vld [vmem:[%s14789_s17 + $0x168] sm:$0xff]  }
 0x19c   : > { %v2608_v1 = vsel %vm2464_vm1, %v2605_v30, %v2607_v3  ;;  %v2613_v3 = vsel %vm2464_vm1, %v2610_v55, %v2612_v9  ;;  %v2614_v30 = vrot.slane %v19478_v34, 2  ;;  %19482 = vst [vmem:[#allocation74_spill] sm:$0xff] %v16434_v50  ;;  %v19483_v55 = vld [vmem:[#allocation3_spill] sm:$0xff]  ;;  %v19485_v34 = vld [vmem:[#allocation4_spill] sm:$0xff]  ;;  %19490 = vst [vmem:[#allocation160_spill] sm:$0xff] %v16488_v36 }
 0x19d   : > { %v16415_v27 = vpack.c.bf16 %v2608_v1, %v2606_v18  ;;  %v16430_v53 = vpack.c.bf16 %v2613_v3, %v2611_v49  ;;  %12228 = vmatpush3.bf16.msra.mxu1 %v14384_v56  ;;  %v19481_v18 = vunpack.c.l.bf16 %v19480_v58  ;;  %v14390_v58 = vld [vmem:[%s18717_s1 + $0x190] sm:$0xff]   ;;  %v16554_v3 = vld [vmem:[%s14789_s17 + $0x1e0] sm:$0xff]  }
 0x19e   : > { %12148 = vmatmul.mubr.bf16.gmra.mrb[56].mxu1 %v19449_v39  ;;  %12229 = vmatprep.subr.bf16.mxu1 %v14385_v7  ;;  %v19486_v39 = vunpack.c.l.bf16 %v19485_v34  ;;  %v2615_v2 = vsel %vm2464_vm1, %v2612_v9, %v2614_v30  ;;  %v16518_v34 = vld [vmem:[%s14789_s17 + $0x198] sm:$0xff]   ;;  %19502 = vst [vmem:[#allocation172_spill] sm:$0xff] %v16554_v3 }
 0x19f   : > { %19477 = vst [vmem:[#allocation158_spill] sm:$0xff] %v16415_v27  ;;  %12644 = vmatmul.mubr.bf16.gmra.mrb[120].mxu0 %v16026_v17  ;;  %12151 = vmatprep.mubr.bf16.mxu1 %v19455_v52  ;;  %19479 = vst [vmem:[#allocation159_spill] sm:$0xff] %v16430_v53  ;;  %v2616_v1 = vrot.slane %v19481_v18, 2  ;;  %v19484_v17 = vunpack.c.h.bf16 %v19483_v55  ;;  %v16501_v18 = vld [vmem:[%s14789_s17 + $0x17c] sm:$0xff]  }
 0x1a0   : > { %12647 = vmatprep.mubr.bf16.mxu0 %v16406_v13  ;;  %v2472_v13 = vrot.slane %v19486_v39, 2  ;;  %v14389_v39 = vld [vmem:[%s18717_s1 + $0xb8] sm:$0xff]   ;;  %19492 = vst [vmem:[#allocation162_spill] sm:$0xff] %v16501_v18  ;;  %19495 = vst [vmem:[#allocation165_spill] sm:$0xff] %v16518_v34 }
 0x1a1   : > { %v2470_v52 = vrot.slane %v19484_v17, 2  ;;  %v2617_v59 = vsel %vm2464_vm1, %v2614_v30, %v2616_v1  ;;  %12230 = vmatpush3.bf16.msra.mxu1 %v14385_v7  ;;  %v19487_v17 = vunpack.c.l.bf16 %v19483_v55  ;;  %v16468_v30 = vld [vmem:[%s14789_s17 + $0x154] sm:$0xff]   ;;  %v16508_v1 = vld [vmem:[%s14789_s17 + $0x184] sm:$0xff]  }
 0x1a2   : > { %v16445_v56 = vpack.c.bf16 %v2617_v59, %v2615_v2  ;;  %12231 = vmatprep.subr.bf16.mxu1 %v14388_v26  ;;  %19488 = vst [vmem:[#allocation3_spill] sm:$0xff] %v16468_v30  ;;  %19493 = vst [vmem:[#allocation163_spill] sm:$0xff] %v16508_v1  ;;  %v16511_v55 = vld [vmem:[%s14789_s17 + $0x190] sm:$0xff]   ;;  %v16521_v2 = vld [vmem:[%s14789_s17 + $0x1a4] sm:$0xff]  }
 0x1a3   : > { %v16455_v9 = vrot.slane %v19487_v17, 2  ;;  %v16459_v7 = vsel %vm2464_vm1, %v2470_v52, %v2472_v13  ;;  %v16477_v13 = vld [vmem:[%s18717_s1 + $0xc0] sm:$0xff]   ;;  %19494 = vst [vmem:[#allocation164_spill] sm:$0xff] %v16511_v55  ;;  %19496 = vst [vmem:[#allocation166_spill] sm:$0xff] %v16521_v2  ;;  %v16528_v59 = vld [vmem:[%s14789_s17 + $0x1ac] sm:$0xff]  }
 0x1a4   : > { %19497 = vst [vmem:[#allocation167_spill] sm:$0xff] %v16528_v59  ;;  %v16541_v17 = vld [vmem:[%s14789_s17 + $0x1c0] sm:$0xff]  }
 0x1a5   : > { %12232 = vmatpush3.bf16.msra.mxu1 %v14388_v26  ;;  %v16463_v49 = vsel %vm2464_vm1, %v16455_v9, %v2470_v52  ;;  %v16485_v52 = vld [vmem:[%s14789_s17 + $0x15c] sm:$0xff]   ;;  %19499 = vst [vmem:[#allocation169_spill] sm:$0xff] %v16541_v17 }
 0x1a6   : > { %12152 = vmatmul.mubr.bf16.gmra.mrb[60].mxu1 %v19458_v5  ;;  %12233 = vmatprep.subr.bf16.mxu1 %v14389_v39  ;;  %19489 = vst [vmem:[#allocation4_spill] sm:$0xff] %v16485_v52  ;;  %v16531_v26 = vld [vmem:[%s14789_s17 + $0x1b8] sm:$0xff]  }
 0x1a7   : > { %12648 = vmatmul.mubr.bf16.gmra.mrb[124].mxu0 %v16434_v50  ;;  %12155 = vmatprep.mubr.bf16.mxu1 %v19469_v37  ;;  %19498 = vst [vmem:[#allocation168_spill] sm:$0xff] %v16531_v26  ;;  %v16564_v50 = vld [vmem:[%s14789_s17 + $0x1f4] sm:$0xff]  }
 0x1a8   : > { %12667 = vmatprep.mubr.bf16.mxu0 %v16047_v12  ;;  %19504 = vst [vmem:[#allocation174_spill] sm:$0xff] %v16564_v50  ;;  %v19524_v37 = vld [vmem:[#allocation80_spill] sm:$0xff] }
 0x1a9   : > { %12234 = vmatpush3.bf16.msra.mxu1 %v14389_v39  ;;  %v14391_v39 = vld [vmem:[%s18717_s1 + $0x198] sm:$0xff]   ;;  %v19525_v5 = vunpack.c.l.bf16 %v19524_v37 }
 0x1aa   : > { %13227 = vmatprep.subr.bf16.mxu1 %v16477_v13 }
 0x1ae   : > { %12156 = vmatmul.mubr.bf16.gmra.mrb[64].mxu1 %v19472_v48 }
 0x1af   : > { %12668 = vmatmul.mubr.bf16.vlgmr.msra.gmra.mrb[0].mxu0 %v16059_v45  ;;  %12159 = vmatprep.mubr.bf16.mxu1 %v16468_v30 }
 0x1b0   : > { %12671 = vmatprep.mubr.bf16.mxu0 %v16068_v32  ;;  %12796 = vmatpush3.bf16.msra.mxu0 %v16264_v63  ;;  %v16498_v63 = vld [vmem:[%s14789_s17 + $0x170] sm:$0xff]  }
 0x1b1   : > { %12797 = vmatprep.subr.bf16.mxu0 %v14380_v61  ;;  %19491 = vst [vmem:[#allocation161_spill] sm:$0xff] %v16498_v63 }
 0x1b4   : > { %12798 = vmatpush3.bf16.msra.mxu0 %v14380_v61  ;;  %v16544_v61 = vld [vmem:[%s14789_s17 + $0x1cc] sm:$0xff]  }
 0x1b5   : > { %12799 = vmatprep.subr.bf16.mxu0 %v14390_v58  ;;  %19500 = vst [vmem:[#allocation170_spill] sm:$0xff] %v16544_v61 }
 0x1b6   : > { %12160 = vmatmul.mubr.bf16.gmra.mrb[68].mxu1 %v16485_v52  ;;  %v19520_v52 = vld [vmem:[#allocation77_spill] sm:$0xff] }
 0x1b7   : > { %12672 = vmatmul.mubr.bf16.gmra.mrb[4].mxu0 %v16080_v41  ;;  %12163 = vmatprep.mubr.bf16.mxu1 %v16488_v36  ;;  %v19521_v30 = vunpack.c.l.bf16 %v19520_v52 }
 0x1b8   : > { %12675 = vmatprep.mubr.bf16.mxu0 %v16090_v40  ;;  %12800 = vmatpush3.bf16.msra.mxu0 %v14390_v58  ;;  %v16551_v58 = vld [vmem:[%s14789_s17 + $0x1d4] sm:$0xff]  }
 0x1b9   : > { %12801 = vmatprep.subr.bf16.mxu0 %v14391_v39  ;;  %19501 = vst [vmem:[#allocation171_spill] sm:$0xff] %v16551_v58  ;;  %v2621_v48 = vrot.slane %v19521_v30, 2  ;;  %v19523_v30 = vunpack.c.h.bf16 %v19520_v52 }
 0x1bc   : > { %12802 = vmatpush3.bf16.msra.mxu0 %v14391_v39  ;;  %v16561_v39 = vld [vmem:[%s14789_s17 + $0x1e8] sm:$0xff]  }
 0x1bd   : > { %19503 = vst [vmem:[#allocation173_spill] sm:$0xff] %v16561_v39 }
 0x1be   : > { %12164 = vmatmul.mubr.bf16.gmra.mrb[72].mxu1 %v16498_v63 }
 0x1bf   : > { %12676 = vmatmul.mubr.bf16.gmra.mrb[8].mxu0 %v16102_v42  ;;  %12167 = vmatprep.mubr.bf16.mxu1 %v16501_v18 }
 0x1c0   : > { %12679 = vmatprep.mubr.bf16.mxu0 %v16112_v47 }
 0x1c6   : > { %12168 = vmatmul.mubr.bf16.gmra.mrb[76].mxu1 %v16508_v1 }
 0x1c7   : > { %12680 = vmatmul.mubr.bf16.gmra.mrb[12].mxu0 %v16124_v38  ;;  %12171 = vmatprep.mubr.bf16.mxu1 %v16511_v55  ;;  %v19517_v55 = vld [vmem:[#allocation76_spill] sm:$0xff] }
 0x1c8   : > { %12683 = vmatprep.mubr.bf16.mxu0 %v16134_v29  ;;  %v19518_v1 = vunpack.c.l.bf16 %v19517_v55  ;;  %v19519_v63 = vunpack.c.h.bf16 %v19517_v55 }
 0x1ca   : > { %v2618_v18 = vrot.slane %v19518_v1, 2  ;;  %v2619_v36 = vrot.slane %v19519_v63, 2 }
 0x1cc   : > { %v2620_v1 = vsel %vm2464_vm1, %v2618_v18, %v2619_v36  ;;  %v2622_v63 = vsel %vm2464_vm1, %v2619_v36, %v2621_v48  ;;  %v14394_v36 = vld [vmem:[%s18717_s1 + $0x1b0] sm:$0xff]  }
 0x1ce   : > { %12172 = vmatmul.mubr.bf16.gmra.mrb[80].mxu1 %v16518_v34 }
 0x1cf   : > { %12684 = vmatmul.mubr.bf16.gmra.mrb[16].mxu0 %v16146_v28  ;;  %12175 = vmatprep.mubr.bf16.mxu1 %v16521_v2 }
 0x1d0   : > { %12687 = vmatprep.mubr.bf16.mxu0 %v16156_v8 }
 0x1d6   : > { %12176 = vmatmul.mubr.bf16.gmra.mrb[84].mxu1 %v16528_v59 }
 0x1d7   : > { %12688 = vmatmul.mubr.bf16.gmra.mrb[20].mxu0 %v16168_v11  ;;  %12179 = vmatprep.mubr.bf16.mxu1 %v16531_v26 }
 0x1d8   : > { %12691 = vmatprep.mubr.bf16.mxu0 %v16178_v0 }
 0x1de   : > { %12180 = vmatmul.mubr.bf16.gmra.mrb[88].mxu1 %v16541_v17  ;;  %v19514_v17 = vld [vmem:[#allocation2_spill] sm:$0xff] }
 0x1df   : > { %12692 = vmatmul.mubr.bf16.gmra.mrb[24].mxu0 %v16190_v23  ;;  %12183 = vmatprep.mubr.bf16.mxu1 %v16544_v61  ;;  %v16587_v61 = vld [vmem:[%s14789_s17 + $0x21c] sm:$0xff]   ;;  %v19515_v26 = vunpack.c.l.bf16 %v19514_v17  ;;  %v19516_v2 = vunpack.c.h.bf16 %v19514_v17  ;;  %v2623_v17 = vrot.slane %v19523_v30, 2 }
 0x1e0   : > { %12695 = vmatprep.mubr.bf16.mxu0 %v16200_v6  ;;  %19508 = vst [vmem:[#allocation178_spill] sm:$0xff] %v16587_v61 }
 0x1e1   : > { %v2465_v59 = vrot.slane %v19515_v26, 2  ;;  %v2466_v34 = vrot.slane %v19516_v2, 2  ;;  %v16630_v26 = vpack.c.bf16 %v2622_v63, %v2620_v1 }
 0x1e3   : > { %v2469_v2 = vsel %vm2464_vm1, %v2466_v34, %v16455_v9  ;;  %v19529_v9 = vld [vmem:[#allocation82_spill] sm:$0xff] }
 0x1e4   : > { %v19531_v1 = vunpack.c.h.bf16 %v19529_v9 }
 0x1e6   : > { %12184 = vmatmul.mubr.bf16.gmra.mrb[92].mxu1 %v16551_v58  ;;  %v16571_v58 = vld [vmem:[%s14789_s17 + $0x1fc] sm:$0xff]   ;;  %v2632_v63 = vrot.slane %v19531_v1, 2 }
 0x1e7   : > { %12696 = vmatmul.mubr.bf16.gmra.mrb[28].mxu0 %v16212_v4  ;;  %12187 = vmatprep.mubr.bf16.mxu1 %v16554_v3  ;;  %19505 = vst [vmem:[#allocation175_spill] sm:$0xff] %v16571_v58  ;;  %v16574_v3 = vld [vmem:[%s14789_s17 + $0x208] sm:$0xff]   ;;  %v19541_v1 = vld [vmem:[#allocation90_spill] sm:$0xff] }
 0x1e8   : > { %12699 = vmatprep.mubr.bf16.mxu0 %v16222_v10  ;;  %19506 = vst [vmem:[#allocation176_spill] sm:$0xff] %v16574_v3 }
 0x1ee   : > { %12188 = vmatmul.mubr.bf16.gmra.mrb[96].mxu1 %v16561_v39  ;;  %v14392_v39 = vld [vmem:[%s18717_s1 + $0x1a0] sm:$0xff]  }
 0x1ef   : > { %12700 = vmatmul.mubr.bf16.gmra.mrb[32].mxu0 %v16234_v51  ;;  %12191 = vmatprep.mubr.bf16.mxu1 %v16564_v50  ;;  %v16584_v50 = vld [vmem:[%s14789_s17 + $0x210] sm:$0xff]  }
 0x1f0   : > { %12703 = vmatprep.mubr.bf16.mxu0 %v16244_v25  ;;  %12803 = vmatprep.subr.bf16.mxu0 %v14392_v39  ;;  %19507 = vst [vmem:[#allocation177_spill] sm:$0xff] %v16584_v50 }
 0x1f1   : > { %12804 = vmatpush3.bf16.msra.mxu0 %v14392_v39  ;;  %v19510_v39 = vld [vmem:[#allocation131_spill] sm:$0xff] }
 0x1f2   : > { %19522 = vst [vmem:[#allocation131_spill] sm:$0xff] %v16630_v26 }
 0x1f6   : > { %12192 = vmatmul.mubr.bf16.gmra.mrb[100].mxu1 %v16571_v58  ;;  %v19513_v58 = vld [vmem:[#allocation140_spill] sm:$0xff] }
 0x1f7   : > { %12704 = vmatmul.mubr.bf16.gmra.mrb[36].mxu0 %v16256_v60  ;;  %12195 = vmatprep.mubr.bf16.mxu1 %v16574_v3  ;;  %v16594_v3 = vld [vmem:[%s14789_s17 + $0x224] sm:$0xff]  }
 0x1f8   : > { %12707 = vmatprep.mubr.bf16.mxu0 %v16271_v14  ;;  %19509 = vst [vmem:[#allocation179_spill] sm:$0xff] %v16594_v3 }
 0x1fe   : > { %12196 = vmatmul.mubr.bf16.gmra.mrb[104].mxu1 %v16584_v50  ;;  %v19511_v50 = vld [vmem:[#allocation135_spill] sm:$0xff] }
 0x1ff   : > { %12708 = vmatmul.mubr.bf16.gmra.mrb[40].mxu0 %v16284_v19  ;;  %12199 = vmatprep.mubr.bf16.mxu1 %v16587_v61  ;;  %v19512_v61 = vld [vmem:[#allocation136_spill] sm:$0xff] }
 0x200   : > { %12711 = vmatprep.mubr.bf16.mxu0 %v16294_v43 }
 0x206   : > { %12200 = vmatmul.mubr.bf16.gmra.mrb[108].mxu1 %v16594_v3  ;;  %v14393_v3 = vld [vmem:[%s18717_s1 + $0x1a8] sm:$0xff]  }
 0x207   : > { %12712 = vmatmul.mubr.bf16.gmra.mrb[44].mxu0 %v16306_v20  ;;  %12203 = vmatprep.mubr.bf16.mxu1 %v15853_v57 }
 0x208   : > { %12715 = vmatprep.mubr.bf16.mxu0 %v16316_v46  ;;  %12805 = vmatprep.subr.bf16.mxu0 %v14393_v3 }
 0x209   : > { %12806 = vmatpush3.bf16.msra.mxu0 %v14393_v3  ;;  %v2467_v3 = vsel %vm2464_vm1, %v2465_v59, %v2466_v34  ;;  %v19530_v34 = vunpack.c.l.bf16 %v19529_v9 }
 0x20a   : > { %v2881_v55 = vpack.c.bf16 %v2469_v2, %v2467_v3  ;;  %12807 = vmatprep.subr.bf16.mxu0 %v14394_v36 }
 0x20b   : > { %v2630_v18 = vrot.slane %v19530_v34, 2 }
 0x20d   : > { %12808 = vmatpush3.bf16.msra.mxu0 %v14394_v36  ;;  %v2633_v9 = vsel %vm2464_vm1, %v2630_v18, %v2632_v63 }
 0x20e   : > { %12204 = vmatmul.mubr.bf16.gmra.mrb[112].mxu1 %v19510_v39 }
 0x20f   : > { %12716 = vmatmul.mubr.bf16.gmra.mrb[48].mxu0 %v16331_v54  ;;  %12207 = vmatprep.mubr.bf16.mxu1 %v19511_v50 }
 0x210   : > { %12719 = vmatprep.mubr.bf16.mxu0 %v16350_v22 }
 0x216   : > { %12208 = vmatmul.mubr.bf16.gmra.mrb[116].mxu1 %v19512_v61 }
 0x217   : > { %12720 = vmatmul.mubr.bf16.gmra.mrb[52].mxu0 %v16377_v16  ;;  %12211 = vmatprep.mubr.bf16.mxu1 %v19513_v58 }
 0x218   : > { %12723 = vmatprep.mubr.bf16.mxu0 %v16392_v31  ;;  %v19526_v31 = vld [vmem:[#allocation81_spill] sm:$0xff] }
 0x219   : > { %v19528_v59 = vunpack.c.h.bf16 %v19526_v31 }
 0x21b   : > { %v2628_v62 = vrot.slane %v19528_v59, 2 }
 0x21d   : > { %v2631_v52 = vsel %vm2464_vm1, %v2628_v62, %v2630_v18 }
 0x21e   : > { %12212 = vmatmul.mubr.bf16.gmra.mrb[120].mxu1 %v15931_v21 }
 0x21f   : > { %12724 = vmatmul.mubr.bf16.gmra.mrb[56].mxu0 %v16415_v27  ;;  %12215 = vmatprep.mubr.bf16.mxu1 %v15964_v35  ;;  %v2625_v27 = vrot.slane %v19525_v5, 2  ;;  %v14395_v5 = vld [vmem:[%s18717_s1 + $0x1b8] sm:$0xff]  }
 0x220   : > { %12727 = vmatprep.mubr.bf16.mxu0 %v16430_v53  ;;  %v19527_v53 = vunpack.c.l.bf16 %v19526_v31  ;;  %v2624_v31 = vsel %vm2464_vm1, %v2621_v48, %v2623_v17  ;;  %12809 = vmatprep.subr.bf16.mxu0 %v14395_v5  ;;  %v19534_v48 = vld [vmem:[#allocation86_spill] sm:$0xff] }
 0x221   : > { %v2626_v37 = vsel %vm2464_vm1, %v2623_v17, %v2625_v27  ;;  %v19535_v34 = vunpack.c.l.bf16 %v19534_v48  ;;  %v19536_v17 = vunpack.c.h.bf16 %v19534_v48  ;;  %12810 = vmatpush3.bf16.msra.mxu0 %v14395_v5 }
 0x222   : > { %v2627_v16 = vrot.slane %v19527_v53, 2  ;;  %v16655_v3 = vpack.c.bf16 %v2626_v37, %v2624_v31  ;;  %v19539_v31 = vpack.c.bf16 %v16459_v7, %v16463_v49  ;;  %v14701_v7 = vld [vmem:[%s18717_s1 + $0xc8] sm:$0xff]  }
 0x223   : > { %v2636_v27 = vrot.slane %v19535_v34, 2 }
 0x224   : > { %v2629_v53 = vsel %vm2464_vm1, %v2627_v16, %v2628_v62  ;;  %v2637_v16 = vrot.slane %v19536_v17, 2 }
 0x225   : > { %v16657_v2 = vpack.c.bf16 %v2631_v52, %v2629_v53 }
 0x226   : > { %12216 = vmatmul.mubr.bf16.gmra.mrb[124].mxu1 %v15967_v33  ;;  %v2638_v53 = vsel %vm2464_vm1, %v2636_v27, %v2637_v16  ;;  %v19546_v27 = vld [vmem:[#allocation92_spill] sm:$0xff] }
 0x227   : > { %12728 = vmatmul.mubr.bf16.gmra.mrb[60].mxu0 %v16445_v56  ;;  %12235 = vmatprep.mubr.bf16.mxu1 %v2881_v55  ;;  %v19532_v55 = vld [vmem:[#allocation85_spill] sm:$0xff]  ;;  %v19547_v17 = vunpack.c.l.bf16 %v19546_v27 }
 0x228   : > { %12731 = vmatprep.mubr.bf16.mxu0 %v16630_v26  ;;  %v19533_v30 = vunpack.c.l.bf16 %v19532_v55  ;;  %v19537_v26 = vld [vmem:[#allocation87_spill] sm:$0xff] }
 0x229   : > { %v19538_v62 = vunpack.c.l.bf16 %v19537_v26  ;;  %v19540_v52 = vunpack.c.h.bf16 %v19537_v26 }
 0x22a   : > { %v2634_v59 = vrot.slane %v19533_v30, 2 }
 0x22b   : > { %v2639_v36 = vrot.slane %v19538_v62, 2  ;;  %v2641_v18 = vrot.slane %v19540_v52, 2  ;;  %v14702_v62 = vld [vmem:[%s18717_s1 + $0xd0] sm:$0xff]  }
 0x22c   : > { %v2635_v37 = vsel %vm2464_vm1, %v2632_v63, %v2634_v59  ;;  %v19542_v63 = vunpack.c.l.bf16 %v19541_v1 }
 0x22d   : > { %v2640_v5 = vsel %vm2464_vm1, %v2637_v16, %v2639_v36  ;;  %v16683_v49 = vpack.c.bf16 %v2635_v37, %v2633_v9  ;;  %v2648_v16 = vrot.slane %v19547_v17, 2  ;;  %v2642_v26 = vsel %vm2464_vm1, %v2639_v36, %v2641_v18  ;;  %v19549_v36 = vld [vmem:[#allocation95_spill] sm:$0xff] }
 0x22e   : > { %12236 = vmatmul.mubr.bf16.vlgmr.msra.gmra.mrb[0].mxu1 %v19539_v31  ;;  %v2643_v55 = vrot.slane %v19542_v63, 2  ;;  %v19550_v1 = vunpack.c.l.bf16 %v19549_v36  ;;  %v19551_v63 = vld [vmem:[#allocation96_spill] sm:$0xff] }
 0x22f   : > { %12732 = vmatmul.mubr.bf16.gmra.mrb[64].mxu0 %v16655_v3  ;;  %12239 = vmatprep.mubr.bf16.mxu1 %v16047_v12  ;;  %v16685_v12 = vpack.c.bf16 %v2640_v5, %v2638_v53  ;;  %v14703_v53 = vld [vmem:[%s18717_s1 + $0xd8] sm:$0xff]  }
 0x230   : > { %12735 = vmatprep.mubr.bf16.mxu0 %v16657_v2  ;;  %13235 = vmatpush3.bf16.msra.mxu1 %v16477_v13  ;;  %v19543_v13 = vld [vmem:[#allocation91_spill] sm:$0xff]  ;;  %v2644_v31 = vsel %vm2464_vm1, %v2641_v18, %v2643_v55  ;;  %v2652_v18 = vrot.slane %v19550_v1, 2  ;;  %v19552_v55 = vunpack.c.l.bf16 %v19551_v63 }
 0x231   : > { %13228 = vmatprep.subr.bf16.mxu1 %v14701_v7  ;;  %v19544_v30 = vunpack.c.l.bf16 %v19543_v13  ;;  %v19545_v48 = vunpack.c.h.bf16 %v19543_v13 }
 0x232   : > { %v2654_v13 = vrot.slane %v19552_v55, 2 }
 0x233   : > { %v2645_v59 = vrot.slane %v19544_v30, 2  ;;  %v2646_v34 = vrot.slane %v19545_v48, 2  ;;  %v19553_v30 = vunpack.c.h.bf16 %v19551_v63  ;;  %v19554_v48 = vld [vmem:[#allocation97_spill] sm:$0xff] }
 0x234   : > { %13236 = vmatpush3.bf16.msra.mxu1 %v14701_v7  ;;  %v19548_v7 = vunpack.c.h.bf16 %v19546_v27  ;;  %v19556_v36 = vunpack.c.h.bf16 %v19554_v48 }
 0x235   : > { %13229 = vmatprep.subr.bf16.mxu1 %v14702_v62  ;;  %v2647_v9 = vsel %vm2464_vm1, %v2645_v59, %v2646_v34  ;;  %v2649_v37 = vsel %vm2464_vm1, %v2646_v34, %v2648_v16  ;;  %v2655_v59 = vrot.slane %v19553_v30, 2  ;;  %v19555_v34 = vunpack.c.l.bf16 %v19554_v48 }
 0x236   : > { %12240 = vmatmul.mubr.bf16.gmra.mrb[4].mxu1 %v16059_v45  ;;  %v16711_v45 = vpack.c.bf16 %v2644_v31, %v2642_v26  ;;  %v16713_v5 = vpack.c.bf16 %v2649_v37, %v2647_v9  ;;  %v2650_v52 = vrot.slane %v19548_v7, 2  ;;  %v14705_v37 = vld [vmem:[%s18717_s1 + $0xe8] sm:$0xff]   ;;  %v2659_v1 = vrot.slane %v19556_v36, 2 }
 0x237   : > { %12736 = vmatmul.mubr.bf16.gmra.mrb[68].mxu0 %v16683_v49  ;;  %12243 = vmatprep.mubr.bf16.mxu1 %v16068_v32  ;;  %v2657_v17 = vrot.slane %v19555_v34, 2  ;;  %v2656_v31 = vsel %vm2464_vm1, %v2654_v13, %v2655_v59  ;;  %v19562_v34 = vld [vmem:[#allocation102_spill] sm:$0xff] }
 0x238   : > { %12739 = vmatprep.mubr.bf16.mxu0 %v16685_v12  ;;  %13237 = vmatpush3.bf16.msra.mxu1 %v14702_v62  ;;  %v14704_v62 = vld [vmem:[%s18717_s1 + $0xe0] sm:$0xff]   ;;  %v2651_v27 = vsel %vm2464_vm1, %v2648_v16, %v2650_v52  ;;  %v2653_v26 = vsel %vm2464_vm1, %v2650_v52, %v2652_v18  ;;  %v19557_v16 = vld [vmem:[#allocation100_spill] sm:$0xff]  ;;  %v19559_v18 = vld [vmem:[#allocation101_spill] sm:$0xff] }
 0x239   : > { %13230 = vmatprep.subr.bf16.mxu1 %v14703_v53  ;;  %v2658_v9 = vsel %vm2464_vm1, %v2655_v59, %v2657_v17  ;;  %v19558_v63 = vunpack.c.l.bf16 %v19557_v16  ;;  %v19560_v55 = vunpack.c.l.bf16 %v19559_v18  ;;  %v19561_v30 = vunpack.c.h.bf16 %v19559_v18 }
 0x23a   : > { %v16741_v7 = vpack.c.bf16 %v2658_v9, %v2656_v31  ;;  %v2660_v48 = vsel %vm2464_vm1, %v2657_v17, %v2659_v1  ;;  %v19565_v17 = vld [vmem:[#allocation105_spill] sm:$0xff] }
 0x23b   : > { %v2661_v52 = vrot.slane %v19558_v63, 2  ;;  %v2663_v13 = vrot.slane %v19560_v55, 2  ;;  %v2664_v59 = vrot.slane %v19561_v30, 2  ;;  %v19564_v63 = vunpack.c.h.bf16 %v19562_v34 }
 0x23c   : > { %13238 = vmatpush3.bf16.msra.mxu1 %v14703_v53  ;;  %v16739_v53 = vpack.c.bf16 %v2653_v26, %v2651_v27  ;;  %v14706_v27 = vld [vmem:[%s18717_s1 + $0xf0] sm:$0xff]   ;;  %v19566_v55 = vunpack.c.l.bf16 %v19565_v17  ;;  %v19573_v17 = vld [vmem:[#allocation110_spill] sm:$0xff] }
 0x23d   : > { %13231 = vmatprep.subr.bf16.mxu1 %v14704_v62  ;;  %v2662_v26 = vsel %vm2464_vm1, %v2659_v1, %v2661_v52  ;;  %v2665_v31 = vsel %vm2464_vm1, %v2663_v13, %v2664_v59  ;;  %v2668_v18 = vrot.slane %v19564_v63, 2  ;;  %v19567_v52 = vld [vmem:[#allocation106_spill] sm:$0xff] }
 0x23e   : > { %12244 = vmatmul.mubr.bf16.gmra.mrb[8].mxu1 %v16080_v41  ;;  %v16767_v36 = vpack.c.bf16 %v2662_v26, %v2660_v48  ;;  %v2670_v1 = vrot.slane %v19566_v55, 2  ;;  %v19568_v13 = vunpack.c.l.bf16 %v19567_v52  ;;  %v19574_v55 = vunpack.c.l.bf16 %v19573_v17 }
 0x23f   : > { %12740 = vmatmul.mubr.bf16.gmra.mrb[72].mxu0 %v16711_v45  ;;  %12247 = vmatprep.mubr.bf16.mxu1 %v16090_v40 }
 0x240   : > { %12743 = vmatprep.mubr.bf16.mxu0 %v16713_v5  ;;  %13239 = vmatpush3.bf16.msra.mxu1 %v14704_v62  ;;  %v19563_v62 = vunpack.c.l.bf16 %v19562_v34  ;;  %v2672_v30 = vrot.slane %v19568_v13, 2  ;;  %v2671_v48 = vsel %vm2464_vm1, %v2668_v18, %v2670_v1  ;;  %v19575_v13 = vld [vmem:[#allocation111_spill] sm:$0xff]  ;;  %v19578_v1 = vld [vmem:[#allocation112_spill] sm:$0xff] }
 0x241   : > { %13232 = vmatprep.subr.bf16.mxu1 %v14705_v37 }
 0x242   : > { %v2666_v40 = vrot.slane %v19563_v62, 2 }
 0x244   : > { %13240 = vmatpush3.bf16.msra.mxu1 %v14705_v37  ;;  %v2667_v9 = vsel %vm2464_vm1, %v2664_v59, %v2666_v40  ;;  %v14707_v37 = vld [vmem:[%s18717_s1 + $0xf8] sm:$0xff]   ;;  %v19569_v59 = vunpack.c.h.bf16 %v19567_v52  ;;  %v2669_v34 = vsel %vm2464_vm1, %v2666_v40, %v2668_v18  ;;  %v2679_v52 = vrot.slane %v19574_v55, 2  ;;  %v19581_v55 = vld [vmem:[#allocation115_spill] sm:$0xff] }
 0x245   : > { %13233 = vmatprep.subr.bf16.mxu1 %v14706_v27  ;;  %v16769_v16 = vpack.c.bf16 %v2667_v9, %v2665_v31  ;;  %v16789_v9 = vpack.c.bf16 %v2671_v48, %v2669_v34  ;;  %v19577_v40 = vunpack.c.h.bf16 %v19575_v13 }
 0x246   : > { %12248 = vmatmul.mubr.bf16.gmra.mrb[12].mxu1 %v16102_v42  ;;  %v2673_v62 = vrot.slane %v19569_v59, 2  ;;  %v19576_v59 = vunpack.c.l.bf16 %v19575_v13  ;;  %v19582_v13 = vunpack.c.l.bf16 %v19581_v55 }
 0x247   : > { %12744 = vmatmul.mubr.bf16.gmra.mrb[76].mxu0 %v16739_v53  ;;  %12251 = vmatprep.mubr.bf16.mxu1 %v16112_v47  ;;  %v2682_v18 = vrot.slane %v19577_v40, 2  ;;  %v19583_v40 = vld [vmem:[#allocation116_spill] sm:$0xff] }
 0x248   : > { %12747 = vmatprep.mubr.bf16.mxu0 %v16741_v7  ;;  %13241 = vmatpush3.bf16.msra.mxu1 %v14706_v27  ;;  %v19570_v27 = vld [vmem:[#allocation107_spill] sm:$0xff]  ;;  %v2674_v26 = vsel %vm2464_vm1, %v2672_v30, %v2673_v62  ;;  %v19579_v30 = vunpack.c.l.bf16 %v19578_v1 }
 0x249   : > { %13234 = vmatprep.subr.bf16.mxu1 %v14707_v37  ;;  %v19571_v47 = vunpack.c.l.bf16 %v19570_v27 }
 0x24b   : > { %v2675_v42 = vrot.slane %v19571_v47, 2  ;;  %v19572_v47 = vunpack.c.h.bf16 %v19570_v27 }
 0x24c   : > { %13242 = vmatpush3.bf16.msra.mxu1 %v14707_v37 }
 0x24d   : > { %v2676_v31 = vsel %vm2464_vm1, %v2673_v62, %v2675_v42  ;;  %v2677_v63 = vrot.slane %v19572_v47, 2  ;;  %v19580_v47 = vunpack.c.h.bf16 %v19578_v1 }
 0x24e   : > { %12252 = vmatmul.mubr.bf16.gmra.mrb[16].mxu1 %v16124_v38  ;;  %v16791_v37 = vpack.c.bf16 %v2676_v31, %v2674_v26  ;;  %v2684_v38 = vrot.slane %v19579_v30, 2  ;;  %v19584_v30 = vunpack.c.l.bf16 %v19583_v40 }
 0x24f   : > { %12748 = vmatmul.mubr.bf16.gmra.mrb[80].mxu0 %v16767_v36  ;;  %12255 = vmatprep.mubr.bf16.mxu1 %v16134_v29  ;;  %v2681_v29 = vrot.slane %v19576_v59, 2  ;;  %v2678_v62 = vsel %vm2464_vm1, %v2675_v42, %v2677_v63  ;;  %v2680_v27 = vsel %vm2464_vm1, %v2677_v63, %v2679_v52  ;;  %v2686_v17 = vrot.slane %v19580_v47, 2  ;;  %v19586_v52 = vld [vmem:[#allocation117_spill] sm:$0xff] }
 0x250   : > { %12751 = vmatprep.mubr.bf16.mxu0 %v16769_v16  ;;  %v2685_v48 = vsel %vm2464_vm1, %v2682_v18, %v2684_v38  ;;  %v16811_v26 = vpack.c.bf16 %v2680_v27, %v2678_v62  ;;  %v2688_v59 = vrot.slane %v19582_v13, 2  ;;  %v19585_v42 = vunpack.c.h.bf16 %v19583_v40  ;;  %v19589_v13 = vld [vmem:[#allocation120_spill] sm:$0xff] }
 0x251   : > { %v2683_v34 = vsel %vm2464_vm1, %v2681_v29, %v2682_v18  ;;  %v19587_v29 = vunpack.c.l.bf16 %v19586_v52  ;;  %v2687_v18 = vsel %vm2464_vm1, %v2684_v38, %v2686_v17  ;;  %v19588_v47 = vunpack.c.h.bf16 %v19586_v52 }
 0x252   : > { %v16813_v31 = vpack.c.bf16 %v2685_v48, %v2683_v34  ;;  %v2691_v63 = vrot.slane %v19585_v42, 2  ;;  %v2689_v1 = vsel %vm2464_vm1, %v2686_v17, %v2688_v59  ;;  %v19590_v40 = vunpack.c.l.bf16 %v19589_v13  ;;  %v19591_v42 = vld [vmem:[#allocation121_spill] sm:$0xff]  ;;  %v19594_v59 = vld [vmem:[#allocation122_spill] sm:$0xff] }
 0x253   : > { %v16833_v34 = vpack.c.bf16 %v2689_v1, %v2687_v18  ;;  %v2695_v55 = vrot.slane %v19588_v47, 2  ;;  %v19593_v38 = vunpack.c.h.bf16 %v19591_v42  ;;  %v19596_v47 = vunpack.c.h.bf16 %v19594_v59 }
 0x255   : > { %v2700_v17 = vrot.slane %v19593_v38, 2  ;;  %v2704_v13 = vrot.slane %v19596_v47, 2  ;;  %v19599_v38 = vld [vmem:[#allocation126_spill] sm:$0xff] }
 0x256   : > { %12256 = vmatmul.mubr.bf16.gmra.mrb[20].mxu1 %v16146_v28  ;;  %v2693_v28 = vrot.slane %v19587_v29, 2  ;;  %v19592_v29 = vunpack.c.l.bf16 %v19591_v42 }
 0x257   : > { %12752 = vmatmul.mubr.bf16.gmra.mrb[84].mxu0 %v16789_v9  ;;  %12259 = vmatprep.mubr.bf16.mxu1 %v16156_v8  ;;  %v2690_v8 = vrot.slane %v19584_v30, 2  ;;  %v2697_v30 = vrot.slane %v19590_v40, 2  ;;  %v19597_v40 = vld [vmem:[#allocation125_spill] sm:$0xff] }
 0x258   : > { %12755 = vmatprep.mubr.bf16.mxu0 %v16791_v37  ;;  %v2694_v27 = vsel %vm2464_vm1, %v2691_v63, %v2693_v28  ;;  %v19598_v42 = vunpack.c.l.bf16 %v19597_v40 }
 0x259   : > { %v2692_v62 = vsel %vm2464_vm1, %v2690_v8, %v2691_v63  ;;  %v19595_v8 = vunpack.c.l.bf16 %v19594_v59  ;;  %v2696_v63 = vsel %vm2464_vm1, %v2693_v28, %v2695_v55  ;;  %v2698_v52 = vsel %vm2464_vm1, %v2695_v55, %v2697_v30  ;;  %v19602_v30 = vld [vmem:[#allocation127_spill] sm:$0xff] }
 0x25a   : > { %v16835_v48 = vpack.c.bf16 %v2694_v27, %v2692_v62  ;;  %v16855_v62 = vpack.c.bf16 %v2698_v52, %v2696_v63  ;;  %v19601_v28 = vunpack.c.h.bf16 %v19599_v38  ;;  %v19604_v47 = vunpack.c.h.bf16 %v19602_v30 }
 0x25c   : > { %v2709_v55 = vrot.slane %v19601_v28, 2  ;;  %v2713_v40 = vrot.slane %v19604_v47, 2  ;;  %v19607_v28 = vunpack.c.l.bf16 %v15853_v57 }
 0x25e   : > { %12260 = vmatmul.mubr.bf16.gmra.mrb[24].mxu1 %v16168_v11  ;;  %v2702_v11 = vrot.slane %v19595_v8, 2  ;;  %v19600_v8 = vunpack.c.l.bf16 %v19599_v38 }
 0x25f   : > { %12756 = vmatmul.mubr.bf16.gmra.mrb[88].mxu0 %v16811_v26  ;;  %12263 = vmatprep.mubr.bf16.mxu1 %v16178_v0  ;;  %v2699_v0 = vrot.slane %v19592_v29, 2  ;;  %v2706_v29 = vrot.slane %v19598_v42, 2  ;;  %v19605_v42 = vld [vmem:[#allocation130_spill] sm:$0xff] }
 0x260   : > { %12759 = vmatprep.mubr.bf16.mxu0 %v16813_v31  ;;  %v2703_v1 = vsel %vm2464_vm1, %v2700_v17, %v2702_v11  ;;  %v19606_v38 = vunpack.c.l.bf16 %v19605_v42  ;;  %v19610_v42 = vunpack.c.h.bf16 %v19510_v39 }
 0x261   : > { %v2701_v18 = vsel %vm2464_vm1, %v2699_v0, %v2700_v17  ;;  %v19603_v0 = vunpack.c.l.bf16 %v19602_v30  ;;  %v2705_v17 = vsel %vm2464_vm1, %v2702_v11, %v2704_v13  ;;  %v2707_v59 = vsel %vm2464_vm1, %v2704_v13, %v2706_v29 }
 0x262   : > { %v16857_v27 = vpack.c.bf16 %v2703_v1, %v2701_v18  ;;  %v16877_v18 = vpack.c.bf16 %v2707_v59, %v2705_v17  ;;  %v19608_v11 = vunpack.c.h.bf16 %v15853_v57 }
 0x264   : > { %v2718_v13 = vrot.slane %v19608_v11, 2 }
 0x266   : > { %12264 = vmatmul.mubr.bf16.gmra.mrb[28].mxu1 %v16190_v23  ;;  %v2711_v23 = vrot.slane %v19603_v0, 2  ;;  %v2717_v0 = vrot.slane %v19607_v28, 2  ;;  %v19611_v28 = vld [vmem:[#allocation134_spill] sm:$0xff] }
 0x267   : > { %12760 = vmatmul.mubr.bf16.gmra.mrb[92].mxu0 %v16833_v34  ;;  %12267 = vmatprep.mubr.bf16.mxu1 %v16200_v6  ;;  %v2708_v6 = vrot.slane %v19600_v8, 2  ;;  %v2715_v8 = vrot.slane %v19606_v38, 2  ;;  %v2722_v38 = vrot.slane %v19610_v42, 2  ;;  %v19612_v11 = vunpack.c.l.bf16 %v19611_v28 }
 0x268   : > { %12763 = vmatprep.mubr.bf16.mxu0 %v16835_v48  ;;  %v2712_v52 = vsel %vm2464_vm1, %v2709_v55, %v2711_v23  ;;  %v2714_v30 = vsel %vm2464_vm1, %v2711_v23, %v2713_v40  ;;  %v2719_v59 = vsel %vm2464_vm1, %v2717_v0, %v2718_v13  ;;  %v19613_v23 = vunpack.c.l.bf16 %v19511_v50 }
 0x269   : > { %v2710_v63 = vsel %vm2464_vm1, %v2708_v6, %v2709_v55  ;;  %v19609_v6 = vunpack.c.l.bf16 %v19510_v39  ;;  %v16897_v55 = vld [vmem:[%s18717_s1 + $0x1c0] sm:$0xff]   ;;  %v2716_v17 = vsel %vm2464_vm1, %v2713_v40, %v2715_v8  ;;  %v19614_v40 = vunpack.c.h.bf16 %v19511_v50 }
 0x26a   : > { %v16879_v1 = vpack.c.bf16 %v2712_v52, %v2710_v63  ;;  %12939 = vmatprep.subr.bf16.mxu0 %v16897_v55  ;;  %v16905_v52 = vpack.c.bf16 %v2716_v17, %v2714_v30  ;;  %v19615_v0 = vunpack.c.l.bf16 %v19512_v61 }
 0x26b   : > { %v2720_v29 = vrot.slane %v19609_v6, 2  ;;  %v2724_v6 = vrot.slane %v19612_v11, 2  ;;  %v2727_v8 = vrot.slane %v19614_v40, 2  ;;  %v19616_v11 = vunpack.c.h.bf16 %v19512_v61  ;;  %v19617_v40 = vld [vmem:[#allocation139_spill] sm:$0xff] }
 0x26d   : > { %v2721_v63 = vsel %vm2464_vm1, %v2718_v13, %v2720_v29  ;;  %v2729_v13 = vrot.slane %v19615_v0, 2  ;;  %v2723_v30 = vsel %vm2464_vm1, %v2720_v29, %v2722_v38  ;;  %v2725_v17 = vsel %vm2464_vm1, %v2722_v38, %v2724_v6 }
 0x26e   : > { %12268 = vmatmul.mubr.bf16.gmra.mrb[32].mxu1 %v16212_v4  ;;  %v16907_v47 = vpack.c.bf16 %v2721_v63, %v2719_v59  ;;  %v16927_v42 = vpack.c.bf16 %v2725_v17, %v2723_v30  ;;  %v19618_v0 = vunpack.c.l.bf16 %v19617_v40  ;;  %v19620_v29 = vunpack.c.h.bf16 %v19513_v58 }
 0x26f   : > { %12764 = vmatmul.mubr.bf16.gmra.mrb[96].mxu0 %v16855_v62  ;;  %12271 = vmatprep.mubr.bf16.mxu1 %v16222_v10  ;;  %v2730_v63 = vsel %vm2464_vm1, %v2727_v8, %v2729_v13 }
 0x270   : > { %12767 = vmatprep.mubr.bf16.mxu0 %v16857_v27  ;;  %v2736_v38 = vrot.slane %v19620_v29, 2 }
 0x276   : > { %12272 = vmatmul.mubr.bf16.gmra.mrb[36].mxu1 %v16234_v51 }
 0x277   : > { %12768 = vmatmul.mubr.bf16.gmra.mrb[100].mxu0 %v16877_v18  ;;  %12275 = vmatprep.mubr.bf16.mxu1 %v16244_v25  ;;  %v2726_v25 = vrot.slane %v19613_v23, 2  ;;  %v2731_v23 = vrot.slane %v19616_v11, 2  ;;  %v19622_v11 = vunpack.c.h.bf16 %v15931_v21 }
 0x278   : > { %12771 = vmatprep.mubr.bf16.mxu0 %v16879_v1 }
 0x279   : > { %v2728_v59 = vsel %vm2464_vm1, %v2726_v25, %v2727_v8  ;;  %v19621_v25 = vunpack.c.l.bf16 %v15931_v21  ;;  %v2732_v8 = vsel %vm2464_vm1, %v2729_v13, %v2731_v23  ;;  %v2740_v40 = vrot.slane %v19622_v11, 2 }
 0x27a   : > { %v16929_v28 = vpack.c.bf16 %v2730_v63, %v2728_v59  ;;  %v19625_v13 = vunpack.c.h.bf16 %v15964_v35  ;;  %v19628_v11 = vunpack.c.h.bf16 %v15967_v33 }
 0x27b   : > { %v2738_v6 = vrot.slane %v19621_v25, 2  ;;  %v19624_v25 = vunpack.c.l.bf16 %v15964_v35 }
 0x27d   : > { %v2739_v17 = vsel %vm2464_vm1, %v2736_v38, %v2738_v6 }
 0x27e   : > { %12276 = vmatmul.mubr.bf16.gmra.mrb[40].mxu1 %v16256_v60  ;;  %v19619_v60 = vunpack.c.l.bf16 %v19513_v58 }
 0x27f   : > { %12772 = vmatmul.mubr.bf16.gmra.mrb[104].mxu0 %v16905_v52  ;;  %12279 = vmatprep.mubr.bf16.mxu1 %v16271_v14  ;;  %v2733_v14 = vrot.slane %v19618_v0, 2  ;;  %v19623_v0 = vunpack.c.l.bf16 %v15961_v15  ;;  %v2741_v15 = vsel %vm2464_vm1, %v2738_v6, %v2740_v40 }
 0x280   : > { %12775 = vmatprep.mubr.bf16.mxu0 %v16907_v47  ;;  %v2735_v51 = vrot.slane %v19619_v60, 2 }
 0x281   : > { %v2734_v30 = vsel %vm2464_vm1, %v2731_v23, %v2733_v14  ;;  %v2742_v29 = vrot.slane %v19623_v0, 2  ;;  %v2745_v14 = vrot.slane %v19625_v13, 2  ;;  %v2749_v0 = vrot.slane %v19628_v11, 2 }
 0x282   : > { %v2737_v60 = vsel %vm2464_vm1, %v2735_v51, %v2736_v38  ;;  %v16949_v59 = vpack.c.bf16 %v2734_v30, %v2732_v8  ;;  %v19626_v51 = vunpack.c.l.bf16 %v15967_v33 }
 0x283   : > { %v16951_v63 = vpack.c.bf16 %v2739_v17, %v2737_v60  ;;  %v2743_v38 = vsel %vm2464_vm1, %v2740_v40, %v2742_v29 }
 0x284   : > { %v2747_v23 = vrot.slane %v19626_v51, 2  ;;  %v16971_v60 = vpack.c.bf16 %v2743_v38, %v2741_v15  ;;  %v19630_v51 = vld [vmem:[#allocation59_spill] sm:$0xff] }
 0x285   : > { %v19632_v6 = vunpack.c.h.bf16 %v19630_v51 }
 0x286   : > { %12280 = vmatmul.mubr.bf16.gmra.mrb[44].mxu1 %v16284_v19  ;;  %v2748_v30 = vsel %vm2464_vm1, %v2745_v14, %v2747_v23 }
 0x287   : > { %12776 = vmatmul.mubr.bf16.gmra.mrb[108].mxu0 %v16927_v42  ;;  %12283 = vmatprep.mubr.bf16.mxu1 %v16294_v43  ;;  %v2744_v43 = vrot.slane %v19624_v25, 2  ;;  %v19629_v25 = vunpack.c.l.bf16 %v15997_v44  ;;  %v5182_v40 = vrot.slane %v19632_v6, 2  ;;  %v2750_v44 = vsel %vm2464_vm1, %v2747_v23, %v2749_v0  ;;  %v19640_v23 = vld [vmem:[#allocation157_spill] sm:$0xff] }
 0x288   : > { %12779 = vmatprep.mubr.bf16.mxu0 %v16929_v28 }
 0x289   : > { %v2746_v8 = vsel %vm2464_vm1, %v2744_v43, %v2745_v14  ;;  %v2751_v13 = vrot.slane %v19629_v25, 2  ;;  %v19633_v43 = vunpack.c.l.bf16 %v16338_v24  ;;  %v19637_v25 = vld [vmem:[#allocation64_spill] sm:$0xff] }
 0x28a   : > { %v16973_v17 = vpack.c.bf16 %v2748_v30, %v2746_v8  ;;  %v19636_v30 = vunpack.c.h.bf16 %v16338_v24  ;;  %v19643_v24 = vld [vmem:[#allocation159_spill] sm:$0xff] }
 0x28b   : > { %v5184_v29 = vrot.slane %v19633_v43, 2  ;;  %v2752_v14 = vsel %vm2464_vm1, %v2749_v0, %v2751_v13  ;;  %v19639_v43 = vld [vmem:[#allocation156_spill] sm:$0xff] }
 0x28c   : > { %19627 = vst [vmem:[#allocation135_spill] sm:$0xff] %v16973_v17  ;;  %v16993_v38 = vpack.c.bf16 %v2752_v14, %v2750_v44  ;;  %v5186_v11 = vrot.slane %v19636_v30, 2  ;;  %v19644_v44 = vld [vmem:[#allocation5_spill] sm:$0xff]  ;;  %v14397_v14 = vld [vmem:[%s18717_s1 + $0x1c8] sm:$0xff]   ;;  %v19648_v30 = vld [vmem:[#allocation8_spill] sm:$0xff] }
 0x28d   : > { %v5185_v15 = vsel %vm2464_vm1, %v5182_v40, %v5184_v29 }
 0x28e   : > { %12284 = vmatmul.mubr.bf16.gmra.mrb[48].mxu1 %v16306_v20  ;;  %19634 = vst [vmem:[#allocation136_spill] sm:$0xff] %v16993_v38 }
 0x28f   : > { %12780 = vmatmul.mubr.bf16.gmra.mrb[112].mxu0 %v16949_v59  ;;  %12287 = vmatprep.mubr.bf16.mxu1 %v16316_v46  ;;  %v19631_v46 = vunpack.c.l.bf16 %v19630_v51  ;;  %v19638_v51 = vunpack.c.l.bf16 %v19637_v25  ;;  %v19649_v25 = vld [vmem:[#allocation11_spill] sm:$0xff] }
 0x290   : > { %12783 = vmatprep.mubr.bf16.mxu0 %v16951_v63 }
 0x291   : > { %v5181_v20 = vrot.slane %v19631_v46, 2  ;;  %v5188_v6 = vrot.slane %v19638_v51, 2  ;;  %v19650_v51 = vld [vmem:[#allocation12_spill] sm:$0xff] }
 0x293   : > { %v5183_v46 = vsel %vm2464_vm1, %v5181_v20, %v5182_v40  ;;  %v5187_v20 = vsel %vm2464_vm1, %v5184_v29, %v5186_v11  ;;  %v5189_v0 = vsel %vm2464_vm1, %v5186_v11, %v5188_v6  ;;  %v19642_v40 = vld [vmem:[#allocation158_spill] sm:$0xff]  ;;  %v19646_v29 = vld [vmem:[#allocation131_spill] sm:$0xff]  ;;  %v14398_v11 = vld [vmem:[%s18717_s1 + $0x1d0] sm:$0xff]  }
 0x294   : > { %v16995_v8 = vpack.c.bf16 %v5185_v15, %v5183_v46  ;;  %v17007_v13 = vpack.c.bf16 %v5189_v0, %v5187_v20  ;;  %v19645_v46 = vld [vmem:[#allocation6_spill] sm:$0xff]  ;;  %v19647_v15 = vld [vmem:[#allocation7_spill] sm:$0xff]  ;;  %v19652_v6 = vld [vmem:[#allocation17_spill] sm:$0xff] }
 0x295   : > { %v19653_v20 = vld [vmem:[#allocation21_spill] sm:$0xff]  ;;  %v19654_v0 = vld [vmem:[#allocation22_spill] sm:$0xff] }
 0x296   : > { %12288 = vmatmul.mubr.bf16.gmra.mrb[52].mxu1 %v16331_v54  ;;  %19635 = vst [vmem:[#allocation140_spill] sm:$0xff] %v16995_v8  ;;  %19641 = vst [vmem:[#allocation2_spill] sm:$0xff] %v17007_v13 }
 0x297   : > { %12784 = vmatmul.mubr.bf16.gmra.mrb[116].mxu0 %v16971_v60  ;;  %12291 = vmatprep.mubr.bf16.mxu1 %v16350_v22 }
 0x298   : > { %12787 = vmatprep.mubr.bf16.mxu0 %v16973_v17 }
 0x29e   : > { %12292 = vmatmul.mubr.bf16.gmra.mrb[56].mxu1 %v19639_v43 }
 0x29f   : > { %12788 = vmatmul.mubr.bf16.gmra.mrb[120].mxu0 %v16993_v38  ;;  %12295 = vmatprep.mubr.bf16.mxu1 %v19640_v23 }
 0x2a0   : > { %12791 = vmatprep.mubr.bf16.mxu0 %v16995_v8 }
 0x2a6   : > { %12296 = vmatmul.mubr.bf16.gmra.mrb[60].mxu1 %v19642_v40 }
 0x2a7   : > { %12792 = vmatmul.mubr.bf16.gmra.mrb[124].mxu0 %v17007_v13  ;;  %12299 = vmatprep.mubr.bf16.mxu1 %v19643_v24 }
 0x2a8   : > { %12811 = vmatprep.mubr.bf16.mxu0 %v19644_v44  ;;  %v19655_v44 = vld [vmem:[#allocation26_spill] sm:$0xff] }
 0x2ae   : > { %12300 = vmatmul.mubr.bf16.gmra.mrb[64].mxu1 %v16445_v56 }
 0x2af   : > { %12812 = vmatmul.mubr.bf16.vlgmr.msra.gmra.mrb[0].mxu0 %v19645_v46  ;;  %12303 = vmatprep.mubr.bf16.mxu1 %v19646_v29  ;;  %v14399_v46 = vld [vmem:[%s18717_s1 + $0x1d8] sm:$0xff]  }
 0x2b0   : > { %12815 = vmatprep.mubr.bf16.mxu0 %v19647_v15  ;;  %12940 = vmatpush3.bf16.msra.mxu0 %v16897_v55  ;;  %v19651_v55 = vld [vmem:[#allocation16_spill] sm:$0xff]  ;;  %v19657_v15 = vld [vmem:[#allocation31_spill] sm:$0xff] }
 0x2b1   : > { %12941 = vmatprep.subr.bf16.mxu0 %v14397_v14 }
 0x2b4   : > { %12942 = vmatpush3.bf16.msra.mxu0 %v14397_v14  ;;  %v19656_v14 = vld [vmem:[#allocation27_spill] sm:$0xff] }
 0x2b5   : > { %12943 = vmatprep.subr.bf16.mxu0 %v14398_v11 }
 0x2b6   : > { %12304 = vmatmul.mubr.bf16.gmra.mrb[68].mxu1 %v16655_v3 }
 0x2b7   : > { %12816 = vmatmul.mubr.bf16.gmra.mrb[4].mxu0 %v19648_v30  ;;  %12307 = vmatprep.mubr.bf16.mxu1 %v16657_v2  ;;  %v19658_v30 = vld [vmem:[#allocation32_spill] sm:$0xff] }
 0x2b8   : > { %12819 = vmatprep.mubr.bf16.mxu0 %v19649_v25  ;;  %12944 = vmatpush3.bf16.msra.mxu0 %v14398_v11  ;;  %v19659_v11 = vld [vmem:[#allocation36_spill] sm:$0xff]  ;;  %v19660_v25 = vld [vmem:[#allocation37_spill] sm:$0xff] }
 0x2b9   : > { %12945 = vmatprep.subr.bf16.mxu0 %v14399_v46 }
 0x2bc   : > { %12946 = vmatpush3.bf16.msra.mxu0 %v14399_v46  ;;  %v19667_v46 = vld [vmem:[#allocation56_spill] sm:$0xff] }
 0x2be   : > { %12308 = vmatmul.mubr.bf16.gmra.mrb[72].mxu1 %v16683_v49 }
 0x2bf   : > { %12820 = vmatmul.mubr.bf16.gmra.mrb[8].mxu0 %v19650_v51  ;;  %12311 = vmatprep.mubr.bf16.mxu1 %v16685_v12  ;;  %v19661_v51 = vld [vmem:[#allocation40_spill] sm:$0xff] }
 0x2c0   : > { %12823 = vmatprep.mubr.bf16.mxu0 %v19651_v55  ;;  %v19662_v55 = vld [vmem:[#allocation42_spill] sm:$0xff] }
 0x2c6   : > { %12312 = vmatmul.mubr.bf16.gmra.mrb[76].mxu1 %v16711_v45 }
 0x2c7   : > { %12824 = vmatmul.mubr.bf16.gmra.mrb[12].mxu0 %v19652_v6  ;;  %12315 = vmatprep.mubr.bf16.mxu1 %v16713_v5  ;;  %v19663_v6 = vld [vmem:[#allocation46_spill] sm:$0xff] }
 0x2c8   : > { %12827 = vmatprep.mubr.bf16.mxu0 %v19653_v20  ;;  %v19664_v20 = vld [vmem:[#allocation47_spill] sm:$0xff] }
 0x2ce   : > { %12316 = vmatmul.mubr.bf16.gmra.mrb[80].mxu1 %v16739_v53 }
 0x2cf   : > { %12828 = vmatmul.mubr.bf16.gmra.mrb[16].mxu0 %v19654_v0  ;;  %12319 = vmatprep.mubr.bf16.mxu1 %v16741_v7  ;;  %v14400_v0 = vld [vmem:[%s18717_s1 + $0x1e0] sm:$0xff]  }
 0x2d0   : > { %12831 = vmatprep.mubr.bf16.mxu0 %v19655_v44  ;;  %v19665_v44 = vld [vmem:[#allocation51_spill] sm:$0xff]  ;;  %12947 = vmatprep.subr.bf16.mxu0 %v14400_v0 }
 0x2d1   : > { %12948 = vmatpush3.bf16.msra.mxu0 %v14400_v0 }
 0x2d6   : > { %12320 = vmatmul.mubr.bf16.gmra.mrb[84].mxu1 %v16767_v36 }
 0x2d7   : > { %12832 = vmatmul.mubr.bf16.gmra.mrb[20].mxu0 %v19656_v14  ;;  %12323 = vmatprep.mubr.bf16.mxu1 %v16769_v16  ;;  %v19666_v14 = vld [vmem:[#allocation52_spill] sm:$0xff] }
 0x2d8   : > { %12835 = vmatprep.mubr.bf16.mxu0 %v19657_v15 }
 0x2de   : > { %12324 = vmatmul.mubr.bf16.gmra.mrb[88].mxu1 %v16789_v9 }
 0x2df   : > { %12836 = vmatmul.mubr.bf16.gmra.mrb[24].mxu0 %v19658_v30  ;;  %12327 = vmatprep.mubr.bf16.mxu1 %v16791_v37 }
 0x2e0   : > { %12839 = vmatprep.mubr.bf16.mxu0 %v19659_v11 }
 0x2e6   : > { %12328 = vmatmul.mubr.bf16.gmra.mrb[92].mxu1 %v16811_v26 }
 0x2e7   : > { %12840 = vmatmul.mubr.bf16.gmra.mrb[28].mxu0 %v19660_v25  ;;  %12331 = vmatprep.mubr.bf16.mxu1 %v16813_v31 }
 0x2e8   : > { %12843 = vmatprep.mubr.bf16.mxu0 %v19661_v51  ;;  %v19668_v51 = vld [vmem:[#allocation57_spill] sm:$0xff] }
 0x2ee   : > { %12332 = vmatmul.mubr.bf16.gmra.mrb[96].mxu1 %v16833_v34 }
 0x2ef   : > { %12844 = vmatmul.mubr.bf16.gmra.mrb[32].mxu0 %v19662_v55  ;;  %12335 = vmatprep.mubr.bf16.mxu1 %v16835_v48  ;;  %v19669_v55 = vld [vmem:[#allocation61_spill] sm:$0xff] }
 0x2f0   : > { %12847 = vmatprep.mubr.bf16.mxu0 %v19663_v6 }
 0x2f6   : > { %12336 = vmatmul.mubr.bf16.gmra.mrb[100].mxu1 %v16855_v62 }
 0x2f7   : > { %12848 = vmatmul.mubr.bf16.gmra.mrb[36].mxu0 %v19664_v20  ;;  %12339 = vmatprep.mubr.bf16.mxu1 %v16857_v27 }
 0x2f8   : > { %12851 = vmatprep.mubr.bf16.mxu0 %v19665_v44 }
 0x2fe   : > { %12340 = vmatmul.mubr.bf16.gmra.mrb[104].mxu1 %v16877_v18 }
 0x2ff   : > { %12852 = vmatmul.mubr.bf16.gmra.mrb[40].mxu0 %v19666_v14  ;;  %12343 = vmatprep.mubr.bf16.mxu1 %v16879_v1  ;;  %v19673_v14 = vld [vmem:[#allocation62_spill] sm:$0xff] }
 0x300   : > { %12855 = vmatprep.mubr.bf16.mxu0 %v19667_v46  ;;  %v19674_v46 = vld [vmem:[#allocation66_spill] sm:$0xff] }
 0x301   : > { %v17070_v15 = vpop.f32.mrb[0].mxu1 }
 0x302   : > { %v17072_v30 = vpop.f32.mrb[1].mxu1 }
 0x303   : > { %v17074_v11 = vpop.f32.mrb[2].mxu1 }
 0x304   : > { %v17076_v25 = vpop.f32.mrb[3].mxu1 }
 0x306   : > { %12344 = vmatmul.mubr.bf16.gmra.mrb[108].mxu1 %v16905_v52 }
 0x307   : > { %12856 = vmatmul.mubr.bf16.gmra.mrb[44].mxu0 %v19668_v51  ;;  %12347 = vmatprep.mubr.bf16.mxu1 %v16907_v47 }
 0x308   : > { %12859 = vmatprep.mubr.bf16.mxu0 %v19669_v55 }
 0x309   : > { %v17082_v6 = vpop.f32.mrb[4].mxu1 }
 0x30a   : > { %v17084_v20 = vpop.f32.mrb[5].mxu1 }
 0x30b   : > { %19670 = vst [vmem:[#allocation76_spill] sm:$0xff] %v17084_v20  ;;  %v17086_v0 = vpop.f32.mrb[6].mxu1 }
 0x30c   : > { %19671 = vst [vmem:[#allocation77_spill] sm:$0xff] %v17086_v0  ;;  %v17088_v44 = vpop.f32.mrb[7].mxu1  ;;  %v19679_v0 = vld [vmem:[#allocation67_spill] sm:$0xff] }
 0x30d   : > { %19672 = vst [vmem:[#allocation80_spill] sm:$0xff] %v17088_v44  ;;  %v19680_v44 = vld [vmem:[#allocation71_spill] sm:$0xff] }
 0x30e   : > { %12348 = vmatmul.mubr.bf16.gmra.mrb[112].mxu1 %v16927_v42 }
 0x30f   : > { %12860 = vmatmul.mubr.bf16.gmra.mrb[48].mxu0 %v19673_v14  ;;  %12351 = vmatprep.mubr.bf16.mxu1 %v16929_v28  ;;  %v14401_v14 = vld [vmem:[%s18717_s1 + $0x1e8] sm:$0xff]  }
 0x310   : > { %12863 = vmatprep.mubr.bf16.mxu0 %v19674_v46  ;;  %12949 = vmatprep.subr.bf16.mxu0 %v14401_v14 }
 0x311   : > { %v17094_v51 = vpop.f32.mrb[8].mxu1  ;;  %12950 = vmatpush3.bf16.msra.mxu0 %v14401_v14  ;;  %v14406_v14 = vld [vmem:[%s18717_s1 + $0x1f0] sm:$0xff]  }
 0x312   : > { %19675 = vst [vmem:[#allocation81_spill] sm:$0xff] %v17094_v51  ;;  %v17096_v13 = vpop.f32.mrb[9].mxu1  ;;  %v19686_v51 = vld [vmem:[#allocation3_spill] sm:$0xff]  ;;  %12951 = vmatprep.subr.bf16.mxu0 %v14406_v14 }
 0x313   : > { %19676 = vst [vmem:[#allocation82_spill] sm:$0xff] %v17096_v13  ;;  %v17098_v55 = vpop.f32.mrb[10].mxu1 }
 0x314   : > { %19677 = vst [vmem:[#allocation85_spill] sm:$0xff] %v17098_v55  ;;  %v17100_v8 = vpop.f32.mrb[11].mxu1 }
 0x315   : > { %19678 = vst [vmem:[#allocation86_spill] sm:$0xff] %v17100_v8  ;;  %12952 = vmatpush3.bf16.msra.mxu0 %v14406_v14 }
 0x316   : > { %12352 = vmatmul.mubr.bf16.gmra.mrb[116].mxu1 %v16949_v59 }
 0x317   : > { %12864 = vmatmul.mubr.bf16.gmra.mrb[52].mxu0 %v19679_v0  ;;  %12355 = vmatprep.mubr.bf16.mxu1 %v16951_v63  ;;  %v19685_v0 = vld [vmem:[#allocation72_spill] sm:$0xff] }
 0x318   : > { %12867 = vmatprep.mubr.bf16.mxu0 %v19680_v44 }
 0x319   : > { %v17109_v46 = vpop.f32.mrb[12].mxu1 }
 0x31a   : > { %19681 = vst [vmem:[#allocation87_spill] sm:$0xff] %v17109_v46  ;;  %v17111_v13 = vpop.f32.mrb[13].mxu1 }
 0x31b   : > { %19682 = vst [vmem:[#allocation90_spill] sm:$0xff] %v17111_v13  ;;  %v17113_v55 = vpop.f32.mrb[14].mxu1 }
 0x31c   : > { %19683 = vst [vmem:[#allocation91_spill] sm:$0xff] %v17113_v55  ;;  %v17115_v8 = vpop.f32.mrb[15].mxu1 }
 0x31d   : > { %19684 = vst [vmem:[#allocation92_spill] sm:$0xff] %v17115_v8  ;;  %v19691_v8 = vld [vmem:[#allocation4_spill] sm:$0xff] }
 0x31e   : > { %12356 = vmatmul.mubr.bf16.gmra.mrb[120].mxu1 %v16971_v60 }
 0x31f   : > { %12868 = vmatmul.mubr.bf16.gmra.mrb[56].mxu0 %v19685_v0  ;;  %12359 = vmatprep.mubr.bf16.mxu1 %v16973_v17  ;;  %v14407_v0 = vld [vmem:[%s18717_s1 + $0x1f8] sm:$0xff]  }
 0x320   : > { %12871 = vmatprep.mubr.bf16.mxu0 %v19686_v51  ;;  %12953 = vmatprep.subr.bf16.mxu0 %v14407_v0 }
 0x321   : > { %v17121_v20 = vpop.f32.mrb[16].mxu1  ;;  %12954 = vmatpush3.bf16.msra.mxu0 %v14407_v0 }
 0x322   : > { %19687 = vst [vmem:[#allocation95_spill] sm:$0xff] %v17121_v20  ;;  %v17123_v44 = vpop.f32.mrb[17].mxu1  ;;  %v19692_v20 = vld [vmem:[#allocation160_spill] sm:$0xff] }
 0x323   : > { %19688 = vst [vmem:[#allocation96_spill] sm:$0xff] %v17123_v44  ;;  %v17125_v46 = vpop.f32.mrb[18].mxu1 }
 0x324   : > { %19689 = vst [vmem:[#allocation97_spill] sm:$0xff] %v17125_v46  ;;  %v17127_v13 = vpop.f32.mrb[19].mxu1 }
 0x325   : > { %19690 = vst [vmem:[#allocation100_spill] sm:$0xff] %v17127_v13 }
 0x326   : > { %12360 = vmatmul.mubr.bf16.gmra.mrb[124].mxu1 %v16993_v38  ;;  %v19698_v38 = vld [vmem:[#allocation162_spill] sm:$0xff] }
 0x327   : > { %12872 = vmatmul.mubr.bf16.gmra.mrb[60].mxu0 %v19691_v8  ;;  %12443 = vmatprep.mubr.bf16.mxu1 %v19686_v51  ;;  %v19697_v51 = vld [vmem:[#allocation161_spill] sm:$0xff] }
 0x328   : > { %12875 = vmatprep.mubr.bf16.mxu0 %v19692_v20 }
 0x329   : > { %v17139_v46 = vpop.f32.mrb[20].mxu1 }
 0x32a   : > { %19693 = vst [vmem:[#allocation101_spill] sm:$0xff] %v17139_v46  ;;  %v17141_v13 = vpop.f32.mrb[21].mxu1 }
 0x32b   : > { %19694 = vst [vmem:[#allocation102_spill] sm:$0xff] %v17141_v13  ;;  %v17143_v44 = vpop.f32.mrb[22].mxu1 }
 0x32c   : > { %19695 = vst [vmem:[#allocation105_spill] sm:$0xff] %v17143_v44  ;;  %v17145_v55 = vpop.f32.mrb[23].mxu1 }
 0x32d   : > { %19696 = vst [vmem:[#allocation106_spill] sm:$0xff] %v17145_v55  ;;  %v19703_v55 = vld [vmem:[#allocation163_spill] sm:$0xff] }
 0x32e   : > { %12444 = vmatmul.mubr.bf16.vlgmr.msra.gmra.mrb[64].mxu1 %v19691_v8  ;;  %v19704_v8 = vld [vmem:[#allocation164_spill] sm:$0xff] }
 0x32f   : > { %12876 = vmatmul.mubr.bf16.gmra.mrb[64].mxu0 %v19697_v51  ;;  %12447 = vmatprep.mubr.bf16.mxu1 %v19692_v20 }
 0x330   : > { %12879 = vmatprep.mubr.bf16.mxu0 %v19698_v38 }
 0x331   : > { %v17151_v17 = vpop.f32.mrb[24].mxu1 }
 0x332   : > { %19699 = vst [vmem:[#allocation107_spill] sm:$0xff] %v17151_v17  ;;  %v17153_v46 = vpop.f32.mrb[25].mxu1 }
 0x333   : > { %19700 = vst [vmem:[#allocation110_spill] sm:$0xff] %v17153_v46  ;;  %v17155_v14 = vpop.f32.mrb[26].mxu1 }
 0x334   : > { %19701 = vst [vmem:[#allocation111_spill] sm:$0xff] %v17155_v14  ;;  %v17157_v13 = vpop.f32.mrb[27].mxu1  ;;  %v19709_v14 = vld [vmem:[#allocation165_spill] sm:$0xff] }
 0x335   : > { %19702 = vst [vmem:[#allocation112_spill] sm:$0xff] %v17157_v13 }
 0x336   : > { %12448 = vmatmul.mubr.bf16.gmra.mrb[68].mxu1 %v19697_v51  ;;  %v19710_v51 = vld [vmem:[#allocation166_spill] sm:$0xff] }
 0x337   : > { %12880 = vmatmul.mubr.bf16.gmra.mrb[68].mxu0 %v19703_v55  ;;  %12451 = vmatprep.mubr.bf16.mxu1 %v19698_v38 }
 0x338   : > { %12883 = vmatprep.mubr.bf16.mxu0 %v19704_v8 }
 0x339   : > { %v17163_v0 = vpop.f32.mrb[28].mxu1 }
 0x33a   : > { %19705 = vst [vmem:[#allocation115_spill] sm:$0xff] %v17163_v0  ;;  %v17165_v20 = vpop.f32.mrb[29].mxu1 }
 0x33b   : > { %19706 = vst [vmem:[#allocation116_spill] sm:$0xff] %v17165_v20  ;;  %v17167_v44 = vpop.f32.mrb[30].mxu1 }
 0x33c   : > { %19707 = vst [vmem:[#allocation117_spill] sm:$0xff] %v17167_v44  ;;  %v17169_v17 = vpop.f32.mrb[31].mxu1  ;;  %v19715_v44 = vld [vmem:[#allocation167_spill] sm:$0xff] }
 0x33d   : > { %19708 = vst [vmem:[#allocation120_spill] sm:$0xff] %v17169_v17 }
 0x33e   : > { %12452 = vmatmul.mubr.bf16.gmra.mrb[72].mxu1 %v19703_v55  ;;  %v19716_v55 = vld [vmem:[#allocation168_spill] sm:$0xff] }
 0x33f   : > { %12884 = vmatmul.mubr.bf16.gmra.mrb[72].mxu0 %v19709_v14  ;;  %12455 = vmatprep.mubr.bf16.mxu1 %v19704_v8 }
 0x340   : > { %12887 = vmatprep.mubr.bf16.mxu0 %v19710_v51 }
 0x341   : > { %v17175_v13 = vpop.f32.mrb[32].mxu1 }
 0x342   : > { %19711 = vst [vmem:[#allocation121_spill] sm:$0xff] %v17175_v13  ;;  %v17177_v38 = vpop.f32.mrb[33].mxu1 }
 0x343   : > { %19712 = vst [vmem:[#allocation122_spill] sm:$0xff] %v17177_v38  ;;  %v17179_v46 = vpop.f32.mrb[34].mxu1 }
 0x344   : > { %19713 = vst [vmem:[#allocation125_spill] sm:$0xff] %v17179_v46  ;;  %v17181_v0 = vpop.f32.mrb[35].mxu1  ;;  %v19721_v46 = vld [vmem:[#allocation169_spill] sm:$0xff] }
 0x345   : > { %19714 = vst [vmem:[#allocation126_spill] sm:$0xff] %v17181_v0 }
 0x346   : > { %12456 = vmatmul.mubr.bf16.gmra.mrb[76].mxu1 %v19709_v14  ;;  %v19722_v14 = vld [vmem:[#allocation170_spill] sm:$0xff] }
 0x347   : > { %12888 = vmatmul.mubr.bf16.gmra.mrb[76].mxu0 %v19715_v44  ;;  %12459 = vmatprep.mubr.bf16.mxu1 %v19710_v51 }
 0x348   : > { %12891 = vmatprep.mubr.bf16.mxu0 %v19716_v55 }
 0x349   : > { %v17187_v17 = vpop.f32.mrb[36].mxu1 }
 0x34a   : > { %19717 = vst [vmem:[#allocation127_spill] sm:$0xff] %v17187_v17  ;;  %v17189_v8 = vpop.f32.mrb[37].mxu1 }
 0x34b   : > { %19718 = vst [vmem:[#allocation130_spill] sm:$0xff] %v17189_v8  ;;  %v17191_v20 = vpop.f32.mrb[38].mxu1 }
 0x34c   : > { %19719 = vst [vmem:[#allocation134_spill] sm:$0xff] %v17191_v20  ;;  %v17193_v13 = vpop.f32.mrb[39].mxu1  ;;  %v19727_v20 = vld [vmem:[#allocation171_spill] sm:$0xff] }
 0x34d   : > { %19720 = vst [vmem:[#allocation139_spill] sm:$0xff] %v17193_v13 }
 0x34e   : > { %12460 = vmatmul.mubr.bf16.gmra.mrb[80].mxu1 %v19715_v44  ;;  %v19728_v44 = vld [vmem:[#allocation172_spill] sm:$0xff] }
 0x34f   : > { %12892 = vmatmul.mubr.bf16.gmra.mrb[80].mxu0 %v19721_v46  ;;  %12463 = vmatprep.mubr.bf16.mxu1 %v19716_v55 }
 0x350   : > { %12895 = vmatprep.mubr.bf16.mxu0 %v19722_v14 }
 0x351   : > { %v17199_v0 = vpop.f32.mrb[40].mxu1 }
 0x352   : > { %19723 = vst [vmem:[#allocation59_spill] sm:$0xff] %v17199_v0  ;;  %v17201_v51 = vpop.f32.mrb[41].mxu1 }
 0x353   : > { %19724 = vst [vmem:[#allocation64_spill] sm:$0xff] %v17201_v51  ;;  %v17203_v38 = vpop.f32.mrb[42].mxu1 }
 0x354   : > { %19725 = vst [vmem:[#allocation156_spill] sm:$0xff] %v17203_v38  ;;  %v17205_v17 = vpop.f32.mrb[43].mxu1  ;;  %v19733_v38 = vld [vmem:[#allocation173_spill] sm:$0xff] }
 0x355   : > { %19726 = vst [vmem:[#allocation157_spill] sm:$0xff] %v17205_v17 }
 0x356   : > { %12464 = vmatmul.mubr.bf16.gmra.mrb[84].mxu1 %v19721_v46  ;;  %v19734_v46 = vld [vmem:[#allocation174_spill] sm:$0xff] }
 0x357   : > { %12896 = vmatmul.mubr.bf16.gmra.mrb[84].mxu0 %v19727_v20  ;;  %12467 = vmatprep.mubr.bf16.mxu1 %v19722_v14 }
 0x358   : > { %12899 = vmatprep.mubr.bf16.mxu0 %v19728_v44 }
 0x359   : > { %v17211_v13 = vpop.f32.mrb[44].mxu1 }
 0x35a   : > { %19729 = vst [vmem:[#allocation158_spill] sm:$0xff] %v17211_v13  ;;  %v17213_v55 = vpop.f32.mrb[45].mxu1 }
 0x35b   : > { %19730 = vst [vmem:[#allocation159_spill] sm:$0xff] %v17213_v55  ;;  %v17215_v8 = vpop.f32.mrb[46].mxu1 }
 0x35c   : > { %19731 = vst [vmem:[#allocation5_spill] sm:$0xff] %v17215_v8  ;;  %v17217_v0 = vpop.f32.mrb[47].mxu1  ;;  %v19739_v8 = vld [vmem:[#allocation175_spill] sm:$0xff] }
 0x35d   : > { %19732 = vst [vmem:[#allocation6_spill] sm:$0xff] %v17217_v0 }
 0x35e   : > { %12468 = vmatmul.mubr.bf16.gmra.mrb[88].mxu1 %v19727_v20  ;;  %v19740_v20 = vld [vmem:[#allocation176_spill] sm:$0xff] }
 0x35f   : > { %12900 = vmatmul.mubr.bf16.gmra.mrb[88].mxu0 %v19733_v38  ;;  %12471 = vmatprep.mubr.bf16.mxu1 %v19728_v44 }
 0x360   : > { %12903 = vmatprep.mubr.bf16.mxu0 %v19734_v46 }
 0x361   : > { %v17223_v17 = vpop.f32.mrb[48].mxu1 }
 0x362   : > { %19735 = vst [vmem:[#allocation131_spill] sm:$0xff] %v17223_v17  ;;  %v17225_v14 = vpop.f32.mrb[49].mxu1 }
 0x363   : > { %19736 = vst [vmem:[#allocation7_spill] sm:$0xff] %v17225_v14  ;;  %v17227_v51 = vpop.f32.mrb[50].mxu1 }
 0x364   : > { %19737 = vst [vmem:[#allocation8_spill] sm:$0xff] %v17227_v51  ;;  %v17229_v13 = vpop.f32.mrb[51].mxu1  ;;  %v19744_v51 = vld [vmem:[#allocation177_spill] sm:$0xff] }
 0x365   : > { %19738 = vst [vmem:[#allocation11_spill] sm:$0xff] %v17229_v13 }
 0x366   : > { %12472 = vmatmul.mubr.bf16.gmra.mrb[92].mxu1 %v19733_v38  ;;  %v19745_v38 = vld [vmem:[#allocation178_spill] sm:$0xff] }
 0x367   : > { %12904 = vmatmul.mubr.bf16.gmra.mrb[92].mxu0 %v19739_v8  ;;  %12475 = vmatprep.mubr.bf16.mxu1 %v19734_v46 }
 0x368   : > { %12907 = vmatprep.mubr.bf16.mxu0 %v19740_v20 }
 0x369   : > { %v17235_v0 = vpop.f32.mrb[52].mxu1 }
 0x36a   : > { %19741 = vst [vmem:[#allocation12_spill] sm:$0xff] %v17235_v0  ;;  %v17237_v44 = vpop.f32.mrb[53].mxu1 }
 0x36b   : > { %v17239_v55 = vpop.f32.mrb[54].mxu1 }
 0x36c   : > { %19742 = vst [vmem:[#allocation16_spill] sm:$0xff] %v17239_v55  ;;  %v17241_v17 = vpop.f32.mrb[55].mxu1  ;;  %v19750_v55 = vld [vmem:[#allocation179_spill] sm:$0xff] }
 0x36d   : > { %19743 = vst [vmem:[#allocation17_spill] sm:$0xff] %v17241_v17  ;;  %v19881_v17 = vld [vmem:[#allocation74_spill] sm:$0xff] }
 0x36e   : > { %12476 = vmatmul.mubr.bf16.gmra.mrb[96].mxu1 %v19739_v8  ;;  %v14408_v8 = vld [vmem:[%s18717_s1 + $0x200] sm:$0xff]  }
 0x36f   : > { %12908 = vmatmul.mubr.bf16.gmra.mrb[96].mxu0 %v19744_v51  ;;  %12479 = vmatprep.mubr.bf16.mxu1 %v19740_v20 }
 0x370   : > { %12911 = vmatprep.mubr.bf16.mxu0 %v19745_v38  ;;  %13083 = vmatprep.subr.bf16.mxu0 %v14408_v8 }
 0x371   : > { %v17247_v13 = vpop.f32.mrb[56].mxu1 }
 0x372   : > { %19746 = vst [vmem:[#allocation21_spill] sm:$0xff] %v17247_v13  ;;  %v17249_v46 = vpop.f32.mrb[57].mxu1 }
 0x373   : > { %19747 = vst [vmem:[#allocation22_spill] sm:$0xff] %v17249_v46  ;;  %v17251_v14 = vpop.f32.mrb[58].mxu1 }
 0x374   : > { %19748 = vst [vmem:[#allocation26_spill] sm:$0xff] %v17251_v14  ;;  %v17253_v0 = vpop.f32.mrb[59].mxu1 }
 0x375   : > { %19749 = vst [vmem:[#allocation27_spill] sm:$0xff] %v17253_v0 }
 0x376   : > { %12480 = vmatmul.mubr.bf16.gmra.mrb[100].mxu1 %v19744_v51  ;;  %v19757_v51 = vld [vmem:[#allocation15_spill] sm:$0xff] }
 0x377   : > { %12912 = vmatmul.mubr.bf16.gmra.mrb[100].mxu0 %v19750_v55  ;;  %12483 = vmatprep.mubr.bf16.mxu1 %v19745_v38  ;;  %v19759_v38 = vld [vmem:[#allocation20_spill] sm:$0xff] }
 0x378   : > { %12915 = vmatprep.mubr.bf16.mxu0 %v15853_v57 }
 0x379   : > { %v17262_v20 = vpop.f32.mrb[60].mxu1 }
 0x37a   : > { %19751 = vst [vmem:[#allocation31_spill] sm:$0xff] %v17262_v20  ;;  %v17264_v46 = vpop.f32.mrb[61].mxu1 }
 0x37b   : > { %19752 = vst [vmem:[#allocation32_spill] sm:$0xff] %v17264_v46  ;;  %v17266_v14 = vpop.f32.mrb[62].mxu1 }
 0x37c   : > { %19753 = vst [vmem:[#allocation36_spill] sm:$0xff] %v17266_v14  ;;  %v17268_v0 = vpop.f32.mrb[63].mxu1 }
 0x37d   : > { %19754 = vst [vmem:[#allocation37_spill] sm:$0xff] %v17268_v0 }
 0x37e   : > { %12484 = vmatmul.mubr.bf16.gmra.mrb[104].mxu1 %v19750_v55  ;;  %v14410_v55 = vld [vmem:[%s18717_s1 + $0x210] sm:$0xff]  }
 0x37f   : > { %12916 = vmatmul.mubr.bf16.gmra.mrb[104].mxu0 %v19510_v39  ;;  %12487 = vmatprep.mubr.bf16.mxu1 %v15853_v57  ;;  %v14708_v57 = vld [vmem:[%s14789_s17 + $0x280] sm:$0xff]  }
 0x380   : > { %12919 = vmatprep.mubr.bf16.mxu0 %v19511_v50 }
 0x386   : > { %12488 = vmatmul.mubr.bf16.gmra.mrb[108].mxu1 %v19510_v39  ;;  %v14709_v39 = vld [vmem:[%s14789_s17 + $0x288] sm:$0xff]  }
 0x387   : > { %12920 = vmatmul.mubr.bf16.gmra.mrb[108].mxu0 %v19512_v61  ;;  %12491 = vmatprep.mubr.bf16.mxu1 %v19511_v50  ;;  %v17287_v50 = vld [vmem:[%s14789_s17 + $0x294] sm:$0xff]  }
 0x388   : > { %12923 = vmatprep.mubr.bf16.mxu0 %v19513_v58 }
 0x38e   : > { %12492 = vmatmul.mubr.bf16.gmra.mrb[112].mxu1 %v19512_v61  ;;  %v17293_v61 = vld [vmem:[%s14789_s17 + $0x29c] sm:$0xff]  }
 0x38f   : > { %12924 = vmatmul.mubr.bf16.gmra.mrb[112].mxu0 %v15931_v21  ;;  %12495 = vmatprep.mubr.bf16.mxu1 %v19513_v58  ;;  %v19756_v58 = vld [vmem:[#allocation14_spill] sm:$0xff] }
 0x390   : > { %12927 = vmatprep.mubr.bf16.mxu0 %v15964_v35 }
 0x396   : > { %12496 = vmatmul.mubr.bf16.gmra.mrb[116].mxu1 %v15931_v21  ;;  %v19755_v21 = vld [vmem:[#allocation9_spill] sm:$0xff] }
 0x397   : > { %12928 = vmatmul.mubr.bf16.gmra.mrb[116].mxu0 %v15967_v33  ;;  %12499 = vmatprep.mubr.bf16.mxu1 %v15964_v35  ;;  %v14409_v35 = vld [vmem:[%s18717_s1 + $0x208] sm:$0xff]  }
 0x398   : > { %12931 = vmatprep.mubr.bf16.mxu0 %v14708_v57 }
 0x39e   : > { %12500 = vmatmul.mubr.bf16.gmra.mrb[120].mxu1 %v15967_v33  ;;  %v19758_v33 = vld [vmem:[#allocation18_spill] sm:$0xff] }
 0x39f   : > { %12932 = vmatmul.mubr.bf16.gmra.mrb[120].mxu0 %v14709_v39  ;;  %12503 = vmatprep.mubr.bf16.mxu1 %v14708_v57  ;;  %v19760_v57 = vld [vmem:[#allocation23_spill] sm:$0xff] }
 0x3a0   : > { %12935 = vmatprep.mubr.bf16.mxu0 %v17287_v50 }
 0x3a6   : > { %12504 = vmatmul.mubr.bf16.gmra.mrb[124].mxu1 %v14709_v39  ;;  %v19761_v39 = vld [vmem:[#allocation25_spill] sm:$0xff] }
 0x3a7   : > { %12936 = vmatmul.mubr.bf16.gmra.mrb[124].mxu0 %v17293_v61 }
 0x3a8   : > { %12955 = vmatprep.mubr.bf16.mxu0 %v19755_v21  ;;  %v19762_v21 = vld [vmem:[#allocation28_spill] sm:$0xff] }
 0x3af   : > { %12956 = vmatmul.mubr.bf16.vlgmr.msra.gmra.mrb[0].mxu0 %v19756_v58  ;;  %v19763_v58 = vld [vmem:[#allocation30_spill] sm:$0xff] }
 0x3b0   : > { %12959 = vmatprep.mubr.bf16.mxu0 %v19757_v51  ;;  %13084 = vmatpush3.bf16.msra.mxu0 %v14408_v8  ;;  %v19764_v8 = vld [vmem:[#allocation33_spill] sm:$0xff]  ;;  %v19766_v51 = vld [vmem:[#allocation39_spill] sm:$0xff] }
 0x3b1   : > { %13085 = vmatprep.subr.bf16.mxu0 %v14409_v35 }
 0x3b4   : > { %13086 = vmatpush3.bf16.msra.mxu0 %v14409_v35  ;;  %v19765_v35 = vld [vmem:[#allocation35_spill] sm:$0xff] }
 0x3b5   : > { %13087 = vmatprep.subr.bf16.mxu0 %v14410_v55 }
 0x3b7   : > { %12960 = vmatmul.mubr.bf16.gmra.mrb[4].mxu0 %v19758_v33  ;;  %v14411_v33 = vld [vmem:[%s18717_s1 + $0x218] sm:$0xff]  }
 0x3b8   : > { %12963 = vmatprep.mubr.bf16.mxu0 %v19759_v38  ;;  %13088 = vmatpush3.bf16.msra.mxu0 %v14410_v55  ;;  %v19767_v38 = vld [vmem:[#allocation41_spill] sm:$0xff]  ;;  %v19768_v55 = vld [vmem:[#allocation43_spill] sm:$0xff] }
 0x3b9   : > { %13089 = vmatprep.subr.bf16.mxu0 %v14411_v33 }
 0x3bc   : > { %13090 = vmatpush3.bf16.msra.mxu0 %v14411_v33  ;;  %v19776_v33 = vld [vmem:[#allocation63_spill] sm:$0xff] }
 0x3bf   : > { %12964 = vmatmul.mubr.bf16.gmra.mrb[8].mxu0 %v19760_v57  ;;  %v19769_v57 = vld [vmem:[#allocation44_spill] sm:$0xff] }
 0x3c0   : > { %12967 = vmatprep.mubr.bf16.mxu0 %v19761_v39  ;;  %v19770_v39 = vld [vmem:[#allocation48_spill] sm:$0xff] }
 0x3c7   : > { %12968 = vmatmul.mubr.bf16.gmra.mrb[12].mxu0 %v19762_v21  ;;  %v19771_v21 = vld [vmem:[#allocation50_spill] sm:$0xff] }
 0x3c8   : > { %12971 = vmatprep.mubr.bf16.mxu0 %v19763_v58  ;;  %v19772_v58 = vld [vmem:[#allocation53_spill] sm:$0xff] }
 0x3cf   : > { %12972 = vmatmul.mubr.bf16.gmra.mrb[16].mxu0 %v19764_v8  ;;  %v19773_v8 = vld [vmem:[#allocation55_spill] sm:$0xff] }
 0x3d0   : > { %12975 = vmatprep.mubr.bf16.mxu0 %v19765_v35  ;;  %v19774_v35 = vld [vmem:[#allocation58_spill] sm:$0xff] }
 0x3d7   : > { %12976 = vmatmul.mubr.bf16.gmra.mrb[20].mxu0 %v19766_v51  ;;  %v14412_v51 = vld [vmem:[%s18717_s1 + $0x220] sm:$0xff]  }
 0x3d8   : > { %12979 = vmatprep.mubr.bf16.mxu0 %v19767_v38  ;;  %v19775_v38 = vld [vmem:[#allocation60_spill] sm:$0xff]  ;;  %13091 = vmatprep.subr.bf16.mxu0 %v14412_v51 }
 0x3d9   : > { %13092 = vmatpush3.bf16.msra.mxu0 %v14412_v51 }
 0x3df   : > { %12980 = vmatmul.mubr.bf16.gmra.mrb[24].mxu0 %v19768_v55  ;;  %v19777_v55 = vld [vmem:[#allocation65_spill] sm:$0xff] }
 0x3e0   : > { %12983 = vmatprep.mubr.bf16.mxu0 %v19769_v57 }
 0x3e7   : > { %12984 = vmatmul.mubr.bf16.gmra.mrb[28].mxu0 %v19770_v39 }
 0x3e8   : > { %12987 = vmatprep.mubr.bf16.mxu0 %v19771_v21 }
 0x3ef   : > { %12988 = vmatmul.mubr.bf16.gmra.mrb[32].mxu0 %v19772_v58 }
 0x3f0   : > { %12991 = vmatprep.mubr.bf16.mxu0 %v19773_v8  ;;  %v19782_v8 = vld [vmem:[#allocation68_spill] sm:$0xff] }
 0x3f7   : > { %12992 = vmatmul.mubr.bf16.gmra.mrb[36].mxu0 %v19774_v35  ;;  %v19783_v35 = vld [vmem:[#allocation70_spill] sm:$0xff] }
 0x3f8   : > { %12995 = vmatprep.mubr.bf16.mxu0 %v19775_v38 }
 0x3ff   : > { %12996 = vmatmul.mubr.bf16.gmra.mrb[40].mxu0 %v19776_v33 }
 0x400   : > { %12999 = vmatprep.mubr.bf16.mxu0 %v19777_v55  ;;  %v19788_v55 = vld [vmem:[#allocation73_spill] sm:$0xff] }
 0x401   : > { %v17331_v57 = vpop.f32.mrb[64].mxu1 }
 0x402   : > { %19778 = vst [vmem:[#allocation40_spill] sm:$0xff] %v17331_v57  ;;  %v17333_v39 = vpop.f32.mrb[65].mxu1  ;;  %v19789_v57 = vld [vmem:[#allocation75_spill] sm:$0xff] }
 0x403   : > { %19779 = vst [vmem:[#allocation42_spill] sm:$0xff] %v17333_v39  ;;  %v17335_v21 = vpop.f32.mrb[66].mxu1 }
 0x404   : > { %19780 = vst [vmem:[#allocation46_spill] sm:$0xff] %v17335_v21  ;;  %v17337_v58 = vpop.f32.mrb[67].mxu1 }
 0x405   : > { %19781 = vst [vmem:[#allocation47_spill] sm:$0xff] %v17337_v58 }
 0x407   : > { %13000 = vmatmul.mubr.bf16.gmra.mrb[44].mxu0 %v19782_v8 }
 0x408   : > { %13003 = vmatprep.mubr.bf16.mxu0 %v19783_v35  ;;  %v19130_v35 = vunpack.c.l.bf16 %v17287_v50 }
 0x409   : > { %v17341_v0 = vpop.f32.mrb[68].mxu1 }
 0x40a   : > { %19784 = vst [vmem:[#allocation51_spill] sm:$0xff] %v17341_v0  ;;  %v17343_v38 = vpop.f32.mrb[69].mxu1  ;;  %v19794_v0 = vld [vmem:[#allocation78_spill] sm:$0xff] }
 0x40b   : > { %19785 = vst [vmem:[#allocation52_spill] sm:$0xff] %v17343_v38  ;;  %v17345_v51 = vpop.f32.mrb[70].mxu1  ;;  %v19131_v38 = vunpack.c.h.bf16 %v17287_v50 }
 0x40c   : > { %19786 = vst [vmem:[#allocation56_spill] sm:$0xff] %v17345_v51  ;;  %v17347_v33 = vpop.f32.mrb[71].mxu1 }
 0x40d   : > { %19787 = vst [vmem:[#allocation57_spill] sm:$0xff] %v17347_v33  ;;  %v6680_v51 = vrot.slane %v19131_v38, 1 }
 0x40f   : > { %13004 = vmatmul.mubr.bf16.gmra.mrb[48].mxu0 %v19788_v55  ;;  %v19795_v55 = vld [vmem:[#allocation79_spill] sm:$0xff] }
 0x410   : > { %13007 = vmatprep.mubr.bf16.mxu0 %v19789_v57  ;;  %v14413_v57 = vld [vmem:[%s18717_s1 + $0x228] sm:$0xff]  }
 0x411   : > { %v17351_v39 = vpop.f32.mrb[72].mxu1  ;;  %13093 = vmatprep.subr.bf16.mxu0 %v14413_v57 }
 0x412   : > { %19790 = vst [vmem:[#allocation61_spill] sm:$0xff] %v17351_v39  ;;  %v17353_v21 = vpop.f32.mrb[73].mxu1  ;;  %13094 = vmatpush3.bf16.msra.mxu0 %v14413_v57 }
 0x413   : > { %19791 = vst [vmem:[#allocation62_spill] sm:$0xff] %v17353_v21  ;;  %v17355_v58 = vpop.f32.mrb[74].mxu1 }
 0x414   : > { %19792 = vst [vmem:[#allocation66_spill] sm:$0xff] %v17355_v58  ;;  %v17357_v8 = vpop.f32.mrb[75].mxu1 }
 0x415   : > { %19793 = vst [vmem:[#allocation67_spill] sm:$0xff] %v17357_v8  ;;  %v6679_v8 = vrot.slane %v19130_v35, 1  ;;  %v19802_v35 = vld [vmem:[#allocation84_spill] sm:$0xff] }
 0x417   : > { %13008 = vmatmul.mubr.bf16.gmra.mrb[52].mxu0 %v19794_v0  ;;  %v19798_v0 = vunpack.c.l.bf16 %v17293_v61 }
 0x418   : > { %13011 = vmatprep.mubr.bf16.mxu0 %v19795_v55  ;;  %v19801_v55 = vld [vmem:[#allocation83_spill] sm:$0xff] }
 0x419   : > { %v17367_v39 = vpop.f32.mrb[76].mxu1  ;;  %v17377_v21 = vrot.slane %v19798_v0, 1 }
 0x41a   : > { %19796 = vst [vmem:[#allocation71_spill] sm:$0xff] %v17367_v39  ;;  %v17369_v58 = vpop.f32.mrb[77].mxu1  ;;  %v17385_v39 = vsel %vm780_vm0, %v6679_v8, %v6680_v51  ;;  %v14414_v8 = vld [vmem:[%s18717_s1 + $0x230] sm:$0xff]  }
 0x41b   : > { %19797 = vst [vmem:[#allocation72_spill] sm:$0xff] %v17369_v58  ;;  %v17379_v33 = vpop.f32.mrb[78].mxu1  ;;  %v17389_v57 = vsel %vm780_vm0, %v6680_v51, %v17377_v21  ;;  %13095 = vmatprep.subr.bf16.mxu0 %v14414_v8  ;;  %v14415_v51 = vld [vmem:[%s18717_s1 + $0x238] sm:$0xff]  }
 0x41c   : > { %19799 = vst [vmem:[#allocation3_spill] sm:$0xff] %v17379_v33  ;;  %v17381_v14 = vpop.f32.mrb[79].mxu1  ;;  %13096 = vmatpush3.bf16.msra.mxu0 %v14414_v8 }
 0x41d   : > { %19800 = vst [vmem:[#allocation4_spill] sm:$0xff] %v17381_v14  ;;  %13097 = vmatprep.subr.bf16.mxu0 %v14415_v51 }
 0x41f   : > { %13012 = vmatmul.mubr.bf16.gmra.mrb[56].mxu0 %v19801_v55  ;;  %v19807_v55 = vld [vmem:[#allocation88_spill] sm:$0xff] }
 0x420   : > { %13015 = vmatprep.mubr.bf16.mxu0 %v19802_v35  ;;  %v19808_v35 = vld [vmem:[#allocation89_spill] sm:$0xff]  ;;  %13098 = vmatpush3.bf16.msra.mxu0 %v14415_v51 }
 0x421   : > { %v17394_v0 = vpop.f32.mrb[80].mxu1 }
 0x422   : > { %19803 = vst [vmem:[#allocation160_spill] sm:$0xff] %v17394_v0  ;;  %v17396_v58 = vpop.f32.mrb[81].mxu1  ;;  %v19813_v0 = vld [vmem:[#allocation93_spill] sm:$0xff] }
 0x423   : > { %19804 = vst [vmem:[#allocation161_spill] sm:$0xff] %v17396_v58  ;;  %v17398_v33 = vpop.f32.mrb[82].mxu1 }
 0x424   : > { %19805 = vst [vmem:[#allocation162_spill] sm:$0xff] %v17398_v33  ;;  %v17400_v14 = vpop.f32.mrb[83].mxu1 }
 0x425   : > { %19806 = vst [vmem:[#allocation163_spill] sm:$0xff] %v17400_v14 }
 0x427   : > { %13016 = vmatmul.mubr.bf16.gmra.mrb[60].mxu0 %v19807_v55  ;;  %v19814_v55 = vld [vmem:[#allocation94_spill] sm:$0xff] }
 0x428   : > { %13019 = vmatprep.mubr.bf16.mxu0 %v19808_v35 }
 0x429   : > { %v17410_v38 = vpop.f32.mrb[84].mxu1 }
 0x42a   : > { %19809 = vst [vmem:[#allocation164_spill] sm:$0xff] %v17410_v38  ;;  %v17412_v33 = vpop.f32.mrb[85].mxu1  ;;  %v19819_v38 = vld [vmem:[#allocation98_spill] sm:$0xff] }
 0x42b   : > { %19810 = vst [vmem:[#allocation165_spill] sm:$0xff] %v17412_v33  ;;  %v17414_v14 = vpop.f32.mrb[86].mxu1  ;;  %v19820_v33 = vld [vmem:[#allocation99_spill] sm:$0xff] }
 0x42c   : > { %19811 = vst [vmem:[#allocation166_spill] sm:$0xff] %v17414_v14  ;;  %v17416_v58 = vpop.f32.mrb[87].mxu1 }
 0x42d   : > { %19812 = vst [vmem:[#allocation167_spill] sm:$0xff] %v17416_v58 }
 0x42f   : > { %13020 = vmatmul.mubr.bf16.gmra.mrb[64].mxu0 %v19813_v0 }
 0x430   : > { %13023 = vmatprep.mubr.bf16.mxu0 %v19814_v55  ;;  %v19825_v55 = vld [vmem:[#allocation103_spill] sm:$0xff] }
 0x431   : > { %v17420_v46 = vpop.f32.mrb[88].mxu1 }
 0x432   : > { %19815 = vst [vmem:[#allocation168_spill] sm:$0xff] %v17420_v46  ;;  %v17422_v20 = vpop.f32.mrb[89].mxu1  ;;  %v19826_v46 = vld [vmem:[#allocation104_spill] sm:$0xff] }
 0x433   : > { %19816 = vst [vmem:[#allocation169_spill] sm:$0xff] %v17422_v20  ;;  %v17424_v35 = vpop.f32.mrb[90].mxu1 }
 0x434   : > { %19817 = vst [vmem:[#allocation170_spill] sm:$0xff] %v17424_v35  ;;  %v17426_v8 = vpop.f32.mrb[91].mxu1 }
 0x435   : > { %19818 = vst [vmem:[#allocation171_spill] sm:$0xff] %v17426_v8 }
 0x437   : > { %13024 = vmatmul.mubr.bf16.gmra.mrb[68].mxu0 %v19819_v38 }
 0x438   : > { %13027 = vmatprep.mubr.bf16.mxu0 %v19820_v33  ;;  %v19831_v33 = vld [vmem:[#allocation108_spill] sm:$0xff] }
 0x439   : > { %v17430_v14 = vpop.f32.mrb[92].mxu1 }
 0x43a   : > { %19821 = vst [vmem:[#allocation172_spill] sm:$0xff] %v17430_v14  ;;  %v17432_v58 = vpop.f32.mrb[93].mxu1  ;;  %v19832_v14 = vld [vmem:[#allocation109_spill] sm:$0xff] }
 0x43b   : > { %19822 = vst [vmem:[#allocation173_spill] sm:$0xff] %v17432_v58  ;;  %v17434_v51 = vpop.f32.mrb[94].mxu1 }
 0x43c   : > { %19823 = vst [vmem:[#allocation174_spill] sm:$0xff] %v17434_v51  ;;  %v17436_v0 = vpop.f32.mrb[95].mxu1 }
 0x43d   : > { %19824 = vst [vmem:[#allocation175_spill] sm:$0xff] %v17436_v0 }
 0x43f   : > { %13028 = vmatmul.mubr.bf16.gmra.mrb[72].mxu0 %v19825_v55 }
 0x440   : > { %13031 = vmatprep.mubr.bf16.mxu0 %v19826_v46  ;;  %v19837_v46 = vld [vmem:[#allocation113_spill] sm:$0xff] }
 0x441   : > { %v17440_v20 = vpop.f32.mrb[96].mxu1 }
 0x442   : > { %19827 = vst [vmem:[#allocation176_spill] sm:$0xff] %v17440_v20  ;;  %v17442_v35 = vpop.f32.mrb[97].mxu1  ;;  %v19838_v20 = vld [vmem:[#allocation114_spill] sm:$0xff] }
 0x443   : > { %19828 = vst [vmem:[#allocation177_spill] sm:$0xff] %v17442_v35  ;;  %v17444_v8 = vpop.f32.mrb[98].mxu1 }
 0x444   : > { %19829 = vst [vmem:[#allocation178_spill] sm:$0xff] %v17444_v8  ;;  %v17446_v38 = vpop.f32.mrb[99].mxu1 }
 0x445   : > { %19830 = vst [vmem:[#allocation179_spill] sm:$0xff] %v17446_v38 }
 0x447   : > { %13032 = vmatmul.mubr.bf16.gmra.mrb[76].mxu0 %v19831_v33 }
 0x448   : > { %13035 = vmatprep.mubr.bf16.mxu0 %v19832_v14  ;;  %v19843_v14 = vld [vmem:[#allocation118_spill] sm:$0xff] }
 0x449   : > { %v17450_v58 = vpop.f32.mrb[100].mxu1 }
 0x44a   : > { %19833 = vst [vmem:[#allocation9_spill] sm:$0xff] %v17450_v58  ;;  %v17452_v51 = vpop.f32.mrb[101].mxu1  ;;  %v19844_v58 = vld [vmem:[#allocation119_spill] sm:$0xff] }
 0x44b   : > { %19834 = vst [vmem:[#allocation14_spill] sm:$0xff] %v17452_v51  ;;  %v17454_v0 = vpop.f32.mrb[102].mxu1 }
 0x44c   : > { %19835 = vst [vmem:[#allocation15_spill] sm:$0xff] %v17454_v0  ;;  %v17456_v55 = vpop.f32.mrb[103].mxu1 }
 0x44d   : > { %19836 = vst [vmem:[#allocation18_spill] sm:$0xff] %v17456_v55 }
 0x44f   : > { %13036 = vmatmul.mubr.bf16.gmra.mrb[80].mxu0 %v19837_v46 }
 0x450   : > { %13039 = vmatprep.mubr.bf16.mxu0 %v19838_v20  ;;  %v19849_v20 = vld [vmem:[#allocation123_spill] sm:$0xff] }
 0x451   : > { %v17460_v35 = vpop.f32.mrb[104].mxu1 }
 0x452   : > { %19839 = vst [vmem:[#allocation20_spill] sm:$0xff] %v17460_v35  ;;  %v17462_v8 = vpop.f32.mrb[105].mxu1  ;;  %v19850_v35 = vld [vmem:[#allocation124_spill] sm:$0xff] }
 0x453   : > { %19840 = vst [vmem:[#allocation23_spill] sm:$0xff] %v17462_v8  ;;  %v17464_v38 = vpop.f32.mrb[106].mxu1 }
 0x454   : > { %19841 = vst [vmem:[#allocation25_spill] sm:$0xff] %v17464_v38  ;;  %v17466_v33 = vpop.f32.mrb[107].mxu1 }
 0x455   : > { %19842 = vst [vmem:[#allocation28_spill] sm:$0xff] %v17466_v33 }
 0x457   : > { %13040 = vmatmul.mubr.bf16.gmra.mrb[84].mxu0 %v19843_v14 }
 0x458   : > { %13043 = vmatprep.mubr.bf16.mxu0 %v19844_v58  ;;  %v19855_v58 = vld [vmem:[#allocation128_spill] sm:$0xff] }
 0x459   : > { %v17470_v51 = vpop.f32.mrb[108].mxu1 }
 0x45a   : > { %19845 = vst [vmem:[#allocation30_spill] sm:$0xff] %v17470_v51  ;;  %v17472_v0 = vpop.f32.mrb[109].mxu1  ;;  %v19856_v51 = vld [vmem:[#allocation129_spill] sm:$0xff] }
 0x45b   : > { %19846 = vst [vmem:[#allocation33_spill] sm:$0xff] %v17472_v0  ;;  %v17474_v55 = vpop.f32.mrb[110].mxu1 }
 0x45c   : > { %19847 = vst [vmem:[#allocation35_spill] sm:$0xff] %v17474_v55  ;;  %v17476_v46 = vpop.f32.mrb[111].mxu1 }
 0x45d   : > { %19848 = vst [vmem:[#allocation39_spill] sm:$0xff] %v17476_v46 }
 0x45f   : > { %13044 = vmatmul.mubr.bf16.gmra.mrb[88].mxu0 %v19849_v20 }
 0x460   : > { %13047 = vmatprep.mubr.bf16.mxu0 %v19850_v35  ;;  %v19861_v35 = vld [vmem:[#allocation132_spill] sm:$0xff] }
 0x461   : > { %v17480_v8 = vpop.f32.mrb[112].mxu1 }
 0x462   : > { %19851 = vst [vmem:[#allocation41_spill] sm:$0xff] %v17480_v8  ;;  %v17482_v38 = vpop.f32.mrb[113].mxu1  ;;  %v19862_v8 = vld [vmem:[#allocation133_spill] sm:$0xff] }
 0x463   : > { %19852 = vst [vmem:[#allocation43_spill] sm:$0xff] %v17482_v38  ;;  %v17484_v33 = vpop.f32.mrb[114].mxu1 }
 0x464   : > { %19853 = vst [vmem:[#allocation44_spill] sm:$0xff] %v17484_v33  ;;  %v17486_v14 = vpop.f32.mrb[115].mxu1  ;;  %v19874_v33 = vld [vmem:[#allocation142_spill] sm:$0xff] }
 0x465   : > { %19854 = vst [vmem:[#allocation48_spill] sm:$0xff] %v17486_v14 }
 0x467   : > { %13048 = vmatmul.mubr.bf16.gmra.mrb[92].mxu0 %v19855_v58 }
 0x468   : > { %13051 = vmatprep.mubr.bf16.mxu0 %v19856_v51 }
 0x469   : > { %v17490_v0 = vpop.f32.mrb[116].mxu1 }
 0x46a   : > { %19857 = vst [vmem:[#allocation50_spill] sm:$0xff] %v17490_v0  ;;  %v17492_v55 = vpop.f32.mrb[117].mxu1  ;;  %v19867_v0 = vld [vmem:[#allocation137_spill] sm:$0xff] }
 0x46b   : > { %19858 = vst [vmem:[#allocation53_spill] sm:$0xff] %v17492_v55  ;;  %v17494_v46 = vpop.f32.mrb[118].mxu1  ;;  %v19868_v55 = vld [vmem:[#allocation138_spill] sm:$0xff] }
 0x46c   : > { %19859 = vst [vmem:[#allocation55_spill] sm:$0xff] %v17494_v46  ;;  %v17496_v20 = vpop.f32.mrb[119].mxu1 }
 0x46d   : > { %19860 = vst [vmem:[#allocation58_spill] sm:$0xff] %v17496_v20 }
 0x46f   : > { %13052 = vmatmul.mubr.bf16.gmra.mrb[96].mxu0 %v19861_v35 }
 0x470   : > { %13055 = vmatprep.mubr.bf16.mxu0 %v19862_v8 }
 0x471   : > { %v17500_v38 = vpop.f32.mrb[120].mxu1 }
 0x472   : > { %19863 = vst [vmem:[#allocation60_spill] sm:$0xff] %v17500_v38  ;;  %v17502_v14 = vpop.f32.mrb[121].mxu1  ;;  %v19873_v38 = vld [vmem:[#allocation141_spill] sm:$0xff] }
 0x473   : > { %19864 = vst [vmem:[#allocation63_spill] sm:$0xff] %v17502_v14  ;;  %v17504_v58 = vpop.f32.mrb[122].mxu1  ;;  %v19875_v14 = vld [vmem:[#allocation143_spill] sm:$0xff] }
 0x474   : > { %19865 = vst [vmem:[#allocation65_spill] sm:$0xff] %v17504_v58  ;;  %v17506_v51 = vpop.f32.mrb[123].mxu1  ;;  %v19876_v58 = vld [vmem:[#allocation144_spill] sm:$0xff] }
 0x475   : > { %19866 = vst [vmem:[#allocation68_spill] sm:$0xff] %v17506_v51  ;;  %v19877_v51 = vld [vmem:[#allocation145_spill] sm:$0xff] }
 0x477   : > { %13056 = vmatmul.mubr.bf16.gmra.mrb[100].mxu0 %v19867_v0  ;;  %v19878_v0 = vld [vmem:[#allocation146_spill] sm:$0xff] }
 0x478   : > { %13059 = vmatprep.mubr.bf16.mxu0 %v19868_v55  ;;  %v369_v55 = vld [vmem:[%s14789_s17 + $0x2a4] sm:$0x1] }
 0x479   : > { %v17510_v46 = vpop.f32.mrb[124].mxu1 }
 0x47a   : > { %19869 = vst [vmem:[#allocation70_spill] sm:$0xff] %v17510_v46  ;;  %v17512_v20 = vpop.f32.mrb[125].mxu1  ;;  %v19879_v46 = vld [vmem:[#allocation147_spill] sm:$0xff] }
 0x47b   : > { %19870 = vst [vmem:[#allocation73_spill] sm:$0xff] %v17512_v20  ;;  %v17514_v35 = vpop.f32.mrb[126].mxu1  ;;  %v538_v20 = vunpack.c.h.bf16 %v17293_v61 }
 0x47c   : > { %19871 = vst [vmem:[#allocation75_spill] sm:$0xff] %v17514_v35  ;;  %v17516_v8 = vpop.f32.mrb[127].mxu1  ;;  %v19880_v35 = vld [vmem:[#allocation69_spill] sm:$0xff] }
 0x47d   : > { %19872 = vst [vmem:[#allocation78_spill] sm:$0xff] %v17516_v8  ;;  %v539_v8 = vunpack.c.l.bf16 %v369_v55  ;;  %v6684_v13 = vrot.slane %v538_v20, 1  ;;  %v19891_v55 = vld [vmem:[#allocation152_spill] sm:$0xff] }
 0x47f   : > { %13060 = vmatmul.mubr.bf16.gmra.mrb[104].mxu0 %v19873_v38  ;;  %v6686_v38 = vrot.slane %v539_v8, 1 }
 0x480   : > { %13063 = vmatprep.mubr.bf16.mxu0 %v19874_v33  ;;  %v19882_v33 = vpack.c.bf16 %v17389_v57, %v17385_v39  ;;  %v19887_v39 = vld [vmem:[#allocation150_spill] sm:$0xff]  ;;  %v19888_v57 = vld [vmem:[#allocation19_spill] sm:$0xff] }
 0x487   : > { %13064 = vmatmul.mubr.bf16.gmra.mrb[108].mxu0 %v19875_v14  ;;  %v6685_v14 = vsel %vm780_vm0, %v17377_v21, %v6684_v13  ;;  %v19889_v21 = vld [vmem:[#allocation151_spill] sm:$0xff] }
 0x488   : > { %13067 = vmatprep.mubr.bf16.mxu0 %v19876_v58  ;;  %v6687_v58 = vsel %vm780_vm0, %v6684_v13, %v6686_v38  ;;  %v19890_v13 = vld [vmem:[#allocation24_spill] sm:$0xff]  ;;  %v19894_v38 = vld [vmem:[#allocation34_spill] sm:$0xff] }
 0x48f   : > { %13068 = vmatmul.mubr.bf16.gmra.mrb[112].mxu0 %v19877_v51  ;;  %v6693_v51 = vpack.c.bf16 %v6687_v58, %v6685_v14  ;;  %v19896_v14 = vld [vmem:[#allocation45_spill] sm:$0xff]  ;;  %v19897_v58 = vld [vmem:[#allocation154_spill] sm:$0xff] }
 0x490   : > { %13071 = vmatprep.mubr.bf16.mxu0 %v19878_v0  ;;  %v19886_v0 = vld [vmem:[#allocation13_spill] sm:$0xff] }
 0x497   : > { %13072 = vmatmul.mubr.bf16.gmra.mrb[116].mxu0 %v19879_v46  ;;  %v19883_v46 = vld [vmem:[#allocation148_spill] sm:$0xff] }
 0x498   : > { %13075 = vmatprep.mubr.bf16.mxu0 %v19880_v35  ;;  %v19884_v35 = vld [vmem:[#allocation10_spill] sm:$0xff] }
 0x49f   : > { %13076 = vmatmul.mubr.bf16.gmra.mrb[120].mxu0 %v19881_v17  ;;  %v19885_v17 = vld [vmem:[#allocation149_spill] sm:$0xff] }
 0x4a0   : > { %13079 = vmatprep.mubr.bf16.mxu0 %v19882_v33  ;;  %v19895_v33 = vld [vmem:[#allocation38_spill] sm:$0xff] }
 0x4a7   : > { %13080 = vmatmul.mubr.bf16.gmra.mrb[124].mxu0 %v6693_v51  ;;  %v19898_v51 = vld [vmem:[#allocation49_spill] sm:$0xff] }
 0x4a8   : > { %13099 = vmatprep.mubr.bf16.mxu0 %v16068_v32  ;;  %v19892_v32 = vld [vmem:[#allocation29_spill] sm:$0xff] }
 0x4af   : > { %13100 = vmatmul.mubr.bf16.vlgmr.msra.gmra.mrb[0].mxu0 %v16080_v41  ;;  %v19893_v41 = vld [vmem:[#allocation153_spill] sm:$0xff] }
 0x4b0   : > { %13103 = vmatprep.mubr.bf16.mxu0 %v19883_v46  ;;  %v19899_v46 = vld [vmem:[#allocation54_spill] sm:$0xff] }
 0x4b7   : > { %13104 = vmatmul.mubr.bf16.gmra.mrb[4].mxu0 %v19884_v35  ;;  %v19900_v35 = vld [vmem:[#allocation155_spill] sm:$0xff] }
 0x4b8   : > { %13107 = vmatprep.mubr.bf16.mxu0 %v19885_v17 }
 0x4bf   : > { %13108 = vmatmul.mubr.bf16.gmra.mrb[8].mxu0 %v19886_v0  ;;  %v19903_v0 = vunpack.c.l.bf16 %v17293_v61 }
 0x4c0   : > { %13111 = vmatprep.mubr.bf16.mxu0 %v19887_v39 }
 0x4c1   : > { %v7435_v39 = vrot.slane %v19903_v0, 2 }
 0x4c7   : > { %13112 = vmatmul.mubr.bf16.gmra.mrb[12].mxu0 %v19888_v57 }
 0x4c8   : > { %13115 = vmatprep.mubr.bf16.mxu0 %v19889_v21 }
 0x4cf   : > { %13116 = vmatmul.mubr.bf16.gmra.mrb[16].mxu0 %v19890_v13 }
 0x4d0   : > { %13119 = vmatprep.mubr.bf16.mxu0 %v19891_v55 }
 0x4d7   : > { %13120 = vmatmul.mubr.bf16.gmra.mrb[20].mxu0 %v19892_v32 }
 0x4d8   : > { %13123 = vmatprep.mubr.bf16.mxu0 %v19893_v41 }
 0x4df   : > { %13124 = vmatmul.mubr.bf16.gmra.mrb[24].mxu0 %v16212_v4  ;;  %v19901_v4 = vunpack.c.l.bf16 %v17287_v50 }
 0x4e0   : > { %13127 = vmatprep.mubr.bf16.mxu0 %v16222_v10 }
 0x4e1   : > { %v7432_v10 = vrot.slane %v19901_v4, 2 }
 0x4e7   : > { %13128 = vmatmul.mubr.bf16.gmra.mrb[28].mxu0 %v19894_v38 }
 0x4e8   : > { %13131 = vmatprep.mubr.bf16.mxu0 %v19895_v33  ;;  %v19908_v33 = vld [vmem:[#allocation81_spill] sm:$0xff] }
 0x4ef   : > { %13132 = vmatmul.mubr.bf16.gmra.mrb[32].mxu0 %v19896_v14 }
 0x4f0   : > { %13135 = vmatprep.mubr.bf16.mxu0 %v19897_v58 }
 0x4f7   : > { %13136 = vmatmul.mubr.bf16.gmra.mrb[36].mxu0 %v16284_v19  ;;  %v19902_v19 = vunpack.c.h.bf16 %v17287_v50 }
 0x4f8   : > { %13139 = vmatprep.mubr.bf16.mxu0 %v19898_v51 }
 0x4f9   : > { %v7433_v17 = vrot.slane %v19902_v19, 2 }
 0x4ff   : > { %13140 = vmatmul.mubr.bf16.gmra.mrb[40].mxu0 %v19899_v46 }
 0x500   : > { %13143 = vmatprep.mubr.bf16.mxu0 %v19900_v35 }
 0x507   : > { %13144 = vmatmul.mubr.bf16.gmra.mrb[44].mxu0 %v16331_v54  ;;  %v7437_v54 = vrot.slane %v538_v20, 2  ;;  %v19907_v20 = vld [vmem:[#allocation135_spill] sm:$0xff] }
 0x508   : > { %13147 = vmatprep.mubr.bf16.mxu0 %v16350_v22  ;;  %v7439_v22 = vrot.slane %v539_v8, 2 }
 0x50a   : > { %v17584_v50 = vsel %vm2464_vm1, %v7437_v54, %v7439_v22  ;;  %v19912_v22 = vld [vmem:[#allocation136_spill] sm:$0xff] }
 0x50f   : > { %13148 = vmatmul.mubr.bf16.gmra.mrb[48].mxu0 %v19639_v43  ;;  %v17573_v43 = vsel %vm2464_vm1, %v7432_v10, %v7433_v17  ;;  %v19910_v10 = vld [vmem:[#allocation85_spill] sm:$0xff] }
 0x510   : > { %13151 = vmatprep.mubr.bf16.mxu0 %v19640_v23  ;;  %v17576_v23 = vsel %vm2464_vm1, %v7433_v17, %v7435_v39 }
 0x517   : > { %13152 = vmatmul.mubr.bf16.gmra.mrb[52].mxu0 %v19642_v40  ;;  %v7445_v40 = vpack.c.bf16 %v17576_v23, %v17573_v43 }
 0x518   : > { %13155 = vmatprep.mubr.bf16.mxu0 %v19643_v24  ;;  %v17581_v24 = vsel %vm2464_vm1, %v7435_v39, %v7437_v54  ;;  %v19911_v39 = vld [vmem:[#allocation86_spill] sm:$0xff] }
 0x51f   : > { %13156 = vmatmul.mubr.bf16.gmra.mrb[56].mxu0 %v16445_v56  ;;  %v7446_v56 = vpack.c.bf16 %v17584_v50, %v17581_v24 }
 0x520   : > { %13159 = vmatprep.mubr.bf16.mxu0 %v19646_v29 }
 0x527   : > { %13160 = vmatmul.mubr.bf16.gmra.mrb[60].mxu0 %v16655_v3 }
 0x528   : > { %13163 = vmatprep.mubr.bf16.mxu0 %v16657_v2 }
 0x52f   : > { %13164 = vmatmul.mubr.bf16.gmra.mrb[64].mxu0 %v16683_v49 }
 0x530   : > { %13167 = vmatprep.mubr.bf16.mxu0 %v16685_v12 }
 0x537   : > { %13168 = vmatmul.mubr.bf16.gmra.mrb[68].mxu0 %v16711_v45 }
 0x538   : > { %13171 = vmatprep.mubr.bf16.mxu0 %v16713_v5 }
 0x53f   : > { %13172 = vmatmul.mubr.bf16.gmra.mrb[72].mxu0 %v16739_v53 }
 0x540   : > { %13175 = vmatprep.mubr.bf16.mxu0 %v16741_v7 }
 0x547   : > { %13176 = vmatmul.mubr.bf16.gmra.mrb[76].mxu0 %v16767_v36  ;;  %v17620_v36 = vld [vmem:[%s18718_s2] ss:$0 sm:$0xff] }
 0x548   : > { %13179 = vmatprep.mubr.bf16.mxu0 %v16769_v16 }
 0x54f   : > { %13180 = vmatmul.mubr.bf16.gmra.mrb[80].mxu0 %v16789_v9 }
 0x550   : > { %13183 = vmatprep.mubr.bf16.mxu0 %v16791_v37 }
 0x557   : > { %13184 = vmatmul.mubr.bf16.gmra.mrb[84].mxu0 %v16811_v26 }
 0x558   : > { %13187 = vmatprep.mubr.bf16.mxu0 %v16813_v31 }
 0x55f   : > { %13188 = vmatmul.mubr.bf16.gmra.mrb[88].mxu0 %v16833_v34  ;;  %v19904_v34 = vld [vmem:[#allocation76_spill] sm:$0xff] }
 0x560   : > { %13191 = vmatprep.mubr.bf16.mxu0 %v16835_v48 }
 0x567   : > { %13192 = vmatmul.mubr.bf16.gmra.mrb[92].mxu0 %v16855_v62 }
 0x568   : > { %13195 = vmatprep.mubr.bf16.mxu0 %v16857_v27 }
 0x56f   : > { %13196 = vmatmul.mubr.bf16.gmra.mrb[96].mxu0 %v16877_v18 }
 0x570   : > { %13199 = vmatprep.mubr.bf16.mxu0 %v16879_v1  ;;  %v19905_v1 = vld [vmem:[#allocation77_spill] sm:$0xff] }
 0x577   : > { %13200 = vmatmul.mubr.bf16.gmra.mrb[100].mxu0 %v16905_v52 }
 0x578   : > { %13203 = vmatprep.mubr.bf16.mxu0 %v16907_v47 }
 0x57f   : > { %13204 = vmatmul.mubr.bf16.gmra.mrb[104].mxu0 %v16927_v42  ;;  %v14418_v42 = vld [vmem:[%s18719_s3 + $0x4] ss:$16 sps:$4 sm:$0xff]  }
 0x580   : > { %13207 = vmatprep.mubr.bf16.mxu0 %v16929_v28  ;;  %8960 = vmatprep.mubr.bf16.mxu1 %v14418_v42 }
 0x582   : > { %v13101_v3 = vpop.f32.mrb[0].mxu0 }
 0x583   : > { %v13243_v2 = vadd.f32 %v13101_v3, %v17070_v15  ;;  %v7546_v49 = vpop.f32.mrb[1].mxu0  ;;  %v19913_v3 = vld [vmem:[#allocation140_spill] sm:$0xff] }
 0x584   : > { %v13244_v12 = vadd.f32 %v7546_v49, %v17072_v30  ;;  %v13102_v45 = vpop.f32.mrb[2].mxu0 }
 0x585   : > { %v13245_v5 = vadd.f32 %v13102_v45, %v17074_v11  ;;  %v7549_v53 = vpop.f32.mrb[3].mxu0  ;;  %v8194_v9 = vadd.f32 %v13243_v2, %v17620_v36 }
 0x586   : > { %v13246_v7 = vadd.f32 %v7549_v53, %v17076_v25  ;;  %v8192_v31 = vadd.f32 %v13244_v12, %v17620_v36  ;;  %v19914_v12 = vld [vmem:[#allocation87_spill] sm:$0xff] }
 0x587   : > { %13208 = vmatmul.mubr.bf16.gmra.mrb[108].mxu0 %v16949_v59  ;;  %v8195_v27 = vadd.f32 %v13245_v5, %v17620_v36  ;;  %v8322_v15 = vmax.f32 %v8194_v9, 0.0 }
 0x588   : > { %13211 = vmatprep.mubr.bf16.mxu0 %v16951_v63  ;;  %v8193_v28 = vadd.f32 %v13246_v7, %v17620_v36  ;;  %v19906_v63 = vld [vmem:[#allocation80_spill] sm:$0xff]  ;;  %v8320_v25 = vmax.f32 %v8192_v31, 0.0  ;;  %v19915_v7 = vld [vmem:[#allocation90_spill] sm:$0xff]  ;;  %v19916_v31 = vld [vmem:[#allocation91_spill] sm:$0xff] }
 0x589   : > { %v8323_v8 = vmax.f32 %v8195_v27, 0.0 }
 0x58a   : > { %v13105_v16 = vpop.f32.mrb[4].mxu0  ;;  %v8321_v13 = vmax.f32 %v8193_v28, 0.0  ;;  %v19918_v28 = vld [vmem:[#allocation2_spill] sm:$0xff] }
 0x58b   : > { %v13247_v37 = vadd.f32 %v13105_v16, %v17082_v6  ;;  %v7562_v26 = vpop.f32.mrb[5].mxu0 }
 0x58c   : > { %v13248_v48 = vadd.f32 %v7562_v26, %v19904_v34  ;;  %v13106_v62 = vpop.f32.mrb[6].mxu0 }
 0x58d   : > { %v8198_v18 = vadd.f32 %v13247_v37, %v17620_v36  ;;  %v13249_v52 = vadd.f32 %v13106_v62, %v19905_v1  ;;  %v7565_v47 = vpop.f32.mrb[7].mxu0 }
 0x58e   : > { %v8196_v59 = vadd.f32 %v13248_v48, %v17620_v36  ;;  %v13250_v29 = vadd.f32 %v7565_v47, %v19906_v63 }
 0x58f   : > { %v8326_v30 = vmax.f32 %v8198_v18, 0.0  ;;  %v8199_v11 = vadd.f32 %v13249_v52, %v17620_v36  ;;  %13212 = vmatmul.mubr.bf16.gmra.mrb[112].mxu0 %v16971_v60  ;;  %v19909_v60 = vld [vmem:[#allocation82_spill] sm:$0xff]  ;;  %v19917_v18 = vld [vmem:[#allocation92_spill] sm:$0xff] }
 0x590   : > { %v8324_v6 = vmax.f32 %v8196_v59, 0.0  ;;  %v8197_v61 = vadd.f32 %v13250_v29, %v17620_v36  ;;  %13215 = vmatprep.mubr.bf16.mxu0 %v19907_v20 }
 0x591   : > { %v8450_v57 = vmax.f32 %v8322_v15, %v8326_v30  ;;  %v8327_v21 = vmax.f32 %v8199_v11, 0.0 }
 0x592   : > { %v8448_v55 = vmax.f32 %v8320_v25, %v8324_v6  ;;  %v8325_v32 = vmax.f32 %v8197_v61, 0.0  ;;  %v13109_v41 = vpop.f32.mrb[8].mxu0 }
 0x593   : > { %v8451_v38 = vmax.f32 %v8323_v8, %v8327_v21  ;;  %v13251_v14 = vadd.f32 %v13109_v41, %v19908_v33  ;;  %v7578_v58 = vpop.f32.mrb[9].mxu0 }
 0x594   : > { %v8449_v51 = vmax.f32 %v8321_v13, %v8325_v32  ;;  %v13252_v46 = vadd.f32 %v7578_v58, %v19909_v60  ;;  %v13110_v35 = vpop.f32.mrb[10].mxu0  ;;  %v19920_v32 = vld [vmem:[#allocation96_spill] sm:$0xff] }
 0x595   : > { %v17642_v4 = vpack.c.bf16 %v8451_v38, %v8450_v57  ;;  %v13253_v19 = vadd.f32 %v13110_v35, %v19910_v10  ;;  %v7581_v17 = vpop.f32.mrb[11].mxu0  ;;  %v8202_v49 = vadd.f32 %v13251_v14, %v17620_v36  ;;  %v19919_v57 = vld [vmem:[#allocation95_spill] sm:$0xff]  ;;  %v19921_v14 = vld [vmem:[#allocation97_spill] sm:$0xff]  ;;  %v19922_v58 = vld [vmem:[#allocation100_spill] sm:$0xff] }
 0x596   : > { %v17645_v0 = vpack.c.bf16 %v8449_v51, %v8448_v55  ;;  %v13254_v54 = vadd.f32 %v7581_v17, %v19911_v39  ;;  %v8200_v53 = vadd.f32 %v13252_v46, %v17620_v36  ;;  %v19923_v35 = vld [vmem:[#allocation101_spill] sm:$0xff]  ;;  %v19924_v39 = vld [vmem:[#allocation102_spill] sm:$0xff] }
 0x597   : > { %13216 = vmatmul.mubr.bf16.gmra.mrb[116].mxu0 %v19912_v22  ;;  %v8203_v37 = vadd.f32 %v13253_v19, %v17620_v36  ;;  %v8330_v52 = vmax.f32 %v8202_v49, 0.0  ;;  %v19925_v49 = vld [vmem:[#allocation105_spill] sm:$0xff] }
 0x598   : > { %13219 = vmatprep.mubr.bf16.mxu0 %v19913_v3  ;;  %v8201_v62 = vadd.f32 %v13254_v54, %v17620_v36  ;;  %v8328_v59 = vmax.f32 %v8200_v53, 0.0 }
 0x599   : > { %v8331_v15 = vmax.f32 %v8203_v37, 0.0 }
 0x59a   : > { %v13113_v2 = vpop.f32.mrb[12].mxu0  ;;  %v8329_v25 = vmax.f32 %v8201_v62, 0.0 }
 0x59b   : > { %v13255_v45 = vadd.f32 %v13113_v2, %v19914_v12  ;;  %v7594_v5 = vpop.f32.mrb[13].mxu0 }
 0x59c   : > { %v13256_v16 = vadd.f32 %v7594_v5, %v19915_v7  ;;  %v13114_v9 = vpop.f32.mrb[14].mxu0 }
 0x59d   : > { %v8206_v26 = vadd.f32 %v13255_v45, %v17620_v36  ;;  %v13257_v34 = vadd.f32 %v13114_v9, %v19916_v31  ;;  %v7597_v48 = vpop.f32.mrb[15].mxu0 }
 0x59e   : > { %v8204_v27 = vadd.f32 %v13256_v16, %v17620_v36  ;;  %v13258_v1 = vadd.f32 %v7597_v48, %v19917_v18 }
 0x59f   : > { %v8334_v47 = vmax.f32 %v8206_v26, 0.0  ;;  %v8207_v42 = vadd.f32 %v13257_v34, %v17620_v36  ;;  %13220 = vmatmul.mubr.bf16.gmra.mrb[120].mxu0 %v19918_v28 }
 0x5a0   : > { %v8332_v63 = vmax.f32 %v8204_v27, 0.0  ;;  %v8205_v29 = vadd.f32 %v13258_v1, %v17620_v36  ;;  %13223 = vmatprep.mubr.bf16.mxu0 %v7445_v40 }
 0x5a1   : > { %v8454_v30 = vmax.f32 %v8330_v52, %v8334_v47  ;;  %v8335_v11 = vmax.f32 %v8207_v42, 0.0  ;;  %v19927_v47 = vld [vmem:[#allocation107_spill] sm:$0xff] }
 0x5a2   : > { %v8452_v6 = vmax.f32 %v8328_v59, %v8332_v63  ;;  %v8333_v61 = vmax.f32 %v8205_v29, 0.0  ;;  %v13117_v20 = vpop.f32.mrb[16].mxu0  ;;  %v19928_v63 = vld [vmem:[#allocation110_spill] sm:$0xff] }
 0x5a3   : > { %v8455_v8 = vmax.f32 %v8331_v15, %v8335_v11  ;;  %v13259_v21 = vadd.f32 %v13117_v20, %v19919_v57  ;;  %v7610_v13 = vpop.f32.mrb[17].mxu0  ;;  %v19929_v11 = vld [vmem:[#allocation111_spill] sm:$0xff]  ;;  %v19930_v20 = vld [vmem:[#allocation112_spill] sm:$0xff] }
 0x5a4   : > { %v8453_v55 = vmax.f32 %v8329_v25, %v8333_v61  ;;  %v13260_v41 = vadd.f32 %v7610_v13, %v19920_v32  ;;  %v13118_v38 = vpop.f32.mrb[18].mxu0  ;;  %v19931_v13 = vld [vmem:[#allocation115_spill] sm:$0xff] }
 0x5a5   : > { %v17668_v33 = vpack.c.bf16 %v8455_v8, %v8454_v30  ;;  %v13261_v43 = vadd.f32 %v13118_v38, %v19921_v14  ;;  %v7613_v23 = vpop.f32.mrb[19].mxu0  ;;  %v8210_v46 = vadd.f32 %v13259_v21, %v17620_v36  ;;  %v19932_v38 = vld [vmem:[#allocation116_spill] sm:$0xff] }
 0x5a6   : > { %v17671_v40 = vpack.c.bf16 %v8453_v55, %v8452_v6  ;;  %v13262_v51 = vadd.f32 %v7613_v23, %v19922_v58  ;;  %v8208_v17 = vadd.f32 %v13260_v41, %v17620_v36 }
 0x5a7   : > { %13224 = vmatmul.mubr.bf16.gmra.mrb[124].mxu0 %v7446_v56  ;;  %v8211_v3 = vadd.f32 %v13261_v43, %v17620_v36  ;;  %v19926_v56 = vld [vmem:[#allocation106_spill] sm:$0xff]  ;;  %v8338_v53 = vmax.f32 %v8210_v46, 0.0 }
 0x5a8   : > { %v8209_v24 = vadd.f32 %v13262_v51, %v17620_v36  ;;  %v8336_v9 = vmax.f32 %v8208_v17, 0.0  ;;  %v19933_v51 = vld [vmem:[#allocation117_spill] sm:$0xff] }
 0x5a9   : > { %v8339_v31 = vmax.f32 %v8211_v3, 0.0 }
 0x5aa   : > { %v13121_v60 = vpop.f32.mrb[20].mxu0  ;;  %v8337_v62 = vmax.f32 %v8209_v24, 0.0 }
 0x5ab   : > { %v13263_v10 = vadd.f32 %v13121_v60, %v19923_v35  ;;  %v7626_v19 = vpop.f32.mrb[21].mxu0 }
 0x5ac   : > { %v13264_v54 = vadd.f32 %v7626_v19, %v19924_v39  ;;  %v13122_v22 = vpop.f32.mrb[22].mxu0  ;;  %v19934_v19 = vld [vmem:[#allocation120_spill] sm:$0xff] }
 0x5ad   : > { %v8214_v2 = vadd.f32 %v13263_v10, %v17620_v36  ;;  %v13265_v12 = vadd.f32 %v13122_v22, %v19925_v49  ;;  %v7629_v45 = vpop.f32.mrb[23].mxu0 }
 0x5ae   : > { %v8212_v50 = vadd.f32 %v13264_v54, %v17620_v36  ;;  %v13266_v5 = vadd.f32 %v7629_v45, %v19926_v56 }
 0x5af   : > { %v8342_v7 = vmax.f32 %v8214_v2, 0.0  ;;  %v8215_v16 = vadd.f32 %v13265_v12, %v17620_v36 }
 0x5b0   : > { %v8340_v37 = vmax.f32 %v8212_v50, 0.0  ;;  %v8213_v26 = vadd.f32 %v13266_v5, %v17620_v36 }
 0x5b1   : > { %v8458_v34 = vmax.f32 %v8338_v53, %v8342_v7  ;;  %v8343_v48 = vmax.f32 %v8215_v16, 0.0  ;;  %v19935_v16 = vld [vmem:[#allocation121_spill] sm:$0xff] }
 0x5b2   : > { %v8456_v27 = vmax.f32 %v8336_v9, %v8340_v37  ;;  %v8341_v18 = vmax.f32 %v8213_v26, 0.0  ;;  %v13125_v1 = vpop.f32.mrb[24].mxu0 }
 0x5b3   : > { %v8459_v52 = vmax.f32 %v8339_v31, %v8343_v48  ;;  %v13267_v42 = vadd.f32 %v13125_v1, %v19927_v47  ;;  %v7642_v28 = vpop.f32.mrb[25].mxu0  ;;  %v19936_v31 = vld [vmem:[#allocation122_spill] sm:$0xff] }
 0x5b4   : > { %v8457_v59 = vmax.f32 %v8337_v62, %v8341_v18  ;;  %v13268_v29 = vadd.f32 %v7642_v28, %v19928_v63  ;;  %v13126_v15 = vpop.f32.mrb[26].mxu0  ;;  %v19938_v47 = vld [vmem:[#allocation126_spill] sm:$0xff]  ;;  %v19939_v63 = vld [vmem:[#allocation127_spill] sm:$0xff] }
 0x5b5   : > { %v17691_v30 = vpack.c.bf16 %v8459_v52, %v8458_v34  ;;  %v13269_v25 = vadd.f32 %v13126_v15, %v19929_v11  ;;  %v7645_v6 = vpop.f32.mrb[27].mxu0  ;;  %v8218_v21 = vadd.f32 %v13267_v42, %v17620_v36 }
 0x5b6   : > { %v17694_v61 = vpack.c.bf16 %v8457_v59, %v8456_v27  ;;  %v13270_v8 = vadd.f32 %v7645_v6, %v19930_v20  ;;  %v8216_v41 = vadd.f32 %v13268_v29, %v17620_v36  ;;  %v19937_v27 = vld [vmem:[#allocation125_spill] sm:$0xff] }
 0x5b7   : > { %v8219_v23 = vadd.f32 %v13269_v25, %v17620_v36  ;;  %v8346_v39 = vmax.f32 %v8218_v21, 0.0  ;;  %v19940_v25 = vld [vmem:[#allocation130_spill] sm:$0xff] }
 0x5b8   : > { %v8217_v35 = vadd.f32 %v13270_v8, %v17620_v36  ;;  %v8344_v3 = vmax.f32 %v8216_v41, 0.0  ;;  %v19941_v21 = vld [vmem:[#allocation134_spill] sm:$0xff] }
 0x5b9   : > { %v8347_v12 = vmax.f32 %v8219_v23, 0.0 }
 0x5ba   : > { %v13129_v57 = vpop.f32.mrb[28].mxu0  ;;  %v8345_v50 = vmax.f32 %v8217_v35, 0.0 }
 0x5bb   : > { %v13271_v55 = vadd.f32 %v13129_v57, %v19931_v13  ;;  %v7658_v32 = vpop.f32.mrb[29].mxu0 }
 0x5bc   : > { %v13272_v14 = vadd.f32 %v7658_v32, %v19932_v38  ;;  %v13130_v43 = vpop.f32.mrb[30].mxu0  ;;  %v19942_v38 = vld [vmem:[#allocation139_spill] sm:$0xff] }
 0x5bd   : > { %v8222_v58 = vadd.f32 %v13271_v55, %v17620_v36  ;;  %v13273_v60 = vadd.f32 %v13130_v43, %v19933_v51  ;;  %v7661_v46 = vpop.f32.mrb[31].mxu0 }
 0x5be   : > { %v8220_v10 = vadd.f32 %v13272_v14, %v17620_v36  ;;  %v13274_v17 = vadd.f32 %v7661_v46, %v19934_v19 }
 0x5bf   : > { %v8350_v54 = vmax.f32 %v8222_v58, 0.0  ;;  %v8223_v22 = vadd.f32 %v13273_v60, %v17620_v36 }
 0x5c0   : > { %v8348_v2 = vmax.f32 %v8220_v10, 0.0  ;;  %v8221_v49 = vadd.f32 %v13274_v17, %v17620_v36 }
 0x5c1   : > { %v8462_v45 = vmax.f32 %v8346_v39, %v8350_v54  ;;  %v8351_v24 = vmax.f32 %v8223_v22, 0.0 }
 0x5c2   : > { %v8460_v56 = vmax.f32 %v8344_v3, %v8348_v2  ;;  %v8349_v5 = vmax.f32 %v8221_v49, 0.0  ;;  %v13133_v53 = vpop.f32.mrb[32].mxu0  ;;  %v19943_v2 = vld [vmem:[#allocation59_spill] sm:$0xff] }
 0x5c3   : > { %v8463_v7 = vmax.f32 %v8347_v12, %v8351_v24  ;;  %v13275_v9 = vadd.f32 %v13133_v53, %v19935_v16  ;;  %v7674_v37 = vpop.f32.mrb[33].mxu0  ;;  %v19944_v24 = vld [vmem:[#allocation64_spill] sm:$0xff] }
 0x5c4   : > { %v8461_v26 = vmax.f32 %v8345_v50, %v8349_v5  ;;  %v13276_v34 = vadd.f32 %v7674_v37, %v19936_v31  ;;  %v13134_v48 = vpop.f32.mrb[34].mxu0  ;;  %v19945_v5 = vld [vmem:[#allocation156_spill] sm:$0xff] }
 0x5c5   : > { %v17711_v62 = vpack.c.bf16 %v8463_v7, %v8462_v45  ;;  %v13277_v18 = vadd.f32 %v13134_v48, %v19937_v27  ;;  %v7677_v1 = vpop.f32.mrb[35].mxu0  ;;  %v8226_v59 = vadd.f32 %v13275_v9, %v17620_v36  ;;  %v19946_v9 = vld [vmem:[#allocation157_spill] sm:$0xff]  ;;  %v19947_v48 = vld [vmem:[#allocation158_spill] sm:$0xff] }
 0x5c6   : > { %v17714_v52 = vpack.c.bf16 %v8461_v26, %v8460_v56  ;;  %v13278_v42 = vadd.f32 %v7677_v1, %v19938_v47  ;;  %v8224_v11 = vadd.f32 %v13276_v34, %v17620_v36  ;;  %v19948_v47 = vld [vmem:[#allocation159_spill] sm:$0xff] }
 0x5c7   : > { %v8227_v8 = vadd.f32 %v13277_v18, %v17620_v36  ;;  %v8354_v43 = vmax.f32 %v8226_v59, 0.0 }
 0x5c8   : > { %v8225_v32 = vadd.f32 %v13278_v42, %v17620_v36  ;;  %v8352_v51 = vmax.f32 %v8224_v11, 0.0 }
 0x5c9   : > { %v8355_v35 = vmax.f32 %v8227_v8, 0.0 }
 0x5ca   : > { %v13137_v28 = vpop.f32.mrb[36].mxu0  ;;  %v8353_v17 = vmax.f32 %v8225_v32, 0.0 }
 0x5cb   : > { %v13279_v29 = vadd.f32 %v13137_v28, %v19939_v63  ;;  %v7690_v15 = vpop.f32.mrb[37].mxu0 }
 0x5cc   : > { %v13280_v6 = vadd.f32 %v7690_v15, %v19940_v25  ;;  %v13138_v20 = vpop.f32.mrb[38].mxu0 }
 0x5cd   : > { %v8230_v57 = vadd.f32 %v13279_v29, %v17620_v36  ;;  %v13281_v13 = vadd.f32 %v13138_v20, %v19941_v21  ;;  %v7693_v55 = vpop.f32.mrb[39].mxu0  ;;  %v19949_v29 = vld [vmem:[#allocation5_spill] sm:$0xff]  ;;  %v19950_v20 = vld [vmem:[#allocation6_spill] sm:$0xff] }
 0x5ce   : > { %v8228_v41 = vadd.f32 %v13280_v6, %v17620_v36  ;;  %v13282_v14 = vadd.f32 %v7693_v55, %v19942_v38 }
 0x5cf   : > { %v8358_v23 = vmax.f32 %v8230_v57, 0.0  ;;  %v8231_v58 = vadd.f32 %v13281_v13, %v17620_v36 }
 0x5d0   : > { %v8356_v60 = vmax.f32 %v8228_v41, 0.0  ;;  %v8229_v46 = vadd.f32 %v13282_v14, %v17620_v36 }
 0x5d1   : > { %v8466_v10 = vmax.f32 %v8354_v43, %v8358_v23  ;;  %v8359_v19 = vmax.f32 %v8231_v58, 0.0 }
 0x5d2   : > { %v8464_v39 = vmax.f32 %v8352_v51, %v8356_v60  ;;  %v8357_v54 = vmax.f32 %v8229_v46, 0.0  ;;  %v13141_v22 = vpop.f32.mrb[40].mxu0 }
 0x5d3   : > { %v8467_v3 = vmax.f32 %v8355_v35, %v8359_v19  ;;  %v13283_v49 = vadd.f32 %v13141_v22, %v19943_v2  ;;  %v7706_v12 = vpop.f32.mrb[41].mxu0  ;;  %v19951_v35 = vld [vmem:[#allocation131_spill] sm:$0xff] }
 0x5d4   : > { %v8465_v45 = vmax.f32 %v8353_v17, %v8357_v54  ;;  %v13284_v50 = vadd.f32 %v7706_v12, %v19944_v24  ;;  %v13142_v56 = vpop.f32.mrb[42].mxu0 }
 0x5d5   : > { %v13285_v53 = vadd.f32 %v13142_v56, %v19945_v5  ;;  %v7709_v7 = vpop.f32.mrb[43].mxu0  ;;  %v17732_v16 = vpack.c.bf16 %v8467_v3, %v8466_v10  ;;  %v8234_v34 = vadd.f32 %v13283_v49, %v17620_v36  ;;  %v19953_v3 = vld [vmem:[#allocation8_spill] sm:$0xff] }
 0x5d6   : > { %v13286_v37 = vadd.f32 %v7709_v7, %v19946_v9  ;;  %v17735_v26 = vpack.c.bf16 %v8465_v45, %v8464_v39  ;;  %v8232_v1 = vadd.f32 %v13284_v50, %v17620_v36  ;;  %v19952_v39 = vld [vmem:[#allocation7_spill] sm:$0xff] }
 0x5d7   : > { %v8235_v59 = vadd.f32 %v13285_v53, %v17620_v36  ;;  %v8362_v57 = vmax.f32 %v8234_v34, 0.0  ;;  %v19954_v45 = vld [vmem:[#allocation11_spill] sm:$0xff]  ;;  %v19955_v53 = vld [vmem:[#allocation12_spill] sm:$0xff] }
 0x5d8   : > { %11483 = vmatprep.subr.bf16.mxu1 %v17735_v26  ;;  %v8233_v25 = vadd.f32 %v13286_v37, %v17620_v36  ;;  %v8360_v55 = vmax.f32 %v8232_v1, 0.0 }
 0x5d9   : > { %11484 = vmatpush3.bf16.msra.mxu1 %v17645_v0  ;;  %v8363_v38 = vmax.f32 %v8235_v59, 0.0  ;;  %v19957_v59 = vld [vmem:[#allocation17_spill] sm:$0xff] }
 0x5da   : > { %v13145_v31 = vpop.f32.mrb[44].mxu0  ;;  %11485 = vmatprep.subr.bf16.mxu1 %v17732_v16  ;;  %v8361_v23 = vmax.f32 %v8233_v25, 0.0 }
 0x5db   : > { %v13287_v27 = vadd.f32 %v13145_v31, %v19947_v48  ;;  %v7722_v18 = vpop.f32.mrb[45].mxu0 }
 0x5dc   : > { %v13288_v42 = vadd.f32 %v7722_v18, %v19948_v47  ;;  %v13146_v28 = vpop.f32.mrb[46].mxu0  ;;  %v19956_v18 = vld [vmem:[#allocation16_spill] sm:$0xff] }
 0x5dd   : > { %v8238_v63 = vadd.f32 %v13287_v27, %v17620_v36  ;;  %v13289_v15 = vadd.f32 %v13146_v28, %v19949_v29  ;;  %v7725_v11 = vpop.f32.mrb[47].mxu0  ;;  %11486 = vmatpush3.bf16.msra.mxu1 %v17642_v4 }
 0x5de   : > { %v8236_v6 = vadd.f32 %v13288_v42, %v17620_v36  ;;  %v13290_v8 = vadd.f32 %v7725_v11, %v19950_v20 }
 0x5df   : > { %v8366_v21 = vmax.f32 %v8238_v63, 0.0  ;;  %v8239_v13 = vadd.f32 %v13289_v15, %v17620_v36 }
 0x5e0   : > { %v8364_v32 = vmax.f32 %v8236_v6, 0.0  ;;  %v8237_v41 = vadd.f32 %v13290_v8, %v17620_v36 }
 0x5e1   : > { %v8470_v14 = vmax.f32 %v8362_v57, %v8366_v21  ;;  %v8367_v43 = vmax.f32 %v8239_v13, 0.0 }
 0x5e2   : > { %v8468_v58 = vmax.f32 %v8360_v55, %v8364_v32  ;;  %v8365_v51 = vmax.f32 %v8237_v41, 0.0  ;;  %v13149_v60 = vpop.f32.mrb[48].mxu0 }
 0x5e3   : > { %v8471_v46 = vmax.f32 %v8363_v38, %v8367_v43  ;;  %v13291_v10 = vadd.f32 %v13149_v60, %v19951_v35  ;;  %v7738_v19 = vpop.f32.mrb[49].mxu0  ;;  %v19958_v38 = vld [vmem:[#allocation21_spill] sm:$0xff] }
 0x5e4   : > { %v8469_v17 = vmax.f32 %v8361_v23, %v8365_v51  ;;  %v13292_v54 = vadd.f32 %v7738_v19, %v19952_v39  ;;  %v13150_v22 = vpop.f32.mrb[50].mxu0 }
 0x5e5   : > { %v13293_v2 = vadd.f32 %v13150_v22, %v19953_v3  ;;  %v7741_v49 = vpop.f32.mrb[51].mxu0  ;;  %v17756_v12 = vpack.c.bf16 %v8471_v46, %v8470_v14  ;;  %v8242_v5 = vadd.f32 %v13291_v10, %v17620_v36  ;;  %v19960_v46 = vld [vmem:[#allocation26_spill] sm:$0xff] }
 0x5e6   : > { %v13294_v24 = vadd.f32 %v7741_v49, %v19954_v45  ;;  %v17759_v50 = vpack.c.bf16 %v8469_v17, %v8468_v58  ;;  %v8240_v37 = vadd.f32 %v13292_v54, %v17620_v36  ;;  %v19959_v58 = vld [vmem:[#allocation22_spill] sm:$0xff]  ;;  %v19961_v17 = vld [vmem:[#allocation27_spill] sm:$0xff] }
 0x5e7   : > { %v8243_v48 = vadd.f32 %v13293_v2, %v17620_v36  ;;  %v8370_v29 = vmax.f32 %v8242_v5, 0.0  ;;  %v19962_v2 = vld [vmem:[#allocation31_spill] sm:$0xff] }
 0x5e8   : > { %11487 = vmatprep.subr.bf16.mxu1 %v17759_v50  ;;  %v8241_v42 = vadd.f32 %v13294_v24, %v17620_v36  ;;  %v8368_v11 = vmax.f32 %v8240_v37, 0.0  ;;  %v19964_v37 = vld [vmem:[#allocation36_spill] sm:$0xff] }
 0x5e9   : > { %11488 = vmatpush3.bf16.msra.mxu1 %v17671_v40  ;;  %v8371_v20 = vmax.f32 %v8243_v48, 0.0 }
 0x5ea   : > { %v13153_v56 = vpop.f32.mrb[52].mxu0  ;;  %11489 = vmatprep.subr.bf16.mxu1 %v17756_v12  ;;  %v8369_v21 = vmax.f32 %v8241_v42, 0.0 }
 0x5eb   : > { %v13295_v7 = vadd.f32 %v13153_v56, %v19955_v53  ;;  %v7754_v9 = vpop.f32.mrb[53].mxu0  ;;  %v19963_v56 = vld [vmem:[#allocation32_spill] sm:$0xff] }
 0x5ec   : > { %v13296_v31 = vadd.f32 %v7754_v9, %v17237_v44  ;;  %v13154_v34 = vpop.f32.mrb[54].mxu0 }
 0x5ed   : > { %v8246_v27 = vadd.f32 %v13295_v7, %v17620_v36  ;;  %v13297_v1 = vadd.f32 %v13154_v34, %v19956_v18  ;;  %v7757_v47 = vpop.f32.mrb[55].mxu0  ;;  %11490 = vmatpush3.bf16.msra.mxu1 %v17668_v33  ;;  %v19965_v18 = vld [vmem:[#allocation37_spill] sm:$0xff] }
 0x5ee   : > { %v8244_v28 = vadd.f32 %v13296_v31, %v17620_v36  ;;  %v13298_v63 = vadd.f32 %v7757_v47, %v19957_v59 }
 0x5ef   : > { %v8374_v15 = vmax.f32 %v8246_v27, 0.0  ;;  %v8247_v44 = vadd.f32 %v13297_v1, %v17620_v36 }
 0x5f0   : > { %v8372_v25 = vmax.f32 %v8244_v28, 0.0  ;;  %v8245_v6 = vadd.f32 %v13298_v63, %v17620_v36 }
 0x5f1   : > { %v8474_v8 = vmax.f32 %v8370_v29, %v8374_v15  ;;  %v8375_v57 = vmax.f32 %v8247_v44, 0.0 }
 0x5f2   : > { %v8472_v13 = vmax.f32 %v8368_v11, %v8372_v25  ;;  %v8373_v55 = vmax.f32 %v8245_v6, 0.0  ;;  %v13157_v32 = vpop.f32.mrb[56].mxu0 }
 0x5f3   : > { %v8475_v41 = vmax.f32 %v8371_v20, %v8375_v57  ;;  %v13299_v14 = vadd.f32 %v13157_v32, %v19958_v38  ;;  %v7770_v43 = vpop.f32.mrb[57].mxu0 }
 0x5f4   : > { %v8473_v23 = vmax.f32 %v8369_v21, %v8373_v55  ;;  %v13300_v51 = vadd.f32 %v7770_v43, %v19959_v58  ;;  %v13158_v60 = vpop.f32.mrb[58].mxu0  ;;  %v19966_v21 = vld [vmem:[#allocation40_spill] sm:$0xff]  ;;  %v19968_v43 = vld [vmem:[#allocation46_spill] sm:$0xff] }
 0x5f5   : > { %v13301_v35 = vadd.f32 %v13158_v60, %v19960_v46  ;;  %v7773_v10 = vpop.f32.mrb[59].mxu0  ;;  %v17780_v19 = vpack.c.bf16 %v8475_v41, %v8474_v8  ;;  %v8250_v3 = vadd.f32 %v13299_v14, %v17620_v36  ;;  %v19967_v41 = vld [vmem:[#allocation42_spill] sm:$0xff]  ;;  %v19969_v60 = vld [vmem:[#allocation47_spill] sm:$0xff] }
 0x5f6   : > { %v13302_v39 = vadd.f32 %v7773_v10, %v19961_v17  ;;  %v17783_v54 = vpack.c.bf16 %v8473_v23, %v8472_v13  ;;  %v8248_v24 = vadd.f32 %v13300_v51, %v17620_v36 }
 0x5f7   : > { %v8251_v7 = vadd.f32 %v13301_v35, %v17620_v36  ;;  %v8378_v47 = vmax.f32 %v8250_v3, 0.0 }
 0x5f8   : > { %11491 = vmatprep.subr.bf16.mxu1 %v17783_v54  ;;  %v8249_v48 = vadd.f32 %v13302_v39, %v17620_v36  ;;  %v8376_v59 = vmax.f32 %v8248_v24, 0.0  ;;  %v19970_v39 = vld [vmem:[#allocation51_spill] sm:$0xff] }
 0x5f9   : > { %11492 = vmatpush3.bf16.msra.mxu1 %v17694_v61  ;;  %v8379_v15 = vmax.f32 %v8251_v7, 0.0  ;;  %v19972_v7 = vld [vmem:[#allocation56_spill] sm:$0xff] }
 0x5fa   : > { %v13161_v22 = vpop.f32.mrb[60].mxu0  ;;  %11493 = vmatprep.subr.bf16.mxu1 %v17780_v19  ;;  %v8377_v25 = vmax.f32 %v8249_v48, 0.0 }
 0x5fb   : > { %v13303_v49 = vadd.f32 %v13161_v22, %v19962_v2  ;;  %v7786_v45 = vpop.f32.mrb[61].mxu0 }
 0x5fc   : > { %v13304_v5 = vadd.f32 %v7786_v45, %v19963_v56  ;;  %v13162_v53 = vpop.f32.mrb[62].mxu0  ;;  %v14416_v56 = vld [vmem:[%s18719_s3] ss:$16 sps:$4 sm:$0xff]  }
 0x5fd   : > { %v8254_v9 = vadd.f32 %v13303_v49, %v17620_v36  ;;  %v13305_v31 = vadd.f32 %v13162_v53, %v19964_v37  ;;  %v7789_v34 = vpop.f32.mrb[63].mxu0  ;;  %11494 = vmatpush3.bf16.msra.mxu1 %v17691_v30  ;;  %v19971_v49 = vld [vmem:[#allocation52_spill] sm:$0xff] }
 0x5fe   : > { %v8252_v27 = vadd.f32 %v13304_v5, %v17620_v36  ;;  %v13306_v1 = vadd.f32 %v7789_v34, %v19965_v18 }
 0x5ff   : > { %v8382_v42 = vmax.f32 %v8254_v9, 0.0  ;;  %v8255_v28 = vadd.f32 %v13305_v31, %v17620_v36  ;;  %v14419_v31 = vld [vmem:[%s18719_s3 + $0x24] ss:$16 sps:$4 sm:$0xff]  }
 0x600   : > { %v8380_v63 = vmax.f32 %v8252_v27, 0.0  ;;  %v8253_v29 = vadd.f32 %v13306_v1, %v17620_v36  ;;  %v19973_v27 = vld [vmem:[#allocation57_spill] sm:$0xff] }
 0x601   : > { %v8478_v44 = vmax.f32 %v8378_v47, %v8382_v42  ;;  %v8383_v11 = vmax.f32 %v8255_v28, 0.0 }
 0x602   : > { %v8476_v6 = vmax.f32 %v8376_v59, %v8380_v63  ;;  %v8381_v20 = vmax.f32 %v8253_v29, 0.0  ;;  %v13165_v8 = vpop.f32.mrb[64].mxu0 }
 0x603   : > { %v8479_v57 = vmax.f32 %v8379_v15, %v8383_v11  ;;  %v13307_v13 = vadd.f32 %v13165_v8, %v19966_v21  ;;  %v7802_v55 = vpop.f32.mrb[65].mxu0 }
 0x604   : > { %v8477_v32 = vmax.f32 %v8377_v25, %v8381_v20  ;;  %v13308_v38 = vadd.f32 %v7802_v55, %v19967_v41  ;;  %v13166_v14 = vpop.f32.mrb[66].mxu0 }
 0x605   : > { %v13309_v23 = vadd.f32 %v13166_v14, %v19968_v43  ;;  %v7805_v58 = vpop.f32.mrb[67].mxu0  ;;  %v17804_v51 = vpack.c.bf16 %v8479_v57, %v8478_v44  ;;  %v8258_v17 = vadd.f32 %v13307_v13, %v17620_v36  ;;  %v19974_v57 = vld [vmem:[#allocation61_spill] sm:$0xff]  ;;  %v14421_v14 = vld [vmem:[%s18719_s3 + $0x20] ss:$16 sps:$4 sm:$0xff]  }
 0x606   : > { %v13310_v46 = vadd.f32 %v7805_v58, %v19969_v60  ;;  %v17807_v35 = vpack.c.bf16 %v8477_v32, %v8476_v6  ;;  %v8256_v2 = vadd.f32 %v13308_v38, %v17620_v36  ;;  %v19975_v32 = vld [vmem:[#allocation62_spill] sm:$0xff] }
 0x607   : > { %v8259_v5 = vadd.f32 %v13309_v23, %v17620_v36  ;;  %v8386_v1 = vmax.f32 %v8258_v17, 0.0  ;;  %v19976_v23 = vld [vmem:[#allocation66_spill] sm:$0xff]  ;;  %v19977_v17 = vld [vmem:[#allocation67_spill] sm:$0xff] }
 0x608   : > { %11495 = vmatprep.subr.bf16.mxu1 %v17807_v35  ;;  %v8257_v34 = vadd.f32 %v13310_v46, %v17620_v36  ;;  %v8384_v28 = vmax.f32 %v8256_v2, 0.0  ;;  %v14422_v46 = vld [vmem:[%s18719_s3 + $0x44] ss:$16 sps:$4 sm:$0xff]   ;;  %v19978_v2 = vld [vmem:[#allocation71_spill] sm:$0xff] }
 0x609   : > { %11496 = vmatpush3.bf16.msra.mxu1 %v17714_v52  ;;  %v8387_v29 = vmax.f32 %v8259_v5, 0.0 }
 0x60a   : > { %v13169_v10 = vpop.f32.mrb[68].mxu0  ;;  %11497 = vmatprep.subr.bf16.mxu1 %v17804_v51  ;;  %v8385_v11 = vmax.f32 %v8257_v34, 0.0 }
 0x60b   : > { %v13311_v22 = vadd.f32 %v13169_v10, %v19970_v39  ;;  %v7818_v3 = vpop.f32.mrb[69].mxu0 }
 0x60c   : > { %v13312_v45 = vadd.f32 %v7818_v3, %v19971_v49  ;;  %v13170_v24 = vpop.f32.mrb[70].mxu0 }
 0x60d   : > { %v8262_v53 = vadd.f32 %v13311_v22, %v17620_v36  ;;  %v13313_v9 = vadd.f32 %v13170_v24, %v19972_v7  ;;  %v7821_v37 = vpop.f32.mrb[71].mxu0  ;;  %11498 = vmatpush3.bf16.msra.mxu1 %v17711_v62  ;;  %v14424_v7 = vld [vmem:[%s18719_s3 + $0x40] ss:$16 sps:$4 sm:$0xff]  }
 0x60e   : > { %v8260_v48 = vadd.f32 %v13312_v45, %v17620_v36  ;;  %v13314_v18 = vadd.f32 %v7821_v37, %v19973_v27  ;;  %v14425_v27 = vld [vmem:[%s18719_s3 + $0x64] ss:$16 sps:$4 sm:$0xff]  }
 0x60f   : > { %v8390_v47 = vmax.f32 %v8262_v53, 0.0  ;;  %v8263_v42 = vadd.f32 %v13313_v9, %v17620_v36 }
 0x610   : > { %v8388_v59 = vmax.f32 %v8260_v48, 0.0  ;;  %v8261_v63 = vadd.f32 %v13314_v18, %v17620_v36  ;;  %8961 = vmatmul.mubr.bf16.vlgmr.msra.gmra.mrb[128].mxu1 %v14416_v56  ;;  %v19979_v56 = vld [vmem:[#allocation72_spill] sm:$0xff] }
 0x611   : > { %v8482_v15 = vmax.f32 %v8386_v1, %v8390_v47  ;;  %v8391_v44 = vmax.f32 %v8263_v42, 0.0  ;;  %8968 = vmatprep.mubr.bf16.mxu1 %v14419_v31  ;;  %v19980_v31 = vld [vmem:[#allocation3_spill] sm:$0xff]  ;;  %v19981_v47 = vld [vmem:[#allocation4_spill] sm:$0xff] }
 0x612   : > { %v8480_v25 = vmax.f32 %v8384_v28, %v8388_v59  ;;  %v8389_v6 = vmax.f32 %v8261_v63, 0.0  ;;  %v13173_v20 = vpop.f32.mrb[72].mxu0 }
 0x613   : > { %v8483_v8 = vmax.f32 %v8387_v29, %v8391_v44  ;;  %v13315_v21 = vadd.f32 %v13173_v20, %v19974_v57  ;;  %v7834_v13 = vpop.f32.mrb[73].mxu0 }
 0x614   : > { %v8481_v55 = vmax.f32 %v8385_v11, %v8389_v6  ;;  %v13316_v41 = vadd.f32 %v7834_v13, %v19975_v32  ;;  %v13174_v38 = vpop.f32.mrb[74].mxu0 }
 0x615   : > { %v17836_v43 = vpack.c.bf16 %v8483_v8, %v8482_v15  ;;  %v13317_v58 = vadd.f32 %v13174_v38, %v19976_v23  ;;  %v7837_v60 = vpop.f32.mrb[75].mxu0  ;;  %v8266_v3 = vadd.f32 %v13315_v21, %v17620_v36 }
 0x616   : > { %v17842_v10 = vpack.c.bf16 %v8481_v55, %v8480_v25  ;;  %v13318_v39 = vadd.f32 %v7837_v60, %v19977_v17  ;;  %v8264_v24 = vadd.f32 %v13316_v41, %v17620_v36  ;;  %v19982_v55 = vld [vmem:[#allocation160_spill] sm:$0xff]  ;;  %v19984_v17 = vld [vmem:[#allocation162_spill] sm:$0xff] }
 0x617   : > { %v8267_v9 = vadd.f32 %v13317_v58, %v17620_v36  ;;  %v8394_v28 = vmax.f32 %v8266_v3, 0.0  ;;  %v14427_v60 = vld [vmem:[%s18719_s3 + $0x60] ss:$16 sps:$4 sm:$0xff]   ;;  %v14428_v3 = vld [vmem:[%s18719_s3 + $0x84] ss:$16 sps:$4 sm:$0xff]  }
 0x618   : > { %8969 = vmatmul.mubr.bf16.gmra.mrb[132].mxu1 %v14421_v14  ;;  %v8265_v18 = vadd.f32 %v13318_v39, %v17620_v36  ;;  %v8392_v29 = vmax.f32 %v8264_v24, 0.0  ;;  %v19983_v14 = vld [vmem:[#allocation161_spill] sm:$0xff] }
 0x619   : > { %8976 = vmatprep.mubr.bf16.mxu1 %v14422_v46  ;;  %v8395_v11 = vmax.f32 %v8267_v9, 0.0 }
 0x61a   : > { %v13177_v22 = vpop.f32.mrb[76].mxu0  ;;  %v8393_v20 = vmax.f32 %v8265_v18, 0.0 }
 0x61b   : > { %v13319_v49 = vadd.f32 %v13177_v22, %v19978_v2  ;;  %v7850_v45 = vpop.f32.mrb[77].mxu0 }
 0x61c   : > { %v13320_v5 = vadd.f32 %v7850_v45, %v19979_v56  ;;  %v13178_v53 = vpop.f32.mrb[78].mxu0 }
 0x61d   : > { %v8270_v37 = vadd.f32 %v13319_v49, %v17620_v36  ;;  %v13321_v34 = vadd.f32 %v13178_v53, %v19980_v31  ;;  %v7853_v48 = vpop.f32.mrb[79].mxu0  ;;  %v19985_v49 = vld [vmem:[#allocation163_spill] sm:$0xff] }
 0x61e   : > { %v8268_v1 = vadd.f32 %v13320_v5, %v17620_v36  ;;  %v13322_v42 = vadd.f32 %v7853_v48, %v19981_v47  ;;  %v19986_v5 = vld [vmem:[#allocation164_spill] sm:$0xff] }
 0x61f   : > { %v8398_v59 = vmax.f32 %v8270_v37, 0.0  ;;  %v8271_v63 = vadd.f32 %v13321_v34, %v17620_v36  ;;  %v19987_v37 = vld [vmem:[#allocation165_spill] sm:$0xff]  ;;  %v14430_v48 = vld [vmem:[%s18719_s3 + $0x80] ss:$16 sps:$4 sm:$0xff]  }
 0x620   : > { %v8396_v15 = vmax.f32 %v8268_v1, 0.0  ;;  %v8269_v44 = vadd.f32 %v13322_v42, %v17620_v36  ;;  %8977 = vmatmul.mubr.bf16.gmra.mrb[136].mxu1 %v14424_v7  ;;  %v19988_v1 = vld [vmem:[#allocation166_spill] sm:$0xff] }
 0x621   : > { %v8486_v25 = vmax.f32 %v8394_v28, %v8398_v59  ;;  %v8399_v6 = vmax.f32 %v8271_v63, 0.0  ;;  %8984 = vmatprep.mubr.bf16.mxu1 %v14425_v27  ;;  %v14431_v28 = vld [vmem:[%s18719_s3 + $0xa4] ss:$16 sps:$4 sm:$0xff]  }
 0x622   : > { %v8484_v8 = vmax.f32 %v8392_v29, %v8396_v15  ;;  %v8397_v57 = vmax.f32 %v8269_v44, 0.0  ;;  %v13181_v21 = vpop.f32.mrb[80].mxu0  ;;  %v19989_v29 = vld [vmem:[#allocation167_spill] sm:$0xff] }
 0x623   : > { %v8487_v13 = vmax.f32 %v8395_v11, %v8399_v6  ;;  %v13323_v32 = vadd.f32 %v13181_v21, %v19982_v55  ;;  %v7866_v41 = vpop.f32.mrb[81].mxu0 }
 0x624   : > { %v8485_v38 = vmax.f32 %v8393_v20, %v8397_v57  ;;  %v13324_v23 = vadd.f32 %v7866_v41, %v19983_v14  ;;  %v13182_v58 = vpop.f32.mrb[82].mxu0 }
 0x625   : > { %v17868_v46 = vpack.c.bf16 %v8487_v13, %v8486_v25  ;;  %v13325_v39 = vadd.f32 %v13182_v58, %v19984_v17  ;;  %v7869_v22 = vpop.f32.mrb[83].mxu0  ;;  %v8274_v56 = vadd.f32 %v13323_v32, %v17620_v36 }
 0x626   : > { %v17874_v2 = vpack.c.bf16 %v8485_v38, %v8484_v8  ;;  %v13326_v45 = vadd.f32 %v7869_v22, %v19985_v49  ;;  %v8272_v9 = vadd.f32 %v13324_v23, %v17620_v36  ;;  %v19990_v23 = vld [vmem:[#allocation168_spill] sm:$0xff] }
 0x627   : > { %v8275_v27 = vadd.f32 %v13325_v39, %v17620_v36  ;;  %v8402_v44 = vmax.f32 %v8274_v56, 0.0  ;;  %v19991_v39 = vld [vmem:[#allocation169_spill] sm:$0xff]  ;;  %v14433_v49 = vld [vmem:[%s18719_s3 + $0xa0] ss:$16 sps:$4 sm:$0xff]  }
 0x628   : > { %8985 = vmatmul.mubr.bf16.gmra.mrb[140].mxu1 %v14427_v60  ;;  %v8273_v59 = vadd.f32 %v13326_v45, %v17620_v36  ;;  %v8400_v6 = vmax.f32 %v8272_v9, 0.0  ;;  %v19993_v9 = vld [vmem:[#allocation171_spill] sm:$0xff] }
 0x629   : > { %8992 = vmatprep.mubr.bf16.mxu1 %v14428_v3  ;;  %v8403_v57 = vmax.f32 %v8275_v27, 0.0 }
 0x62a   : > { %v13185_v24 = vpop.f32.mrb[84].mxu0  ;;  %v8401_v55 = vmax.f32 %v8273_v59, 0.0  ;;  %v14436_v59 = vld [vmem:[%s18719_s3 + $0xc0] ss:$16 sps:$4 sm:$0xff]  }
 0x62b   : > { %v13327_v53 = vadd.f32 %v13185_v24, %v19986_v5  ;;  %v7882_v7 = vpop.f32.mrb[85].mxu0  ;;  %v19992_v24 = vld [vmem:[#allocation170_spill] sm:$0xff] }
 0x62c   : > { %v13328_v31 = vadd.f32 %v7882_v7, %v19987_v37  ;;  %v13186_v34 = vpop.f32.mrb[86].mxu0 }
 0x62d   : > { %v8278_v18 = vadd.f32 %v13327_v53, %v17620_v36  ;;  %v13329_v47 = vadd.f32 %v13186_v34, %v19988_v1  ;;  %v7885_v42 = vpop.f32.mrb[87].mxu0  ;;  %v14434_v53 = vld [vmem:[%s18719_s3 + $0xc4] ss:$16 sps:$4 sm:$0xff]  }
 0x62e   : > { %v8276_v63 = vadd.f32 %v13328_v31, %v17620_v36  ;;  %v13330_v15 = vadd.f32 %v7885_v42, %v19989_v29 }
 0x62f   : > { %v8406_v11 = vmax.f32 %v8278_v18, 0.0  ;;  %v8279_v25 = vadd.f32 %v13329_v47, %v17620_v36  ;;  %v19995_v47 = vld [vmem:[#allocation173_spill] sm:$0xff] }
 0x630   : > { %v8404_v20 = vmax.f32 %v8276_v63, 0.0  ;;  %v8277_v8 = vadd.f32 %v13330_v15, %v17620_v36  ;;  %8993 = vmatmul.mubr.bf16.gmra.mrb[144].mxu1 %v14430_v48  ;;  %v19994_v48 = vld [vmem:[#allocation172_spill] sm:$0xff]  ;;  %v19996_v15 = vld [vmem:[#allocation174_spill] sm:$0xff] }
 0x631   : > { %v8490_v21 = vmax.f32 %v8402_v44, %v8406_v11  ;;  %v8407_v13 = vmax.f32 %v8279_v25, 0.0  ;;  %9000 = vmatprep.mubr.bf16.mxu1 %v14431_v28  ;;  %v14437_v25 = vld [vmem:[%s18719_s3 + $0xe4] ss:$16 sps:$4 sm:$0xff]  }
 0x632   : > { %v8488_v32 = vmax.f32 %v8400_v6, %v8404_v20  ;;  %v8405_v41 = vmax.f32 %v8277_v8, 0.0  ;;  %v13189_v38 = vpop.f32.mrb[88].mxu0  ;;  %v19997_v8 = vld [vmem:[#allocation175_spill] sm:$0xff] }
 0x633   : > { %v8491_v14 = vmax.f32 %v8403_v57, %v8407_v13  ;;  %v13331_v58 = vadd.f32 %v13189_v38, %v19990_v23  ;;  %v7898_v60 = vpop.f32.mrb[89].mxu0 }
 0x634   : > { %v8489_v17 = vmax.f32 %v8401_v55, %v8405_v41  ;;  %v13332_v22 = vadd.f32 %v7898_v60, %v19991_v39  ;;  %v13190_v3 = vpop.f32.mrb[90].mxu0 }
 0x635   : > { %v17900_v45 = vpack.c.bf16 %v8491_v14, %v8490_v21  ;;  %v13333_v56 = vadd.f32 %v13190_v3, %v19992_v24  ;;  %v7901_v5 = vpop.f32.mrb[91].mxu0  ;;  %v8282_v34 = vadd.f32 %v13331_v58, %v17620_v36 }
 0x636   : > { %v17906_v7 = vpack.c.bf16 %v8489_v17, %v8488_v32  ;;  %v13334_v37 = vadd.f32 %v7901_v5, %v19993_v9  ;;  %v8280_v1 = vadd.f32 %v13332_v22, %v17620_v36 }
 0x637   : > { %v8283_v63 = vadd.f32 %v13333_v56, %v17620_v36  ;;  %v8410_v21 = vmax.f32 %v8282_v34, 0.0  ;;  %v20000_v34 = vld [vmem:[#allocation178_spill] sm:$0xff] }
 0x638   : > { %9001 = vmatmul.mubr.bf16.gmra.mrb[148].mxu1 %v14433_v49  ;;  %v8281_v6 = vadd.f32 %v13334_v37, %v17620_v36  ;;  %v8408_v32 = vmax.f32 %v8280_v1, 0.0  ;;  %v19998_v49 = vld [vmem:[#allocation176_spill] sm:$0xff] }
 0x639   : > { %9008 = vmatprep.mubr.bf16.mxu1 %v14434_v53  ;;  %v8411_v14 = vmax.f32 %v8283_v63, 0.0  ;;  %v19999_v53 = vld [vmem:[#allocation177_spill] sm:$0xff] }
 0x63a   : > { %v13193_v31 = vpop.f32.mrb[92].mxu0  ;;  %v8409_v60 = vmax.f32 %v8281_v6, 0.0 }
 0x63b   : > { %v13335_v27 = vadd.f32 %v13193_v31, %v19994_v48  ;;  %v7914_v18 = vpop.f32.mrb[93].mxu0 }
 0x63c   : > { %v13336_v42 = vadd.f32 %v7914_v18, %v19995_v47  ;;  %v13194_v28 = vpop.f32.mrb[94].mxu0  ;;  %v14440_v18 = vld [vmem:[%s18719_s3 + $0x104] ss:$16 sps:$4 sm:$0xff]   ;;  %v20001_v47 = vld [vmem:[#allocation179_spill] sm:$0xff] }
 0x63d   : > { %v8286_v29 = vadd.f32 %v13335_v27, %v17620_v36  ;;  %v13337_v44 = vadd.f32 %v13194_v28, %v19996_v15  ;;  %v7917_v11 = vpop.f32.mrb[95].mxu0 }
 0x63e   : > { %v8284_v20 = vadd.f32 %v13336_v42, %v17620_v36  ;;  %v13338_v57 = vadd.f32 %v7917_v11, %v19997_v8  ;;  %v14442_v8 = vld [vmem:[%s18719_s3 + $0x100] ss:$16 sps:$4 sm:$0xff]  }
 0x63f   : > { %v8414_v13 = vmax.f32 %v8286_v29, 0.0  ;;  %v8287_v55 = vadd.f32 %v13337_v44, %v17620_v36  ;;  %v20002_v29 = vld [vmem:[#allocation9_spill] sm:$0xff] }
 0x640   : > { %v8412_v41 = vmax.f32 %v8284_v20, 0.0  ;;  %v8285_v38 = vadd.f32 %v13338_v57, %v17620_v36  ;;  %9009 = vmatmul.mubr.bf16.gmra.mrb[152].mxu1 %v14436_v59  ;;  %v14439_v36 = vld [vmem:[%s18719_s3 + $0xe0] ss:$16 sps:$4 sm:$0xff]  }
 0x641   : > { %v8494_v23 = vmax.f32 %v8410_v21, %v8414_v13  ;;  %v8415_v58 = vmax.f32 %v8287_v55, 0.0  ;;  %9016 = vmatprep.mubr.bf16.mxu1 %v14437_v25  ;;  %v17944_v59 = vld [vmem:[%s18718_s2] ss:$0 sm:$0xff]  ;;  %v20004_v13 = vld [vmem:[#allocation15_spill] sm:$0xff] }
 0x642   : > { %v8492_v17 = vmax.f32 %v8408_v32, %v8412_v41  ;;  %v8413_v39 = vmax.f32 %v8285_v38, 0.0  ;;  %v13197_v22 = vpop.f32.mrb[96].mxu0  ;;  %v20003_v25 = vld [vmem:[#allocation14_spill] sm:$0xff] }
 0x643   : > { %v8495_v3 = vmax.f32 %v8411_v14, %v8415_v58  ;;  %v13339_v24 = vadd.f32 %v13197_v22, %v19998_v49  ;;  %v7930_v56 = vpop.f32.mrb[97].mxu0  ;;  %v14443_v41 = vld [vmem:[%s18719_s3 + $0x124] ss:$16 sps:$4 sm:$0xff]  }
 0x644   : > { %v8493_v5 = vmax.f32 %v8409_v60, %v8413_v39  ;;  %v13340_v9 = vadd.f32 %v7930_v56, %v19999_v53  ;;  %v13198_v37 = vpop.f32.mrb[98].mxu0 }
 0x645   : > { %v17932_v31 = vpack.c.bf16 %v8495_v3, %v8494_v23  ;;  %v13341_v48 = vadd.f32 %v13198_v37, %v20000_v34  ;;  %v7933_v27 = vpop.f32.mrb[99].mxu0  ;;  %v8290_v63 = vadd.f32 %v17944_v59, %v13339_v24  ;;  %v20005_v23 = vld [vmem:[#allocation18_spill] sm:$0xff] }
 0x646   : > { %v17938_v1 = vpack.c.bf16 %v8493_v5, %v8492_v17  ;;  %v13342_v42 = vadd.f32 %v7933_v27, %v20001_v47  ;;  %v8288_v11 = vadd.f32 %v17944_v59, %v13340_v9 }
 0x647   : > { %v8291_v57 = vadd.f32 %v17944_v59, %v13341_v48  ;;  %v8418_v60 = vmax.f32 %v8290_v63, 0.0  ;;  %v20006_v48 = vld [vmem:[#allocation20_spill] sm:$0xff] }
 0x648   : > { %9017 = vmatmul.mubr.bf16.gmra.mrb[156].mxu1 %v14439_v36  ;;  %v8289_v38 = vadd.f32 %v17944_v59, %v13342_v42  ;;  %v8416_v22 = vmax.f32 %v8288_v11, 0.0  ;;  %v20007_v42 = vld [vmem:[#allocation23_spill] sm:$0xff] }
 0x649   : > { %9024 = vmatprep.mubr.bf16.mxu1 %v14440_v18  ;;  %v8419_v24 = vmax.f32 %v8291_v57, 0.0 }
 0x64a   : > { %v13201_v28 = vpop.f32.mrb[100].mxu0  ;;  %v8417_v53 = vmax.f32 %v8289_v38, 0.0 }
 0x64b   : > { %v13343_v15 = vadd.f32 %v13201_v28, %v20002_v29  ;;  %v7946_v44 = vpop.f32.mrb[101].mxu0  ;;  %v14445_v29 = vld [vmem:[%s18719_s3 + $0x120] ss:$16 sps:$4 sm:$0xff]  }
 0x64c   : > { %v13344_v6 = vadd.f32 %v7946_v44, %v20003_v25  ;;  %v13202_v20 = vpop.f32.mrb[102].mxu0 }
 0x64d   : > { %v8294_v21 = vadd.f32 %v17944_v59, %v13343_v15  ;;  %v13345_v55 = vadd.f32 %v13202_v20, %v20004_v13  ;;  %v7949_v32 = vpop.f32.mrb[103].mxu0  ;;  %v20008_v15 = vld [vmem:[#allocation25_spill] sm:$0xff]  ;;  %v20009_v20 = vld [vmem:[#allocation28_spill] sm:$0xff] }
 0x64e   : > { %v8292_v14 = vadd.f32 %v17944_v59, %v13344_v6  ;;  %v13346_v58 = vadd.f32 %v7949_v32, %v20005_v23  ;;  %v14446_v6 = vld [vmem:[%s18719_s3 + $0x144] ss:$16 sps:$4 sm:$0xff]  }
 0x64f   : > { %v8422_v17 = vmax.f32 %v8294_v21, 0.0  ;;  %v8295_v39 = vadd.f32 %v17944_v59, %v13345_v55  ;;  %v20010_v55 = vld [vmem:[#allocation30_spill] sm:$0xff] }
 0x650   : > { %v8420_v3 = vmax.f32 %v8292_v14, 0.0  ;;  %v8293_v49 = vadd.f32 %v17944_v59, %v13346_v58  ;;  %9025 = vmatmul.mubr.bf16.gmra.mrb[160].mxu1 %v14442_v8  ;;  %v20011_v14 = vld [vmem:[#allocation33_spill] sm:$0xff] }
 0x651   : > { %v8498_v56 = vmax.f32 %v8418_v60, %v8422_v17  ;;  %v8423_v5 = vmax.f32 %v8295_v39, 0.0  ;;  %9032 = vmatprep.mubr.bf16.mxu1 %v14443_v41  ;;  %v14448_v60 = vld [vmem:[%s18719_s3 + $0x140] ss:$16 sps:$4 sm:$0xff]  }
 0x652   : > { %v8496_v9 = vmax.f32 %v8416_v22, %v8420_v3  ;;  %v8421_v37 = vmax.f32 %v8293_v49, 0.0  ;;  %v13205_v36 = vpop.f32.mrb[104].mxu0  ;;  %v20012_v22 = vld [vmem:[#allocation35_spill] sm:$0xff] }
 0x653   : > { %v8499_v34 = vmax.f32 %v8419_v24, %v8423_v5  ;;  %v13347_v27 = vadd.f32 %v13205_v36, %v20006_v48  ;;  %v7962_v18 = vpop.f32.mrb[105].mxu0  ;;  %v14449_v24 = vld [vmem:[%s18719_s3 + $0x164] ss:$16 sps:$4 sm:$0xff]  }
 0x654   : > { %v8497_v47 = vmax.f32 %v8417_v53, %v8421_v37  ;;  %v13348_v28 = vadd.f32 %v7962_v18, %v20007_v42  ;;  %v13206_v63 = vpop.f32.mrb[106].mxu0  ;;  %v20013_v53 = vld [vmem:[#allocation39_spill] sm:$0xff] }
 0x655   : > { %v13349_v44 = vadd.f32 %v13206_v63, %v20008_v15  ;;  %v7965_v11 = vpop.f32.mrb[107].mxu0  ;;  %v17970_v25 = vpack.c.bf16 %v8499_v34, %v8498_v56  ;;  %v8298_v13 = vadd.f32 %v17944_v59, %v13347_v27 }
 0x656   : > { %v13350_v8 = vadd.f32 %v7965_v11, %v20009_v20  ;;  %v17976_v57 = vpack.c.bf16 %v8497_v47, %v8496_v9  ;;  %v8296_v38 = vadd.f32 %v17944_v59, %v13348_v28 }
 0x657   : > { %v8299_v17 = vadd.f32 %v17944_v59, %v13349_v44  ;;  %v8426_v37 = vmax.f32 %v8298_v13, 0.0  ;;  %v20015_v13 = vld [vmem:[#allocation43_spill] sm:$0xff] }
 0x658   : > { %9033 = vmatmul.mubr.bf16.gmra.mrb[164].mxu1 %v14445_v29  ;;  %11595 = vmatprep.subr.bf16.mxu1 %v17976_v57  ;;  %v8297_v56 = vadd.f32 %v17944_v59, %v13350_v8  ;;  %v8424_v48 = vmax.f32 %v8296_v38, 0.0  ;;  %v20016_v38 = vld [vmem:[#allocation44_spill] sm:$0xff] }
 0x659   : > { %11596 = vmatpush3.bf16.msra.mxu1 %v17842_v10  ;;  %9040 = vmatprep.mubr.bf16.mxu1 %v14446_v6  ;;  %v8427_v47 = vmax.f32 %v8299_v17, 0.0  ;;  %v20014_v6 = vld [vmem:[#allocation41_spill] sm:$0xff]  ;;  %v20017_v17 = vld [vmem:[#allocation48_spill] sm:$0xff] }
 0x65a   : > { %v13209_v21 = vpop.f32.mrb[108].mxu0  ;;  %11597 = vmatprep.subr.bf16.mxu1 %v17970_v25  ;;  %v8425_v63 = vmax.f32 %v8297_v56, 0.0 }
 0x65b   : > { %v13351_v32 = vadd.f32 %v13209_v21, %v20010_v55  ;;  %v7978_v41 = vpop.f32.mrb[109].mxu0 }
 0x65c   : > { %v13352_v23 = vadd.f32 %v7978_v41, %v20011_v14  ;;  %v13210_v58 = vpop.f32.mrb[110].mxu0  ;;  %v14451_v41 = vld [vmem:[%s18719_s3 + $0x160] ss:$16 sps:$4 sm:$0xff]  }
 0x65d   : > { %v8302_v39 = vadd.f32 %v17944_v59, %v13351_v32  ;;  %v13353_v3 = vadd.f32 %v13210_v58, %v20012_v22  ;;  %v7981_v49 = vpop.f32.mrb[111].mxu0  ;;  %11598 = vmatpush3.bf16.msra.mxu1 %v17836_v43 }
 0x65e   : > { %v8300_v5 = vadd.f32 %v17944_v59, %v13352_v23  ;;  %v13354_v9 = vadd.f32 %v7981_v49, %v20013_v53 }
 0x65f   : > { %v8430_v36 = vmax.f32 %v8302_v39, 0.0  ;;  %v8303_v34 = vadd.f32 %v17944_v59, %v13353_v3 }
 0x660   : > { %v8428_v27 = vmax.f32 %v8300_v5, 0.0  ;;  %v8301_v18 = vadd.f32 %v17944_v59, %v13354_v9  ;;  %9041 = vmatmul.mubr.bf16.gmra.mrb[168].mxu1 %v14448_v60  ;;  %v14452_v60 = vld [vmem:[%s18719_s3 + $0x184] ss:$16 sps:$4 sm:$0xff]   ;;  %v20019_v9 = vld [vmem:[#allocation53_spill] sm:$0xff] }
 0x661   : > { %v8502_v42 = vmax.f32 %v8426_v37, %v8430_v36  ;;  %v8431_v28 = vmax.f32 %v8303_v34, 0.0  ;;  %9048 = vmatprep.mubr.bf16.mxu1 %v14449_v24  ;;  %v20018_v24 = vld [vmem:[#allocation50_spill] sm:$0xff] }
 0x662   : > { %v8500_v29 = vmax.f32 %v8424_v48, %v8428_v27  ;;  %v8429_v15 = vmax.f32 %v8301_v18, 0.0  ;;  %v13213_v44 = vpop.f32.mrb[112].mxu0  ;;  %v14454_v34 = vld [vmem:[%s18719_s3 + $0x180] ss:$16 sps:$4 sm:$0xff]   ;;  %v20020_v18 = vld [vmem:[#allocation55_spill] sm:$0xff] }
 0x663   : > { %v8503_v11 = vmax.f32 %v8427_v47, %v8431_v28  ;;  %v13355_v20 = vadd.f32 %v13213_v44, %v20014_v6  ;;  %v7994_v8 = vpop.f32.mrb[113].mxu0  ;;  %v14455_v28 = vld [vmem:[%s18719_s3 + $0x1a4] ss:$16 sps:$4 sm:$0xff]  }
 0x664   : > { %v8501_v21 = vmax.f32 %v8425_v63, %v8429_v15  ;;  %v13356_v55 = vadd.f32 %v7994_v8, %v20015_v13  ;;  %v13214_v32 = vpop.f32.mrb[114].mxu0  ;;  %v20021_v15 = vld [vmem:[#allocation58_spill] sm:$0xff] }
 0x665   : > { %v13357_v14 = vadd.f32 %v13214_v32, %v20016_v38  ;;  %v7997_v23 = vpop.f32.mrb[115].mxu0  ;;  %v18006_v58 = vpack.c.bf16 %v8503_v11, %v8502_v42  ;;  %v8306_v49 = vadd.f32 %v17944_v59, %v13355_v20 }
 0x666   : > { %v13358_v39 = vadd.f32 %v7997_v23, %v20017_v17  ;;  %v18012_v22 = vpack.c.bf16 %v8501_v21, %v8500_v29  ;;  %v8304_v53 = vadd.f32 %v17944_v59, %v13356_v55 }
 0x667   : > { %v8307_v48 = vadd.f32 %v17944_v59, %v13357_v14  ;;  %v8434_v11 = vmax.f32 %v8306_v49, 0.0 }
 0x668   : > { %9049 = vmatmul.mubr.bf16.gmra.mrb[172].mxu1 %v14451_v41  ;;  %11599 = vmatprep.subr.bf16.mxu1 %v18012_v22  ;;  %v8305_v63 = vadd.f32 %v17944_v59, %v13358_v39  ;;  %v8432_v8 = vmax.f32 %v8304_v53, 0.0  ;;  %v20022_v39 = vld [vmem:[#allocation60_spill] sm:$0xff] }
 0x669   : > { %11600 = vmatpush3.bf16.msra.mxu1 %v17874_v2  ;;  %9056 = vmatprep.mubr.bf16.mxu1 %v14452_v60  ;;  %v8435_v55 = vmax.f32 %v8307_v48, 0.0 }
 0x66a   : > { %v13217_v3 = vpop.f32.mrb[116].mxu0  ;;  %11601 = vmatprep.subr.bf16.mxu1 %v18006_v58  ;;  %v8433_v38 = vmax.f32 %v8305_v63, 0.0 }
 0x66b   : > { %v13359_v56 = vadd.f32 %v13217_v3, %v20018_v24  ;;  %v8010_v5 = vpop.f32.mrb[117].mxu0 }
 0x66c   : > { %v13360_v37 = vadd.f32 %v8010_v5, %v20019_v9  ;;  %v13218_v36 = vpop.f32.mrb[118].mxu0  ;;  %v14457_v9 = vld [vmem:[%s18719_s3 + $0x1a0] ss:$16 sps:$4 sm:$0xff]  }
 0x66d   : > { %v8310_v27 = vadd.f32 %v17944_v59, %v13359_v56  ;;  %v13361_v47 = vadd.f32 %v13218_v36, %v20020_v18  ;;  %v8013_v42 = vpop.f32.mrb[119].mxu0  ;;  %11602 = vmatpush3.bf16.msra.mxu1 %v17868_v46  ;;  %v20023_v56 = vld [vmem:[#allocation63_spill] sm:$0xff]  ;;  %v20025_v18 = vld [vmem:[#allocation68_spill] sm:$0xff] }
 0x66e   : > { %v8308_v29 = vadd.f32 %v17944_v59, %v13360_v37  ;;  %v13362_v44 = vadd.f32 %v8013_v42, %v20021_v15  ;;  %v20024_v37 = vld [vmem:[#allocation65_spill] sm:$0xff] }
 0x66f   : > { %v8438_v6 = vmax.f32 %v8310_v27, 0.0  ;;  %v8311_v20 = vadd.f32 %v17944_v59, %v13361_v47  ;;  %v14458_v27 = vld [vmem:[%s18719_s3 + $0x1c4] ss:$16 sps:$4 sm:$0xff]  }
 0x670   : > { %v8436_v21 = vmax.f32 %v8308_v29, 0.0  ;;  %v8309_v13 = vadd.f32 %v17944_v59, %v13362_v44  ;;  %9057 = vmatmul.mubr.bf16.gmra.mrb[176].mxu1 %v14454_v34  ;;  %v20026_v29 = vld [vmem:[#allocation70_spill] sm:$0xff] }
 0x671   : > { %v8506_v32 = vmax.f32 %v8434_v11, %v8438_v6  ;;  %v8439_v41 = vmax.f32 %v8311_v20, 0.0  ;;  %9064 = vmatprep.mubr.bf16.mxu1 %v14455_v28  ;;  %v20027_v6 = vld [vmem:[#allocation73_spill] sm:$0xff] }
 0x672   : > { %v8504_v14 = vmax.f32 %v8432_v8, %v8436_v21  ;;  %v8437_v23 = vmax.f32 %v8309_v13, 0.0  ;;  %v13221_v60 = vpop.f32.mrb[120].mxu0  ;;  %v14460_v21 = vld [vmem:[%s18719_s3 + $0x1c0] ss:$16 sps:$4 sm:$0xff]  }
 0x673   : > { %v8507_v17 = vmax.f32 %v8435_v55, %v8439_v41  ;;  %v13363_v3 = vadd.f32 %v13221_v60, %v20022_v39  ;;  %v8026_v49 = vpop.f32.mrb[121].mxu0 }
 0x674   : > { %v8505_v24 = vmax.f32 %v8433_v38, %v8437_v23  ;;  %v13364_v5 = vadd.f32 %v8026_v49, %v20023_v56  ;;  %v13222_v53 = vpop.f32.mrb[122].mxu0 }
 0x675   : > { %v13365_v36 = vadd.f32 %v13222_v53, %v20024_v37  ;;  %v8029_v34 = vpop.f32.mrb[123].mxu0  ;;  %v18042_v48 = vpack.c.bf16 %v8507_v17, %v8506_v32  ;;  %v8314_v63 = vadd.f32 %v17944_v59, %v13363_v3  ;;  %v20028_v32 = vld [vmem:[#allocation75_spill] sm:$0xff]  ;;  %v20029_v17 = vld [vmem:[#allocation78_spill] sm:$0xff] }
 0x676   : > { %v13366_v47 = vadd.f32 %v8029_v34, %v20025_v18  ;;  %v18048_v42 = vpack.c.bf16 %v8505_v24, %v8504_v14  ;;  %v8312_v11 = vadd.f32 %v17944_v59, %v13364_v5  ;;  %v14461_v14 = vld [vmem:[%s18719_s3 + $0x1e4] ss:$16 sps:$4 sm:$0xff]  }
 0x677   : > { %v8315_v13 = vadd.f32 %v17944_v59, %v13365_v36  ;;  %v8442_v3 = vmax.f32 %v8314_v63, 0.0  ;;  %v14463_v63 = vld [vmem:[%s18719_s3 + $0x1e0] ss:$16 sps:$4 sm:$0xff]  }
 0x678   : > { %9065 = vmatmul.mubr.bf16.gmra.mrb[180].mxu1 %v14457_v9  ;;  %11603 = vmatprep.subr.bf16.mxu1 %v18048_v42  ;;  %v8313_v23 = vadd.f32 %v17944_v59, %v13366_v47  ;;  %v8440_v56 = vmax.f32 %v8312_v11, 0.0  ;;  %v14467_v11 = vld [vmem:[%s18719_s3 + $0x2c] ss:$16 sps:$4 sm:$0xff]  }
 0x679   : > { %11604 = vmatpush3.bf16.msra.mxu1 %v17906_v7  ;;  %9072 = vmatprep.mubr.bf16.mxu1 %v14458_v27  ;;  %v8443_v9 = vmax.f32 %v8315_v13, 0.0  ;;  %v14499_v13 = vld [vmem:[%s18719_s3 + $0x168] ss:$16 sps:$4 sm:$0xff]  }
 0x67a   : > { %v13225_v28 = vpop.f32.mrb[124].mxu0  ;;  %11605 = vmatprep.subr.bf16.mxu1 %v18042_v48  ;;  %v8441_v34 = vmax.f32 %v8313_v23, 0.0 }
 0x67b   : > { %v13367_v15 = vadd.f32 %v13225_v28, %v20026_v29  ;;  %v8042_v44 = vpop.f32.mrb[125].mxu0 }
 0x67c   : > { %v13368_v20 = vadd.f32 %v8042_v44, %v20027_v6  ;;  %v13226_v8 = vpop.f32.mrb[126].mxu0  ;;  %v14464_v44 = vld [vmem:[%s18719_s3 + $0x8] ss:$16 sps:$4 sm:$0xff]  }
 0x67d   : > { %v8318_v55 = vadd.f32 %v17944_v59, %v13367_v15  ;;  %v13369_v41 = vadd.f32 %v13226_v8, %v20028_v32  ;;  %v8045_v38 = vpop.f32.mrb[127].mxu0  ;;  %11606 = vmatpush3.bf16.msra.mxu1 %v17900_v45  ;;  %v14469_v6 = vld [vmem:[%s18719_s3 + $0x28] ss:$16 sps:$4 sm:$0xff]   ;;  %v14497_v8 = vld [vmem:[%s18719_s3 + $0x16c] ss:$16 sps:$4 sm:$0xff]  }
 0x67e   : > { %v8316_v60 = vadd.f32 %v17944_v59, %v13368_v20  ;;  %v13370_v39 = vadd.f32 %v8045_v38, %v20029_v17  ;;  %v14470_v20 = vld [vmem:[%s18719_s3 + $0x4c] ss:$16 sps:$4 sm:$0xff]   ;;  %v14502_v17 = vld [vmem:[%s18719_s3 + $0x188] ss:$16 sps:$4 sm:$0xff]  }
 0x67f   : > { %v8446_v49 = vmax.f32 %v8318_v55, 0.0  ;;  %v8319_v24 = vadd.f32 %v17944_v59, %v13369_v41  ;;  %v14500_v32 = vld [vmem:[%s18719_s3 + $0x18c] ss:$16 sps:$4 sm:$0xff]  }
 0x680   : > { %v8444_v5 = vmax.f32 %v8316_v60, 0.0  ;;  %v8317_v53 = vadd.f32 %v17944_v59, %v13370_v39  ;;  %9073 = vmatmul.mubr.bf16.gmra.mrb[184].mxu1 %v14460_v21  ;;  %v14466_v59 = vld [vmem:[%s18719_s3 + $0xc] ss:$16 sps:$4 sm:$0xff]  }
 0x681   : > { %v8510_v37 = vmax.f32 %v8442_v3, %v8446_v49  ;;  %v8447_v36 = vmax.f32 %v8319_v24, 0.0  ;;  %9080 = vmatprep.mubr.bf16.mxu1 %v14461_v14  ;;  %v14503_v3 = vld [vmem:[%s18719_s3 + $0x1ac] ss:$16 sps:$4 sm:$0xff]  }
 0x682   : > { %v8508_v27 = vmax.f32 %v8440_v56, %v8444_v5  ;;  %v8445_v18 = vmax.f32 %v8317_v53, 0.0 }
 0x683   : > { %v8511_v47 = vmax.f32 %v8443_v9, %v8447_v36  ;;  %v14505_v9 = vld [vmem:[%s18719_s3 + $0x1a8] ss:$16 sps:$4 sm:$0xff]   ;;  %v14506_v36 = vld [vmem:[%s18719_s3 + $0x1cc] ss:$16 sps:$4 sm:$0xff]  }
 0x684   : > { %v8509_v28 = vmax.f32 %v8441_v34, %v8445_v18 }
 0x685   : > { %v18075_v29 = vpack.c.bf16 %v8511_v47, %v8510_v37 }
 0x686   : > { %v18080_v15 = vpack.c.bf16 %v8509_v28, %v8508_v27 }
 0x688   : > { %9081 = vmatmul.mubr.bf16.gmra.mrb[188].mxu1 %v14463_v63  ;;  %11607 = vmatprep.subr.bf16.mxu1 %v18080_v15  ;;  %v14508_v63 = vld [vmem:[%s18719_s3 + $0x1c8] ss:$16 sps:$4 sm:$0xff]  }
 0x689   : > { %11608 = vmatpush3.bf16.msra.mxu1 %v17938_v1  ;;  %9121 = vmatprep.mubr.bf16.mxu1 %v14466_v59 }
 0x68a   : > { %11609 = vmatprep.subr.bf16.mxu1 %v18075_v29 }
 0x68d   : > { %11610 = vmatpush3.bf16.msra.mxu1 %v17932_v31 }
 0x68e   : > { %11707 = vmatprep.subr.bf16.mxu1 %v17735_v26  ;;  %v14485_v26 = vld [vmem:[%s18719_s3 + $0xec] ss:$16 sps:$4 sm:$0xff]  }
 0x690   : > { %9122 = vmatmul.mubr.bf16.vlgmr.msra.gmra.mrb[192].mxu1 %v14464_v44  ;;  %v14509_v44 = vld [vmem:[%s18719_s3 + $0x1ec] ss:$16 sps:$4 sm:$0xff]  }
 0x691   : > { %11708 = vmatpush3.bf16.msra.mxu1 %v17645_v0  ;;  %9129 = vmatprep.mubr.bf16.mxu1 %v14467_v11  ;;  %v14472_v0 = vld [vmem:[%s18719_s3 + $0x48] ss:$16 sps:$4 sm:$0xff]  }
 0x692   : > { %11709 = vmatprep.subr.bf16.mxu1 %v17732_v16  ;;  %v14482_v16 = vld [vmem:[%s18719_s3 + $0xcc] ss:$16 sps:$4 sm:$0xff]  }
 0x695   : > { %11710 = vmatpush3.bf16.msra.mxu1 %v17642_v4  ;;  %v14473_v4 = vld [vmem:[%s18719_s3 + $0x6c] ss:$16 sps:$4 sm:$0xff]  }
 0x696   : > { %11711 = vmatprep.subr.bf16.mxu1 %v17759_v50  ;;  %v14488_v50 = vld [vmem:[%s18719_s3 + $0x10c] ss:$16 sps:$4 sm:$0xff]  }
 0x698   : > { %9130 = vmatmul.mubr.bf16.gmra.mrb[196].mxu1 %v14469_v6 }
 0x699   : > { %11712 = vmatpush3.bf16.msra.mxu1 %v17671_v40  ;;  %9137 = vmatprep.mubr.bf16.mxu1 %v14470_v20  ;;  %v14475_v40 = vld [vmem:[%s18719_s3 + $0x68] ss:$16 sps:$4 sm:$0xff]  }
 0x69a   : > { %11713 = vmatprep.subr.bf16.mxu1 %v17756_v12  ;;  %v14487_v12 = vld [vmem:[%s18719_s3 + $0xe8] ss:$16 sps:$4 sm:$0xff]  }
 0x69d   : > { %11714 = vmatpush3.bf16.msra.mxu1 %v17668_v33  ;;  %v14476_v33 = vld [vmem:[%s18719_s3 + $0x8c] ss:$16 sps:$4 sm:$0xff]  }
 0x69e   : > { %11715 = vmatprep.subr.bf16.mxu1 %v17783_v54  ;;  %v14491_v54 = vld [vmem:[%s18719_s3 + $0x12c] ss:$16 sps:$4 sm:$0xff]  }
 0x6a0   : > { %9138 = vmatmul.mubr.bf16.gmra.mrb[200].mxu1 %v14472_v0 }
 0x6a1   : > { %11716 = vmatpush3.bf16.msra.mxu1 %v17694_v61  ;;  %9145 = vmatprep.mubr.bf16.mxu1 %v14473_v4  ;;  %v14478_v61 = vld [vmem:[%s18719_s3 + $0x88] ss:$16 sps:$4 sm:$0xff]  }
 0x6a2   : > { %11717 = vmatprep.subr.bf16.mxu1 %v17780_v19  ;;  %v14490_v19 = vld [vmem:[%s18719_s3 + $0x108] ss:$16 sps:$4 sm:$0xff]  }
 0x6a5   : > { %11718 = vmatpush3.bf16.msra.mxu1 %v17691_v30  ;;  %v14479_v30 = vld [vmem:[%s18719_s3 + $0xac] ss:$16 sps:$4 sm:$0xff]  }
 0x6a6   : > { %11719 = vmatprep.subr.bf16.mxu1 %v17807_v35  ;;  %v14494_v35 = vld [vmem:[%s18719_s3 + $0x14c] ss:$16 sps:$4 sm:$0xff]  }
 0x6a8   : > { %9146 = vmatmul.mubr.bf16.gmra.mrb[204].mxu1 %v14475_v40  ;;  %v14511_v40 = vld [vmem:[%s18719_s3 + $0x1e8] ss:$16 sps:$4 sm:$0xff]  }
 0x6a9   : > { %11720 = vmatpush3.bf16.msra.mxu1 %v17714_v52  ;;  %9153 = vmatprep.mubr.bf16.mxu1 %v14476_v33  ;;  %v14481_v52 = vld [vmem:[%s18719_s3 + $0xa8] ss:$16 sps:$4 sm:$0xff]  }
 0x6aa   : > { %11721 = vmatprep.subr.bf16.mxu1 %v17804_v51  ;;  %v14493_v51 = vld [vmem:[%s18719_s3 + $0x128] ss:$16 sps:$4 sm:$0xff]  }
 0x6ad   : > { %11722 = vmatpush3.bf16.msra.mxu1 %v17711_v62  ;;  %v14484_v62 = vld [vmem:[%s18719_s3 + $0xc8] ss:$16 sps:$4 sm:$0xff]  }
 0x6ae   : > { %11819 = vmatprep.subr.bf16.mxu1 %v17976_v57  ;;  %v14496_v57 = vld [vmem:[%s18719_s3 + $0x148] ss:$16 sps:$4 sm:$0xff]  }
 0x6b0   : > { %9154 = vmatmul.mubr.bf16.gmra.mrb[208].mxu1 %v14478_v61  ;;  %v14514_v61 = vld [vmem:[%s18719_s3 + $0x204] ss:$16 sps:$4 sm:$0xff]  }
 0x6b1   : > { %9161 = vmatprep.mubr.bf16.mxu1 %v14479_v30 }
 0x6b8   : > { %9162 = vmatmul.mubr.bf16.gmra.mrb[212].mxu1 %v14481_v52 }
 0x6b9   : > { %9169 = vmatprep.mubr.bf16.mxu1 %v14482_v16 }
 0x6c0   : > { %9170 = vmatmul.mubr.bf16.gmra.mrb[216].mxu1 %v14484_v62 }
 0x6c1   : > { %9177 = vmatprep.mubr.bf16.mxu1 %v14485_v26 }
 0x6c8   : > { %9178 = vmatmul.mubr.bf16.gmra.mrb[220].mxu1 %v14487_v12  ;;  %v14512_v12 = vld [vmem:[%s18719_s3 + $0x200] ss:$16 sps:$4 sm:$0xff]  }
 0x6c9   : > { %9185 = vmatprep.mubr.bf16.mxu1 %v14488_v50 }
 0x6d0   : > { %9186 = vmatmul.mubr.bf16.gmra.mrb[224].mxu1 %v14490_v19  ;;  %v14517_v19 = vld [vmem:[%s18719_s3 + $0x224] ss:$16 sps:$4 sm:$0xff]  }
 0x6d1   : > { %9193 = vmatprep.mubr.bf16.mxu1 %v14491_v54 }
 0x6d8   : > { %9194 = vmatmul.mubr.bf16.gmra.mrb[228].mxu1 %v14493_v51 }
 0x6d9   : > { %9201 = vmatprep.mubr.bf16.mxu1 %v14494_v35 }
 0x6e0   : > { %9202 = vmatmul.mubr.bf16.gmra.mrb[232].mxu1 %v14496_v57 }
 0x6e1   : > { %9209 = vmatprep.mubr.bf16.mxu1 %v14497_v8 }
 0x6e3   : > { %v11499_v21 = vpop.f32.mrb[128].mxu1 }
 0x6e4   : > { %v11500_v55 = vpop.f32.mrb[129].mxu1 }
 0x6e5   : > { %v18175_v41 = vadd.f32 %v11500_v55, %v11499_v21  ;;  %v11502_v38 = vpop.f32.mrb[130].mxu1  ;;  %v14515_v21 = vld [vmem:[%s18719_s3 + $0x220] ss:$16 sps:$4 sm:$0xff]   ;;  %v14520_v55 = vld [vmem:[%s18719_s3 + $0x244] ss:$16 sps:$4 sm:$0xff]  }
 0x6e6   : > { %v11503_v14 = vpop.f32.mrb[131].mxu1 }
 0x6e7   : > { %v18177_v23 = vadd.f32 %v11503_v14, %v11502_v38 }
 0x6e8   : > { %9210 = vmatmul.mubr.bf16.gmra.mrb[236].mxu1 %v14499_v13 }
 0x6e9   : > { %9217 = vmatprep.mubr.bf16.mxu1 %v14500_v32 }
 0x6eb   : > { %v11505_v60 = vpop.f32.mrb[132].mxu1 }
 0x6ec   : > { %v11506_v39 = vpop.f32.mrb[133].mxu1 }
 0x6ed   : > { %v18185_v49 = vadd.f32 %v11506_v39, %v11505_v60  ;;  %v11508_v24 = vpop.f32.mrb[134].mxu1 }
 0x6ee   : > { %v11509_v56 = vpop.f32.mrb[135].mxu1 }
 0x6ef   : > { %v18187_v5 = vadd.f32 %v11509_v56, %v11508_v24 }
 0x6f0   : > { %9218 = vmatmul.mubr.bf16.gmra.mrb[240].mxu1 %v14502_v17 }
 0x6f1   : > { %9225 = vmatprep.mubr.bf16.mxu1 %v14503_v3 }
 0x6f3   : > { %v11511_v53 = vpop.f32.mrb[136].mxu1 }
 0x6f4   : > { %v11512_v37 = vpop.f32.mrb[137].mxu1 }
 0x6f5   : > { %v18195_v34 = vadd.f32 %v11512_v37, %v11511_v53  ;;  %v11514_v27 = vpop.f32.mrb[138].mxu1 }
 0x6f6   : > { %v11515_v18 = vpop.f32.mrb[139].mxu1 }
 0x6f7   : > { %v18197_v47 = vadd.f32 %v11515_v18, %v11514_v27 }
 0x6f8   : > { %9226 = vmatmul.mubr.bf16.gmra.mrb[244].mxu1 %v14505_v9 }
 0x6f9   : > { %9233 = vmatprep.mubr.bf16.mxu1 %v14506_v36 }
 0x6fb   : > { %v11517_v28 = vpop.f32.mrb[140].mxu1 }
 0x6fc   : > { %v11518_v59 = vpop.f32.mrb[141].mxu1 }
 0x6fd   : > { %v18205_v11 = vadd.f32 %v11518_v59, %v11517_v28  ;;  %v11520_v6 = vpop.f32.mrb[142].mxu1  ;;  %v14527_v28 = vld [vmem:[%s18719_s3 + $0x2a0] ss:$16 sps:$4 sm:$0xff]  }
 0x6fe   : > { %v11521_v20 = vpop.f32.mrb[143].mxu1 }
 0x6ff   : > { %v18207_v0 = vadd.f32 %v11521_v20, %v11520_v6 }
 0x700   : > { %9234 = vmatmul.mubr.bf16.gmra.mrb[248].mxu1 %v14508_v63 }
 0x701   : > { %9241 = vmatprep.mubr.bf16.mxu1 %v14509_v44 }
 0x703   : > { %v11523_v4 = vpop.f32.mrb[144].mxu1 }
 0x704   : > { %v11524_v33 = vpop.f32.mrb[145].mxu1 }
 0x705   : > { %v18215_v30 = vadd.f32 %v11524_v33, %v11523_v4  ;;  %v11526_v52 = vpop.f32.mrb[146].mxu1 }
 0x706   : > { %v11527_v16 = vpop.f32.mrb[147].mxu1 }
 0x707   : > { %v18217_v62 = vadd.f32 %v11527_v16, %v11526_v52 }
 0x708   : > { %9242 = vmatmul.mubr.bf16.gmra.mrb[252].mxu1 %v14511_v40  ;;  %v14530_v40 = vld [vmem:[%s18719_s3 + $0x2c0] ss:$16 sps:$4 sm:$0xff]  }
 0x709   : > { %9667 = vmatprep.mubr.bf16.mxu1 %v14514_v61  ;;  %v14535_v61 = vld [vmem:[%s18719_s3 + $0x2e4] ss:$16 sps:$4 sm:$0xff]  }
 0x70b   : > { %v11529_v26 = vpop.f32.mrb[148].mxu1 }
 0x70c   : > { %v11530_v50 = vpop.f32.mrb[149].mxu1 }
 0x70d   : > { %v18225_v54 = vadd.f32 %v11530_v50, %v11529_v26  ;;  %v11532_v51 = vpop.f32.mrb[150].mxu1 }
 0x70e   : > { %v11533_v35 = vpop.f32.mrb[151].mxu1 }
 0x70f   : > { %v18227_v57 = vadd.f32 %v11533_v35, %v11532_v51  ;;  %v14538_v35 = vld [vmem:[%s18719_s3 + $0x304] ss:$16 sps:$4 sm:$0xff]  }
 0x710   : > { %9668 = vmatmul.mubr.bf16.vlgmr.msra.gmra.mrb[0].mxu1 %v14512_v12 }
 0x711   : > { %11820 = vmatpush3.bf16.msra.mxu1 %v17842_v10  ;;  %9675 = vmatprep.mubr.bf16.mxu1 %v14517_v19  ;;  %v14533_v19 = vld [vmem:[%s18719_s3 + $0x2e0] ss:$16 sps:$4 sm:$0xff]  }
 0x712   : > { %11821 = vmatprep.subr.bf16.mxu1 %v17970_v25 }
 0x713   : > { %v11535_v8 = vpop.f32.mrb[152].mxu1 }
 0x714   : > { %v11536_v13 = vpop.f32.mrb[153].mxu1 }
 0x715   : > { %11822 = vmatpush3.bf16.msra.mxu1 %v17836_v43  ;;  %v18238_v32 = vadd.f32 %v11536_v13, %v11535_v8  ;;  %v11538_v38 = vpop.f32.mrb[154].mxu1  ;;  %v14518_v43 = vld [vmem:[%s18719_s3 + $0x240] ss:$16 sps:$4 sm:$0xff]  }
 0x716   : > { %11823 = vmatprep.subr.bf16.mxu1 %v18012_v22  ;;  %v11539_v10 = vpop.f32.mrb[155].mxu1  ;;  %v14523_v22 = vld [vmem:[%s18719_s3 + $0x264] ss:$16 sps:$4 sm:$0xff]  }
 0x717   : > { %v18241_v14 = vadd.f32 %v11539_v10, %v11538_v38  ;;  %v14536_v10 = vld [vmem:[%s18719_s3 + $0x300] ss:$16 sps:$4 sm:$0xff]  }
 0x718   : > { %9676 = vmatmul.mubr.bf16.gmra.mrb[4].mxu1 %v14515_v21 }
 0x719   : > { %11824 = vmatpush3.bf16.msra.mxu1 %v17874_v2  ;;  %9683 = vmatprep.mubr.bf16.mxu1 %v14520_v55 }
 0x71a   : > { %11825 = vmatprep.subr.bf16.mxu1 %v18006_v58 }
 0x71b   : > { %v11541_v25 = vpop.f32.mrb[156].mxu1 }
 0x71c   : > { %v11542_v60 = vpop.f32.mrb[157].mxu1 }
 0x71d   : > { %11826 = vmatpush3.bf16.msra.mxu1 %v17868_v46  ;;  %v18252_v17 = vadd.f32 %v11542_v60, %v11541_v25  ;;  %v11544_v39 = vpop.f32.mrb[158].mxu1  ;;  %v14521_v46 = vld [vmem:[%s18719_s3 + $0x260] ss:$16 sps:$4 sm:$0xff]  }
 0x71e   : > { %11827 = vmatprep.subr.bf16.mxu1 %v18048_v42  ;;  %v11545_v2 = vpop.f32.mrb[159].mxu1  ;;  %v14526_v42 = vld [vmem:[%s18719_s3 + $0x284] ss:$16 sps:$4 sm:$0xff]  }
 0x71f   : > { %v18255_v3 = vadd.f32 %v11545_v2, %v11544_v39 }
 0x720   : > { %9684 = vmatmul.mubr.bf16.gmra.mrb[8].mxu1 %v14518_v43  ;;  %v14541_v43 = vld [vmem:[%s18719_s3 + $0x324] ss:$16 sps:$4 sm:$0xff]  }
 0x721   : > { %11828 = vmatpush3.bf16.msra.mxu1 %v17906_v7  ;;  %9691 = vmatprep.mubr.bf16.mxu1 %v14523_v22 }
 0x722   : > { %11829 = vmatprep.subr.bf16.mxu1 %v18042_v48 }
 0x723   : > { %v11547_v58 = vpop.f32.mrb[160].mxu1 }
 0x724   : > { %v11548_v24 = vpop.f32.mrb[161].mxu1 }
 0x725   : > { %11830 = vmatpush3.bf16.msra.mxu1 %v17900_v45  ;;  %v18266_v56 = vadd.f32 %v11548_v24, %v11547_v58  ;;  %v11550_v53 = vpop.f32.mrb[162].mxu1  ;;  %v14524_v45 = vld [vmem:[%s18719_s3 + $0x280] ss:$16 sps:$4 sm:$0xff]  }
 0x726   : > { %11831 = vmatprep.subr.bf16.mxu1 %v18080_v15  ;;  %v11551_v7 = vpop.f32.mrb[163].mxu1  ;;  %v14529_v15 = vld [vmem:[%s18719_s3 + $0x2a4] ss:$16 sps:$4 sm:$0xff]  }
 0x727   : > { %v18269_v9 = vadd.f32 %v11551_v7, %v11550_v53  ;;  %v14544_v7 = vld [vmem:[%s18719_s3 + $0x344] ss:$16 sps:$4 sm:$0xff]  }
 0x728   : > { %9692 = vmatmul.mubr.bf16.gmra.mrb[12].mxu1 %v14521_v46  ;;  %v14539_v46 = vld [vmem:[%s18719_s3 + $0x320] ss:$16 sps:$4 sm:$0xff]  }
 0x729   : > { %11832 = vmatpush3.bf16.msra.mxu1 %v17938_v1  ;;  %9699 = vmatprep.mubr.bf16.mxu1 %v14526_v42 }
 0x72a   : > { %11833 = vmatprep.subr.bf16.mxu1 %v18075_v29 }
 0x72b   : > { %v11553_v48 = vpop.f32.mrb[164].mxu1 }
 0x72c   : > { %v11554_v37 = vpop.f32.mrb[165].mxu1 }
 0x72d   : > { %11834 = vmatpush3.bf16.msra.mxu1 %v17932_v31  ;;  %v18280_v36 = vadd.f32 %v11554_v37, %v11553_v48  ;;  %v11556_v27 = vpop.f32.mrb[166].mxu1  ;;  %v14532_v31 = vld [vmem:[%s18719_s3 + $0x2c4] ss:$16 sps:$4 sm:$0xff]  }
 0x72e   : > { %v11557_v18 = vpop.f32.mrb[167].mxu1 }
 0x72f   : > { %v18282_v1 = vadd.f32 %v11557_v18, %v11556_v27 }
 0x730   : > { %9700 = vmatmul.mubr.bf16.gmra.mrb[16].mxu1 %v14524_v45 }
 0x731   : > { %9707 = vmatprep.mubr.bf16.mxu1 %v14529_v15  ;;  %v14542_v15 = vld [vmem:[%s18719_s3 + $0x340] ss:$16 sps:$4 sm:$0xff]  }
 0x733   : > { %v11559_v29 = vpop.f32.mrb[168].mxu1 }
 0x734   : > { %v11560_v63 = vpop.f32.mrb[169].mxu1 }
 0x735   : > { %v18290_v59 = vadd.f32 %v11560_v63, %v11559_v29  ;;  %v11562_v44 = vpop.f32.mrb[170].mxu1 }
 0x736   : > { %v11563_v6 = vpop.f32.mrb[171].mxu1 }
 0x737   : > { %v18292_v20 = vadd.f32 %v11563_v6, %v11562_v44 }
 0x738   : > { %9708 = vmatmul.mubr.bf16.gmra.mrb[20].mxu1 %v14527_v28  ;;  %v14547_v28 = vld [vmem:[%s18719_s3 + $0x364] ss:$16 sps:$4 sm:$0xff]  }
 0x739   : > { %9715 = vmatprep.mubr.bf16.mxu1 %v14532_v31 }
 0x73b   : > { %v11565_v4 = vpop.f32.mrb[172].mxu1 }
 0x73c   : > { %v11566_v33 = vpop.f32.mrb[173].mxu1 }
 0x73d   : > { %v18300_v52 = vadd.f32 %v11566_v33, %v11565_v4  ;;  %v11568_v16 = vpop.f32.mrb[174].mxu1  ;;  %v14545_v4 = vld [vmem:[%s18719_s3 + $0x360] ss:$16 sps:$4 sm:$0xff]  }
 0x73e   : > { %v11569_v26 = vpop.f32.mrb[175].mxu1 }
 0x73f   : > { %v18302_v12 = vadd.f32 %v11569_v26, %v11568_v16 }
 0x740   : > { %9716 = vmatmul.mubr.bf16.gmra.mrb[24].mxu1 %v14530_v40 }
 0x741   : > { %9723 = vmatprep.mubr.bf16.mxu1 %v14535_v61  ;;  %v14550_v61 = vld [vmem:[%s18719_s3 + $0x384] ss:$16 sps:$4 sm:$0xff]  }
 0x743   : > { %v11571_v50 = vpop.f32.mrb[176].mxu1 }
 0x744   : > { %v11572_v51 = vpop.f32.mrb[177].mxu1 }
 0x745   : > { %v18310_v8 = vadd.f32 %v11572_v51, %v11571_v50  ;;  %v11574_v21 = vpop.f32.mrb[178].mxu1 }
 0x746   : > { %v11575_v13 = vpop.f32.mrb[179].mxu1 }
 0x747   : > { %v18312_v55 = vadd.f32 %v11575_v13, %v11574_v21  ;;  %v14548_v21 = vld [vmem:[%s18719_s3 + $0x380] ss:$16 sps:$4 sm:$0xff]  }
 0x748   : > { %9724 = vmatmul.mubr.bf16.gmra.mrb[28].mxu1 %v14533_v19 }
 0x749   : > { %9731 = vmatprep.mubr.bf16.mxu1 %v14538_v35 }
 0x74b   : > { %v11577_v38 = vpop.f32.mrb[180].mxu1 }
 0x74c   : > { %v11578_v25 = vpop.f32.mrb[181].mxu1 }
 0x74d   : > { %v18320_v60 = vadd.f32 %v11578_v25, %v11577_v38  ;;  %v11580_v22 = vpop.f32.mrb[182].mxu1 }
 0x74e   : > { %v11581_v39 = vpop.f32.mrb[183].mxu1 }
 0x74f   : > { %v18322_v2 = vadd.f32 %v11581_v39, %v11580_v22 }
 0x750   : > { %9732 = vmatmul.mubr.bf16.gmra.mrb[32].mxu1 %v14536_v10  ;;  %v14553_v10 = vld [vmem:[%s18719_s3 + $0x3a4] ss:$16 sps:$4 sm:$0xff]  }
 0x751   : > { %9739 = vmatprep.mubr.bf16.mxu1 %v14541_v43 }
 0x753   : > { %v11583_v58 = vpop.f32.mrb[184].mxu1 }
 0x754   : > { %v11584_v24 = vpop.f32.mrb[185].mxu1 }
 0x755   : > { %v18327_v42 = vadd.f32 %v11584_v24, %v11583_v58  ;;  %v11586_v53 = vpop.f32.mrb[186].mxu1  ;;  %v14551_v58 = vld [vmem:[%s18719_s3 + $0x3a0] ss:$16 sps:$4 sm:$0xff]  }
 0x756   : > { %v11587_v48 = vpop.f32.mrb[187].mxu1 }
 0x757   : > { %v18332_v45 = vadd.f32 %v11587_v48, %v11586_v53  ;;  %v14556_v53 = vld [vmem:[%s18719_s3 + $0x3c4] ss:$16 sps:$4 sm:$0xff]  }
 0x758   : > { %9740 = vmatmul.mubr.bf16.gmra.mrb[36].mxu1 %v14539_v46 }
 0x759   : > { %9747 = vmatprep.mubr.bf16.mxu1 %v14544_v7 }
 0x75b   : > { %v11589_v37 = vpop.f32.mrb[188].mxu1 }
 0x75c   : > { %v11590_v27 = vpop.f32.mrb[189].mxu1 }
 0x75d   : > { %v18337_v18 = vadd.f32 %v11590_v27, %v11589_v37  ;;  %v11592_v29 = vpop.f32.mrb[190].mxu1  ;;  %v14554_v27 = vld [vmem:[%s18719_s3 + $0x3c0] ss:$16 sps:$4 sm:$0xff]  }
 0x75e   : > { %v11593_v63 = vpop.f32.mrb[191].mxu1 }
 0x75f   : > { %v18342_v31 = vadd.f32 %v11593_v63, %v11592_v29  ;;  %v14559_v63 = vld [vmem:[%s18719_s3 + $0x3e4] ss:$16 sps:$4 sm:$0xff]  }
 0x760   : > { %9748 = vmatmul.mubr.bf16.gmra.mrb[40].mxu1 %v14542_v15 }
 0x761   : > { %9755 = vmatprep.mubr.bf16.mxu1 %v14547_v28 }
 0x763   : > { %v11611_v44 = vpop.f32.mrb[192].mxu1 }
 0x764   : > { %v11612_v6 = vpop.f32.mrb[193].mxu1 }
 0x765   : > { %v11613_v40 = vadd.f32 %v11612_v6, %v11611_v44  ;;  %v11614_v33 = vpop.f32.mrb[194].mxu1 }
 0x766   : > { %v11615_v16 = vpop.f32.mrb[195].mxu1 }
 0x767   : > { %v18351_v26 = vadd.f32 %v11613_v40, %v18175_v41  ;;  %v11616_v50 = vadd.f32 %v11615_v16, %v11614_v33  ;;  %v14557_v33 = vld [vmem:[%s18719_s3 + $0x3e0] ss:$16 sps:$4 sm:$0xff]  }
 0x768   : > { %9756 = vmatmul.mubr.bf16.gmra.mrb[44].mxu1 %v14545_v4 }
 0x769   : > { %v18354_v19 = vadd.f32 %v11616_v50, %v18177_v23  ;;  %9763 = vmatprep.mubr.bf16.mxu1 %v14550_v61  ;;  %v14562_v50 = vld [vmem:[%s18719_s3 + $0x20c] ss:$16 sps:$4 sm:$0xff]  }
 0x76b   : > { %v11617_v51 = vpop.f32.mrb[196].mxu1 }
 0x76c   : > { %v11618_v35 = vpop.f32.mrb[197].mxu1 }
 0x76d   : > { %v11619_v13 = vadd.f32 %v11618_v35, %v11617_v51  ;;  %v11620_v38 = vpop.f32.mrb[198].mxu1 }
 0x76e   : > { %v11621_v41 = vpop.f32.mrb[199].mxu1 }
 0x76f   : > { %v18363_v25 = vadd.f32 %v11619_v13, %v18185_v49  ;;  %v11622_v43 = vadd.f32 %v11621_v41, %v11620_v38  ;;  %v14560_v38 = vld [vmem:[%s18719_s3 + $0x208] ss:$16 sps:$4 sm:$0xff]  }
 0x770   : > { %9764 = vmatmul.mubr.bf16.gmra.mrb[48].mxu1 %v14548_v21 }
 0x771   : > { %v18366_v23 = vadd.f32 %v11622_v43, %v18187_v5  ;;  %9771 = vmatprep.mubr.bf16.mxu1 %v14553_v10  ;;  %v14565_v43 = vld [vmem:[%s18719_s3 + $0x22c] ss:$16 sps:$4 sm:$0xff]  }
 0x773   : > { %v11623_v22 = vpop.f32.mrb[200].mxu1 }
 0x774   : > { %v11624_v39 = vpop.f32.mrb[201].mxu1 }
 0x775   : > { %v11625_v46 = vadd.f32 %v11624_v39, %v11623_v22  ;;  %v11626_v24 = vpop.f32.mrb[202].mxu1 }
 0x776   : > { %v11627_v49 = vpop.f32.mrb[203].mxu1 }
 0x777   : > { %v18375_v7 = vadd.f32 %v11625_v46, %v18195_v34  ;;  %v11628_v48 = vadd.f32 %v11627_v49, %v11626_v24  ;;  %v14563_v24 = vld [vmem:[%s18719_s3 + $0x228] ss:$16 sps:$4 sm:$0xff]  }
 0x778   : > { %9772 = vmatmul.mubr.bf16.gmra.mrb[52].mxu1 %v14551_v58 }
 0x779   : > { %v18378_v5 = vadd.f32 %v11628_v48, %v18197_v47  ;;  %9779 = vmatprep.mubr.bf16.mxu1 %v14556_v53  ;;  %v14568_v48 = vld [vmem:[%s18719_s3 + $0x24c] ss:$16 sps:$4 sm:$0xff]  }
 0x77b   : > { %v11629_v37 = vpop.f32.mrb[204].mxu1 }
 0x77c   : > { %v11630_v15 = vpop.f32.mrb[205].mxu1 }
 0x77d   : > { %v11631_v29 = vadd.f32 %v11630_v15, %v11629_v37  ;;  %v11632_v28 = vpop.f32.mrb[206].mxu1 }
 0x77e   : > { %v11633_v34 = vpop.f32.mrb[207].mxu1 }
 0x77f   : > { %v18387_v44 = vadd.f32 %v11631_v29, %v18205_v11  ;;  %v11634_v6 = vadd.f32 %v11633_v34, %v11632_v28  ;;  %v14566_v28 = vld [vmem:[%s18719_s3 + $0x248] ss:$16 sps:$4 sm:$0xff]  }
 0x780   : > { %9780 = vmatmul.mubr.bf16.gmra.mrb[56].mxu1 %v14554_v27 }
 0x781   : > { %v18390_v47 = vadd.f32 %v11634_v6, %v18207_v0  ;;  %9787 = vmatprep.mubr.bf16.mxu1 %v14559_v63  ;;  %v14571_v6 = vld [vmem:[%s18719_s3 + $0x26c] ss:$16 sps:$4 sm:$0xff]  }
 0x783   : > { %v11635_v4 = vpop.f32.mrb[208].mxu1 }
 0x784   : > { %v11636_v40 = vpop.f32.mrb[209].mxu1 }
 0x785   : > { %v11637_v61 = vadd.f32 %v11636_v40, %v11635_v4  ;;  %v11638_v16 = vpop.f32.mrb[210].mxu1 }
 0x786   : > { %v11639_v11 = vpop.f32.mrb[211].mxu1 }
 0x787   : > { %v18399_v51 = vadd.f32 %v11637_v61, %v18215_v30  ;;  %v11640_v35 = vadd.f32 %v11639_v11, %v11638_v16  ;;  %v14569_v16 = vld [vmem:[%s18719_s3 + $0x268] ss:$16 sps:$4 sm:$0xff]  }
 0x788   : > { %9788 = vmatmul.mubr.bf16.gmra.mrb[60].mxu1 %v14557_v33 }
 0x789   : > { %v18402_v0 = vadd.f32 %v11640_v35, %v18217_v62  ;;  %9828 = vmatprep.mubr.bf16.mxu1 %v14562_v50  ;;  %v14574_v35 = vld [vmem:[%s18719_s3 + $0x28c] ss:$16 sps:$4 sm:$0xff]  }
 0x78b   : > { %v11641_v21 = vpop.f32.mrb[212].mxu1 }
 0x78c   : > { %v11642_v13 = vpop.f32.mrb[213].mxu1 }
 0x78d   : > { %v11643_v10 = vadd.f32 %v11642_v13, %v11641_v21  ;;  %v11644_v41 = vpop.f32.mrb[214].mxu1 }
 0x78e   : > { %v11645_v30 = vpop.f32.mrb[215].mxu1 }
 0x78f   : > { %v18411_v22 = vadd.f32 %v11643_v10, %v18225_v54  ;;  %v11646_v39 = vadd.f32 %v11645_v30, %v11644_v41  ;;  %v14572_v41 = vld [vmem:[%s18719_s3 + $0x288] ss:$16 sps:$4 sm:$0xff]  }
 0x790   : > { %9829 = vmatmul.mubr.bf16.vlgmr.msra.gmra.mrb[64].mxu1 %v14560_v38 }
 0x791   : > { %v18414_v62 = vadd.f32 %v11646_v39, %v18227_v57  ;;  %9836 = vmatprep.mubr.bf16.mxu1 %v14565_v43  ;;  %v14577_v39 = vld [vmem:[%s18719_s3 + $0x2ac] ss:$16 sps:$4 sm:$0xff]  }
 0x793   : > { %v11647_v58 = vpop.f32.mrb[216].mxu1 }
 0x794   : > { %v11648_v46 = vpop.f32.mrb[217].mxu1 }
 0x795   : > { %v11649_v53 = vadd.f32 %v11648_v46, %v11647_v58  ;;  %v11650_v49 = vpop.f32.mrb[218].mxu1 }
 0x796   : > { %v11651_v54 = vpop.f32.mrb[219].mxu1 }
 0x797   : > { %v18423_v37 = vadd.f32 %v11649_v53, %v18238_v32  ;;  %v11652_v15 = vadd.f32 %v11651_v54, %v11650_v49  ;;  %v14575_v49 = vld [vmem:[%s18719_s3 + $0x2a8] ss:$16 sps:$4 sm:$0xff]  }
 0x798   : > { %9837 = vmatmul.mubr.bf16.gmra.mrb[68].mxu1 %v14563_v24 }
 0x799   : > { %v18426_v57 = vadd.f32 %v11652_v15, %v18241_v14  ;;  %9844 = vmatprep.mubr.bf16.mxu1 %v14568_v48  ;;  %v14580_v15 = vld [vmem:[%s18719_s3 + $0x2cc] ss:$16 sps:$4 sm:$0xff]  }
 0x79b   : > { %v11653_v27 = vpop.f32.mrb[220].mxu1 }
 0x79c   : > { %v11654_v29 = vpop.f32.mrb[221].mxu1 }
 0x79d   : > { %v11655_v63 = vadd.f32 %v11654_v29, %v11653_v27  ;;  %v11656_v34 = vpop.f32.mrb[222].mxu1 }
 0x79e   : > { %v11657_v32 = vpop.f32.mrb[223].mxu1 }
 0x79f   : > { %v18435_v4 = vadd.f32 %v11655_v63, %v18252_v17  ;;  %v11658_v40 = vadd.f32 %v11657_v32, %v11656_v34  ;;  %v14578_v34 = vld [vmem:[%s18719_s3 + $0x2c8] ss:$16 sps:$4 sm:$0xff]  }
 0x7a0   : > { %9845 = vmatmul.mubr.bf16.gmra.mrb[72].mxu1 %v14566_v28 }
 0x7a1   : > { %v18438_v14 = vadd.f32 %v11658_v40, %v18255_v3  ;;  %9852 = vmatprep.mubr.bf16.mxu1 %v14571_v6  ;;  %v14583_v40 = vld [vmem:[%s18719_s3 + $0x2ec] ss:$16 sps:$4 sm:$0xff]  }
 0x7a3   : > { %v11659_v33 = vpop.f32.mrb[224].mxu1 }
 0x7a4   : > { %v11660_v61 = vpop.f32.mrb[225].mxu1 }
 0x7a5   : > { %v11661_v50 = vadd.f32 %v11660_v61, %v11659_v33  ;;  %v11662_v11 = vpop.f32.mrb[226].mxu1 }
 0x7a6   : > { %v11663_v17 = vpop.f32.mrb[227].mxu1 }
 0x7a7   : > { %v18447_v21 = vadd.f32 %v11661_v50, %v18266_v56  ;;  %v11664_v13 = vadd.f32 %v11663_v17, %v11662_v11  ;;  %v14581_v11 = vld [vmem:[%s18719_s3 + $0x2e8] ss:$16 sps:$4 sm:$0xff]  }
 0x7a8   : > { %9853 = vmatmul.mubr.bf16.gmra.mrb[76].mxu1 %v14569_v16 }
 0x7a9   : > { %v18450_v3 = vadd.f32 %v11664_v13, %v18269_v9  ;;  %9860 = vmatprep.mubr.bf16.mxu1 %v14574_v35  ;;  %v14586_v13 = vld [vmem:[%s18719_s3 + $0x30c] ss:$16 sps:$4 sm:$0xff]  }
 0x7ab   : > { %v11665_v38 = vpop.f32.mrb[228].mxu1 }
 0x7ac   : > { %v11666_v10 = vpop.f32.mrb[229].mxu1 }
 0x7ad   : > { %v11667_v43 = vadd.f32 %v11666_v10, %v11665_v38  ;;  %v11668_v30 = vpop.f32.mrb[230].mxu1 }
 0x7ae   : > { %v11669_v56 = vpop.f32.mrb[231].mxu1 }
 0x7af   : > { %v18459_v58 = vadd.f32 %v11667_v43, %v18280_v36  ;;  %v11670_v46 = vadd.f32 %v11669_v56, %v11668_v30  ;;  %v14584_v30 = vld [vmem:[%s18719_s3 + $0x308] ss:$16 sps:$4 sm:$0xff]  }
 0x7b0   : > { %9861 = vmatmul.mubr.bf16.gmra.mrb[80].mxu1 %v14572_v41 }
 0x7b1   : > { %v18462_v9 = vadd.f32 %v11670_v46, %v18282_v1  ;;  %9868 = vmatprep.mubr.bf16.mxu1 %v14577_v39  ;;  %v14589_v46 = vld [vmem:[%s18719_s3 + $0x32c] ss:$16 sps:$4 sm:$0xff]  }
 0x7b3   : > { %v11671_v24 = vpop.f32.mrb[232].mxu1 }
 0x7b4   : > { %v11672_v53 = vpop.f32.mrb[233].mxu1 }
 0x7b5   : > { %v11673_v48 = vadd.f32 %v11672_v53, %v11671_v24  ;;  %v11674_v54 = vpop.f32.mrb[234].mxu1 }
 0x7b6   : > { %v11675_v36 = vpop.f32.mrb[235].mxu1 }
 0x7b7   : > { %v18471_v27 = vadd.f32 %v11673_v48, %v18290_v59  ;;  %v11676_v29 = vadd.f32 %v11675_v36, %v11674_v54  ;;  %v14587_v54 = vld [vmem:[%s18719_s3 + $0x328] ss:$16 sps:$4 sm:$0xff]  }
 0x7b8   : > { %9869 = vmatmul.mubr.bf16.gmra.mrb[84].mxu1 %v14575_v49 }
 0x7b9   : > { %v18474_v1 = vadd.f32 %v11676_v29, %v18292_v20  ;;  %9876 = vmatprep.mubr.bf16.mxu1 %v14580_v15  ;;  %v14592_v29 = vld [vmem:[%s18719_s3 + $0x34c] ss:$16 sps:$4 sm:$0xff]  }
 0x7bb   : > { %v11677_v28 = vpop.f32.mrb[236].mxu1 }
 0x7bc   : > { %v11678_v63 = vpop.f32.mrb[237].mxu1 }
 0x7bd   : > { %v11679_v6 = vadd.f32 %v11678_v63, %v11677_v28  ;;  %v11680_v32 = vpop.f32.mrb[238].mxu1 }
 0x7be   : > { %v11681_v59 = vpop.f32.mrb[239].mxu1 }
 0x7bf   : > { %v18483_v33 = vadd.f32 %v11679_v6, %v18300_v52  ;;  %v11682_v61 = vadd.f32 %v11681_v59, %v11680_v32  ;;  %v14590_v32 = vld [vmem:[%s18719_s3 + $0x348] ss:$16 sps:$4 sm:$0xff]  }
 0x7c0   : > { %9877 = vmatmul.mubr.bf16.gmra.mrb[88].mxu1 %v14578_v34 }
 0x7c1   : > { %v18486_v20 = vadd.f32 %v11682_v61, %v18302_v12  ;;  %9884 = vmatprep.mubr.bf16.mxu1 %v14583_v40  ;;  %v14595_v61 = vld [vmem:[%s18719_s3 + $0x36c] ss:$16 sps:$4 sm:$0xff]  }
 0x7c3   : > { %20030 = vst [vmem:[#allocation79_spill] sm:$0xff] %v18486_v20  ;;  %v11683_v16 = vpop.f32.mrb[240].mxu1 }
 0x7c4   : > { %v11684_v50 = vpop.f32.mrb[241].mxu1 }
 0x7c5   : > { %v11685_v35 = vadd.f32 %v11684_v50, %v11683_v16  ;;  %v11686_v17 = vpop.f32.mrb[242].mxu1 }
 0x7c6   : > { %v11687_v52 = vpop.f32.mrb[243].mxu1 }
 0x7c7   : > { %v18495_v38 = vadd.f32 %v11685_v35, %v18310_v8  ;;  %v11688_v10 = vadd.f32 %v11687_v52, %v11686_v17  ;;  %v14593_v35 = vld [vmem:[%s18719_s3 + $0x368] ss:$16 sps:$4 sm:$0xff]  }
 0x7c8   : > { %9885 = vmatmul.mubr.bf16.gmra.mrb[92].mxu1 %v14581_v11 }
 0x7c9   : > { %20031 = vst [vmem:[#allocation83_spill] sm:$0xff] %v18495_v38  ;;  %v18498_v12 = vadd.f32 %v11688_v10, %v18312_v55  ;;  %9892 = vmatprep.mubr.bf16.mxu1 %v14586_v13  ;;  %v14598_v13 = vld [vmem:[%s18719_s3 + $0x38c] ss:$16 sps:$4 sm:$0xff]  }
 0x7cb   : > { %20032 = vst [vmem:[#allocation84_spill] sm:$0xff] %v18498_v12  ;;  %v11689_v41 = vpop.f32.mrb[244].mxu1 }
 0x7cc   : > { %v11690_v43 = vpop.f32.mrb[245].mxu1 }
 0x7cd   : > { %v11691_v39 = vadd.f32 %v11690_v43, %v11689_v41  ;;  %v11692_v56 = vpop.f32.mrb[246].mxu1  ;;  %v14596_v43 = vld [vmem:[%s18719_s3 + $0x388] ss:$16 sps:$4 sm:$0xff]  }
 0x7ce   : > { %v11693_v8 = vpop.f32.mrb[247].mxu1 }
 0x7cf   : > { %v18507_v24 = vadd.f32 %v11691_v39, %v18320_v60  ;;  %v11694_v53 = vadd.f32 %v11693_v8, %v11692_v56  ;;  %v14601_v39 = vld [vmem:[%s18719_s3 + $0x3ac] ss:$16 sps:$4 sm:$0xff]  }
 0x7d0   : > { %9893 = vmatmul.mubr.bf16.gmra.mrb[96].mxu1 %v14584_v30 }
 0x7d1   : > { %20033 = vst [vmem:[#allocation88_spill] sm:$0xff] %v18507_v24  ;;  %v18510_v55 = vadd.f32 %v11694_v53, %v18322_v2  ;;  %9900 = vmatprep.mubr.bf16.mxu1 %v14589_v46 }
 0x7d3   : > { %20034 = vst [vmem:[#allocation89_spill] sm:$0xff] %v18510_v55  ;;  %v11695_v49 = vpop.f32.mrb[248].mxu1 }
 0x7d4   : > { %v11696_v48 = vpop.f32.mrb[249].mxu1 }
 0x7d5   : > { %v11697_v15 = vadd.f32 %v11696_v48, %v11695_v49  ;;  %v11698_v36 = vpop.f32.mrb[250].mxu1  ;;  %v14599_v48 = vld [vmem:[%s18719_s3 + $0x3a8] ss:$16 sps:$4 sm:$0xff]  }
 0x7d6   : > { %v11699_v60 = vpop.f32.mrb[251].mxu1 }
 0x7d7   : > { %v18519_v28 = vadd.f32 %v11697_v15, %v18327_v42  ;;  %v11700_v63 = vadd.f32 %v11699_v60, %v11698_v36  ;;  %v14604_v15 = vld [vmem:[%s18719_s3 + $0x3cc] ss:$16 sps:$4 sm:$0xff]  }
 0x7d8   : > { %9901 = vmatmul.mubr.bf16.gmra.mrb[100].mxu1 %v14587_v54 }
 0x7d9   : > { %20035 = vst [vmem:[#allocation93_spill] sm:$0xff] %v18519_v28  ;;  %v18522_v2 = vadd.f32 %v11700_v63, %v18332_v45  ;;  %9908 = vmatprep.mubr.bf16.mxu1 %v14592_v29 }
 0x7db   : > { %20036 = vst [vmem:[#allocation94_spill] sm:$0xff] %v18522_v2  ;;  %v11701_v34 = vpop.f32.mrb[252].mxu1 }
 0x7dc   : > { %v11702_v6 = vpop.f32.mrb[253].mxu1 }
 0x7dd   : > { %v11703_v40 = vadd.f32 %v11702_v6, %v11701_v34  ;;  %v11704_v59 = vpop.f32.mrb[254].mxu1  ;;  %v14602_v6 = vld [vmem:[%s18719_s3 + $0x3c8] ss:$16 sps:$4 sm:$0xff]  }
 0x7de   : > { %v11705_v42 = vpop.f32.mrb[255].mxu1 }
 0x7df   : > { %v18531_v16 = vadd.f32 %v11703_v40, %v18337_v18  ;;  %v11706_v50 = vadd.f32 %v11705_v42, %v11704_v59  ;;  %v14607_v40 = vld [vmem:[%s18719_s3 + $0x3ec] ss:$16 sps:$4 sm:$0xff]  }
 0x7e0   : > { %9909 = vmatmul.mubr.bf16.gmra.mrb[104].mxu1 %v14590_v32 }
 0x7e1   : > { %20037 = vst [vmem:[#allocation98_spill] sm:$0xff] %v18531_v16  ;;  %v18534_v45 = vadd.f32 %v11706_v50, %v18342_v31  ;;  %9916 = vmatprep.mubr.bf16.mxu1 %v14595_v61 }
 0x7e3   : > { %20038 = vst [vmem:[#allocation99_spill] sm:$0xff] %v18534_v45  ;;  %v11723_v11 = vpop.f32.mrb[0].mxu1 }
 0x7e4   : > { %v11724_v17 = vpop.f32.mrb[1].mxu1 }
 0x7e5   : > { %v18542_v52 = vadd.f32 %v11724_v17, %v11723_v11  ;;  %v11726_v18 = vpop.f32.mrb[2].mxu1 }
 0x7e6   : > { %v11727_v10 = vpop.f32.mrb[3].mxu1 }
 0x7e7   : > { %v18544_v41 = vadd.f32 %v11727_v10, %v11726_v18 }
 0x7e8   : > { %9917 = vmatmul.mubr.bf16.gmra.mrb[108].mxu1 %v14593_v35  ;;  %v14605_v35 = vld [vmem:[%s18719_s3 + $0x3e8] ss:$16 sps:$4 sm:$0xff]  }
 0x7e9   : > { %9924 = vmatprep.mubr.bf16.mxu1 %v14598_v13 }
 0x7eb   : > { %v11729_v31 = vpop.f32.mrb[4].mxu1 }
 0x7ec   : > { %v11730_v30 = vpop.f32.mrb[5].mxu1 }
 0x7ed   : > { %v18552_v56 = vadd.f32 %v11730_v30, %v11729_v31  ;;  %v11732_v46 = vpop.f32.mrb[6].mxu1 }
 0x7ee   : > { %v11733_v8 = vpop.f32.mrb[7].mxu1 }
 0x7ef   : > { %v18554_v53 = vadd.f32 %v11733_v8, %v11732_v46 }
 0x7f0   : > { %9925 = vmatmul.mubr.bf16.gmra.mrb[112].mxu1 %v14596_v43 }
 0x7f1   : > { %9932 = vmatprep.mubr.bf16.mxu1 %v14601_v39 }
 0x7f3   : > { %v11735_v49 = vpop.f32.mrb[8].mxu1 }
 0x7f4   : > { %v11736_v54 = vpop.f32.mrb[9].mxu1 }
 0x7f5   : > { %v18562_v36 = vadd.f32 %v11736_v54, %v11735_v49  ;;  %v11738_v29 = vpop.f32.mrb[10].mxu1 }
 0x7f6   : > { %v11739_v60 = vpop.f32.mrb[11].mxu1 }
 0x7f7   : > { %v18564_v63 = vadd.f32 %v11739_v60, %v11738_v29 }
 0x7f8   : > { %9933 = vmatmul.mubr.bf16.gmra.mrb[116].mxu1 %v14599_v48 }
 0x7f9   : > { %9940 = vmatprep.mubr.bf16.mxu1 %v14604_v15 }
 0x7fb   : > { %v11741_v34 = vpop.f32.mrb[12].mxu1 }
 0x7fc   : > { %v11742_v32 = vpop.f32.mrb[13].mxu1 }
 0x7fd   : > { %v18572_v59 = vadd.f32 %v11742_v32, %v11741_v34  ;;  %v11744_v61 = vpop.f32.mrb[14].mxu1 }
 0x7fe   : > { %v11745_v42 = vpop.f32.mrb[15].mxu1 }
 0x7ff   : > { %v18574_v50 = vadd.f32 %v11745_v42, %v11744_v61 }
 0x800   : > { %9941 = vmatmul.mubr.bf16.gmra.mrb[120].mxu1 %v14602_v6 }
 0x801   : > { %9948 = vmatprep.mubr.bf16.mxu1 %v14607_v40 }
 0x803   : > { %v11747_v11 = vpop.f32.mrb[16].mxu1 }
 0x804   : > { %v11748_v17 = vpop.f32.mrb[17].mxu1 }
 0x805   : > { %v18579_v13 = vadd.f32 %v11748_v17, %v11747_v11  ;;  %v11750_v18 = vpop.f32.mrb[18].mxu1 }
 0x806   : > { %v11751_v10 = vpop.f32.mrb[19].mxu1 }
 0x807   : > { %v18581_v31 = vadd.f32 %v11751_v10, %v11750_v18 }
 0x808   : > { %9949 = vmatmul.mubr.bf16.gmra.mrb[124].mxu1 %v14605_v35 }
 0x80b   : > { %v11753_v43 = vpop.f32.mrb[20].mxu1 }
 0x80c   : > { %v11754_v30 = vpop.f32.mrb[21].mxu1 }
 0x80d   : > { %v18583_v39 = vadd.f32 %v11754_v30, %v11753_v43  ;;  %v11756_v46 = vpop.f32.mrb[22].mxu1 }
 0x80e   : > { %v11757_v8 = vpop.f32.mrb[23].mxu1 }
 0x80f   : > { %v18585_v49 = vadd.f32 %v11757_v8, %v11756_v46 }
 0x813   : > { %v11759_v48 = vpop.f32.mrb[24].mxu1 }
 0x814   : > { %v11760_v54 = vpop.f32.mrb[25].mxu1 }
 0x815   : > { %v18587_v15 = vadd.f32 %v11760_v54, %v11759_v48  ;;  %v11762_v29 = vpop.f32.mrb[26].mxu1 }
 0x816   : > { %v11763_v60 = vpop.f32.mrb[27].mxu1 }
 0x817   : > { %v18589_v34 = vadd.f32 %v11763_v60, %v11762_v29 }
 0x81b   : > { %v11765_v6 = vpop.f32.mrb[28].mxu1 }
 0x81c   : > { %v11766_v32 = vpop.f32.mrb[29].mxu1 }
 0x81d   : > { %v18591_v40 = vadd.f32 %v11766_v32, %v11765_v6  ;;  %v11768_v61 = vpop.f32.mrb[30].mxu1 }
 0x81e   : > { %v11769_v42 = vpop.f32.mrb[31].mxu1 }
 0x81f   : > { %v18593_v11 = vadd.f32 %v11769_v42, %v11768_v61 }
 0x823   : > { %v11771_v35 = vpop.f32.mrb[32].mxu1 }
 0x824   : > { %v11772_v17 = vpop.f32.mrb[33].mxu1 }
 0x825   : > { %v18595_v18 = vadd.f32 %v11772_v17, %v11771_v35  ;;  %v11774_v10 = vpop.f32.mrb[34].mxu1 }
 0x826   : > { %v11775_v43 = vpop.f32.mrb[35].mxu1 }
 0x827   : > { %v18597_v30 = vadd.f32 %v11775_v43, %v11774_v10 }
 0x82b   : > { %v11777_v46 = vpop.f32.mrb[36].mxu1 }
 0x82c   : > { %v11778_v8 = vpop.f32.mrb[37].mxu1 }
 0x82d   : > { %v18599_v48 = vadd.f32 %v11778_v8, %v11777_v46  ;;  %v11780_v54 = vpop.f32.mrb[38].mxu1 }
 0x82e   : > { %v11781_v29 = vpop.f32.mrb[39].mxu1 }
 0x82f   : > { %v18601_v60 = vadd.f32 %v11781_v29, %v11780_v54 }
 0x833   : > { %v11783_v6 = vpop.f32.mrb[40].mxu1 }
 0x834   : > { %v11784_v32 = vpop.f32.mrb[41].mxu1 }
 0x835   : > { %v18603_v61 = vadd.f32 %v11784_v32, %v11783_v6  ;;  %v11786_v42 = vpop.f32.mrb[42].mxu1 }
 0x836   : > { %v11787_v45 = vpop.f32.mrb[43].mxu1 }
 0x837   : > { %v18605_v35 = vadd.f32 %v11787_v45, %v11786_v42 }
 0x83b   : > { %v11789_v17 = vpop.f32.mrb[44].mxu1 }
 0x83c   : > { %v11790_v16 = vpop.f32.mrb[45].mxu1 }
 0x83d   : > { %v18607_v10 = vadd.f32 %v11790_v16, %v11789_v17  ;;  %v11792_v43 = vpop.f32.mrb[46].mxu1 }
 0x83e   : > { %v11793_v2 = vpop.f32.mrb[47].mxu1 }
 0x83f   : > { %v18609_v46 = vadd.f32 %v11793_v2, %v11792_v43 }
 0x843   : > { %v11795_v8 = vpop.f32.mrb[48].mxu1 }
 0x844   : > { %v11796_v28 = vpop.f32.mrb[49].mxu1 }
 0x845   : > { %v18611_v54 = vadd.f32 %v11796_v28, %v11795_v8  ;;  %v11798_v29 = vpop.f32.mrb[50].mxu1 }
 0x846   : > { %v11799_v55 = vpop.f32.mrb[51].mxu1 }
 0x847   : > { %20039 = vst [vmem:[#allocation103_spill] sm:$0xff] %v18611_v54  ;;  %v18613_v6 = vadd.f32 %v11799_v55, %v11798_v29 }
 0x849   : > { %20040 = vst [vmem:[#allocation104_spill] sm:$0xff] %v18613_v6 }
 0x84b   : > { %v11801_v32 = vpop.f32.mrb[52].mxu1 }
 0x84c   : > { %v11802_v24 = vpop.f32.mrb[53].mxu1 }
 0x84d   : > { %v18615_v45 = vadd.f32 %v11802_v24, %v11801_v32  ;;  %v11804_v42 = vpop.f32.mrb[54].mxu1 }
 0x84e   : > { %v11805_v16 = vpop.f32.mrb[55].mxu1 }
 0x84f   : > { %v18617_v17 = vadd.f32 %v11805_v16, %v11804_v42 }
 0x851   : > { %20041 = vst [vmem:[#allocation108_spill] sm:$0xff] %v18617_v17 }
 0x853   : > { %v11807_v12 = vpop.f32.mrb[56].mxu1 }
 0x854   : > { %v11808_v2 = vpop.f32.mrb[57].mxu1 }
 0x855   : > { %v18619_v43 = vadd.f32 %v11808_v2, %v11807_v12  ;;  %v11810_v38 = vpop.f32.mrb[58].mxu1 }
 0x856   : > { %v11811_v28 = vpop.f32.mrb[59].mxu1 }
 0x857   : > { %v18621_v8 = vadd.f32 %v11811_v28, %v11810_v38 }
 0x85b   : > { %v11813_v54 = vpop.f32.mrb[60].mxu1 }
 0x85c   : > { %v11814_v55 = vpop.f32.mrb[61].mxu1 }
 0x85d   : > { %v18623_v29 = vadd.f32 %v11814_v55, %v11813_v54  ;;  %v11816_v6 = vpop.f32.mrb[62].mxu1 }
 0x85e   : > { %v11817_v20 = vpop.f32.mrb[63].mxu1 }
 0x85f   : > { %20042 = vst [vmem:[#allocation109_spill] sm:$0xff] %v18623_v29  ;;  %v18626_v24 = vadd.f32 %v11817_v20, %v11816_v6 }
 0x863   : > { %v11835_v32 = vpop.f32.mrb[64].mxu1 }
 0x864   : > { %v11836_v42 = vpop.f32.mrb[65].mxu1 }
 0x865   : > { %v11837_v16 = vadd.f32 %v11836_v42, %v11835_v32  ;;  %v11838_v17 = vpop.f32.mrb[66].mxu1 }
 0x866   : > { %v11839_v12 = vpop.f32.mrb[67].mxu1 }
 0x867   : > { %v9831_v2 = vadd.f32 %v11837_v16, %v18542_v52  ;;  %v11840_v38 = vadd.f32 %v11839_v12, %v11838_v17 }
 0x869   : > { %v9957_v28 = vmax.f32 %v18351_v26, %v9831_v2  ;;  %v9834_v54 = vadd.f32 %v11840_v38, %v18544_v41 }
 0x86b   : > { %v9958_v55 = vmax.f32 %v18354_v19, %v9834_v54  ;;  %v11841_v29 = vpop.f32.mrb[68].mxu1 }
 0x86c   : > { %v11842_v20 = vpop.f32.mrb[69].mxu1 }
 0x86d   : > { %v10743_v6 = vpack.c.bf16 %v9958_v55, %v9957_v28  ;;  %v11843_v32 = vadd.f32 %v11842_v20, %v11841_v29  ;;  %v11844_v52 = vpop.f32.mrb[70].mxu1 }
 0x86e   : > { %v11845_v17 = vpop.f32.mrb[71].mxu1 }
 0x86f   : > { %10744 = vst [vmem:[%s18635_s19] sm:$0xff] %v10743_v6   ;;  %v9839_v26 = vadd.f32 %v11843_v32, %v18552_v56  ;;  %v11846_v42 = vadd.f32 %v11845_v17, %v11844_v52 }
 0x871   : > { %v9959_v41 = vmax.f32 %v18363_v25, %v9839_v26  ;;  %v9842_v19 = vadd.f32 %v11846_v42, %v18554_v53 }
 0x873   : > { %v9960_v16 = vmax.f32 %v18366_v23, %v9842_v19  ;;  %v11847_v12 = vpop.f32.mrb[72].mxu1 }
 0x874   : > { %v11848_v2 = vpop.f32.mrb[73].mxu1 }
 0x875   : > { %v10748_v38 = vpack.c.bf16 %v9960_v16, %v9959_v41  ;;  %v11849_v54 = vadd.f32 %v11848_v2, %v11847_v12  ;;  %v11850_v28 = vpop.f32.mrb[74].mxu1 }
 0x876   : > { %v11851_v55 = vpop.f32.mrb[75].mxu1 }
 0x877   : > { %10820 = vst [vmem:[%s18635_s19 + $0x8] sm:$0xff] %v10748_v38   ;;  %v9847_v29 = vadd.f32 %v11849_v54, %v18562_v36  ;;  %v11852_v20 = vadd.f32 %v11851_v55, %v11850_v28 }
 0x879   : > { %v9961_v56 = vmax.f32 %v18375_v7, %v9847_v29  ;;  %v9850_v6 = vadd.f32 %v11852_v20, %v18564_v63 }
 0x87b   : > { %v9962_v25 = vmax.f32 %v18378_v5, %v9850_v6  ;;  %v11853_v53 = vpop.f32.mrb[76].mxu1 }
 0x87c   : > { %v11854_v32 = vpop.f32.mrb[77].mxu1 }
 0x87d   : > { %v10753_v23 = vpack.c.bf16 %v9962_v25, %v9961_v56  ;;  %v11855_v52 = vadd.f32 %v11854_v32, %v11853_v53  ;;  %v11856_v17 = vpop.f32.mrb[78].mxu1 }
 0x87e   : > { %v11857_v26 = vpop.f32.mrb[79].mxu1 }
 0x87f   : > { %10821 = vst [vmem:[%s18635_s19 + $0x10] sm:$0xff] %v10753_v23   ;;  %v9855_v42 = vadd.f32 %v11855_v52, %v18572_v59  ;;  %v11858_v41 = vadd.f32 %v11857_v26, %v11856_v17 }
 0x881   : > { %v9963_v36 = vmax.f32 %v18387_v44, %v9855_v42  ;;  %v9858_v19 = vadd.f32 %v11858_v41, %v18574_v50 }
 0x883   : > { %v9964_v7 = vmax.f32 %v18390_v47, %v9858_v19  ;;  %v11859_v63 = vpop.f32.mrb[80].mxu1 }
 0x884   : > { %v11860_v16 = vpop.f32.mrb[81].mxu1 }
 0x885   : > { %v10758_v5 = vpack.c.bf16 %v9964_v7, %v9963_v36  ;;  %v11861_v12 = vadd.f32 %v11860_v16, %v11859_v63  ;;  %v11862_v2 = vpop.f32.mrb[82].mxu1 }
 0x886   : > { %v11863_v38 = vpop.f32.mrb[83].mxu1 }
 0x887   : > { %10822 = vst [vmem:[%s18635_s19 + $0x18] sm:$0xff] %v10758_v5   ;;  %v9863_v54 = vadd.f32 %v11861_v12, %v18579_v13  ;;  %v11864_v28 = vadd.f32 %v11863_v38, %v11862_v2 }
 0x889   : > { %v9965_v59 = vmax.f32 %v18399_v51, %v9863_v54  ;;  %v9866_v55 = vadd.f32 %v11864_v28, %v18581_v31 }
 0x88b   : > { %v9966_v44 = vmax.f32 %v18402_v0, %v9866_v55  ;;  %v11865_v50 = vpop.f32.mrb[84].mxu1 }
 0x88c   : > { %v11866_v29 = vpop.f32.mrb[85].mxu1 }
 0x88d   : > { %v10763_v47 = vpack.c.bf16 %v9966_v44, %v9965_v59  ;;  %v11867_v20 = vadd.f32 %v11866_v29, %v11865_v50  ;;  %v11868_v56 = vpop.f32.mrb[86].mxu1 }
 0x88e   : > { %v11869_v6 = vpop.f32.mrb[87].mxu1 }
 0x88f   : > { %10823 = vst [vmem:[%s18635_s19 + $0x20] sm:$0xff] %v10763_v47   ;;  %v9871_v25 = vadd.f32 %v11867_v20, %v18583_v39  ;;  %v11870_v53 = vadd.f32 %v11869_v6, %v11868_v56 }
 0x891   : > { %v9967_v13 = vmax.f32 %v18411_v22, %v9871_v25  ;;  %v9874_v32 = vadd.f32 %v11870_v53, %v18585_v49 }
 0x893   : > { %v9968_v51 = vmax.f32 %v18414_v62, %v9874_v32  ;;  %v11871_v31 = vpop.f32.mrb[88].mxu1 }
 0x894   : > { %v11872_v23 = vpop.f32.mrb[89].mxu1 }
 0x895   : > { %v10768_v0 = vpack.c.bf16 %v9968_v51, %v9967_v13  ;;  %v11873_v52 = vadd.f32 %v11872_v23, %v11871_v31  ;;  %v11874_v17 = vpop.f32.mrb[90].mxu1 }
 0x896   : > { %v11875_v26 = vpop.f32.mrb[91].mxu1 }
 0x897   : > { %10824 = vst [vmem:[%s18635_s19 + $0x28] sm:$0xff] %v10768_v0   ;;  %v9879_v42 = vadd.f32 %v11873_v52, %v18587_v15  ;;  %v11876_v41 = vadd.f32 %v11875_v26, %v11874_v17 }
 0x899   : > { %v9969_v39 = vmax.f32 %v18423_v37, %v9879_v42  ;;  %v9882_v36 = vadd.f32 %v11876_v41, %v18589_v34 }
 0x89b   : > { %v9970_v22 = vmax.f32 %v18426_v57, %v9882_v36  ;;  %v11877_v49 = vpop.f32.mrb[92].mxu1 }
 0x89c   : > { %v11878_v19 = vpop.f32.mrb[93].mxu1 }
 0x89d   : > { %v10773_v62 = vpack.c.bf16 %v9970_v22, %v9969_v39  ;;  %v11879_v7 = vadd.f32 %v11878_v19, %v11877_v49  ;;  %v11880_v63 = vpop.f32.mrb[94].mxu1 }
 0x89e   : > { %v11881_v16 = vpop.f32.mrb[95].mxu1 }
 0x89f   : > { %10825 = vst [vmem:[%s18635_s19 + $0x30] sm:$0xff] %v10773_v62   ;;  %v9887_v5 = vadd.f32 %v11879_v7, %v18591_v40  ;;  %v11882_v12 = vadd.f32 %v11881_v16, %v11880_v63  ;;  %v20044_v16 = vld [vmem:[#allocation103_spill] sm:$0xff] }
 0x8a1   : > { %v9971_v15 = vmax.f32 %v18435_v4, %v9887_v5  ;;  %v9890_v2 = vadd.f32 %v11882_v12, %v18593_v11 }
 0x8a3   : > { %v9972_v37 = vmax.f32 %v18438_v14, %v9890_v2  ;;  %v11883_v34 = vpop.f32.mrb[96].mxu1  ;;  %v20046_v2 = vld [vmem:[#allocation104_spill] sm:$0xff] }
 0x8a4   : > { %v11884_v38 = vpop.f32.mrb[97].mxu1 }
 0x8a5   : > { %v10778_v57 = vpack.c.bf16 %v9972_v37, %v9971_v15  ;;  %v11885_v54 = vadd.f32 %v11884_v38, %v11883_v34  ;;  %v11886_v28 = vpop.f32.mrb[98].mxu1  ;;  %v20045_v15 = vld [vmem:[#allocation83_spill] sm:$0xff] }
 0x8a6   : > { %v11887_v59 = vpop.f32.mrb[99].mxu1 }
 0x8a7   : > { %10826 = vst [vmem:[%s18635_s19 + $0x38] sm:$0xff] %v10778_v57   ;;  %v9895_v55 = vadd.f32 %v11885_v54, %v18595_v18  ;;  %v11888_v44 = vadd.f32 %v11887_v59, %v11886_v28 }
 0x8a9   : > { %v9973_v40 = vmax.f32 %v18447_v21, %v9895_v55  ;;  %v9898_v50 = vadd.f32 %v11888_v44, %v18597_v30 }
 0x8ab   : > { %v9974_v4 = vmax.f32 %v18450_v3, %v9898_v50  ;;  %v11889_v11 = vpop.f32.mrb[100].mxu1 }
 0x8ac   : > { %v11890_v29 = vpop.f32.mrb[101].mxu1 }
 0x8ad   : > { %v10783_v14 = vpack.c.bf16 %v9974_v4, %v9973_v40  ;;  %v11891_v47 = vadd.f32 %v11890_v29, %v11889_v11  ;;  %v11892_v20 = vpop.f32.mrb[102].mxu1  ;;  %v20048_v40 = vld [vmem:[#allocation88_spill] sm:$0xff]  ;;  %v20050_v29 = vld [vmem:[#allocation89_spill] sm:$0xff] }
 0x8ae   : > { %v11893_v56 = vpop.f32.mrb[103].mxu1  ;;  %v20049_v4 = vld [vmem:[#allocation108_spill] sm:$0xff] }
 0x8af   : > { %10827 = vst [vmem:[%s18635_s19 + $0x40] sm:$0xff] %v10783_v14   ;;  %v9903_v6 = vadd.f32 %v11891_v47, %v18599_v48  ;;  %v11894_v25 = vadd.f32 %v11893_v56, %v11892_v20 }
 0x8b1   : > { %v9975_v18 = vmax.f32 %v18459_v58, %v9903_v6  ;;  %v9906_v53 = vadd.f32 %v11894_v25, %v18601_v60 }
 0x8b3   : > { %v9976_v21 = vmax.f32 %v18462_v9, %v9906_v53  ;;  %v11895_v30 = vpop.f32.mrb[104].mxu1 }
 0x8b4   : > { %v11896_v13 = vpop.f32.mrb[105].mxu1 }
 0x8b5   : > { %v10788_v3 = vpack.c.bf16 %v9976_v21, %v9975_v18  ;;  %v11897_v32 = vadd.f32 %v11896_v13, %v11895_v30  ;;  %v11898_v51 = vpop.f32.mrb[106].mxu1  ;;  %v20051_v30 = vld [vmem:[#allocation93_spill] sm:$0xff] }
 0x8b6   : > { %v11899_v31 = vpop.f32.mrb[107].mxu1 }
 0x8b7   : > { %10828 = vst [vmem:[%s18635_s19 + $0x48] sm:$0xff] %v10788_v3   ;;  %v9911_v23 = vadd.f32 %v11897_v32, %v18603_v61  ;;  %v11900_v0 = vadd.f32 %v11899_v31, %v11898_v51  ;;  %v20052_v3 = vld [vmem:[#allocation94_spill] sm:$0xff] }
 0x8b9   : > { %v9977_v48 = vmax.f32 %v18471_v27, %v9911_v23  ;;  %v9914_v52 = vadd.f32 %v11900_v0, %v18605_v35  ;;  %v20043_v27 = vld [vmem:[#allocation79_spill] sm:$0xff] }
 0x8bb   : > { %v9978_v58 = vmax.f32 %v18474_v1, %v9914_v52  ;;  %v11901_v60 = vpop.f32.mrb[108].mxu1 }
 0x8bc   : > { %v11902_v17 = vpop.f32.mrb[109].mxu1 }
 0x8bd   : > { %v10793_v9 = vpack.c.bf16 %v9978_v58, %v9977_v48  ;;  %v11903_v26 = vadd.f32 %v11902_v17, %v11901_v60  ;;  %v11904_v42 = vpop.f32.mrb[110].mxu1  ;;  %v20053_v58 = vld [vmem:[#allocation109_spill] sm:$0xff] }
 0x8be   : > { %v11905_v41 = vpop.f32.mrb[111].mxu1 }
 0x8bf   : > { %10829 = vst [vmem:[%s18635_s19 + $0x50] sm:$0xff] %v10793_v9   ;;  %v9919_v39 = vadd.f32 %v11903_v26, %v18607_v10  ;;  %v11906_v36 = vadd.f32 %v11905_v41, %v11904_v42  ;;  %v20054_v9 = vld [vmem:[#allocation98_spill] sm:$0xff]  ;;  %v20055_v42 = vld [vmem:[#allocation99_spill] sm:$0xff] }
 0x8c1   : > { %v9979_v61 = vmax.f32 %v18483_v33, %v9919_v39  ;;  %v9922_v22 = vadd.f32 %v11906_v36, %v18609_v46  ;;  %v20047_v33 = vld [vmem:[#allocation84_spill] sm:$0xff] }
 0x8c3   : > { %v9980_v49 = vmax.f32 %v20043_v27, %v9922_v22  ;;  %v11907_v35 = vpop.f32.mrb[112].mxu1 }
 0x8c4   : > { %v11908_v19 = vpop.f32.mrb[113].mxu1 }
 0x8c5   : > { %v10798_v1 = vpack.c.bf16 %v9980_v49, %v9979_v61  ;;  %v11909_v62 = vadd.f32 %v11908_v19, %v11907_v35  ;;  %v11910_v7 = vpop.f32.mrb[114].mxu1 }
 0x8c6   : > { %v11911_v63 = vpop.f32.mrb[115].mxu1 }
 0x8c7   : > { %10830 = vst [vmem:[%s18635_s19 + $0x58] sm:$0xff] %v10798_v1   ;;  %v9927_v5 = vadd.f32 %v11909_v62, %v20044_v16  ;;  %v11912_v12 = vadd.f32 %v11911_v63, %v11910_v7 }
 0x8c9   : > { %v9981_v10 = vmax.f32 %v20045_v15, %v9927_v5  ;;  %v9930_v37 = vadd.f32 %v11912_v12, %v20046_v2 }
 0x8cb   : > { %v9982_v34 = vmax.f32 %v20047_v33, %v9930_v37  ;;  %v11913_v46 = vpop.f32.mrb[116].mxu1 }
 0x8cc   : > { %v11914_v38 = vpop.f32.mrb[117].mxu1 }
 0x8cd   : > { %v10803_v57 = vpack.c.bf16 %v9982_v34, %v9981_v10  ;;  %v11915_v54 = vadd.f32 %v11914_v38, %v11913_v46  ;;  %v11916_v28 = vpop.f32.mrb[118].mxu1 }
 0x8ce   : > { %v11917_v59 = vpop.f32.mrb[119].mxu1 }
 0x8cf   : > { %10831 = vst [vmem:[%s18635_s19 + $0x60] sm:$0xff] %v10803_v57   ;;  %v9935_v55 = vadd.f32 %v11915_v54, %v18615_v45  ;;  %v11918_v44 = vadd.f32 %v11917_v59, %v11916_v28 }
 0x8d1   : > { %v9983_v50 = vmax.f32 %v20048_v40, %v9935_v55  ;;  %v9938_v11 = vadd.f32 %v11918_v44, %v20049_v4 }
 0x8d3   : > { %v9984_v14 = vmax.f32 %v20050_v29, %v9938_v11  ;;  %v11919_v47 = vpop.f32.mrb[120].mxu1 }
 0x8d4   : > { %v11920_v20 = vpop.f32.mrb[121].mxu1 }
 0x8d5   : > { %v10808_v56 = vpack.c.bf16 %v9984_v14, %v9983_v50  ;;  %v11921_v6 = vadd.f32 %v11920_v20, %v11919_v47  ;;  %v11922_v25 = vpop.f32.mrb[122].mxu1 }
 0x8d6   : > { %v11923_v18 = vpop.f32.mrb[123].mxu1 }
 0x8d7   : > { %10832 = vst [vmem:[%s18635_s19 + $0x68] sm:$0xff] %v10808_v56   ;;  %v9943_v53 = vadd.f32 %v11921_v6, %v18619_v43  ;;  %v11924_v21 = vadd.f32 %v11923_v18, %v11922_v25 }
 0x8d9   : > { %v9985_v45 = vmax.f32 %v20051_v30, %v9943_v53  ;;  %v9946_v13 = vadd.f32 %v11924_v21, %v18621_v8 }
 0x8db   : > { %v9986_v32 = vmax.f32 %v20052_v3, %v9946_v13  ;;  %v11925_v51 = vpop.f32.mrb[124].mxu1 }
 0x8dc   : > { %v11926_v31 = vpop.f32.mrb[125].mxu1 }
 0x8dd   : > { %v10813_v23 = vpack.c.bf16 %v9986_v32, %v9985_v45  ;;  %v11927_v0 = vadd.f32 %v11926_v31, %v11925_v51  ;;  %v11928_v48 = vpop.f32.mrb[126].mxu1 }
 0x8de   : > { %v11929_v52 = vpop.f32.mrb[127].mxu1 }
 0x8df   : > { %10833 = vst [vmem:[%s18635_s19 + $0x70] sm:$0xff] %v10813_v23   ;;  %v9951_v60 = vadd.f32 %v11927_v0, %v20053_v58  ;;  %v11930_v17 = vadd.f32 %v11929_v52, %v11928_v48 }
 0x8e1   : > { %v9987_v43 = vmax.f32 %v20054_v9, %v9951_v60  ;;  %v9954_v26 = vadd.f32 %v11930_v17, %v18626_v24 }
 0x8e3   : > { %v9988_v41 = vmax.f32 %v20055_v42, %v9954_v26 }
 0x8e5   : > { %v10818_v39 = vpack.c.bf16 %v9988_v41, %v9987_v43 }
 0x8e7   : > { %10834 = vst [vmem:[%s18635_s19 + $0x78] sm:$0xff] %v10818_v39  }
 0x8e8 PF: > { %s14_s15 = sadd.s32 1, %s14717_s15  }
 0x8e9   : > { %p11_p5 = scmp.ge.s32.totalorder %s14_s15, 4  }
 0x8eb   :  { %13 = sbr.rel (!%p11_p5) target bundleno = 1 (0x1), region = 75 }

</bundles_post_ra>
